<compile_context>
chip_gen: v7x
topology: tpu7x:2x2x1
jax: 0.10.0
libtpu: 0.0.40
codegen_flags: <defaults>
</compile_context>

<pallas_src>
import functools

import jax
import jax.numpy as jnp
from jax.experimental import pallas as pl
from jax.experimental.pallas import tpu as pltpu

KERNEL_SIZE = 4
LEAKY_ALPHA = 0.2
BN_EPS = 1e-5
LANE = 128


def _round_up(x, m):
    return ((x + m - 1) // m) * m


# ---------------------------------------------------------------------------
# Pallas kernels
# ---------------------------------------------------------------------------
def _conv_mm_kernel(x_ref, w_ref, b_ref, o_ref, *, alpha):
    # bf16 x bf16 -> f32 accumulation on the MXU; epilogue in f32; store bf16.
    y = jnp.dot(x_ref[...], w_ref[...], preferred_element_type=jnp.float32)
    y = y + b_ref[...]                       # folded-BN bias, (1, Cout) f32
    y = jnp.where(y >= 0, y, alpha * y)      # LeakyReLU
    o_ref[...] = y.astype(o_ref.dtype)


def _head_kernel(x_ref, w4_ref, b4_ref, w5_ref, o_ref, *, alpha):
    # conv4 (+BN) + LeakyReLU for one sample's 4x4 spatial grid ...
    y = jnp.dot(x_ref[...], w4_ref[...], preferred_element_type=jnp.float32)  # (16, 512)
    y = y + b4_ref[...]
    y = jnp.where(y >= 0, y, alpha * y)
    # ... then conv5 (4x4 valid, Cout=1) == elementwise dot over (pos, chan), then Sigmoid.
    prod = y * w5_ref[...]                                   # (16, 512) f32
    logit = jnp.sum(prod, axis=1, keepdims=True)             # (16, 1)  cross-lane
    logit = jnp.sum(logit, axis=0, keepdims=True)            # (1, 1)   cross-sublane
    out = jax.nn.sigmoid(jnp.broadcast_to(logit, (8, LANE)))  # lane-dense store tile
    o_ref[0] = out.astype(o_ref.dtype)


# ---------------------------------------------------------------------------
# pallas_call wrappers
# ---------------------------------------------------------------------------
def _pick_tm(m):
    # Largest row tile that divides M, preferring >= 2 grid programs so both
    # v7x TensorCores get work (harmless on single-core v5e/v6e).
    for t in (512, 256, 128, 64, 32, 16, 8):
        if m % t == 0 and m // t >= 2:
            return t
    for t in (512, 256, 128, 64, 32, 16, 8):
        if m % t == 0:
            return t
    return m


def fused_conv_matmul(x, w_t, bias, alpha):
    """x: (M, K) bf16, w_t: (K, Cout) bf16, bias: (1, Cout) f32 -> (M, Cout) bf16."""
    m, k = x.shape
    cout = w_t.shape[1]
    tm = _pick_tm(m)
    kernel = functools.partial(_conv_mm_kernel, alpha=alpha)
    return pl.pallas_call(
        kernel,
        out_shape=jax.ShapeDtypeStruct((m, cout), jnp.bfloat16),
        grid_spec=pltpu.PrefetchScalarGridSpec(
            num_scalar_prefetch=0,
            grid=(m // tm,),
            in_specs=[
                pl.BlockSpec((tm, k), lambda i: (i, 0)),      # X row tile
                pl.BlockSpec((k, cout), lambda i: (0, 0)),    # resident folded weight
                pl.BlockSpec((1, cout), lambda i: (0, 0)),    # resident bias
            ],
            out_specs=pl.BlockSpec((tm, cout), lambda i: (i, 0)),
        ),
        compiler_params=pltpu.CompilerParams(
            dimension_semantics=("parallel",),
        ),
    )(x, w_t, bias)


def fused_head(patches, w4_t, b4, w5_mat, n, r, alpha):
    """Layers 4+5 fused. patches: (N*R, K) bf16 -> (N, 1, 1, 1) f32 in (0, 1)."""
    k = patches.shape[1]
    cout = w4_t.shape[1]
    kernel = functools.partial(_head_kernel, alpha=alpha)
    out = pl.pallas_call(
        kernel,
        out_shape=jax.ShapeDtypeStruct((n, 8, LANE), jnp.float32),
        grid_spec=pltpu.PrefetchScalarGridSpec(
            num_scalar_prefetch=0,
            grid=(n,),
            in_specs=[
                pl.BlockSpec((r, k), lambda i: (i, 0)),       # one sample's patches
                pl.BlockSpec((k, cout), lambda i: (0, 0)),    # conv4 weight (BN folded)
                pl.BlockSpec((1, cout), lambda i: (0, 0)),    # conv4 bias
                pl.BlockSpec((r, cout), lambda i: (0, 0)),    # conv5 weight as (pos, chan)
            ],
            out_specs=pl.BlockSpec((1, 8, LANE), lambda i: (i, 0, 0)),
        ),
        compiler_params=pltpu.CompilerParams(
            dimension_semantics=("parallel",),
        ),
    )(patches, w4_t, b4, w5_mat)
    return out[:, 0, 0].reshape(n, 1, 1, 1)


# ---------------------------------------------------------------------------
# Plain-JAX glue: NHWC im2col (fused by XLA with pad + bf16 cast)
# ---------------------------------------------------------------------------
def im2col_nhwc(x, k, stride, pad):
    """x: (N, H, W, C) -> (N*Ho*Wo, k*k*C) with K ordered (kH, kW, C)."""
    n, h, w, c = x.shape
    if pad > 0:
        x = jnp.pad(x, ((0, 0), (pad, pad), (pad, pad), (0, 0)))
    ho = (h + 2 * pad - k) // stride + 1
    wo = (w + 2 * pad - k) // stride + 1
    cols = []
    for ki in range(k):
        for kj in range(k):
            cols.append(x[:, ki:ki + stride * ho:stride,
                          kj:kj + stride * wo:stride, :])     # (N, Ho, Wo, C)
    p = jnp.stack(cols, axis=3)                               # (N, Ho, Wo, k*k, C)
    return p.reshape(n * ho * wo, k * k * c), (n, ho, wo)


def conv_block(x, w_t, bias, cout, stride, pad, alpha=LEAKY_ALPHA):
    """Conv2d(bias=False) + folded-BN bias + LeakyReLU. NHWC in/out, bf16 activations."""
    patches, (n, ho, wo) = im2col_nhwc(x, KERNEL_SIZE, stride, pad)
    patches = patches.astype(jnp.bfloat16)
    k_pad = w_t.shape[0]
    if k_pad != patches.shape[1]:                    # layer 1: K=16 -> 128 (zero pad)
        patches = jnp.pad(patches, ((0, 0), (0, k_pad - patches.shape[1])))
    y = fused_conv_matmul(patches, w_t, bias, alpha)  # (M, Cout_padded) bf16
    if w_t.shape[1] != cout:                          # layer 1: Cout 128 -> 64
        y = y[:, :cout]
    return y.reshape(n, ho, wo, cout)


# ---------------------------------------------------------------------------
# Parameter init (DCGAN-style, inference-form BN) and host-side weight packing
# ---------------------------------------------------------------------------
def _fold_bn(w, bn):
    """PyTorch conv weight (Cout,Cin,k,k) + optional inference BN ->
       lane-padded bf16 (Kp, Cp) weight with K ordered (kH,kW,Cin), f32 (1,Cp) bias."""
    cout, cin, k, _ = w.shape
    if bn is None:
        scale = jnp.ones((cout,), jnp.float32)
        bias = jnp.zeros((cout,), jnp.float32)
    else:
        gamma, beta, mean, var = bn
        scale = gamma / jnp.sqrt(var + BN_EPS)
        bias = beta - mean * scale
    w_t = jnp.transpose(w, (2, 3, 1, 0)).reshape(k * k * cin, cout)  # (K, Cout)
    w_t = w_t * scale[None, :]                                       # fold BN scale
    k_real = k * k * cin
    k_pad = _round_up(k_real, LANE)
    c_pad = _round_up(cout, LANE)
    w_t = jnp.pad(w_t, ((0, k_pad - k_real), (0, c_pad - cout)))
    bias = jnp.pad(bias, (0, c_pad - cout)).reshape(1, c_pad)
    return w_t.astype(jnp.bfloat16), bias.astype(jnp.float32)


def init_params(key):
    """Deterministic DCGAN-style init: conv weights ~ N(0, 0.02), BN gamma ~ N(1, 0.02)."""
    chans = [(1, 64), (64, 128), (128, 256), (256, 512), (512, 1)]
    raw = []
    for i, (cin, cout) in enumerate(chans):
        key, wk, gk = jax.random.split(key, 3)
        w = 0.02 * jax.random.normal(wk, (cout, cin, KERNEL_SIZE, KERNEL_SIZE),
                                     dtype=jnp.float32)
        if i in (1, 2, 3):   # layers with BatchNorm2d (inference form)
            gamma = 1.0 + 0.02 * jax.random.normal(gk, (cout,), dtype=jnp.float32)
            beta = jnp.zeros((cout,), jnp.float32)
            mean = jnp.zeros((cout,), jnp.float32)
            var = jnp.ones((cout,), jnp.float32)
            bn = (gamma, beta, mean, var)
        else:
            bn = None
        raw.append((w, bn))

    params = {}
    for idx in range(4):
        wt, b = _fold_bn(*raw[idx])
        params[f"w{idx + 1}"] = wt
        params[f"b{idx + 1}"] = b
    # conv5 weight (1, 512, 4, 4) -> (16, 512) f32 aligned with the layer-4
    # output tile layout: row = spatial position kh*4+kw, col = channel.
    w5 = raw[4][0]
    params["w5"] = jnp.transpose(w5[0], (1, 2, 0)).reshape(
        KERNEL_SIZE * KERNEL_SIZE, w5.shape[1]).astype(jnp.float32)
    return params


# ---------------------------------------------------------------------------
# Discriminator64 forward
# ---------------------------------------------------------------------------
def discriminator64_forward(params, x_nchw):
    """x: (N, 1, 64, 64) NCHW f32 -> (N, 1, 1, 1) f32 in (0, 1)."""
    x = jnp.transpose(x_nchw, (0, 2, 3, 1)).astype(jnp.bfloat16)       # NHWC bf16
    x = conv_block(x, params["w1"], params["b1"], 64, stride=2, pad=1)   # (N,32,32,64)
    x = conv_block(x, params["w2"], params["b2"], 128, stride=2, pad=1)  # (N,16,16,128)
    x = conv_block(x, params["w3"], params["b3"], 256, stride=2, pad=1)  # (N,8,8,256)
    # layers 4+5 fused: conv4(+BN)+LeakyReLU then 4x4-valid conv5 + Sigmoid
    patches, (n, ho, wo) = im2col_nhwc(x, KERNEL_SIZE, 2, 1)             # (N*16, 4096)
    patches = patches.astype(jnp.bfloat16)
    return fused_head(patches, params["w4"], params["b4"], params["w5"],
                      n, ho * wo, LEAKY_ALPHA)


if __name__ == "__main__":
    key = jax.random.PRNGKey(0)
    key, xk = jax.random.split(key)
    # Input consistent with Discriminator64: (N, 1, 64, 64), NCHW.
    x = jax.random.normal(xk, (2, 1, 64, 64), dtype=jnp.float32)
    params = init_params(key)

    out = jax.jit(discriminator64_forward)(params, x)
    out = jax.block_until_ready(out)
    assert out.shape == (2, 1, 1, 1)
    assert bool(jnp.all((out >= 0.0) & (out <= 1.0)))
    print("KERNEL_OK")
</pallas_src>

<mosaic_0001>
module attributes {stable_mosaic.version = 11 : i64} {
  func.func @_conv_mm_kernel(%arg0: i32, %arg1: memref<512x128xbf16, #tpu.memory_space<vmem>>, %arg2: memref<128x128xbf16, #tpu.memory_space<vmem>>, %arg3: memref<1x128xf32, #tpu.memory_space<vmem>>, %arg4: memref<512x128xbf16, #tpu.memory_space<vmem>>) attributes {dimension_semantics = [#tpu.dimension_semantics<parallel>], iteration_bounds = array<i64: 4>, scalar_prefetch = 0 : i64, scratch_operands = 0 : i64, tpu.core_type = #tpu.core_type<tc>, window_params = [{transform_indices = @transform_0, window_bounds = array<i64: 512, 128>}, {pipeline_mode = #tpu.pipeline_mode<synchronous>, transform_indices = @transform_1, window_bounds = array<i64: 128, 128>}, {pipeline_mode = #tpu.pipeline_mode<synchronous>, transform_indices = @transform_2, window_bounds = array<i64: 1, 128>}, {transform_indices = @transform_3, window_bounds = array<i64: 512, 128>}]} {
    %c0 = arith.constant 0 : index
    %c0_0 = arith.constant 0 : index
    %0 = vector.load %arg1[%c0, %c0_0] : memref<512x128xbf16, #tpu.memory_space<vmem>>, vector<512x128xbf16>
    %c0_1 = arith.constant 0 : index
    %c0_2 = arith.constant 0 : index
    %1 = vector.load %arg2[%c0_1, %c0_2] : memref<128x128xbf16, #tpu.memory_space<vmem>>, vector<128x128xbf16>
    %cst = arith.constant dense<0.000000e+00> : vector<512x128xf32>
    %2 = tpu.matmul %0, %1, %cst {dimension_numbers = #tpu.dot_dimension_numbers<[1], [0], [0], [1], [0, 0, 1, 1], [], []>} : vector<512x128xbf16>, vector<128x128xbf16>, vector<512x128xf32> -> vector<512x128xf32>
    %c0_3 = arith.constant 0 : index
    %c0_4 = arith.constant 0 : index
    %3 = vector.load %arg3[%c0_3, %c0_4] : memref<1x128xf32, #tpu.memory_space<vmem>>, vector<1x128xf32>
    %4 = vector.broadcast %3 : vector<1x128xf32> to vector<512x128xf32>
    %5 = arith.addf %2, %4 : vector<512x128xf32>
    %cst_5 = arith.constant 0.000000e+00 : f32
    %6 = vector.broadcast %cst_5 : f32 to vector<512x128xf32>
    %7 = arith.cmpf oge, %5, %6 : vector<512x128xf32>
    %cst_6 = arith.constant 2.000000e-01 : f32
    %8 = vector.broadcast %cst_6 : f32 to vector<512x128xf32>
    %9 = arith.mulf %8, %5 : vector<512x128xf32>
    %10 = arith.select %7, %5, %9 : vector<512x128xi1>, vector<512x128xf32>
    %11 = arith.truncf %10 : vector<512x128xf32> to vector<512x128xbf16>
    %c0_7 = arith.constant 0 : index
    %c0_8 = arith.constant 0 : index
    %12 = vector.load %arg4[%c0_7, %c0_8] : memref<512x128xbf16, #tpu.memory_space<vmem>>, vector<512x128xbf16>
    tpu.vector_store %arg4[%c0_7, %c0_8], %11 {strides = array<i32>} : memref<512x128xbf16, #tpu.memory_space<vmem>>, vector<512x128xbf16>,
    return
  }
  func.func @transform_0(%arg0: i32) -> (i32, i32) {
    %c0_i32 = arith.constant 0 : i32
    %c0_i32_0 = arith.constant 0 : i32
    return %arg0, %c0_i32 : i32, i32
  }
  func.func @transform_1(%arg0: i32) -> (i32, i32) {
    %c0_i32 = arith.constant 0 : i32
    %c0_i32_0 = arith.constant 0 : i32
    %c0_i32_1 = arith.constant 0 : i32
    return %c0_i32, %c0_i32_0 : i32, i32
  }
  func.func @transform_2(%arg0: i32) -> (i32, i32) {
    %c0_i32 = arith.constant 0 : i32
    %c0_i32_0 = arith.constant 0 : i32
    %c0_i32_1 = arith.constant 0 : i32
    return %c0_i32, %c0_i32_0 : i32, i32
  }
  func.func @transform_3(%arg0: i32) -> (i32, i32) {
    %c0_i32 = arith.constant 0 : i32
    %c0_i32_0 = arith.constant 0 : i32
    return %arg0, %c0_i32 : i32, i32
  }
}

module attributes {stable_mosaic.version = 11 : i64} {
  func.func @_conv_mm_kernel(%arg0: i32, %arg1: memref<256x1024xbf16, #tpu.memory_space<vmem>>, %arg2: memref<1024x128xbf16, #tpu.memory_space<vmem>>, %arg3: memref<1x128xf32, #tpu.memory_space<vmem>>, %arg4: memref<256x128xbf16, #tpu.memory_space<vmem>>) attributes {dimension_semantics = [#tpu.dimension_semantics<parallel>], iteration_bounds = array<i64: 2>, scalar_prefetch = 0 : i64, scratch_operands = 0 : i64, tpu.core_type = #tpu.core_type<tc>, window_params = [{transform_indices = @transform_0, window_bounds = array<i64: 256, 1024>}, {pipeline_mode = #tpu.pipeline_mode<synchronous>, transform_indices = @transform_1, window_bounds = array<i64: 1024, 128>}, {pipeline_mode = #tpu.pipeline_mode<synchronous>, transform_indices = @transform_2, window_bounds = array<i64: 1, 128>}, {transform_indices = @transform_3, window_bounds = array<i64: 256, 128>}]} {
    %c0 = arith.constant 0 : index
    %c0_0 = arith.constant 0 : index
    %0 = vector.load %arg1[%c0, %c0_0] : memref<256x1024xbf16, #tpu.memory_space<vmem>>, vector<256x1024xbf16>
    %c0_1 = arith.constant 0 : index
    %c0_2 = arith.constant 0 : index
    %1 = vector.load %arg2[%c0_1, %c0_2] : memref<1024x128xbf16, #tpu.memory_space<vmem>>, vector<1024x128xbf16>
    %cst = arith.constant dense<0.000000e+00> : vector<256x128xf32>
    %2 = tpu.matmul %0, %1, %cst {dimension_numbers = #tpu.dot_dimension_numbers<[1], [0], [0], [1], [0, 0, 1, 1], [], []>} : vector<256x1024xbf16>, vector<1024x128xbf16>, vector<256x128xf32> -> vector<256x128xf32>
    %c0_3 = arith.constant 0 : index
    %c0_4 = arith.constant 0 : index
    %3 = vector.load %arg3[%c0_3, %c0_4] : memref<1x128xf32, #tpu.memory_space<vmem>>, vector<1x128xf32>
    %4 = vector.broadcast %3 : vector<1x128xf32> to vector<256x128xf32>
    %5 = arith.addf %2, %4 : vector<256x128xf32>
    %cst_5 = arith.constant 0.000000e+00 : f32
    %6 = vector.broadcast %cst_5 : f32 to vector<256x128xf32>
    %7 = arith.cmpf oge, %5, %6 : vector<256x128xf32>
    %cst_6 = arith.constant 2.000000e-01 : f32
    %8 = vector.broadcast %cst_6 : f32 to vector<256x128xf32>
    %9 = arith.mulf %8, %5 : vector<256x128xf32>
    %10 = arith.select %7, %5, %9 : vector<256x128xi1>, vector<256x128xf32>
    %11 = arith.truncf %10 : vector<256x128xf32> to vector<256x128xbf16>
    %c0_7 = arith.constant 0 : index
    %c0_8 = arith.constant 0 : index
    %12 = vector.load %arg4[%c0_7, %c0_8] : memref<256x128xbf16, #tpu.memory_space<vmem>>, vector<256x128xbf16>
    tpu.vector_store %arg4[%c0_7, %c0_8], %11 {strides = array<i32>} : memref<256x128xbf16, #tpu.memory_space<vmem>>, vector<256x128xbf16>,
    return
  }
  func.func @transform_0(%arg0: i32) -> (i32, i32) {
    %c0_i32 = arith.constant 0 : i32
    %c0_i32_0 = arith.constant 0 : i32
    return %arg0, %c0_i32 : i32, i32
  }
  func.func @transform_1(%arg0: i32) -> (i32, i32) {
    %c0_i32 = arith.constant 0 : i32
    %c0_i32_0 = arith.constant 0 : i32
    %c0_i32_1 = arith.constant 0 : i32
    return %c0_i32, %c0_i32_0 : i32, i32
  }
  func.func @transform_2(%arg0: i32) -> (i32, i32) {
    %c0_i32 = arith.constant 0 : i32
    %c0_i32_0 = arith.constant 0 : i32
    %c0_i32_1 = arith.constant 0 : i32
    return %c0_i32, %c0_i32_0 : i32, i32
  }
  func.func @transform_3(%arg0: i32) -> (i32, i32) {
    %c0_i32 = arith.constant 0 : i32
    %c0_i32_0 = arith.constant 0 : i32
    return %arg0, %c0_i32 : i32, i32
  }
}

module attributes {stable_mosaic.version = 11 : i64} {
  func.func @_conv_mm_kernel(%arg0: i32, %arg1: memref<64x2048xbf16, #tpu.memory_space<vmem>>, %arg2: memref<2048x256xbf16, #tpu.memory_space<vmem>>, %arg3: memref<1x256xf32, #tpu.memory_space<vmem>>, %arg4: memref<64x256xbf16, #tpu.memory_space<vmem>>) attributes {dimension_semantics = [#tpu.dimension_semantics<parallel>], iteration_bounds = array<i64: 2>, scalar_prefetch = 0 : i64, scratch_operands = 0 : i64, tpu.core_type = #tpu.core_type<tc>, window_params = [{transform_indices = @transform_0, window_bounds = array<i64: 64, 2048>}, {pipeline_mode = #tpu.pipeline_mode<synchronous>, transform_indices = @transform_1, window_bounds = array<i64: 2048, 256>}, {pipeline_mode = #tpu.pipeline_mode<synchronous>, transform_indices = @transform_2, window_bounds = array<i64: 1, 256>}, {transform_indices = @transform_3, window_bounds = array<i64: 64, 256>}]} {
    %c0 = arith.constant 0 : index
    %c0_0 = arith.constant 0 : index
    %0 = vector.load %arg1[%c0, %c0_0] : memref<64x2048xbf16, #tpu.memory_space<vmem>>, vector<64x2048xbf16>
    %c0_1 = arith.constant 0 : index
    %c0_2 = arith.constant 0 : index
    %1 = vector.load %arg2[%c0_1, %c0_2] : memref<2048x256xbf16, #tpu.memory_space<vmem>>, vector<2048x256xbf16>
    %cst = arith.constant dense<0.000000e+00> : vector<64x256xf32>
    %2 = tpu.matmul %0, %1, %cst {dimension_numbers = #tpu.dot_dimension_numbers<[1], [0], [0], [1], [0, 0, 1, 1], [], []>} : vector<64x2048xbf16>, vector<2048x256xbf16>, vector<64x256xf32> -> vector<64x256xf32>
    %c0_3 = arith.constant 0 : index
    %c0_4 = arith.constant 0 : index
    %3 = vector.load %arg3[%c0_3, %c0_4] : memref<1x256xf32, #tpu.memory_space<vmem>>, vector<1x256xf32>
    %4 = vector.broadcast %3 : vector<1x256xf32> to vector<64x256xf32>
    %5 = arith.addf %2, %4 : vector<64x256xf32>
    %cst_5 = arith.constant 0.000000e+00 : f32
    %6 = vector.broadcast %cst_5 : f32 to vector<64x256xf32>
    %7 = arith.cmpf oge, %5, %6 : vector<64x256xf32>
    %cst_6 = arith.constant 2.000000e-01 : f32
    %8 = vector.broadcast %cst_6 : f32 to vector<64x256xf32>
    %9 = arith.mulf %8, %5 : vector<64x256xf32>
    %10 = arith.select %7, %5, %9 : vector<64x256xi1>, vector<64x256xf32>
    %11 = arith.truncf %10 : vector<64x256xf32> to vector<64x256xbf16>
    %c0_7 = arith.constant 0 : index
    %c0_8 = arith.constant 0 : index
    %12 = vector.load %arg4[%c0_7, %c0_8] : memref<64x256xbf16, #tpu.memory_space<vmem>>, vector<64x256xbf16>
    tpu.vector_store %arg4[%c0_7, %c0_8], %11 {strides = array<i32>} : memref<64x256xbf16, #tpu.memory_space<vmem>>, vector<64x256xbf16>,
    return
  }
  func.func @transform_0(%arg0: i32) -> (i32, i32) {
    %c0_i32 = arith.constant 0 : i32
    %c0_i32_0 = arith.constant 0 : i32
    return %arg0, %c0_i32 : i32, i32
  }
  func.func @transform_1(%arg0: i32) -> (i32, i32) {
    %c0_i32 = arith.constant 0 : i32
    %c0_i32_0 = arith.constant 0 : i32
    %c0_i32_1 = arith.constant 0 : i32
    return %c0_i32, %c0_i32_0 : i32, i32
  }
  func.func @transform_2(%arg0: i32) -> (i32, i32) {
    %c0_i32 = arith.constant 0 : i32
    %c0_i32_0 = arith.constant 0 : i32
    %c0_i32_1 = arith.constant 0 : i32
    return %c0_i32, %c0_i32_0 : i32, i32
  }
  func.func @transform_3(%arg0: i32) -> (i32, i32) {
    %c0_i32 = arith.constant 0 : i32
    %c0_i32_0 = arith.constant 0 : i32
    return %arg0, %c0_i32 : i32, i32
  }
}

module attributes {stable_mosaic.version = 11 : i64} {
  func.func @_head_kernel(%arg0: i32, %arg1: memref<16x4096xbf16, #tpu.memory_space<vmem>>, %arg2: memref<4096x512xbf16, #tpu.memory_space<vmem>>, %arg3: memref<1x512xf32, #tpu.memory_space<vmem>>, %arg4: memref<16x512xf32, #tpu.memory_space<vmem>>, %arg5: memref<1x8x128xf32, #tpu.memory_space<vmem>>) attributes {dimension_semantics = [#tpu.dimension_semantics<parallel>], iteration_bounds = array<i64: 2>, scalar_prefetch = 0 : i64, scratch_operands = 0 : i64, tpu.core_type = #tpu.core_type<tc>, window_params = [{transform_indices = @transform_0, window_bounds = array<i64: 16, 4096>}, {pipeline_mode = #tpu.pipeline_mode<synchronous>, transform_indices = @transform_1, window_bounds = array<i64: 4096, 512>}, {pipeline_mode = #tpu.pipeline_mode<synchronous>, transform_indices = @transform_2, window_bounds = array<i64: 1, 512>}, {pipeline_mode = #tpu.pipeline_mode<synchronous>, transform_indices = @transform_3, window_bounds = array<i64: 16, 512>}, {transform_indices = @transform_4, window_bounds = array<i64: 1, 8, 128>}]} {
    %c0 = arith.constant 0 : index
    %c0_0 = arith.constant 0 : index
    %0 = vector.load %arg1[%c0, %c0_0] : memref<16x4096xbf16, #tpu.memory_space<vmem>>, vector<16x4096xbf16>
    %c0_1 = arith.constant 0 : index
    %c0_2 = arith.constant 0 : index
    %1 = vector.load %arg2[%c0_1, %c0_2] : memref<4096x512xbf16, #tpu.memory_space<vmem>>, vector<4096x512xbf16>
    %cst = arith.constant dense<0.000000e+00> : vector<16x512xf32>
    %2 = tpu.matmul %0, %1, %cst {dimension_numbers = #tpu.dot_dimension_numbers<[1], [0], [0], [1], [0, 0, 1, 1], [], []>} : vector<16x4096xbf16>, vector<4096x512xbf16>, vector<16x512xf32> -> vector<16x512xf32>
    %c0_3 = arith.constant 0 : index
    %c0_4 = arith.constant 0 : index
    %3 = vector.load %arg3[%c0_3, %c0_4] : memref<1x512xf32, #tpu.memory_space<vmem>>, vector<1x512xf32>
    %4 = vector.broadcast %3 : vector<1x512xf32> to vector<16x512xf32>
    %5 = arith.addf %2, %4 : vector<16x512xf32>
    %cst_5 = arith.constant 0.000000e+00 : f32
    %6 = vector.broadcast %cst_5 : f32 to vector<16x512xf32>
    %7 = arith.cmpf oge, %5, %6 : vector<16x512xf32>
    %cst_6 = arith.constant 2.000000e-01 : f32
    %8 = vector.broadcast %cst_6 : f32 to vector<16x512xf32>
    %9 = arith.mulf %8, %5 : vector<16x512xf32>
    %10 = arith.select %7, %5, %9 : vector<16x512xi1>, vector<16x512xf32>
    %c0_7 = arith.constant 0 : index
    %c0_8 = arith.constant 0 : index
    %11 = vector.load %arg4[%c0_7, %c0_8] : memref<16x512xf32, #tpu.memory_space<vmem>>, vector<16x512xf32>
    %12 = arith.mulf %10, %11 : vector<16x512xf32>
    %cst_9 = arith.constant dense<0.000000e+00> : vector<16xf32>
    %13 = vector.multi_reduction <add>, %12, %cst_9 [1] : vector<16x512xf32> to vector<16xf32>
    %14 = vector.shape_cast %13 : vector<16xf32> to vector<16x1xf32>
    %cst_10 = arith.constant dense<0.000000e+00> : vector<1xf32>
    %15 = vector.multi_reduction <add>, %14, %cst_10 [0] : vector<16x1xf32> to vector<1xf32>
    %16 = vector.shape_cast %15 : vector<1xf32> to vector<1x1xf32>
    %17 = vector.shape_cast %16 : vector<1x1xf32> to vector<1x1xf32>
    %18 = vector.broadcast %17 : vector<1x1xf32> to vector<8x128xf32>
    %19 = arith.negf %18 : vector<8x128xf32>
    %20 = math.exp %19 : vector<8x128xf32>
    %cst_11 = arith.constant 1.000000e+00 : f32
    %21 = vector.broadcast %cst_11 : f32 to vector<8x128xf32>
    %22 = arith.addf %21, %20 : vector<8x128xf32>
    %23 = arith.divf %21, %22 : vector<8x128xf32>
    %c0_12 = arith.constant 0 : index
    %c0_13 = arith.constant 0 : index
    %c0_14 = arith.constant 0 : index
    %24 = vector.load %arg5[%c0_12, %c0_13, %c0_14] : memref<1x8x128xf32, #tpu.memory_space<vmem>>, vector<1x8x128xf32>
    %25 = vector.shape_cast %24 : vector<1x8x128xf32> to vector<8x128xf32>
    %26 = vector.shape_cast %23 : vector<8x128xf32> to vector<1x8x128xf32>
    tpu.vector_store %arg5[%c0_12, %c0_13, %c0_14], %26 {strides = array<i32>} : memref<1x8x128xf32, #tpu.memory_space<vmem>>, vector<1x8x128xf32>,
    return
  }
  func.func @transform_0(%arg0: i32) -> (i32, i32) {
    %c0_i32 = arith.constant 0 : i32
    %c0_i32_0 = arith.constant 0 : i32
    return %arg0, %c0_i32 : i32, i32
  }
  func.func @transform_1(%arg0: i32) -> (i32, i32) {
    %c0_i32 = arith.constant 0 : i32
    %c0_i32_0 = arith.constant 0 : i32
    %c0_i32_1 = arith.constant 0 : i32
    return %c0_i32, %c0_i32_0 : i32, i32
  }
  func.func @transform_2(%arg0: i32) -> (i32, i32) {
    %c0_i32 = arith.constant 0 : i32
    %c0_i32_0 = arith.constant 0 : i32
    %c0_i32_1 = arith.constant 0 : i32
    return %c0_i32, %c0_i32_0 : i32, i32
  }
  func.func @transform_3(%arg0: i32) -> (i32, i32) {
    %c0_i32 = arith.constant 0 : i32
    %c0_i32_0 = arith.constant 0 : i32
    %c0_i32_1 = arith.constant 0 : i32
    return %c0_i32, %c0_i32_0 : i32, i32
  }
  func.func @transform_4(%arg0: i32) -> (i32, i32, i32) {
    %c0_i32 = arith.constant 0 : i32
    %c0_i32_0 = arith.constant 0 : i32
    %c0_i32_1 = arith.constant 0 : i32
    return %arg0, %c0_i32, %c0_i32_0 : i32, i32, i32
  }
}

</mosaic_0001>

<bundles_post_ra>
// kernel: discriminator64_forward.4
= control target key start
LH: loop header
LB: loop body
LE: loop exit
PB: predicated region body
PF: predicated region fallthrough
CT: control target
= control target key end

     0   :  { %s1942_s12 = smov 0   ;;  %s2136_s0 = inlined_call_operand.vmem [shape: bf16[2048,128], index: 0, kind: input, shape index: {}]   ;;  %s2137_s1 = inlined_call_operand.vmem [shape: bf16[128,128], index: 1, kind: input, shape index: {}]   ;;  %s2138_s2 = inlined_call_operand.vmem [shape: f32[1,128], index: 2, kind: input, shape index: {}]   ;;  %s2139_s3 = inlined_call_operand.vmem [shape: bf16[2048,128], index: 3, kind: output, shape index: {}]  }
   0x1 LB: > { %s1359_s13 = sadd.s32 4294967295, %s1920_s12   ;;  %p1363_p0 = scmp.ge.s32.totalorder %s1920_s12, 1  ;;  %s1920_s12 = sphi %s1942_s12, %s13_s12  }
   0x2   : > { %p138_p1 = scmp.lt.s32.totalorder %s1920_s12, 5 }
   0x4   : > { %p139_p2 = pnand %p1363_p0, %p138_p1 }
   0x5   : > { %v1874_v0 = vld [vmem:[%s2137_s1] sm:$0xff] (!%p139_p2)   ;;  %s1364_s16 = sshll.u32 (!%p139_p2), %s1359_s13, 6  ;;  %v1875_v1 = vld [vmem:[%s2137_s1 + $0x8] sm:$0xff] (!%p139_p2)   ;;  %v1876_v2 = vld [vmem:[%s2137_s1 + $0x10] sm:$0xff] (!%p139_p2)  }
   0x6   : > { %142 = sbr.rel (%p139_p2) target bundleno = 327 (0x147), region = 32  ;;  %p163_p3 = scmp.lt.s32.totalorder (!%p139_p2), %s1364_s16, 255  ;;  %1770 = vmatprep.subr.bf16.mxu0 (!%p139_p2), %v1874_v0  ;;  %1850 = vmatprep.subr.bf16.mxu1 (!%p139_p2), %v1874_v0  ;;  %v1877_v3 = vld [vmem:[%s2137_s1 + $0x18] sm:$0xff] (!%p139_p2)   ;;  %v1878_v6 = vld [vmem:[%s2137_s1 + $0x20] sm:$0xff] (!%p139_p2)   ;;  %v1879_v7 = vld [vmem:[%s2137_s1 + $0x28] sm:$0xff] (!%p139_p2)  }
   0x7   : > { %1771 = vmatpush3.bf16.msra.mxu0 (!%p139_p2), %v1874_v0  ;;  %1858 = vmatpush3.bf16.msra.mxu1 (!%p139_p2), %v1874_v0  ;;  %v1880_v8 = vld [vmem:[%s2137_s1 + $0x30] sm:$0xff] (!%p139_p2)   ;;  %v1881_v9 = vld [vmem:[%s2137_s1 + $0x38] sm:$0xff] (!%p139_p2)   ;;  %v2019_v40 = vld [vmem:[%s2138_s2] ss:$0 sm:$0xff] (!%p139_p2) }
   0x8   : > { %1772 = vmatprep.subr.bf16.mxu0 (!%p139_p2), %v1875_v1  ;;  %1851 = vmatprep.subr.bf16.mxu1 (!%p139_p2), %v1875_v1 }
   0xb   : > { %1773 = vmatpush3.bf16.msra.mxu0 (!%p139_p2), %v1875_v1  ;;  %1859 = vmatpush3.bf16.msra.mxu1 (!%p139_p2), %v1875_v1 }
   0xc   : > { %1774 = vmatprep.subr.bf16.mxu0 (!%p139_p2), %v1876_v2  ;;  %1852 = vmatprep.subr.bf16.mxu1 (!%p139_p2), %v1876_v2 }
   0xd   : > { %s2141_s16 = smov (!%p163_p3, %s1364_s16), 255 }
   0xe   : > { %s1365_s21 = sshll.u32 %s2141_s16, 2 }
   0xf   : > { %s1967_s24 = scalar_lea.vmem %s2136_s0, %s1365_s21  ;;  %1775 = vmatpush3.bf16.msra.mxu0 %v1876_v2  ;;  %1860 = vmatpush3.bf16.msra.mxu1 %v1876_v2  ;;  %s2036_s13 = scalar_lea.vmem %s2139_s3, %s1365_s21 }
  0x10   : > { %v1882_v4 = vld [vmem:[%s1967_s24] sm:$0xff]   ;;  %1776 = vmatprep.subr.bf16.mxu0 %v1877_v3  ;;  %1853 = vmatprep.subr.bf16.mxu1 %v1877_v3  ;;  %v1884_v10 = vld [vmem:[%s1967_s24 + $0x8] sm:$0xff]   ;;  %v1886_v12 = vld [vmem:[%s1967_s24 + $0x10] sm:$0xff]  }
  0x11   : > { %v1883_v5 = vld [vmem:[%s1967_s24 + $0x80] sm:$0xff]   ;;  %1786 = vmatprep.mubr.bf16.mxu0 %v1882_v4  ;;  %v1885_v11 = vld [vmem:[%s1967_s24 + $0x88] sm:$0xff]   ;;  %v1887_v13 = vld [vmem:[%s1967_s24 + $0x90] sm:$0xff]  }
  0x12   : > { %1818 = vmatprep.mubr.bf16.mxu1 %v1883_v5  ;;  %v1888_v14 = vld [vmem:[%s1967_s24 + $0x18] sm:$0xff]   ;;  %v1890_v16 = vld [vmem:[%s1967_s24 + $0x20] sm:$0xff]   ;;  %v1892_v18 = vld [vmem:[%s1967_s24 + $0x28] sm:$0xff]  }
  0x13   : > { %1777 = vmatpush3.bf16.msra.mxu0 %v1877_v3  ;;  %1861 = vmatpush3.bf16.msra.mxu1 %v1877_v3  ;;  %v1889_v15 = vld [vmem:[%s1967_s24 + $0x98] sm:$0xff]   ;;  %v1891_v17 = vld [vmem:[%s1967_s24 + $0xa0] sm:$0xff]   ;;  %v1893_v19 = vld [vmem:[%s1967_s24 + $0xa8] sm:$0xff]  }
  0x14   : > { %1778 = vmatprep.subr.bf16.mxu0 %v1878_v6  ;;  %1854 = vmatprep.subr.bf16.mxu1 %v1878_v6  ;;  %v1894_v20 = vld [vmem:[%s1967_s24 + $0x30] sm:$0xff]   ;;  %v1896_v22 = vld [vmem:[%s1967_s24 + $0x38] sm:$0xff]   ;;  %v1898_v24 = vld [vmem:[%s1967_s24 + $0x40] sm:$0xff]  }
  0x15   : > { %v1895_v21 = vld [vmem:[%s1967_s24 + $0xb0] sm:$0xff]   ;;  %v1897_v23 = vld [vmem:[%s1967_s24 + $0xb8] sm:$0xff]   ;;  %v1899_v25 = vld [vmem:[%s1967_s24 + $0xc0] sm:$0xff]  }
  0x16   : > { %v1900_v26 = vld [vmem:[%s1967_s24 + $0x48] sm:$0xff]   ;;  %v1902_v28 = vld [vmem:[%s1967_s24 + $0x50] sm:$0xff]   ;;  %v1904_v30 = vld [vmem:[%s1967_s24 + $0x58] sm:$0xff]  }
  0x17   : > { %1779 = vmatpush3.bf16.msra.mxu0 %v1878_v6  ;;  %1862 = vmatpush3.bf16.msra.mxu1 %v1878_v6  ;;  %v1901_v27 = vld [vmem:[%s1967_s24 + $0xc8] sm:$0xff]   ;;  %v1903_v29 = vld [vmem:[%s1967_s24 + $0xd0] sm:$0xff]   ;;  %v1905_v31 = vld [vmem:[%s1967_s24 + $0xd8] sm:$0xff]  }
  0x18   : > { %1780 = vmatprep.subr.bf16.mxu0 %v1879_v7  ;;  %1855 = vmatprep.subr.bf16.mxu1 %v1879_v7  ;;  %v1906_v32 = vld [vmem:[%s1967_s24 + $0x60] sm:$0xff]   ;;  %v1908_v34 = vld [vmem:[%s1967_s24 + $0x68] sm:$0xff]   ;;  %v1910_v36 = vld [vmem:[%s1967_s24 + $0x70] sm:$0xff]  }
  0x19   : > { %v1907_v33 = vld [vmem:[%s1967_s24 + $0xe0] sm:$0xff]   ;;  %v1909_v35 = vld [vmem:[%s1967_s24 + $0xe8] sm:$0xff]   ;;  %v1911_v37 = vld [vmem:[%s1967_s24 + $0xf0] sm:$0xff]  }
  0x1a   : > { %v1912_v38 = vld [vmem:[%s1967_s24 + $0x78] sm:$0xff]  }
  0x1b   : > { %1781 = vmatpush3.bf16.msra.mxu0 %v1879_v7  ;;  %1863 = vmatpush3.bf16.msra.mxu1 %v1879_v7  ;;  %v1913_v39 = vld [vmem:[%s1967_s24 + $0xf8] sm:$0xff]  }
  0x1c   : > { %1782 = vmatprep.subr.bf16.mxu0 %v1880_v8  ;;  %1856 = vmatprep.subr.bf16.mxu1 %v1880_v8 }
  0x1f   : > { %1783 = vmatpush3.bf16.msra.mxu0 %v1880_v8  ;;  %1864 = vmatpush3.bf16.msra.mxu1 %v1880_v8 }
  0x20   : > { %1784 = vmatprep.subr.bf16.mxu0 %v1881_v9  ;;  %1857 = vmatprep.subr.bf16.mxu1 %v1881_v9 }
  0x23   : > { %1785 = vmatpush3.bf16.msra.mxu0 %v1881_v9  ;;  %1865 = vmatpush3.bf16.msra.mxu1 %v1881_v9 }
  0x26   : > { %1787 = vmatmul.mubr.bf16.vlgmr.msra.gmra.mrb[0].mxu0 %v1884_v10  ;;  %1819 = vmatmul.mubr.bf16.vlgmr.msra.gmra.mrb[0].mxu1 %v1885_v11 }
  0x27   : > { %1790 = vmatprep.mubr.bf16.mxu0 %v1886_v12  ;;  %1822 = vmatprep.mubr.bf16.mxu1 %v1887_v13 }
  0x2e   : > { %1791 = vmatmul.mubr.bf16.gmra.mrb[4].mxu0 %v1888_v14  ;;  %1823 = vmatmul.mubr.bf16.gmra.mrb[4].mxu1 %v1889_v15 }
  0x2f   : > { %1794 = vmatprep.mubr.bf16.mxu0 %v1890_v16  ;;  %1826 = vmatprep.mubr.bf16.mxu1 %v1891_v17 }
  0x36   : > { %1795 = vmatmul.mubr.bf16.gmra.mrb[8].mxu0 %v1892_v18  ;;  %1827 = vmatmul.mubr.bf16.gmra.mrb[8].mxu1 %v1893_v19 }
  0x37   : > { %1798 = vmatprep.mubr.bf16.mxu0 %v1894_v20  ;;  %1830 = vmatprep.mubr.bf16.mxu1 %v1895_v21 }
  0x3e   : > { %1799 = vmatmul.mubr.bf16.gmra.mrb[12].mxu0 %v1896_v22  ;;  %1831 = vmatmul.mubr.bf16.gmra.mrb[12].mxu1 %v1897_v23 }
  0x3f   : > { %1802 = vmatprep.mubr.bf16.mxu0 %v1898_v24  ;;  %1834 = vmatprep.mubr.bf16.mxu1 %v1899_v25 }
  0x46   : > { %1803 = vmatmul.mubr.bf16.gmra.mrb[16].mxu0 %v1900_v26  ;;  %1835 = vmatmul.mubr.bf16.gmra.mrb[16].mxu1 %v1901_v27 }
  0x47   : > { %1806 = vmatprep.mubr.bf16.mxu0 %v1902_v28  ;;  %1838 = vmatprep.mubr.bf16.mxu1 %v1903_v29 }
  0x4e   : > { %1807 = vmatmul.mubr.bf16.gmra.mrb[20].mxu0 %v1904_v30  ;;  %1839 = vmatmul.mubr.bf16.gmra.mrb[20].mxu1 %v1905_v31 }
  0x4f   : > { %1810 = vmatprep.mubr.bf16.mxu0 %v1906_v32  ;;  %1842 = vmatprep.mubr.bf16.mxu1 %v1907_v33 }
  0x56   : > { %1811 = vmatmul.mubr.bf16.gmra.mrb[24].mxu0 %v1908_v34  ;;  %1843 = vmatmul.mubr.bf16.gmra.mrb[24].mxu1 %v1909_v35 }
  0x57   : > { %1814 = vmatprep.mubr.bf16.mxu0 %v1910_v36  ;;  %1846 = vmatprep.mubr.bf16.mxu1 %v1911_v37 }
  0x5e   : > { %1815 = vmatmul.mubr.bf16.gmra.mrb[28].mxu0 %v1912_v38  ;;  %1847 = vmatmul.mubr.bf16.gmra.mrb[28].mxu1 %v1913_v39 }
  0xf9   : > { %v1788_v41 = vpop.f32.mrb[0].mxu0  ;;  %v1820_v42 = vpop.f32.mrb[0].mxu1 }
  0xfa   : > { %v545_v43 = vadd.f32 %v1788_v41, %v2019_v40  ;;  %v673_v44 = vadd.f32 %v1820_v42, %v2019_v40  ;;  %v536_v45 = vpop.f32.mrb[1].mxu0  ;;  %v664_v46 = vpop.f32.mrb[1].mxu1 }
  0xfb   : > { %v537_v47 = vadd.f32 %v2019_v40, %v536_v45  ;;  %v665_v48 = vadd.f32 %v2019_v40, %v664_v46  ;;  %v1789_v49 = vpop.f32.mrb[2].mxu0  ;;  %v1821_v50 = vpop.f32.mrb[2].mxu1 }
  0xfc   : > { %vm793_vm0 = vcmp.ge.f32.partialorder %v545_v43, 0.0  ;;  %v857_v51 = vmul.f32 0.2, %v545_v43  ;;  %vm825_vm1 = vcmp.ge.f32.partialorder %v673_v44, 0.0  ;;  %v889_v52 = vmul.f32 0.2, %v673_v44 }
  0xfd   : > { %vm791_vm2 = vcmp.ge.f32.partialorder %v537_v47, 0.0  ;;  %v855_v53 = vmul.f32 0.2, %v537_v47  ;;  %vm823_vm3 = vcmp.ge.f32.partialorder %v665_v48, 0.0  ;;  %v887_v54 = vmul.f32 0.2, %v665_v48 }
  0xfe   : > { %v548_v55 = vadd.f32 %v1789_v49, %v2019_v40  ;;  %v676_v56 = vadd.f32 %v1821_v50, %v2019_v40  ;;  %v539_v57 = vpop.f32.mrb[3].mxu0  ;;  %v667_v58 = vpop.f32.mrb[3].mxu1  ;;  %v921_v59 = vsel %vm793_vm0, %v545_v43, %v857_v51  ;;  %v953_v60 = vsel %vm825_vm1, %v673_v44, %v889_v52 }
  0xff   : > { %v540_v61 = vadd.f32 %v2019_v40, %v539_v57  ;;  %v668_v62 = vadd.f32 %v2019_v40, %v667_v58  ;;  %v919_v3 = vsel %vm791_vm2, %v537_v47, %v855_v53  ;;  %v951_v4 = vsel %vm823_vm3, %v665_v48, %v887_v54 }
 0x100   : > { %vm794_vm4 = vcmp.ge.f32.partialorder %v548_v55, 0.0  ;;  %v858_v63 = vmul.f32 0.2, %v548_v55  ;;  %vm826_vm5 = vcmp.ge.f32.partialorder %v676_v56, 0.0  ;;  %v890_v0 = vmul.f32 0.2, %v676_v56 }
 0x101   : > { %vm792_vm6 = vcmp.ge.f32.partialorder %v540_v61, 0.0  ;;  %v856_v1 = vmul.f32 0.2, %v540_v61  ;;  %vm824_vm7 = vcmp.ge.f32.partialorder %v668_v62, 0.0  ;;  %v888_v2 = vmul.f32 0.2, %v668_v62 }
 0x102   : > { %v922_v5 = vsel %vm794_vm4, %v548_v55, %v858_v63  ;;  %v954_v6 = vsel %vm826_vm5, %v676_v56, %v890_v0  ;;  %v1792_v7 = vpop.f32.mrb[4].mxu0  ;;  %v1824_v8 = vpop.f32.mrb[4].mxu1 }
 0x103   : > { %v1547_v9 = vpack.c.bf16 %v922_v5, %v921_v59  ;;  %v1627_v10 = vpack.c.bf16 %v954_v6, %v953_v60  ;;  %v920_v11 = vsel %vm792_vm6, %v540_v61, %v856_v1  ;;  %v952_v12 = vsel %vm824_vm7, %v668_v62, %v888_v2  ;;  %v552_v13 = vpop.f32.mrb[5].mxu0  ;;  %v680_v14 = vpop.f32.mrb[5].mxu1 }
 0x104   : > { %v1542_v15 = vpack.c.bf16 %v920_v11, %v919_v3  ;;  %v1622_v16 = vpack.c.bf16 %v952_v12, %v951_v4  ;;  %v561_v17 = vadd.f32 %v1792_v7, %v2019_v40  ;;  %v689_v18 = vadd.f32 %v1824_v8, %v2019_v40  ;;  %v1793_v19 = vpop.f32.mrb[6].mxu0  ;;  %v1825_v20 = vpop.f32.mrb[6].mxu1 }
 0x105   : > { %1699 = vst [vmem:[%s2036_s13 + $0x8] sm:$0xff] %v1547_v9   ;;  %1715 = vst [vmem:[%s2036_s13 + $0x88] sm:$0xff] %v1627_v10   ;;  %v553_v21 = vadd.f32 %v2019_v40, %v552_v13  ;;  %v681_v22 = vadd.f32 %v2019_v40, %v680_v14  ;;  %v564_v23 = vadd.f32 %v1793_v19, %v2019_v40  ;;  %v555_v25 = vpop.f32.mrb[7].mxu0  ;;  %v683_v26 = vpop.f32.mrb[7].mxu1 }
 0x106   : > { %v692_v24 = vadd.f32 %v1825_v20, %v2019_v40  ;;  %1543 = vst [vmem:[%s2036_s13] sm:$0xff] %v1542_v15   ;;  %1714 = vst [vmem:[%s2036_s13 + $0x80] sm:$0xff] %v1622_v16   ;;  %vm797_vm8 = vcmp.ge.f32.partialorder %v561_v17, 0.0  ;;  %v861_v27 = vmul.f32 0.2, %v561_v17  ;;  %vm829_vm9 = vcmp.ge.f32.partialorder %v689_v18, 0.0 }
 0x107   : > { %v893_v28 = vmul.f32 0.2, %v689_v18  ;;  %vm795_vm10 = vcmp.ge.f32.partialorder %v553_v21, 0.0  ;;  %v859_v29 = vmul.f32 0.2, %v553_v21  ;;  %vm827_vm11 = vcmp.ge.f32.partialorder %v681_v22, 0.0 }
 0x108   : > { %v891_v30 = vmul.f32 0.2, %v681_v22  ;;  %v925_v31 = vsel %vm797_vm8, %v561_v17, %v861_v27  ;;  %vm798_vm12 = vcmp.ge.f32.partialorder %v564_v23, 0.0  ;;  %v862_v33 = vmul.f32 0.2, %v564_v23 }
 0x109   : > { %v957_v32 = vsel %vm829_vm9, %v689_v18, %v893_v28  ;;  %v923_v34 = vsel %vm795_vm10, %v553_v21, %v859_v29  ;;  %vm830_vm13 = vcmp.ge.f32.partialorder %v692_v24, 0.0  ;;  %v894_v36 = vmul.f32 0.2, %v692_v24  ;;  %v1796_v37 = vpop.f32.mrb[8].mxu0  ;;  %v1828_v38 = vpop.f32.mrb[8].mxu1 }
 0x10a   : > { %v955_v35 = vsel %vm827_vm11, %v681_v22, %v891_v30  ;;  %v926_v39 = vsel %vm798_vm12, %v564_v23, %v862_v33  ;;  %v556_v41 = vadd.f32 %v2019_v40, %v555_v25  ;;  %v684_v42 = vadd.f32 %v2019_v40, %v683_v26  ;;  %v568_v44 = vpop.f32.mrb[9].mxu0  ;;  %v696_v45 = vpop.f32.mrb[9].mxu1 }
 0x10b   : > { %v577_v43 = vadd.f32 %v1796_v37, %v2019_v40  ;;  %v1557_v46 = vpack.c.bf16 %v926_v39, %v925_v31  ;;  %v958_v47 = vsel %vm830_vm13, %v692_v24, %v894_v36  ;;  %v705_v48 = vadd.f32 %v1828_v38, %v2019_v40  ;;  %v1797_v50 = vpop.f32.mrb[10].mxu0  ;;  %v1829_v51 = vpop.f32.mrb[10].mxu1 }
 0x10c   : > { %v569_v49 = vadd.f32 %v2019_v40, %v568_v44  ;;  %v1637_v52 = vpack.c.bf16 %v958_v47, %v957_v32  ;;  %vm796_vm14 = vcmp.ge.f32.partialorder %v556_v41, 0.0  ;;  %v860_v53 = vmul.f32 0.2, %v556_v41  ;;  %v571_v54 = vpop.f32.mrb[11].mxu0  ;;  %v699_v55 = vpop.f32.mrb[11].mxu1 }
 0x10d   : > { %vm828_vm15 = vcmp.ge.f32.partialorder %v684_v42, 0.0  ;;  %1701 = vst [vmem:[%s2036_s13 + $0x18] sm:$0xff] %v1557_v46   ;;  %v892_v56 = vmul.f32 0.2, %v684_v42  ;;  %vm801_vm0 = vcmp.ge.f32.partialorder %v577_v43, 0.0  ;;  %vm833_vm1 = vcmp.ge.f32.partialorder %v705_v48, 0.0 }
 0x10e   : > { %v865_v57 = vmul.f32 0.2, %v577_v43  ;;  %1717 = vst [vmem:[%s2036_s13 + $0x98] sm:$0xff] %v1637_v52   ;;  %v924_v58 = vsel %vm796_vm14, %v556_v41, %v860_v53  ;;  %v897_v59 = vmul.f32 0.2, %v705_v48  ;;  %vm799_vm2 = vcmp.ge.f32.partialorder %v569_v49, 0.0 }
 0x10f   : > { %v863_v60 = vmul.f32 0.2, %v569_v49  ;;  %v1552_v61 = vpack.c.bf16 %v924_v58, %v923_v34  ;;  %v956_v62 = vsel %vm828_vm15, %v684_v42, %v892_v56  ;;  %v697_v0 = vadd.f32 %v2019_v40, %v696_v45 }
 0x110   : > { %v929_v63 = vsel %vm801_vm0, %v577_v43, %v865_v57  ;;  %v1632_v1 = vpack.c.bf16 %v956_v62, %v955_v35  ;;  %v961_v2 = vsel %vm833_vm1, %v705_v48, %v897_v59  ;;  %v580_v4 = vadd.f32 %v1797_v50, %v2019_v40 }
 0x111   : > { %v927_v3 = vsel %vm799_vm2, %v569_v49, %v863_v60  ;;  %1700 = vst [vmem:[%s2036_s13 + $0x10] sm:$0xff] %v1552_v61   ;;  %vm831_vm3 = vcmp.ge.f32.partialorder %v697_v0, 0.0  ;;  %v895_v5 = vmul.f32 0.2, %v697_v0  ;;  %v708_v6 = vadd.f32 %v1829_v51, %v2019_v40  ;;  %v1800_v8 = vpop.f32.mrb[12].mxu0  ;;  %v1832_v9 = vpop.f32.mrb[12].mxu1 }
 0x112   : > { %v572_v7 = vadd.f32 %v2019_v40, %v571_v54  ;;  %1716 = vst [vmem:[%s2036_s13 + $0x90] sm:$0xff] %v1632_v1   ;;  %vm802_vm4 = vcmp.ge.f32.partialorder %v580_v4, 0.0  ;;  %v866_v10 = vmul.f32 0.2, %v580_v4  ;;  %v700_v11 = vadd.f32 %v2019_v40, %v699_v55  ;;  %v584_v13 = vpop.f32.mrb[13].mxu0  ;;  %v712_v14 = vpop.f32.mrb[13].mxu1 }
 0x113   : > { %v593_v12 = vadd.f32 %v1800_v8, %v2019_v40  ;;  %v959_v15 = vsel %vm831_vm3, %v697_v0, %v895_v5  ;;  %vm834_vm5 = vcmp.ge.f32.partialorder %v708_v6, 0.0  ;;  %v898_v16 = vmul.f32 0.2, %v708_v6  ;;  %v1801_v17 = vpop.f32.mrb[14].mxu0  ;;  %v1833_v18 = vpop.f32.mrb[14].mxu1 }
 0x114   : > { %vm800_vm6 = vcmp.ge.f32.partialorder %v572_v7, 0.0  ;;  %v930_v19 = vsel %vm802_vm4, %v580_v4, %v866_v10  ;;  %v864_v20 = vmul.f32 0.2, %v572_v7  ;;  %vm832_vm7 = vcmp.ge.f32.partialorder %v700_v11, 0.0  ;;  %v587_v22 = vpop.f32.mrb[15].mxu0  ;;  %v715_v26 = vpop.f32.mrb[15].mxu1 }
 0x115   : > { %v896_v21 = vmul.f32 0.2, %v700_v11  ;;  %v1567_v23 = vpack.c.bf16 %v930_v19, %v929_v63  ;;  %v962_v24 = vsel %vm834_vm5, %v708_v6, %v898_v16  ;;  %vm805_vm8 = vcmp.ge.f32.partialorder %v593_v12, 0.0 }
 0x116   : > { %v869_v25 = vmul.f32 0.2, %v593_v12  ;;  %v1647_v27 = vpack.c.bf16 %v962_v24, %v961_v2  ;;  %v928_v28 = vsel %vm800_vm6, %v572_v7, %v864_v20  ;;  %v721_v30 = vadd.f32 %v1832_v9, %v2019_v40 }
 0x117   : > { %v960_v29 = vsel %vm832_vm7, %v700_v11, %v896_v21  ;;  %1703 = vst [vmem:[%s2036_s13 + $0x28] sm:$0xff] %v1567_v23   ;;  %v1562_v31 = vpack.c.bf16 %v928_v28, %v927_v3  ;;  %v585_v34 = vadd.f32 %v2019_v40, %v584_v13  ;;  %v713_v36 = vadd.f32 %v2019_v40, %v712_v14 }
 0x118   : > { %v1642_v32 = vpack.c.bf16 %v960_v29, %v959_v15  ;;  %v933_v33 = vsel %vm805_vm8, %v593_v12, %v869_v25  ;;  %1719 = vst [vmem:[%s2036_s13 + $0xa8] sm:$0xff] %v1647_v27   ;;  %vm837_vm9 = vcmp.ge.f32.partialorder %v721_v30, 0.0  ;;  %v901_v35 = vmul.f32 0.2, %v721_v30 }
 0x119   : > { %v596_v37 = vadd.f32 %v1801_v17, %v2019_v40  ;;  %1702 = vst [vmem:[%s2036_s13 + $0x20] sm:$0xff] %v1562_v31   ;;  %vm803_vm10 = vcmp.ge.f32.partialorder %v585_v34, 0.0  ;;  %v867_v38 = vmul.f32 0.2, %v585_v34  ;;  %v724_v39 = vadd.f32 %v1833_v18, %v2019_v40  ;;  %v1804_v42 = vpop.f32.mrb[16].mxu0  ;;  %v1836_v43 = vpop.f32.mrb[16].mxu1 }
 0x11a   : > { %1718 = vst [vmem:[%s2036_s13 + $0xa0] sm:$0xff] %v1642_v32   ;;  %v588_v41 = vadd.f32 %v2019_v40, %v587_v22  ;;  %v965_v44 = vsel %vm837_vm9, %v721_v30, %v901_v35  ;;  %vm835_vm11 = vcmp.ge.f32.partialorder %v713_v36, 0.0  ;;  %v899_v45 = vmul.f32 0.2, %v713_v36  ;;  %v600_v46 = vpop.f32.mrb[17].mxu0  ;;  %v728_v47 = vpop.f32.mrb[17].mxu1 }
 0x11b   : > { %vm806_vm12 = vcmp.ge.f32.partialorder %v596_v37, 0.0  ;;  %v931_v48 = vsel %vm803_vm10, %v585_v34, %v867_v38  ;;  %v870_v49 = vmul.f32 0.2, %v596_v37  ;;  %vm838_vm13 = vcmp.ge.f32.partialorder %v724_v39, 0.0  ;;  %v1805_v51 = vpop.f32.mrb[18].mxu0  ;;  %v1837_v55 = vpop.f32.mrb[18].mxu1 }
 0x11c   : > { %v902_v50 = vmul.f32 0.2, %v724_v39  ;;  %v963_v52 = vsel %vm835_vm11, %v713_v36, %v899_v45  ;;  %vm804_vm14 = vcmp.ge.f32.partialorder %v588_v41, 0.0  ;;  %v868_v53 = vmul.f32 0.2, %v588_v41  ;;  %v603_v56 = vpop.f32.mrb[19].mxu0 }
 0x11d   : > { %v716_v54 = vadd.f32 %v2019_v40, %v715_v26  ;;  %v934_v57 = vsel %vm806_vm12, %v596_v37, %v870_v49  ;;  %v609_v59 = vadd.f32 %v1804_v42, %v2019_v40  ;;  %v737_v60 = vadd.f32 %v1836_v43, %v2019_v40  ;;  %v731_v61 = vpop.f32.mrb[19].mxu1 }
 0x11e   : > { %v966_v58 = vsel %vm838_vm13, %v724_v39, %v902_v50  ;;  %v1577_v62 = vpack.c.bf16 %v934_v57, %v933_v33  ;;  %v932_v0 = vsel %vm804_vm14, %v588_v41, %v868_v53  ;;  %v601_v5 = vadd.f32 %v2019_v40, %v600_v46 }
 0x11f   : > { %v1657_v63 = vpack.c.bf16 %v966_v58, %v965_v44  ;;  %vm836_vm15 = vcmp.ge.f32.partialorder %v716_v54, 0.0  ;;  %v1572_v1 = vpack.c.bf16 %v932_v0, %v931_v48  ;;  %v900_v2 = vmul.f32 0.2, %v716_v54 }
 0x120   : > { %vm809_vm0 = vcmp.ge.f32.partialorder %v609_v59, 0.0  ;;  %v873_v3 = vmul.f32 0.2, %v609_v59  ;;  %1705 = vst [vmem:[%s2036_s13 + $0x38] sm:$0xff] %v1577_v62   ;;  %vm841_vm1 = vcmp.ge.f32.partialorder %v737_v60, 0.0  ;;  %v729_v6 = vadd.f32 %v2019_v40, %v728_v47 }
 0x121   : > { %1721 = vst [vmem:[%s2036_s13 + $0xb8] sm:$0xff] %v1657_v63   ;;  %v905_v4 = vmul.f32 0.2, %v737_v60  ;;  %1704 = vst [vmem:[%s2036_s13 + $0x30] sm:$0xff] %v1572_v1   ;;  %v964_v7 = vsel %vm836_vm15, %v716_v54, %v900_v2  ;;  %v612_v9 = vadd.f32 %v1805_v51, %v2019_v40  ;;  %v740_v10 = vadd.f32 %v1837_v55, %v2019_v40  ;;  %v1808_v11 = vpop.f32.mrb[20].mxu0  ;;  %v1840_v12 = vpop.f32.mrb[20].mxu1 }
 0x122   : > { %v937_v8 = vsel %vm809_vm0, %v609_v59, %v873_v3  ;;  %v1652_v13 = vpack.c.bf16 %v964_v7, %v963_v52  ;;  %vm807_vm2 = vcmp.ge.f32.partialorder %v601_v5, 0.0  ;;  %v871_v15 = vmul.f32 0.2, %v601_v5  ;;  %v616_v16 = vpop.f32.mrb[21].mxu0  ;;  %v744_v17 = vpop.f32.mrb[21].mxu1 }
 0x123   : > { %v969_v14 = vsel %vm841_vm1, %v737_v60, %v905_v4  ;;  %vm839_vm3 = vcmp.ge.f32.partialorder %v729_v6, 0.0  ;;  %v903_v18 = vmul.f32 0.2, %v729_v6  ;;  %vm810_vm4 = vcmp.ge.f32.partialorder %v612_v9, 0.0  ;;  %v1809_v23 = vpop.f32.mrb[22].mxu0  ;;  %v1841_v24 = vpop.f32.mrb[22].mxu1 }
 0x124   : > { %v874_v19 = vmul.f32 0.2, %v612_v9  ;;  %1720 = vst [vmem:[%s2036_s13 + $0xb0] sm:$0xff] %v1652_v13   ;;  %v935_v20 = vsel %vm807_vm2, %v601_v5, %v871_v15  ;;  %vm842_vm5 = vcmp.ge.f32.partialorder %v740_v10, 0.0  ;;  %v906_v21 = vmul.f32 0.2, %v740_v10 }
 0x125   : > { %v604_v22 = vadd.f32 %v2019_v40, %v603_v56  ;;  %v967_v25 = vsel %vm839_vm3, %v729_v6, %v903_v18  ;;  %v732_v27 = vadd.f32 %v2019_v40, %v731_v61  ;;  %v625_v28 = vadd.f32 %v1808_v11, %v2019_v40  ;;  %v619_v29 = vpop.f32.mrb[23].mxu0  ;;  %v747_v30 = vpop.f32.mrb[23].mxu1 }
 0x126   : > { %v938_v26 = vsel %vm810_vm4, %v612_v9, %v874_v19  ;;  %v970_v32 = vsel %vm842_vm5, %v740_v10, %v906_v21  ;;  %v753_v38 = vadd.f32 %v1840_v12, %v2019_v40  ;;  %v617_v39 = vadd.f32 %v2019_v40, %v616_v16 }
 0x127   : > { %v1587_v31 = vpack.c.bf16 %v938_v26, %v937_v8  ;;  %vm808_vm6 = vcmp.ge.f32.partialorder %v604_v22, 0.0  ;;  %v872_v33 = vmul.f32 0.2, %v604_v22  ;;  %v1667_v34 = vpack.c.bf16 %v970_v32, %v969_v14 }
 0x128   : > { %vm840_vm7 = vcmp.ge.f32.partialorder %v732_v27, 0.0  ;;  %v904_v35 = vmul.f32 0.2, %v732_v27  ;;  %vm813_vm8 = vcmp.ge.f32.partialorder %v625_v28, 0.0  ;;  %v877_v37 = vmul.f32 0.2, %v625_v28 }
 0x129   : > { %1707 = vst [vmem:[%s2036_s13 + $0x48] sm:$0xff] %v1587_v31   ;;  %v936_v36 = vsel %vm808_vm6, %v604_v22, %v872_v33  ;;  %1723 = vst [vmem:[%s2036_s13 + $0xc8] sm:$0xff] %v1667_v34   ;;  %v745_v43 = vadd.f32 %v2019_v40, %v744_v17  ;;  %v628_v44 = vadd.f32 %v1809_v23, %v2019_v40  ;;  %v1812_v45 = vpop.f32.mrb[24].mxu0  ;;  %v1844_v46 = vpop.f32.mrb[24].mxu1  ;;  %vm845_vm9 = vcmp.ge.f32.partialorder %v753_v38, 0.0 }
 0x12a   : > { %v1582_v41 = vpack.c.bf16 %v936_v36, %v935_v20  ;;  %v968_v42 = vsel %vm840_vm7, %v732_v27, %v904_v35  ;;  %v909_v48 = vmul.f32 0.2, %v753_v38  ;;  %v632_v49 = vpop.f32.mrb[25].mxu0  ;;  %v760_v50 = vpop.f32.mrb[25].mxu1  ;;  %v941_v51 = vsel %vm813_vm8, %v625_v28, %v877_v37 }
 0x12b   : > { %v1662_v47 = vpack.c.bf16 %v968_v42, %v967_v25  ;;  %vm811_vm10 = vcmp.ge.f32.partialorder %v617_v39, 0.0  ;;  %v875_v52 = vmul.f32 0.2, %v617_v39  ;;  %v907_v53 = vmul.f32 0.2, %v745_v43  ;;  %v1813_v56 = vpop.f32.mrb[26].mxu0 }
 0x12c   : > { %1706 = vst [vmem:[%s2036_s13 + $0x40] sm:$0xff] %v1582_v41   ;;  %vm843_vm11 = vcmp.ge.f32.partialorder %v745_v43, 0.0  ;;  %vm814_vm12 = vcmp.ge.f32.partialorder %v628_v44, 0.0  ;;  %v878_v54 = vmul.f32 0.2, %v628_v44  ;;  %v756_v55 = vadd.f32 %v1841_v24, %v2019_v40  ;;  %v1845_v57 = vpop.f32.mrb[26].mxu1 }
 0x12d   : > { %1722 = vst [vmem:[%s2036_s13 + $0xc0] sm:$0xff] %v1662_v47   ;;  %v973_v58 = vsel %vm845_vm9, %v753_v38, %v909_v48  ;;  %v939_v59 = vsel %vm811_vm10, %v617_v39, %v875_v52  ;;  %v620_v60 = vadd.f32 %v2019_v40, %v619_v29  ;;  %v748_v61 = vadd.f32 %v2019_v40, %v747_v30  ;;  %v635_v62 = vpop.f32.mrb[27].mxu0  ;;  %v763_v63 = vpop.f32.mrb[27].mxu1 }
 0x12e   : > { %v942_v0 = vsel %vm814_vm12, %v628_v44, %v878_v54  ;;  %vm846_vm13 = vcmp.ge.f32.partialorder %v756_v55, 0.0  ;;  %v910_v1 = vmul.f32 0.2, %v756_v55  ;;  %v641_v2 = vadd.f32 %v1812_v45, %v2019_v40 }
 0x12f   : > { %v1597_v3 = vpack.c.bf16 %v942_v0, %v941_v51  ;;  %vm812_vm14 = vcmp.ge.f32.partialorder %v620_v60, 0.0  ;;  %v876_v4 = vmul.f32 0.2, %v620_v60  ;;  %vm844_vm15 = vcmp.ge.f32.partialorder %v748_v61, 0.0 }
 0x130   : > { %v974_v5 = vsel %vm846_vm13, %v756_v55, %v910_v1  ;;  %v908_v6 = vmul.f32 0.2, %v748_v61  ;;  %vm817_vm0 = vcmp.ge.f32.partialorder %v641_v2, 0.0  ;;  %v881_v7 = vmul.f32 0.2, %v641_v2 }
 0x131   : > { %1709 = vst [vmem:[%s2036_s13 + $0x58] sm:$0xff] %v1597_v3   ;;  %v1677_v8 = vpack.c.bf16 %v974_v5, %v973_v58  ;;  %v940_v9 = vsel %vm812_vm14, %v620_v60, %v876_v4  ;;  %v769_v10 = vadd.f32 %v1844_v46, %v2019_v40  ;;  %v633_v11 = vadd.f32 %v2019_v40, %v632_v49  ;;  %v1816_v12 = vpop.f32.mrb[28].mxu0  ;;  %v1848_v13 = vpop.f32.mrb[28].mxu1 }
 0x132   : > { %v971_v14 = vsel %vm843_vm11, %v745_v43, %v907_v53  ;;  %v1592_v15 = vpack.c.bf16 %v940_v9, %v939_v59  ;;  %v972_v16 = vsel %vm844_vm15, %v748_v61, %v908_v6  ;;  %v761_v17 = vadd.f32 %v2019_v40, %v760_v50  ;;  %v648_v18 = vpop.f32.mrb[29].mxu0  ;;  %v776_v19 = vpop.f32.mrb[29].mxu1 }
 0x133   : > { %1725 = vst [vmem:[%s2036_s13 + $0xd8] sm:$0xff] %v1677_v8   ;;  %v1672_v20 = vpack.c.bf16 %v972_v16, %v971_v14  ;;  %vm849_vm1 = vcmp.ge.f32.partialorder %v769_v10, 0.0  ;;  %v913_v21 = vmul.f32 0.2, %v769_v10  ;;  %vm815_vm2 = vcmp.ge.f32.partialorder %v633_v11, 0.0  ;;  %v1817_v22 = vpop.f32.mrb[30].mxu0 }
 0x134   : > { %v1849_v23 = vpop.f32.mrb[30].mxu1  ;;  %1708 = vst [vmem:[%s2036_s13 + $0x50] sm:$0xff] %v1592_v15   ;;  %v945_v24 = vsel %vm817_vm0, %v641_v2, %v881_v7  ;;  %v879_v25 = vmul.f32 0.2, %v633_v11  ;;  %vm847_vm3 = vcmp.ge.f32.partialorder %v761_v17, 0.0  ;;  %v644_v26 = vadd.f32 %v1813_v56, %v2019_v40  ;;  %v651_v27 = vpop.f32.mrb[31].mxu0 }
 0x135   : > { %1724 = vst [vmem:[%s2036_s13 + $0xd0] sm:$0xff] %v1672_v20   ;;  %v911_v28 = vmul.f32 0.2, %v761_v17  ;;  %v772_v29 = vadd.f32 %v1845_v57, %v2019_v40  ;;  %v636_v30 = vadd.f32 %v2019_v40, %v635_v62  ;;  %v764_v31 = vadd.f32 %v2019_v40, %v763_v63  ;;  %v779_v32 = vpop.f32.mrb[31].mxu1 }
 0x136   : > { %v977_v33 = vsel %vm849_vm1, %v769_v10, %v913_v21  ;;  %v943_v34 = vsel %vm815_vm2, %v633_v11, %v879_v25  ;;  %vm818_vm4 = vcmp.ge.f32.partialorder %v644_v26, 0.0  ;;  %v882_v35 = vmul.f32 0.2, %v644_v26 }
 0x137   : > { %vm850_vm5 = vcmp.ge.f32.partialorder %v772_v29, 0.0  ;;  %v914_v36 = vmul.f32 0.2, %v772_v29  ;;  %vm816_vm6 = vcmp.ge.f32.partialorder %v636_v30, 0.0  ;;  %v880_v37 = vmul.f32 0.2, %v636_v30 }
 0x138   : > { %v946_v38 = vsel %vm818_vm4, %v644_v26, %v882_v35  ;;  %vm848_vm7 = vcmp.ge.f32.partialorder %v764_v31, 0.0  ;;  %v912_v39 = vmul.f32 0.2, %v764_v31  ;;  %v657_v41 = vadd.f32 %v1816_v12, %v2019_v40 }
 0x139   : > { %v1607_v42 = vpack.c.bf16 %v946_v38, %v945_v24  ;;  %v978_v43 = vsel %vm850_vm5, %v772_v29, %v914_v36  ;;  %v944_v44 = vsel %vm816_vm6, %v636_v30, %v880_v37  ;;  %v785_v45 = vadd.f32 %v1848_v13, %v2019_v40 }
 0x13a   : > { %v975_v46 = vsel %vm847_vm3, %v761_v17, %v911_v28  ;;  %v1687_v47 = vpack.c.bf16 %v978_v43, %v977_v33  ;;  %v1602_v48 = vpack.c.bf16 %v944_v44, %v943_v34  ;;  %v976_v49 = vsel %vm848_vm7, %v764_v31, %v912_v39 }
 0x13b   : > { %1711 = vst [vmem:[%s2036_s13 + $0x68] sm:$0xff] %v1607_v42   ;;  %v1682_v50 = vpack.c.bf16 %v976_v49, %v975_v46  ;;  %vm821_vm8 = vcmp.ge.f32.partialorder %v657_v41, 0.0  ;;  %v885_v51 = vmul.f32 0.2, %v657_v41  ;;  %v917_v52 = vmul.f32 0.2, %v785_v45 }
 0x13c   : > { %1727 = vst [vmem:[%s2036_s13 + $0xe8] sm:$0xff] %v1687_v47   ;;  %1710 = vst [vmem:[%s2036_s13 + $0x60] sm:$0xff] %v1602_v48   ;;  %v649_v53 = vadd.f32 %v2019_v40, %v648_v18  ;;  %v777_v54 = vadd.f32 %v2019_v40, %v776_v19  ;;  %v660_v55 = vadd.f32 %v1817_v22, %v2019_v40  ;;  %vm853_vm9 = vcmp.ge.f32.partialorder %v785_v45, 0.0 }
 0x13d   : > { %v788_v56 = vadd.f32 %v1849_v23, %v2019_v40  ;;  %1726 = vst [vmem:[%s2036_s13 + $0xe0] sm:$0xff] %v1682_v50   ;;  %v652_v57 = vadd.f32 %v2019_v40, %v651_v27  ;;  %v780_v58 = vadd.f32 %v2019_v40, %v779_v32  ;;  %v949_v59 = vsel %vm821_vm8, %v657_v41, %v885_v51 }
 0x13e   : > { %vm819_vm10 = vcmp.ge.f32.partialorder %v649_v53, 0.0  ;;  %v883_v60 = vmul.f32 0.2, %v649_v53  ;;  %v915_v61 = vmul.f32 0.2, %v777_v54  ;;  %vm822_vm11 = vcmp.ge.f32.partialorder %v660_v55, 0.0 }
 0x13f   : > { %v886_v62 = vmul.f32 0.2, %v660_v55  ;;  %vm854_vm12 = vcmp.ge.f32.partialorder %v788_v56, 0.0  ;;  %v918_v63 = vmul.f32 0.2, %v788_v56  ;;  %v981_v0 = vsel %vm853_vm9, %v785_v45, %v917_v52 }
 0x140   : > { %vm851_vm13 = vcmp.ge.f32.partialorder %v777_v54, 0.0  ;;  %vm820_vm14 = vcmp.ge.f32.partialorder %v652_v57, 0.0  ;;  %v884_v1 = vmul.f32 0.2, %v652_v57  ;;  %vm852_vm15 = vcmp.ge.f32.partialorder %v780_v58, 0.0 }
 0x141   : > { %v950_v2 = vsel %vm822_vm11, %v660_v55, %v886_v62  ;;  %v982_v3 = vsel %vm854_vm12, %v788_v56, %v918_v63  ;;  %v916_v40 = vmul.f32 0.2, %v780_v58  ;;  %v947_v4 = vsel %vm819_vm10, %v649_v53, %v883_v60 }
 0x142   : > { %v1617_v5 = vpack.c.bf16 %v950_v2, %v949_v59  ;;  %v1697_v6 = vpack.c.bf16 %v982_v3, %v981_v0  ;;  %v948_v7 = vsel %vm820_vm14, %v652_v57, %v884_v1  ;;  %v979_v8 = vsel %vm851_vm13, %v777_v54, %v915_v61 }
 0x143   : > { %v1612_v9 = vpack.c.bf16 %v948_v7, %v947_v4  ;;  %v980_v10 = vsel %vm852_vm15, %v780_v58, %v916_v40 }
 0x144   : > { %1713 = vst [vmem:[%s2036_s13 + $0x78] sm:$0xff] %v1617_v5   ;;  %1729 = vst [vmem:[%s2036_s13 + $0xf8] sm:$0xff] %v1697_v6   ;;  %v1692_v11 = vpack.c.bf16 %v980_v10, %v979_v8 }
 0x145   : > { %1712 = vst [vmem:[%s2036_s13 + $0x70] sm:$0xff] %v1612_v9  }
 0x146   : > { %1728 = vst [vmem:[%s2036_s13 + $0xf0] sm:$0xff] %v1692_v11  }
 0x147 PF: > { %s13_s12 = sadd.s32 1, %s1920_s12  }
 0x148   : > { %p10_p4 = scmp.ge.s32.totalorder %s13_s12, 6  }
 0x14a   :  { %12 = sbr.rel (!%p10_p4) target bundleno = 1 (0x1), region = 62 }

// kernel: discriminator64_forward.5
= control target key start
LH: loop header
LB: loop body
LE: loop exit
PB: predicated region body
PF: predicated region fallthrough
CT: control target
= control target key end

     0   :  { %s3334_s12 = smov 0   ;;  %s3830_s0 = inlined_call_operand.vmem [shape: bf16[512,1024], index: 0, kind: input, shape index: {}]   ;;  %s3831_s1 = inlined_call_operand.vmem [shape: bf16[1024,128], index: 1, kind: input, shape index: {}]   ;;  %s3832_s2 = inlined_call_operand.vmem [shape: f32[1,128], index: 2, kind: input, shape index: {}]   ;;  %s3833_s3 = inlined_call_operand.vmem [shape: bf16[512,128], index: 3, kind: output, shape index: {}]  }
   0x1 LB: > { %s2421_s13 = sadd.s32 4294967295, %s3312_s12   ;;  %p2425_p0 = scmp.ge.s32.totalorder %s3312_s12, 1  ;;  %s3312_s12 = sphi %s3334_s12, %s13_s12  }
   0x2   : > { %p139_p1 = scmp.lt.s32.totalorder %s3312_s12, 3 }
   0x4   : > { %p140_p2 = pnand %p2425_p0, %p139_p1 }
   0x5   : > { %v3242_v0 = vld [vmem:[%s3831_s1 + $0x40] sm:$0xff] (!%p140_p2)   ;;  %v3246_v4 = vld [vmem:[%s3831_s1 + $0x48] sm:$0xff] (!%p140_p2)   ;;  %v3250_v8 = vld [vmem:[%s3831_s1 + $0x50] sm:$0xff] (!%p140_p2)   ;;  %s2426_s21 = sshll.u32 (!%p140_p2), %s2421_s13, 5 }
   0x6   : > { %143 = sbr.rel (%p140_p2) target bundleno = 514 (0x202), region = 32  ;;  %v3243_v1 = vld [vmem:[%s3831_s1 + $0xc0] sm:$0xff] (!%p140_p2)   ;;  %2786 = vmatprep.subr.bf16.mxu0 (!%p140_p2), %v3242_v0  ;;  %v3247_v5 = vld [vmem:[%s3831_s1 + $0xc8] sm:$0xff] (!%p140_p2)   ;;  %v3251_v9 = vld [vmem:[%s3831_s1 + $0xd0] sm:$0xff] (!%p140_p2)   ;;  %p165_p3 = scmp.lt.s32.totalorder (!%p140_p2), %s2426_s21, 63 }
   0x7   : > { %v3244_v2 = vld [vmem:[%s3831_s1] sm:$0xff] (!%p140_p2)   ;;  %2898 = vmatprep.subr.bf16.mxu1 (!%p140_p2), %v3243_v1  ;;  %v3248_v6 = vld [vmem:[%s3831_s1 + $0x8] sm:$0xff] (!%p140_p2)   ;;  %v3252_v10 = vld [vmem:[%s3831_s1 + $0x10] sm:$0xff] (!%p140_p2)  }
   0x8   : > { %v3245_v3 = vld [vmem:[%s3831_s1 + $0x80] sm:$0xff] (!%p140_p2)   ;;  %2787 = vmatpush3.bf16.msra.mxu0 (!%p140_p2), %v3244_v2  ;;  %v3249_v7 = vld [vmem:[%s3831_s1 + $0x88] sm:$0xff] (!%p140_p2)   ;;  %v3253_v11 = vld [vmem:[%s3831_s1 + $0x90] sm:$0xff] (!%p140_p2)  }
   0x9   : > { %2899 = vmatpush3.bf16.msra.mxu1 (!%p140_p2), %v3245_v3  ;;  %2788 = vmatprep.subr.bf16.mxu0 (!%p140_p2), %v3246_v4  ;;  %v3254_v12 = vld [vmem:[%s3831_s1 + $0x58] sm:$0xff] (!%p140_p2)   ;;  %v3258_v16 = vld [vmem:[%s3831_s1 + $0x60] sm:$0xff] (!%p140_p2)   ;;  %v3262_v20 = vld [vmem:[%s3831_s1 + $0x68] sm:$0xff] (!%p140_p2)  }
   0xa   : > { %2900 = vmatprep.subr.bf16.mxu1 (!%p140_p2), %v3247_v5  ;;  %v3255_v13 = vld [vmem:[%s3831_s1 + $0xd8] sm:$0xff] (!%p140_p2)   ;;  %v3259_v17 = vld [vmem:[%s3831_s1 + $0xe0] sm:$0xff] (!%p140_p2)   ;;  %v3263_v21 = vld [vmem:[%s3831_s1 + $0xe8] sm:$0xff] (!%p140_p2)  }
   0xb   : > { %v3256_v14 = vld [vmem:[%s3831_s1 + $0x18] sm:$0xff] (!%p140_p2)   ;;  %v3260_v18 = vld [vmem:[%s3831_s1 + $0x20] sm:$0xff] (!%p140_p2)   ;;  %v3264_v22 = vld [vmem:[%s3831_s1 + $0x28] sm:$0xff] (!%p140_p2)  }
   0xc   : > { %2789 = vmatpush3.bf16.msra.mxu0 (!%p140_p2), %v3248_v6  ;;  %v3257_v15 = vld [vmem:[%s3831_s1 + $0x98] sm:$0xff] (!%p140_p2)   ;;  %v3261_v19 = vld [vmem:[%s3831_s1 + $0xa0] sm:$0xff] (!%p140_p2)   ;;  %v3265_v23 = vld [vmem:[%s3831_s1 + $0xa8] sm:$0xff] (!%p140_p2)  }
   0xd   : > { %2901 = vmatpush3.bf16.msra.mxu1 %v3249_v7  ;;  %2790 = vmatprep.subr.bf16.mxu0 %v3250_v8  ;;  %s3835_s21 = smov (!%p165_p3, %s2426_s21), 63  ;;  %v3266_v24 = vld [vmem:[%s3831_s1 + $0x70] sm:$0xff]   ;;  %v3270_v28 = vld [vmem:[%s3831_s1 + $0x78] sm:$0xff]   ;;  %v3274_v40 = vld [vmem:[%s3831_s1 + $0x140] sm:$0xff]  }
   0xe   : > { %2902 = vmatprep.subr.bf16.mxu1 %v3251_v9  ;;  %v3267_v25 = vld [vmem:[%s3831_s1 + $0xf0] sm:$0xff]   ;;  %s2658_s18 = sshll.u32 %s3835_s21, 5  ;;  %v3271_v29 = vld [vmem:[%s3831_s1 + $0xf8] sm:$0xff]   ;;  %v3275_v41 = vld [vmem:[%s3831_s1 + $0x100] sm:$0xff]  }
   0xf   : > { %v3268_v26 = vld [vmem:[%s3831_s1 + $0x30] sm:$0xff]   ;;  %s3440_s28 = scalar_lea.vmem %s3830_s0, %s2658_s18  ;;  %v3272_v30 = vld [vmem:[%s3831_s1 + $0x38] sm:$0xff]   ;;  %v3276_v42 = vld [vmem:[%s3831_s1 + $0x1c0] sm:$0xff]  }
  0x10   : > { %2791 = vmatpush3.bf16.msra.mxu0 %v3252_v10  ;;  %v3269_v27 = vld [vmem:[%s3831_s1 + $0xb0] sm:$0xff]   ;;  %v3273_v31 = vld [vmem:[%s3831_s1 + $0xb8] sm:$0xff]   ;;  %v178_v32 = vld [vmem:[%s3440_s28] sm:$0xff] }
  0x11   : > { %2903 = vmatpush3.bf16.msra.mxu1 %v3253_v11  ;;  %2792 = vmatprep.subr.bf16.mxu0 %v3254_v12  ;;  %v182_v33 = vld [vmem:[%s3440_s28 + $0x20] sm:$0xff]  ;;  %v179_v34 = vld [vmem:[%s3440_s28 + $0x8] sm:$0xff]  ;;  %v3282_v2 = vld [vmem:[%s3831_s1 + $0x150] sm:$0xff]  }
  0x12   : > { %2904 = vmatprep.subr.bf16.mxu1 %v3255_v13  ;;  %v2432_v35 = vcombine.low %v178_v32, %v182_v33  ;;  %v2433_v36 = vcombine.high %v178_v32, %v182_v33  ;;  %v183_v37 = vld [vmem:[%s3440_s28 + $0x28] sm:$0xff]  ;;  %v3277_v43 = vld [vmem:[%s3831_s1 + $0x180] sm:$0xff]   ;;  %v3283_v4 = vld [vmem:[%s3831_s1 + $0x110] sm:$0xff]  }
  0x13   : > { %v2434_v38 = vcombine.low %v179_v34, %v183_v37  ;;  %v2435_v39 = vcombine.high %v179_v34, %v183_v37  ;;  %v186_v44 = vld [vmem:[%s3440_s28 + $0x40] sm:$0xff]  ;;  %v187_v47 = vld [vmem:[%s3440_s28 + $0x48] sm:$0xff]  ;;  %v3284_v7 = vld [vmem:[%s3831_s1 + $0x1d0] sm:$0xff]  }
  0x14   : > { %2793 = vmatpush3.bf16.msra.mxu0 %v3256_v14  ;;  %1497 = vmatprep.mubr.bf16.mxu0 %v2433_v36  ;;  %v190_v45 = vld [vmem:[%s3440_s28 + $0x60] sm:$0xff]  ;;  %v191_v48 = vld [vmem:[%s3440_s28 + $0x68] sm:$0xff]  ;;  %v3285_v9 = vld [vmem:[%s3831_s1 + $0x190] sm:$0xff]  }
  0x15   : > { %2905 = vmatpush3.bf16.msra.mxu1 %v3257_v15  ;;  %2794 = vmatprep.subr.bf16.mxu0 %v3258_v16  ;;  %v2441_v46 = vcombine.high %v186_v44, %v190_v45  ;;  %v194_v49 = vld [vmem:[%s3440_s28 + $0x80] sm:$0xff]  ;;  %v2443_v50 = vcombine.high %v187_v47, %v191_v48  ;;  %v195_v52 = vld [vmem:[%s3440_s28 + $0x88] sm:$0xff]  ;;  %v2440_v54 = vcombine.low %v186_v44, %v190_v45  ;;  %v3286_v14 = vld [vmem:[%s3831_s1 + $0x158] sm:$0xff]  }
  0x16   : > { %2906 = vmatprep.subr.bf16.mxu1 %v3259_v17  ;;  %1658 = vmatprep.mubr.bf16.mxu1 %v2435_v39  ;;  %v198_v51 = vld [vmem:[%s3440_s28 + $0xa0] sm:$0xff]  ;;  %v199_v53 = vld [vmem:[%s3440_s28 + $0xa8] sm:$0xff]  ;;  %v2442_v56 = vcombine.low %v187_v47, %v191_v48  ;;  %v3287_v15 = vld [vmem:[%s3831_s1 + $0x118] sm:$0xff]  }
  0x17   : > { %v3278_v55 = vld [vmem:[%s3831_s1 + $0x148] sm:$0xff]   ;;  %v2449_v57 = vcombine.high %v194_v49, %v198_v51  ;;  %v2451_v59 = vcombine.high %v195_v52, %v199_v53  ;;  %v202_v62 = vld [vmem:[%s3440_s28 + $0xc0] sm:$0xff]  ;;  %v2448_v3 = vcombine.low %v194_v49, %v198_v51  ;;  %v2450_v5 = vcombine.low %v195_v52, %v199_v53  ;;  %v3288_v17 = vld [vmem:[%s3831_s1 + $0x1d8] sm:$0xff]  }
  0x18   : > { %2795 = vmatpush3.bf16.msra.mxu0 %v3260_v18  ;;  %v3279_v58 = vld [vmem:[%s3831_s1 + $0x108] sm:$0xff]   ;;  %v206_v63 = vld [vmem:[%s3440_s28 + $0xe0] sm:$0xff]  ;;  %v3299_v47 = vld [vmem:[%s3831_s1 + $0x130] sm:$0xff]  }
  0x19   : > { %2907 = vmatpush3.bf16.msra.mxu1 %v3261_v19  ;;  %2796 = vmatprep.subr.bf16.mxu0 %v3262_v20  ;;  %v3280_v60 = vld [vmem:[%s3831_s1 + $0x1c8] sm:$0xff]   ;;  %v2457_v6 = vcombine.high %v202_v62, %v206_v63  ;;  %v210_v10 = vld [vmem:[%s3440_s28 + $0x100] sm:$0xff]  ;;  %v2456_v16 = vcombine.low %v202_v62, %v206_v63  ;;  %v3289_v20 = vld [vmem:[%s3831_s1 + $0x198] sm:$0xff]  }
  0x1a   : > { %2908 = vmatprep.subr.bf16.mxu1 %v3263_v21  ;;  %v3281_v61 = vld [vmem:[%s3831_s1 + $0x188] sm:$0xff]   ;;  %v214_v11 = vld [vmem:[%s3440_s28 + $0x120] sm:$0xff]  ;;  %v3300_v48 = vld [vmem:[%s3831_s1 + $0x1f0] sm:$0xff]  }
  0x1b   : > { %v203_v0 = vld [vmem:[%s3440_s28 + $0xc8] sm:$0xff]  ;;  %v2465_v19 = vcombine.high %v210_v10, %v214_v11  ;;  %v3301_v49 = vld [vmem:[%s3831_s1 + $0x1b0] sm:$0xff]   ;;  %v238_v51 = vld [vmem:[%s3440_s28 + $0x1e0] sm:$0xff] }
  0x1c   : > { %2797 = vmatpush3.bf16.msra.mxu0 %v3264_v22  ;;  %v207_v1 = vld [vmem:[%s3440_s28 + $0xe8] sm:$0xff]  ;;  %v218_v22 = vld [vmem:[%s3440_s28 + $0x140] sm:$0xff] }
  0x1d   : > { %2909 = vmatpush3.bf16.msra.mxu1 %v3265_v23  ;;  %2798 = vmatprep.subr.bf16.mxu0 %v3266_v24  ;;  %v2459_v8 = vcombine.high %v203_v0, %v207_v1  ;;  %v211_v12 = vld [vmem:[%s3440_s28 + $0x108] sm:$0xff]  ;;  %v2458_v18 = vcombine.low %v203_v0, %v207_v1  ;;  %v222_v23 = vld [vmem:[%s3440_s28 + $0x160] sm:$0xff] }
  0x1e   : > { %2910 = vmatprep.subr.bf16.mxu1 %v3267_v25  ;;  %v215_v13 = vld [vmem:[%s3440_s28 + $0x128] sm:$0xff]  ;;  %v3290_v24 = vld [vmem:[%s3831_s1 + $0x160] sm:$0xff]   ;;  %v2473_v32 = vcombine.high %v218_v22, %v222_v23 }
  0x1f   : > { %v2467_v21 = vcombine.high %v211_v12, %v215_v13  ;;  %v219_v25 = vld [vmem:[%s3440_s28 + $0x148] sm:$0xff]  ;;  %v242_v62 = vld [vmem:[%s3440_s28 + $0x200] sm:$0xff] }
  0x20   : > { %2799 = vmatpush3.bf16.msra.mxu0 %v3268_v26  ;;  %v223_v26 = vld [vmem:[%s3440_s28 + $0x168] sm:$0xff]  ;;  %v246_v63 = vld [vmem:[%s3440_s28 + $0x220] sm:$0xff] }
  0x21   : > { %2911 = vmatpush3.bf16.msra.mxu1 %v3269_v27  ;;  %2800 = vmatprep.subr.bf16.mxu0 %v3270_v28  ;;  %v3291_v27 = vld [vmem:[%s3831_s1 + $0x120] sm:$0xff]   ;;  %v2475_v33 = vcombine.high %v219_v25, %v223_v26  ;;  %v3294_v34 = vld [vmem:[%s3831_s1 + $0x168] sm:$0xff]  }
  0x22   : > { %2912 = vmatprep.subr.bf16.mxu1 %v3271_v29  ;;  %v3292_v28 = vld [vmem:[%s3831_s1 + $0x1e0] sm:$0xff]   ;;  %v3295_v36 = vld [vmem:[%s3831_s1 + $0x128] sm:$0xff]  }
  0x23   : > { %v3293_v29 = vld [vmem:[%s3831_s1 + $0x1a0] sm:$0xff]   ;;  %v3296_v37 = vld [vmem:[%s3831_s1 + $0x1e8] sm:$0xff]  }
  0x24   : > { %2801 = vmatpush3.bf16.msra.mxu0 %v3272_v30  ;;  %v2464_v30 = vcombine.low %v210_v10, %v214_v11  ;;  %v3297_v39 = vld [vmem:[%s3831_s1 + $0x1a8] sm:$0xff]   ;;  %v2496_v10 = vcombine.low %v242_v62, %v246_v63 }
  0x25   : > { %2913 = vmatpush3.bf16.msra.mxu1 %v3273_v31  ;;  %3010 = vmatprep.subr.bf16.mxu0 %v3274_v40  ;;  %v2466_v31 = vcombine.low %v211_v12, %v215_v13  ;;  %v227_v40 = vld [vmem:[%s3440_s28 + $0x188] sm:$0xff] }
  0x26   : > { %3122 = vmatprep.subr.bf16.mxu1 %v3276_v42  ;;  %v2472_v42 = vcombine.low %v218_v22, %v222_v23  ;;  %v235_v52 = vld [vmem:[%s3440_s28 + $0x1c8] sm:$0xff]  ;;  %v266_v22 = vld [vmem:[%s3440_s28 + $0x2c0] sm:$0xff] }
  0x27   : > { %1498 = vmatmul.mubr.bf16.vlgmr.msra.gmra.mrb[0].mxu0 %v2432_v35  ;;  %v226_v35 = vld [vmem:[%s3440_s28 + $0x180] sm:$0xff]  ;;  %v239_v53 = vld [vmem:[%s3440_s28 + $0x1e8] sm:$0xff] }
  0x28   : > { %1659 = vmatmul.mubr.bf16.vlgmr.msra.gmra.mrb[0].mxu1 %v2434_v38  ;;  %3011 = vmatpush3.bf16.msra.mxu0 %v3275_v41  ;;  %v230_v38 = vld [vmem:[%s3440_s28 + $0x1a0] sm:$0xff]  ;;  %v231_v41 = vld [vmem:[%s3440_s28 + $0x1a8] sm:$0xff] }
  0x29   : > { %3123 = vmatpush3.bf16.msra.mxu1 %v3277_v43  ;;  %1505 = vmatprep.mubr.bf16.mxu0 %v2441_v46  ;;  %v2474_v43 = vcombine.low %v219_v25, %v223_v26  ;;  %v2481_v44 = vcombine.high %v226_v35, %v230_v38  ;;  %v2483_v45 = vcombine.high %v227_v40, %v231_v41  ;;  %v3298_v46 = vld [vmem:[%s3831_s1 + $0x170] sm:$0xff]   ;;  %v243_v0 = vld [vmem:[%s3440_s28 + $0x208] sm:$0xff]  ;;  %v270_v23 = vld [vmem:[%s3440_s28 + $0x2e0] sm:$0xff] }
  0x2a   : > { %1666 = vmatprep.mubr.bf16.mxu1 %v2443_v50  ;;  %3012 = vmatprep.subr.bf16.mxu0 %v3278_v55  ;;  %v234_v50 = vld [vmem:[%s3440_s28 + $0x1c0] sm:$0xff]  ;;  %v3302_v55 = vld [vmem:[%s3831_s1 + $0x178] sm:$0xff]   ;;  %v247_v1 = vld [vmem:[%s3440_s28 + $0x228] sm:$0xff] }
  0x2b   : > { %3124 = vmatprep.subr.bf16.mxu1 %v3280_v60  ;;  %v3304_v60 = vld [vmem:[%s3831_s1 + $0x1f8] sm:$0xff]   ;;  %v2498_v11 = vcombine.low %v243_v0, %v247_v1  ;;  %v271_v25 = vld [vmem:[%s3440_s28 + $0x2e8] sm:$0xff] }
  0x2c   : > { %3013 = vmatpush3.bf16.msra.mxu0 %v3279_v58  ;;  %v3303_v58 = vld [vmem:[%s3831_s1 + $0x138] sm:$0xff]  }
  0x2d   : > { %3125 = vmatpush3.bf16.msra.mxu1 %v3281_v61  ;;  %3014 = vmatprep.subr.bf16.mxu0 %v3282_v2  ;;  %v3305_v61 = vld [vmem:[%s3831_s1 + $0x1b8] sm:$0xff]   ;;  %v2488_v2 = vcombine.low %v234_v50, %v238_v51 }
  0x2e   : > { %3126 = vmatprep.subr.bf16.mxu1 %v3284_v7  ;;  %v254_v7 = vld [vmem:[%s3440_s28 + $0x260] sm:$0xff] }
  0x2f   : > { %1506 = vmatmul.mubr.bf16.gmra.mrb[4].mxu0 %v2440_v54  ;;  %v2480_v54 = vcombine.low %v226_v35, %v230_v38  ;;  %v282_v38 = vld [vmem:[%s3440_s28 + $0x340] sm:$0xff] }
  0x30   : > { %1667 = vmatmul.mubr.bf16.gmra.mrb[4].mxu1 %v2442_v56  ;;  %1513 = vmatprep.mubr.bf16.mxu0 %v2449_v57  ;;  %v2482_v56 = vcombine.low %v227_v40, %v231_v41  ;;  %v2489_v57 = vcombine.high %v234_v50, %v238_v51  ;;  %v283_v40 = vld [vmem:[%s3440_s28 + $0x348] sm:$0xff] }
  0x31   : > { %1674 = vmatprep.mubr.bf16.mxu1 %v2451_v59  ;;  %3015 = vmatpush3.bf16.msra.mxu0 %v3283_v4  ;;  %v2491_v59 = vcombine.high %v235_v52, %v239_v53  ;;  %v2497_v4 = vcombine.high %v242_v62, %v246_v63  ;;  %v287_v41 = vld [vmem:[%s3440_s28 + $0x368] sm:$0xff]  ;;  %v180_v62 = vld [vmem:[%s3440_s28 + $0x10] sm:$0xff] }
  0x32   : > { %3127 = vmatpush3.bf16.msra.mxu1 %v3285_v9  ;;  %3016 = vmatprep.subr.bf16.mxu0 %v3286_v14  ;;  %v255_v9 = vld [vmem:[%s3440_s28 + $0x268] sm:$0xff]  ;;  %v258_v14 = vld [vmem:[%s3440_s28 + $0x280] sm:$0xff]  ;;  %v2538_v51 = vcombine.low %v283_v40, %v287_v41  ;;  %v184_v63 = vld [vmem:[%s3440_s28 + $0x30] sm:$0xff] }
  0x33   : > { %3128 = vmatprep.subr.bf16.mxu1 %v3288_v17  ;;  %v263_v17 = vld [vmem:[%s3440_s28 + $0x2a8] sm:$0xff] }
  0x35   : > { %3017 = vmatpush3.bf16.msra.mxu0 %v3287_v15  ;;  %v262_v15 = vld [vmem:[%s3440_s28 + $0x2a0] sm:$0xff] }
  0x36   : > { %3129 = vmatpush3.bf16.msra.mxu1 %v3289_v20  ;;  %3018 = vmatprep.subr.bf16.mxu0 %v3290_v24  ;;  %v2513_v20 = vcombine.high %v258_v14, %v262_v15  ;;  %v267_v24 = vld [vmem:[%s3440_s28 + $0x2c8] sm:$0xff]  ;;  %v2512_v26 = vcombine.low %v258_v14, %v262_v15  ;;  %v196_v14 = vld [vmem:[%s3440_s28 + $0x90] sm:$0xff] }
  0x37   : > { %1514 = vmatmul.mubr.bf16.gmra.mrb[8].mxu0 %v2448_v3  ;;  %3130 = vmatprep.subr.bf16.mxu1 %v3292_v28  ;;  %v2490_v3 = vcombine.low %v235_v52, %v239_v53  ;;  %v2521_v28 = vcombine.high %v266_v22, %v270_v23  ;;  %v2522_v35 = vcombine.low %v267_v24, %v271_v25  ;;  %v200_v15 = vld [vmem:[%s3440_s28 + $0xb0] sm:$0xff] }
  0x38   : > { %1675 = vmatmul.mubr.bf16.gmra.mrb[8].mxu1 %v2450_v5  ;;  %1521 = vmatprep.mubr.bf16.mxu0 %v2457_v6  ;;  %v2499_v5 = vcombine.high %v243_v0, %v247_v1  ;;  %v250_v6 = vld [vmem:[%s3440_s28 + $0x240] sm:$0xff]  ;;  %v181_v0 = vld [vmem:[%s3440_s28 + $0x18] sm:$0xff] }
  0x39   : > { %1682 = vmatprep.mubr.bf16.mxu1 %v2459_v8  ;;  %3019 = vmatpush3.bf16.msra.mxu0 %v3291_v27  ;;  %v251_v8 = vld [vmem:[%s3440_s28 + $0x248] sm:$0xff]  ;;  %v2505_v12 = vcombine.high %v250_v6, %v254_v7  ;;  %v185_v1 = vld [vmem:[%s3440_s28 + $0x38] sm:$0xff] }
  0x3a   : > { %3131 = vmatpush3.bf16.msra.mxu1 %v3293_v29  ;;  %3020 = vmatprep.subr.bf16.mxu0 %v3294_v34  ;;  %v2507_v13 = vcombine.high %v251_v8, %v255_v9  ;;  %v2523_v29 = vcombine.high %v267_v24, %v271_v25  ;;  %v2520_v34 = vcombine.low %v266_v22, %v270_v23  ;;  %v204_v22 = vld [vmem:[%s3440_s28 + $0xd0] sm:$0xff]  ;;  %v205_v24 = vld [vmem:[%s3440_s28 + $0xd8] sm:$0xff] }
  0x3b   : > { %3132 = vmatprep.subr.bf16.mxu1 %v3296_v37  ;;  %v208_v23 = vld [vmem:[%s3440_s28 + $0xf0] sm:$0xff]  ;;  %v209_v25 = vld [vmem:[%s3440_s28 + $0xf8] sm:$0xff] }
  0x3d   : > { %3021 = vmatpush3.bf16.msra.mxu0 %v3295_v36 }
  0x3e   : > { %3133 = vmatpush3.bf16.msra.mxu1 %v3297_v39  ;;  %3022 = vmatprep.subr.bf16.mxu0 %v3298_v46  ;;  %v286_v39 = vld [vmem:[%s3440_s28 + $0x360] sm:$0xff] }
  0x3f   : > { %1522 = vmatmul.mubr.bf16.gmra.mrb[12].mxu0 %v2456_v16  ;;  %3134 = vmatprep.subr.bf16.mxu1 %v3300_v48  ;;  %v259_v16 = vld [vmem:[%s3440_s28 + $0x288] sm:$0xff]  ;;  %v290_v46 = vld [vmem:[%s3440_s28 + $0x380] sm:$0xff]  ;;  %v2536_v50 = vcombine.low %v282_v38, %v286_v39 }
  0x40   : > { %1683 = vmatmul.mubr.bf16.gmra.mrb[12].mxu1 %v2458_v18  ;;  %1529 = vmatprep.mubr.bf16.mxu0 %v2465_v19  ;;  %v2504_v18 = vcombine.low %v250_v6, %v254_v7  ;;  %v2506_v19 = vcombine.low %v251_v8, %v255_v9  ;;  %v2514_v27 = vcombine.low %v259_v16, %v263_v17  ;;  %v291_v48 = vld [vmem:[%s3440_s28 + $0x388] sm:$0xff]  ;;  %v188_v6 = vld [vmem:[%s3440_s28 + $0x50] sm:$0xff]  ;;  %v189_v8 = vld [vmem:[%s3440_s28 + $0x58] sm:$0xff] }
  0x41   : > { %1690 = vmatprep.mubr.bf16.mxu1 %v2467_v21  ;;  %3023 = vmatpush3.bf16.msra.mxu0 %v3299_v47  ;;  %v2515_v21 = vcombine.high %v259_v16, %v263_v17  ;;  %v294_v47 = vld [vmem:[%s3440_s28 + $0x3a0] sm:$0xff]  ;;  %v192_v7 = vld [vmem:[%s3440_s28 + $0x70] sm:$0xff]  ;;  %v193_v9 = vld [vmem:[%s3440_s28 + $0x78] sm:$0xff] }
  0x42   : > { %3135 = vmatpush3.bf16.msra.mxu1 %v3301_v49  ;;  %3024 = vmatprep.subr.bf16.mxu0 %v3302_v55  ;;  %v295_v49 = vld [vmem:[%s3440_s28 + $0x3a8] sm:$0xff]  ;;  %v2545_v52 = vcombine.high %v290_v46, %v294_v47  ;;  %v302_v55 = vld [vmem:[%s3440_s28 + $0x3e0] sm:$0xff]  ;;  %v197_v16 = vld [vmem:[%s3440_s28 + $0x98] sm:$0xff] }
  0x43   : > { %3136 = vmatprep.subr.bf16.mxu1 %v3304_v60  ;;  %v2547_v53 = vcombine.high %v291_v48, %v295_v49  ;;  %v201_v17 = vld [vmem:[%s3440_s28 + $0xb8] sm:$0xff] }
  0x45   : > { %3025 = vmatpush3.bf16.msra.mxu0 %v3303_v58  ;;  %v2544_v58 = vcombine.low %v290_v46, %v294_v47  ;;  %v228_v46 = vld [vmem:[%s3440_s28 + $0x190] sm:$0xff] }
  0x46   : > { %3137 = vmatpush3.bf16.msra.mxu1 %v3305_v61  ;;  %v232_v47 = vld [vmem:[%s3440_s28 + $0x1b0] sm:$0xff] }
  0x47   : > { %1530 = vmatmul.mubr.bf16.gmra.mrb[16].mxu0 %v2464_v30  ;;  %v274_v30 = vld [vmem:[%s3440_s28 + $0x300] sm:$0xff] }
  0x48   : > { %1691 = vmatmul.mubr.bf16.gmra.mrb[16].mxu1 %v2466_v31  ;;  %1537 = vmatprep.mubr.bf16.mxu0 %v2473_v32  ;;  %v278_v31 = vld [vmem:[%s3440_s28 + $0x320] sm:$0xff]  ;;  %v275_v32 = vld [vmem:[%s3440_s28 + $0x308] sm:$0xff] }
  0x49   : > { %1698 = vmatprep.mubr.bf16.mxu1 %v2475_v33  ;;  %v279_v33 = vld [vmem:[%s3440_s28 + $0x328] sm:$0xff]  ;;  %v2529_v36 = vcombine.high %v274_v30, %v278_v31 }
  0x4a   : > { %v2531_v37 = vcombine.high %v275_v32, %v279_v33 }
  0x4f   : > { %1538 = vmatmul.mubr.bf16.gmra.mrb[20].mxu0 %v2472_v42  ;;  %v2528_v42 = vcombine.low %v274_v30, %v278_v31  ;;  %v212_v30 = vld [vmem:[%s3440_s28 + $0x110] sm:$0xff] }
  0x50   : > { %1699 = vmatmul.mubr.bf16.gmra.mrb[20].mxu1 %v2474_v43  ;;  %1545 = vmatprep.mubr.bf16.mxu0 %v2481_v44  ;;  %v2530_v43 = vcombine.low %v275_v32, %v279_v33  ;;  %v2537_v44 = vcombine.high %v282_v38, %v286_v39  ;;  %v216_v31 = vld [vmem:[%s3440_s28 + $0x130] sm:$0xff]  ;;  %v213_v32 = vld [vmem:[%s3440_s28 + $0x118] sm:$0xff] }
  0x51   : > { %1706 = vmatprep.mubr.bf16.mxu1 %v2483_v45  ;;  %v2539_v45 = vcombine.high %v283_v40, %v287_v41  ;;  %v217_v33 = vld [vmem:[%s3440_s28 + $0x138] sm:$0xff]  ;;  %v220_v38 = vld [vmem:[%s3440_s28 + $0x150] sm:$0xff] }
  0x52   : > { %v224_v39 = vld [vmem:[%s3440_s28 + $0x170] sm:$0xff]  ;;  %v221_v40 = vld [vmem:[%s3440_s28 + $0x158] sm:$0xff] }
  0x53   : > { %v225_v41 = vld [vmem:[%s3440_s28 + $0x178] sm:$0xff] }
  0x57   : > { %1546 = vmatmul.mubr.bf16.gmra.mrb[24].mxu0 %v2480_v54  ;;  %v298_v54 = vld [vmem:[%s3440_s28 + $0x3c0] sm:$0xff] }
  0x58   : > { %1707 = vmatmul.mubr.bf16.gmra.mrb[24].mxu1 %v2482_v56  ;;  %1553 = vmatprep.mubr.bf16.mxu0 %v2489_v57  ;;  %v299_v56 = vld [vmem:[%s3440_s28 + $0x3c8] sm:$0xff]  ;;  %v2553_v60 = vcombine.high %v298_v54, %v302_v55 }
  0x59   : > { %1714 = vmatprep.mubr.bf16.mxu1 %v2491_v59  ;;  %v303_v57 = vld [vmem:[%s3440_s28 + $0x3e8] sm:$0xff]  ;;  %v2546_v59 = vcombine.low %v291_v48, %v295_v49  ;;  %v229_v48 = vld [vmem:[%s3440_s28 + $0x198] sm:$0xff] }
  0x5a   : > { %v2555_v61 = vcombine.high %v299_v56, %v303_v57  ;;  %v233_v49 = vld [vmem:[%s3440_s28 + $0x1b8] sm:$0xff] }
  0x5f   : > { %1554 = vmatmul.mubr.bf16.gmra.mrb[28].mxu0 %v2488_v2  ;;  %v2552_v2 = vcombine.low %v298_v54, %v302_v55  ;;  %v236_v54 = vld [vmem:[%s3440_s28 + $0x1d0] sm:$0xff] }
  0x60   : > { %1715 = vmatmul.mubr.bf16.gmra.mrb[28].mxu1 %v2490_v3  ;;  %1561 = vmatprep.mubr.bf16.mxu0 %v2497_v4  ;;  %v2554_v3 = vcombine.low %v299_v56, %v303_v57  ;;  %v2437_v4 = vcombine.high %v180_v62, %v184_v63  ;;  %v240_v55 = vld [vmem:[%s3440_s28 + $0x1f0] sm:$0xff]  ;;  %v237_v56 = vld [vmem:[%s3440_s28 + $0x1d8] sm:$0xff] }
  0x61   : > { %1722 = vmatprep.mubr.bf16.mxu1 %v2499_v5  ;;  %v2439_v5 = vcombine.high %v181_v0, %v185_v1  ;;  %v241_v57 = vld [vmem:[%s3440_s28 + $0x1f8] sm:$0xff] }
  0x67   : > { %1562 = vmatmul.mubr.bf16.gmra.mrb[32].mxu0 %v2496_v10  ;;  %v2436_v10 = vcombine.low %v180_v62, %v184_v63  ;;  %v244_v62 = vld [vmem:[%s3440_s28 + $0x210] sm:$0xff] }
  0x68   : > { %1723 = vmatmul.mubr.bf16.gmra.mrb[32].mxu1 %v2498_v11  ;;  %1569 = vmatprep.mubr.bf16.mxu0 %v2505_v12  ;;  %v2438_v11 = vcombine.low %v181_v0, %v185_v1  ;;  %v2445_v12 = vcombine.high %v188_v6, %v192_v7  ;;  %v248_v63 = vld [vmem:[%s3440_s28 + $0x230] sm:$0xff]  ;;  %v245_v0 = vld [vmem:[%s3440_s28 + $0x218] sm:$0xff] }
  0x69   : > { %1730 = vmatprep.mubr.bf16.mxu1 %v2507_v13  ;;  %v2447_v13 = vcombine.high %v189_v8, %v193_v9  ;;  %v249_v1 = vld [vmem:[%s3440_s28 + $0x238] sm:$0xff] }
  0x6f   : > { %1570 = vmatmul.mubr.bf16.gmra.mrb[36].mxu0 %v2504_v18  ;;  %v2444_v18 = vcombine.low %v188_v6, %v192_v7  ;;  %v252_v6 = vld [vmem:[%s3440_s28 + $0x250] sm:$0xff] }
  0x70   : > { %1731 = vmatmul.mubr.bf16.gmra.mrb[36].mxu1 %v2506_v19  ;;  %1577 = vmatprep.mubr.bf16.mxu0 %v2513_v20  ;;  %v2446_v19 = vcombine.low %v189_v8, %v193_v9  ;;  %v2453_v20 = vcombine.high %v196_v14, %v200_v15  ;;  %v256_v7 = vld [vmem:[%s3440_s28 + $0x270] sm:$0xff]  ;;  %v253_v8 = vld [vmem:[%s3440_s28 + $0x258] sm:$0xff] }
  0x71   : > { %1738 = vmatprep.mubr.bf16.mxu1 %v2515_v21  ;;  %v2455_v21 = vcombine.high %v197_v16, %v201_v17  ;;  %v257_v9 = vld [vmem:[%s3440_s28 + $0x278] sm:$0xff] }
  0x77   : > { %1578 = vmatmul.mubr.bf16.gmra.mrb[40].mxu0 %v2512_v26  ;;  %v2452_v26 = vcombine.low %v196_v14, %v200_v15  ;;  %v260_v14 = vld [vmem:[%s3440_s28 + $0x290] sm:$0xff] }
  0x78   : > { %1739 = vmatmul.mubr.bf16.gmra.mrb[40].mxu1 %v2514_v27  ;;  %1585 = vmatprep.mubr.bf16.mxu0 %v2521_v28  ;;  %v2454_v27 = vcombine.low %v197_v16, %v201_v17  ;;  %v2461_v28 = vcombine.high %v204_v22, %v208_v23  ;;  %v264_v15 = vld [vmem:[%s3440_s28 + $0x2b0] sm:$0xff]  ;;  %v261_v16 = vld [vmem:[%s3440_s28 + $0x298] sm:$0xff] }
  0x79   : > { %1746 = vmatprep.mubr.bf16.mxu1 %v2523_v29  ;;  %v2463_v29 = vcombine.high %v205_v24, %v209_v25  ;;  %v265_v17 = vld [vmem:[%s3440_s28 + $0x2b8] sm:$0xff] }
  0x7f   : > { %1586 = vmatmul.mubr.bf16.gmra.mrb[44].mxu0 %v2520_v34  ;;  %v2460_v34 = vcombine.low %v204_v22, %v208_v23  ;;  %v268_v22 = vld [vmem:[%s3440_s28 + $0x2d0] sm:$0xff] }
  0x80   : > { %1747 = vmatmul.mubr.bf16.gmra.mrb[44].mxu1 %v2522_v35  ;;  %1593 = vmatprep.mubr.bf16.mxu0 %v2529_v36  ;;  %v2462_v35 = vcombine.low %v205_v24, %v209_v25  ;;  %v2469_v36 = vcombine.high %v212_v30, %v216_v31  ;;  %v272_v23 = vld [vmem:[%s3440_s28 + $0x2f0] sm:$0xff]  ;;  %v269_v24 = vld [vmem:[%s3440_s28 + $0x2d8] sm:$0xff] }
  0x81   : > { %1754 = vmatprep.mubr.bf16.mxu1 %v2531_v37  ;;  %v2471_v37 = vcombine.high %v213_v32, %v217_v33  ;;  %v273_v25 = vld [vmem:[%s3440_s28 + $0x2f8] sm:$0xff] }
  0x87   : > { %1594 = vmatmul.mubr.bf16.gmra.mrb[48].mxu0 %v2528_v42  ;;  %v2468_v42 = vcombine.low %v212_v30, %v216_v31  ;;  %v276_v30 = vld [vmem:[%s3440_s28 + $0x310] sm:$0xff] }
  0x88   : > { %1755 = vmatmul.mubr.bf16.gmra.mrb[48].mxu1 %v2530_v43  ;;  %1601 = vmatprep.mubr.bf16.mxu0 %v2537_v44  ;;  %v2470_v43 = vcombine.low %v213_v32, %v217_v33  ;;  %v2477_v44 = vcombine.high %v220_v38, %v224_v39  ;;  %v280_v31 = vld [vmem:[%s3440_s28 + $0x330] sm:$0xff]  ;;  %v277_v33 = vld [vmem:[%s3440_s28 + $0x318] sm:$0xff] }
  0x89   : > { %1762 = vmatprep.mubr.bf16.mxu1 %v2539_v45  ;;  %v2479_v45 = vcombine.high %v221_v40, %v225_v41 }
  0x8f   : > { %1602 = vmatmul.mubr.bf16.gmra.mrb[52].mxu0 %v2536_v50  ;;  %v2476_v50 = vcombine.low %v220_v38, %v224_v39  ;;  %v2524_v38 = vcombine.low %v268_v22, %v272_v23 }
  0x90   : > { %1763 = vmatmul.mubr.bf16.gmra.mrb[52].mxu1 %v2538_v51  ;;  %1609 = vmatprep.mubr.bf16.mxu0 %v2545_v52  ;;  %v2478_v51 = vcombine.low %v221_v40, %v225_v41  ;;  %v2485_v52 = vcombine.high %v228_v46, %v232_v47 }
  0x91   : > { %1770 = vmatprep.mubr.bf16.mxu1 %v2547_v53  ;;  %v2487_v53 = vcombine.high %v229_v48, %v233_v49 }
  0x97   : > { %1610 = vmatmul.mubr.bf16.gmra.mrb[56].mxu0 %v2544_v58  ;;  %v2484_v58 = vcombine.low %v228_v46, %v232_v47 }
  0x98   : > { %1771 = vmatmul.mubr.bf16.gmra.mrb[56].mxu1 %v2546_v59  ;;  %1617 = vmatprep.mubr.bf16.mxu0 %v2553_v60  ;;  %v2486_v59 = vcombine.low %v229_v48, %v233_v49  ;;  %v2493_v60 = vcombine.high %v236_v54, %v240_v55 }
  0x99   : > { %1778 = vmatprep.mubr.bf16.mxu1 %v2555_v61  ;;  %v2495_v61 = vcombine.high %v237_v56, %v241_v57 }
  0x9f   : > { %1618 = vmatmul.mubr.bf16.gmra.mrb[60].mxu0 %v2552_v2  ;;  %v2492_v2 = vcombine.low %v236_v54, %v240_v55  ;;  %v284_v54 = vld [vmem:[%s3440_s28 + $0x350] sm:$0xff] }
  0xa0   : > { %1779 = vmatmul.mubr.bf16.gmra.mrb[60].mxu1 %v2554_v3  ;;  %1819 = vmatprep.mubr.bf16.mxu0 %v2437_v4  ;;  %v2494_v3 = vcombine.low %v237_v56, %v241_v57  ;;  %v2501_v4 = vcombine.high %v244_v62, %v248_v63  ;;  %v288_v55 = vld [vmem:[%s3440_s28 + $0x370] sm:$0xff] }
  0xa1   : > { %1980 = vmatprep.mubr.bf16.mxu1 %v2439_v5  ;;  %v2503_v5 = vcombine.high %v245_v0, %v249_v1 }
  0xa7   : > { %1820 = vmatmul.mubr.bf16.vlgmr.msra.gmra.mrb[64].mxu0 %v2436_v10  ;;  %v2500_v10 = vcombine.low %v244_v62, %v248_v63  ;;  %v2532_v62 = vcombine.low %v276_v30, %v280_v31 }
  0xa8   : > { %1981 = vmatmul.mubr.bf16.vlgmr.msra.gmra.mrb[64].mxu1 %v2438_v11  ;;  %1827 = vmatprep.mubr.bf16.mxu0 %v2445_v12  ;;  %v2502_v11 = vcombine.low %v245_v0, %v249_v1  ;;  %v2509_v12 = vcombine.high %v252_v6, %v256_v7 }
  0xa9   : > { %1988 = vmatprep.mubr.bf16.mxu1 %v2447_v13  ;;  %v2511_v13 = vcombine.high %v253_v8, %v257_v9 }
  0xaf   : > { %1828 = vmatmul.mubr.bf16.gmra.mrb[68].mxu0 %v2444_v18  ;;  %v2508_v18 = vcombine.low %v252_v6, %v256_v7 }
  0xb0   : > { %1989 = vmatmul.mubr.bf16.gmra.mrb[68].mxu1 %v2446_v19  ;;  %1835 = vmatprep.mubr.bf16.mxu0 %v2453_v20  ;;  %v2510_v19 = vcombine.low %v253_v8, %v257_v9  ;;  %v2517_v20 = vcombine.high %v260_v14, %v264_v15 }
  0xb1   : > { %1996 = vmatprep.mubr.bf16.mxu1 %v2455_v21  ;;  %v2519_v21 = vcombine.high %v261_v16, %v265_v17 }
  0xb7   : > { %1836 = vmatmul.mubr.bf16.gmra.mrb[72].mxu0 %v2452_v26  ;;  %v2516_v26 = vcombine.low %v260_v14, %v264_v15  ;;  %v292_v14 = vld [vmem:[%s3440_s28 + $0x390] sm:$0xff] }
  0xb8   : > { %1997 = vmatmul.mubr.bf16.gmra.mrb[72].mxu1 %v2454_v27  ;;  %1843 = vmatprep.mubr.bf16.mxu0 %v2461_v28  ;;  %v2518_v27 = vcombine.low %v261_v16, %v265_v17  ;;  %v2525_v28 = vcombine.high %v268_v22, %v272_v23  ;;  %v296_v15 = vld [vmem:[%s3440_s28 + $0x3b0] sm:$0xff]  ;;  %v2540_v22 = vcombine.low %v284_v54, %v288_v55 }
  0xb9   : > { %2004 = vmatprep.mubr.bf16.mxu1 %v2463_v29  ;;  %v2527_v29 = vcombine.high %v269_v24, %v273_v25 }
  0xbf   : > { %1844 = vmatmul.mubr.bf16.gmra.mrb[76].mxu0 %v2460_v34  ;;  %v281_v34 = vld [vmem:[%s3440_s28 + $0x338] sm:$0xff] }
  0xc0   : > { %2005 = vmatmul.mubr.bf16.gmra.mrb[76].mxu1 %v2462_v35  ;;  %1851 = vmatprep.mubr.bf16.mxu0 %v2469_v36  ;;  %v3663_v36 = vld [vmem:[%s3832_s2] ss:$0 sm:$0xff]  ;;  %v2535_v47 = vcombine.high %v277_v33, %v281_v34 }
  0xc1   : > { %2012 = vmatprep.mubr.bf16.mxu1 %v2471_v37 }
  0xc7   : > { %1852 = vmatmul.mubr.bf16.gmra.mrb[80].mxu0 %v2468_v42  ;;  %v2526_v42 = vcombine.low %v269_v24, %v273_v25 }
  0xc8   : > { %2013 = vmatmul.mubr.bf16.gmra.mrb[80].mxu1 %v2470_v43  ;;  %1859 = vmatprep.mubr.bf16.mxu0 %v2477_v44  ;;  %v2533_v43 = vcombine.high %v276_v30, %v280_v31 }
  0xc9   : > { %2020 = vmatprep.mubr.bf16.mxu1 %v2479_v45 }
  0xcf   : > { %1860 = vmatmul.mubr.bf16.gmra.mrb[84].mxu0 %v2476_v50 }
  0xd0   : > { %2021 = vmatmul.mubr.bf16.gmra.mrb[84].mxu1 %v2478_v51  ;;  %1867 = vmatprep.mubr.bf16.mxu0 %v2485_v52 }
  0xd1   : > { %2028 = vmatprep.mubr.bf16.mxu1 %v2487_v53 }
  0xd7   : > { %1868 = vmatmul.mubr.bf16.gmra.mrb[88].mxu0 %v2484_v58  ;;  %v285_v58 = vld [vmem:[%s3440_s28 + $0x358] sm:$0xff] }
  0xd8   : > { %2029 = vmatmul.mubr.bf16.gmra.mrb[88].mxu1 %v2486_v59  ;;  %1875 = vmatprep.mubr.bf16.mxu0 %v2493_v60  ;;  %v289_v59 = vld [vmem:[%s3440_s28 + $0x378] sm:$0xff] }
  0xd9   : > { %2036 = vmatprep.mubr.bf16.mxu1 %v2495_v61  ;;  %v2543_v7 = vcombine.high %v285_v58, %v289_v59 }
  0xdf   : > { %1876 = vmatmul.mubr.bf16.gmra.mrb[92].mxu0 %v2492_v2  ;;  %v2534_v2 = vcombine.low %v277_v33, %v281_v34 }
  0xe0   : > { %2037 = vmatmul.mubr.bf16.gmra.mrb[92].mxu1 %v2494_v3  ;;  %1883 = vmatprep.mubr.bf16.mxu0 %v2501_v4  ;;  %v2541_v3 = vcombine.high %v284_v54, %v288_v55 }
  0xe1   : > { %2044 = vmatprep.mubr.bf16.mxu1 %v2503_v5 }
  0xe7   : > { %1884 = vmatmul.mubr.bf16.gmra.mrb[96].mxu0 %v2500_v10 }
  0xe8   : > { %2045 = vmatmul.mubr.bf16.gmra.mrb[96].mxu1 %v2502_v11  ;;  %1891 = vmatprep.mubr.bf16.mxu0 %v2509_v12 }
  0xe9   : > { %2052 = vmatprep.mubr.bf16.mxu1 %v2511_v13 }
  0xef   : > { %1892 = vmatmul.mubr.bf16.gmra.mrb[100].mxu0 %v2508_v18  ;;  %v293_v18 = vld [vmem:[%s3440_s28 + $0x398] sm:$0xff] }
  0xf0   : > { %2053 = vmatmul.mubr.bf16.gmra.mrb[100].mxu1 %v2510_v19  ;;  %1899 = vmatprep.mubr.bf16.mxu0 %v2517_v20  ;;  %v297_v19 = vld [vmem:[%s3440_s28 + $0x3b8] sm:$0xff] }
  0xf1   : > { %2060 = vmatprep.mubr.bf16.mxu1 %v2519_v21  ;;  %v2551_v31 = vcombine.high %v293_v18, %v297_v19 }
  0xf7   : > { %1900 = vmatmul.mubr.bf16.gmra.mrb[104].mxu0 %v2516_v26  ;;  %v2542_v26 = vcombine.low %v285_v58, %v289_v59 }
  0xf8   : > { %2061 = vmatmul.mubr.bf16.gmra.mrb[104].mxu1 %v2518_v27  ;;  %1907 = vmatprep.mubr.bf16.mxu0 %v2525_v28  ;;  %v2549_v27 = vcombine.high %v292_v14, %v296_v15 }
  0xf9   : > { %2068 = vmatprep.mubr.bf16.mxu1 %v2527_v29 }
  0xfa   : > { %v2802_v32 = vpop.f32.mrb[0].mxu0 }
  0xfb   : > { %v2914_v35 = vpop.f32.mrb[0].mxu1  ;;  %v2803_v37 = vpop.f32.mrb[1].mxu0 }
  0xfc   : > { %v2804_v39 = vadd.f32 %v2803_v37, %v2802_v32  ;;  %v2915_v40 = vpop.f32.mrb[1].mxu1  ;;  %v2805_v41 = vpop.f32.mrb[2].mxu0 }
  0xfd   : > { %v2916_v44 = vadd.f32 %v2915_v40, %v2914_v35  ;;  %v2917_v45 = vpop.f32.mrb[2].mxu1  ;;  %v2806_v46 = vpop.f32.mrb[3].mxu0  ;;  %v304_v40 = vld [vmem:[%s3440_s28 + $0x3f0] sm:$0xff] }
  0xfe   : > { %v1500_v48 = vadd.f32 %v2804_v39, %v3663_v36  ;;  %v2807_v49 = vadd.f32 %v2806_v46, %v2805_v41  ;;  %v2918_v50 = vpop.f32.mrb[3].mxu1  ;;  %v300_v39 = vld [vmem:[%s3440_s28 + $0x3d0] sm:$0xff] }
  0xff   : > { %v2919_v51 = vadd.f32 %v2918_v50, %v2917_v45  ;;  %1908 = vmatmul.mubr.bf16.gmra.mrb[108].mxu0 %v2524_v38 }
 0x100   : > { %v3666_v52 = vadd.f32 %v2916_v44, %v1500_v48  ;;  %v1503_v53 = vadd.f32 %v2807_v49, %v3663_v36  ;;  %2069 = vmatmul.mubr.bf16.gmra.mrb[108].mxu1 %v2526_v42  ;;  %1915 = vmatprep.mubr.bf16.mxu0 %v2533_v43  ;;  %v301_v43 = vld [vmem:[%s3440_s28 + $0x3d8] sm:$0xff] }
 0x101   : > { %2076 = vmatprep.mubr.bf16.mxu1 %v2535_v47  ;;  %v305_v44 = vld [vmem:[%s3440_s28 + $0x3f8] sm:$0xff]  ;;  %v2548_v47 = vcombine.low %v292_v14, %v296_v15  ;;  %s2430_s28 = sshll.u32 %s3835_s21, 2 }
 0x102   : > { %v3671_v56 = vadd.f32 %v2919_v51, %v1503_v53  ;;  %v2808_v57 = vpop.f32.mrb[4].mxu0  ;;  %v2550_v51 = vcombine.low %v293_v18, %v297_v19  ;;  %v2557_v53 = vcombine.high %v300_v39, %v304_v40  ;;  %v2559_v58 = vcombine.high %v301_v43, %v305_v44  ;;  %s3779_s29 = scalar_lea.vmem %s3833_s3, %s2430_s28 }
 0x103   : > { %v2920_v60 = vpop.f32.mrb[4].mxu1  ;;  %v2809_v61 = vpop.f32.mrb[5].mxu0 }
 0x104   : > { %v2810_v63 = vadd.f32 %v2809_v61, %v2808_v57  ;;  %v2921_v0 = vpop.f32.mrb[5].mxu1  ;;  %v2811_v1 = vpop.f32.mrb[6].mxu0 }
 0x105   : > { %v2922_v4 = vadd.f32 %v2921_v0, %v2920_v60  ;;  %v2923_v5 = vpop.f32.mrb[6].mxu1  ;;  %v2812_v6 = vpop.f32.mrb[7].mxu0 }
 0x106   : > { %v1508_v8 = vadd.f32 %v2810_v63, %v3663_v36  ;;  %v2813_v9 = vadd.f32 %v2812_v6, %v2811_v1  ;;  %v2924_v10 = vpop.f32.mrb[7].mxu1 }
 0x107   : > { %v2925_v11 = vadd.f32 %v2924_v10, %v2923_v5  ;;  %1916 = vmatmul.mubr.bf16.gmra.mrb[112].mxu0 %v2532_v62  ;;  %v2556_v5 = vcombine.low %v300_v39, %v304_v40 }
 0x108   : > { %v3676_v12 = vadd.f32 %v2922_v4, %v1508_v8  ;;  %v1511_v13 = vadd.f32 %v2813_v9, %v3663_v36  ;;  %2077 = vmatmul.mubr.bf16.gmra.mrb[112].mxu1 %v2534_v2  ;;  %1923 = vmatprep.mubr.bf16.mxu0 %v2541_v3  ;;  %v2558_v9 = vcombine.low %v301_v43, %v305_v44 }
 0x109   : > { %2084 = vmatprep.mubr.bf16.mxu1 %v2543_v7 }
 0x10a   : > { %v3681_v16 = vadd.f32 %v2925_v11, %v1511_v13  ;;  %v2814_v17 = vpop.f32.mrb[8].mxu0 }
 0x10b   : > { %v2926_v20 = vpop.f32.mrb[8].mxu1  ;;  %v2815_v21 = vpop.f32.mrb[9].mxu0 }
 0x10c   : > { %v2816_v23 = vadd.f32 %v2815_v21, %v2814_v17  ;;  %v2927_v24 = vpop.f32.mrb[9].mxu1  ;;  %v2817_v25 = vpop.f32.mrb[10].mxu0 }
 0x10d   : > { %v2928_v28 = vadd.f32 %v2927_v24, %v2926_v20  ;;  %v2929_v29 = vpop.f32.mrb[10].mxu1  ;;  %v2818_v30 = vpop.f32.mrb[11].mxu0 }
 0x10e   : > { %v1516_v32 = vadd.f32 %v2816_v23, %v3663_v36  ;;  %v2819_v33 = vadd.f32 %v2818_v30, %v2817_v25  ;;  %v2930_v34 = vpop.f32.mrb[11].mxu1 }
 0x10f   : > { %v2931_v35 = vadd.f32 %v2930_v34, %v2929_v29  ;;  %1924 = vmatmul.mubr.bf16.gmra.mrb[116].mxu0 %v2540_v22 }
 0x110   : > { %v3686_v37 = vadd.f32 %v2928_v28, %v1516_v32  ;;  %v1519_v38 = vadd.f32 %v2819_v33, %v3663_v36  ;;  %2085 = vmatmul.mubr.bf16.gmra.mrb[116].mxu1 %v2542_v26  ;;  %1931 = vmatprep.mubr.bf16.mxu0 %v2549_v27 }
 0x111   : > { %2092 = vmatprep.mubr.bf16.mxu1 %v2551_v31 }
 0x112   : > { %v3691_v41 = vadd.f32 %v2931_v35, %v1519_v38  ;;  %v2820_v42 = vpop.f32.mrb[12].mxu0 }
 0x113   : > { %v2932_v45 = vpop.f32.mrb[12].mxu1  ;;  %v2821_v46 = vpop.f32.mrb[13].mxu0 }
 0x114   : > { %v2822_v48 = vadd.f32 %v2821_v46, %v2820_v42  ;;  %v2933_v49 = vpop.f32.mrb[13].mxu1  ;;  %v2823_v50 = vpop.f32.mrb[14].mxu0 }
 0x115   : > { %v2934_v54 = vadd.f32 %v2933_v49, %v2932_v45  ;;  %v2935_v55 = vpop.f32.mrb[14].mxu1  ;;  %v2824_v57 = vpop.f32.mrb[15].mxu0 }
 0x116   : > { %v1524_v59 = vadd.f32 %v2822_v48, %v3663_v36  ;;  %v2825_v60 = vadd.f32 %v2824_v57, %v2823_v50  ;;  %v2936_v61 = vpop.f32.mrb[15].mxu1 }
 0x117   : > { %v2937_v62 = vadd.f32 %v2936_v61, %v2935_v55  ;;  %1932 = vmatmul.mubr.bf16.gmra.mrb[120].mxu0 %v2548_v47 }
 0x118   : > { %v3696_v63 = vadd.f32 %v2934_v54, %v1524_v59  ;;  %v1527_v0 = vadd.f32 %v2825_v60, %v3663_v36  ;;  %2093 = vmatmul.mubr.bf16.gmra.mrb[120].mxu1 %v2550_v51  ;;  %1939 = vmatprep.mubr.bf16.mxu0 %v2557_v53 }
 0x119   : > { %2100 = vmatprep.mubr.bf16.mxu1 %v2559_v58 }
 0x11a   : > { %v3699_v1 = vadd.f32 %v2937_v62, %v1527_v0  ;;  %v2826_v2 = vpop.f32.mrb[16].mxu0 }
 0x11b   : > { %v2938_v3 = vpop.f32.mrb[16].mxu1  ;;  %v2827_v4 = vpop.f32.mrb[17].mxu0 }
 0x11c   : > { %v2828_v6 = vadd.f32 %v2827_v4, %v2826_v2  ;;  %v2939_v7 = vpop.f32.mrb[17].mxu1  ;;  %v2829_v8 = vpop.f32.mrb[18].mxu0 }
 0x11d   : > { %v2940_v10 = vadd.f32 %v2939_v7, %v2938_v3  ;;  %v2941_v11 = vpop.f32.mrb[18].mxu1  ;;  %v2830_v13 = vpop.f32.mrb[19].mxu0 }
 0x11e   : > { %v1532_v14 = vadd.f32 %v2828_v6, %v3663_v36  ;;  %v2831_v15 = vadd.f32 %v2830_v13, %v2829_v8  ;;  %v2942_v17 = vpop.f32.mrb[19].mxu1 }
 0x11f   : > { %v2943_v18 = vadd.f32 %v2942_v17, %v2941_v11  ;;  %1940 = vmatmul.mubr.bf16.gmra.mrb[124].mxu0 %v2556_v5 }
 0x120   : > { %v3702_v19 = vadd.f32 %v2940_v10, %v1532_v14  ;;  %v1535_v20 = vadd.f32 %v2831_v15, %v3663_v36  ;;  %2101 = vmatmul.mubr.bf16.gmra.mrb[124].mxu1 %v2558_v9 }
 0x122   : > { %v3705_v21 = vadd.f32 %v2943_v18, %v1535_v20  ;;  %v2832_v22 = vpop.f32.mrb[20].mxu0 }
 0x123   : > { %v2944_v23 = vpop.f32.mrb[20].mxu1  ;;  %v2833_v24 = vpop.f32.mrb[21].mxu0 }
 0x124   : > { %v2834_v25 = vadd.f32 %v2833_v24, %v2832_v22  ;;  %v2945_v26 = vpop.f32.mrb[21].mxu1  ;;  %v2835_v27 = vpop.f32.mrb[22].mxu0 }
 0x125   : > { %v2946_v28 = vadd.f32 %v2945_v26, %v2944_v23  ;;  %v2947_v29 = vpop.f32.mrb[22].mxu1  ;;  %v2836_v30 = vpop.f32.mrb[23].mxu0 }
 0x126   : > { %v1540_v31 = vadd.f32 %v2834_v25, %v3663_v36  ;;  %v2837_v32 = vadd.f32 %v2836_v30, %v2835_v27  ;;  %v2948_v33 = vpop.f32.mrb[23].mxu1 }
 0x127   : > { %v2949_v34 = vadd.f32 %v2948_v33, %v2947_v29 }
 0x128   : > { %v3708_v35 = vadd.f32 %v2946_v28, %v1540_v31  ;;  %v1543_v38 = vadd.f32 %v2837_v32, %v3663_v36 }
 0x12a   : > { %v3711_v39 = vadd.f32 %v2949_v34, %v1543_v38  ;;  %v2838_v40 = vpop.f32.mrb[24].mxu0 }
 0x12b   : > { %v2950_v42 = vpop.f32.mrb[24].mxu1  ;;  %v2839_v43 = vpop.f32.mrb[25].mxu0 }
 0x12c   : > { %v2840_v44 = vadd.f32 %v2839_v43, %v2838_v40  ;;  %v2951_v45 = vpop.f32.mrb[25].mxu1  ;;  %v2841_v46 = vpop.f32.mrb[26].mxu0 }
 0x12d   : > { %v2952_v47 = vadd.f32 %v2951_v45, %v2950_v42  ;;  %v2953_v48 = vpop.f32.mrb[26].mxu1  ;;  %v2842_v49 = vpop.f32.mrb[27].mxu0 }
 0x12e   : > { %v1548_v50 = vadd.f32 %v2840_v44, %v3663_v36  ;;  %v2843_v51 = vadd.f32 %v2842_v49, %v2841_v46  ;;  %v2954_v53 = vpop.f32.mrb[27].mxu1 }
 0x12f   : > { %v2955_v54 = vadd.f32 %v2954_v53, %v2953_v48 }
 0x130   : > { %v3714_v55 = vadd.f32 %v2952_v47, %v1548_v50  ;;  %v1551_v57 = vadd.f32 %v2843_v51, %v3663_v36 }
 0x132   : > { %v3717_v58 = vadd.f32 %v2955_v54, %v1551_v57  ;;  %v2844_v59 = vpop.f32.mrb[28].mxu0 }
 0x133   : > { %v2956_v60 = vpop.f32.mrb[28].mxu1  ;;  %v2845_v61 = vpop.f32.mrb[29].mxu0 }
 0x134   : > { %v2846_v62 = vadd.f32 %v2845_v61, %v2844_v59  ;;  %v2957_v0 = vpop.f32.mrb[29].mxu1  ;;  %v2847_v2 = vpop.f32.mrb[30].mxu0 }
 0x135   : > { %v2958_v3 = vadd.f32 %v2957_v0, %v2956_v60  ;;  %v2959_v4 = vpop.f32.mrb[30].mxu1  ;;  %v2848_v5 = vpop.f32.mrb[31].mxu0 }
 0x136   : > { %v1556_v6 = vadd.f32 %v2846_v62, %v3663_v36  ;;  %v2849_v7 = vadd.f32 %v2848_v5, %v2847_v2  ;;  %v2960_v8 = vpop.f32.mrb[31].mxu1 }
 0x137   : > { %v2961_v9 = vadd.f32 %v2960_v8, %v2959_v4 }
 0x138   : > { %v3720_v10 = vadd.f32 %v2958_v3, %v1556_v6  ;;  %v1559_v11 = vadd.f32 %v2849_v7, %v3663_v36 }
 0x13a   : > { %v3723_v13 = vadd.f32 %v2961_v9, %v1559_v11  ;;  %v2850_v14 = vpop.f32.mrb[32].mxu0 }
 0x13b   : > { %v2962_v15 = vpop.f32.mrb[32].mxu1  ;;  %v2851_v17 = vpop.f32.mrb[33].mxu0 }
 0x13c   : > { %v2852_v18 = vadd.f32 %v2851_v17, %v2850_v14  ;;  %v2963_v20 = vpop.f32.mrb[33].mxu1  ;;  %v2853_v22 = vpop.f32.mrb[34].mxu0 }
 0x13d   : > { %v2964_v23 = vadd.f32 %v2963_v20, %v2962_v15  ;;  %v2965_v24 = vpop.f32.mrb[34].mxu1  ;;  %v2854_v25 = vpop.f32.mrb[35].mxu0 }
 0x13e   : > { %v1564_v26 = vadd.f32 %v2852_v18, %v3663_v36  ;;  %v2855_v27 = vadd.f32 %v2854_v25, %v2853_v22  ;;  %v2966_v28 = vpop.f32.mrb[35].mxu1 }
 0x13f   : > { %v2967_v29 = vadd.f32 %v2966_v28, %v2965_v24 }
 0x140   : > { %v3726_v30 = vadd.f32 %v2964_v23, %v1564_v26  ;;  %v1567_v31 = vadd.f32 %v2855_v27, %v3663_v36 }
 0x142   : > { %v3729_v32 = vadd.f32 %v2967_v29, %v1567_v31  ;;  %v2856_v33 = vpop.f32.mrb[36].mxu0 }
 0x143   : > { %v2968_v34 = vpop.f32.mrb[36].mxu1  ;;  %v2857_v38 = vpop.f32.mrb[37].mxu0 }
 0x144   : > { %v2858_v40 = vadd.f32 %v2857_v38, %v2856_v33  ;;  %v2969_v42 = vpop.f32.mrb[37].mxu1  ;;  %v2859_v43 = vpop.f32.mrb[38].mxu0 }
 0x145   : > { %v2970_v44 = vadd.f32 %v2969_v42, %v2968_v34  ;;  %v2971_v45 = vpop.f32.mrb[38].mxu1  ;;  %v2860_v46 = vpop.f32.mrb[39].mxu0 }
 0x146   : > { %v1572_v47 = vadd.f32 %v2858_v40, %v3663_v36  ;;  %v2861_v48 = vadd.f32 %v2860_v46, %v2859_v43  ;;  %v2972_v49 = vpop.f32.mrb[39].mxu1 }
 0x147   : > { %v2973_v50 = vadd.f32 %v2972_v49, %v2971_v45 }
 0x148   : > { %v3732_v51 = vadd.f32 %v2970_v44, %v1572_v47  ;;  %v1575_v53 = vadd.f32 %v2861_v48, %v3663_v36 }
 0x14a   : > { %v3735_v54 = vadd.f32 %v2973_v50, %v1575_v53  ;;  %v2862_v57 = vpop.f32.mrb[40].mxu0 }
 0x14b   : > { %v2974_v59 = vpop.f32.mrb[40].mxu1  ;;  %v2863_v60 = vpop.f32.mrb[41].mxu0 }
 0x14c   : > { %v2864_v61 = vadd.f32 %v2863_v60, %v2862_v57  ;;  %v2975_v62 = vpop.f32.mrb[41].mxu1  ;;  %v2865_v0 = vpop.f32.mrb[42].mxu0 }
 0x14d   : > { %v2976_v2 = vadd.f32 %v2975_v62, %v2974_v59  ;;  %v2977_v3 = vpop.f32.mrb[42].mxu1  ;;  %v2866_v4 = vpop.f32.mrb[43].mxu0 }
 0x14e   : > { %v1580_v5 = vadd.f32 %v2864_v61, %v3663_v36  ;;  %v2867_v6 = vadd.f32 %v2866_v4, %v2865_v0  ;;  %v2978_v7 = vpop.f32.mrb[43].mxu1 }
 0x14f   : > { %v2979_v8 = vadd.f32 %v2978_v7, %v2977_v3 }
 0x150   : > { %v3738_v9 = vadd.f32 %v2976_v2, %v1580_v5  ;;  %v1583_v11 = vadd.f32 %v2867_v6, %v3663_v36 }
 0x152   : > { %v3741_v14 = vadd.f32 %v2979_v8, %v1583_v11  ;;  %v2868_v15 = vpop.f32.mrb[44].mxu0 }
 0x153   : > { %v2980_v17 = vpop.f32.mrb[44].mxu1  ;;  %v2869_v18 = vpop.f32.mrb[45].mxu0 }
 0x154   : > { %v2870_v20 = vadd.f32 %v2869_v18, %v2868_v15  ;;  %v2981_v22 = vpop.f32.mrb[45].mxu1  ;;  %v2871_v23 = vpop.f32.mrb[46].mxu0 }
 0x155   : > { %v2982_v24 = vadd.f32 %v2981_v22, %v2980_v17  ;;  %v2983_v25 = vpop.f32.mrb[46].mxu1  ;;  %v2872_v26 = vpop.f32.mrb[47].mxu0 }
 0x156   : > { %v1588_v27 = vadd.f32 %v2870_v20, %v3663_v36  ;;  %v2873_v28 = vadd.f32 %v2872_v26, %v2871_v23  ;;  %v2984_v29 = vpop.f32.mrb[47].mxu1 }
 0x157   : > { %v2985_v31 = vadd.f32 %v2984_v29, %v2983_v25 }
 0x158   : > { %v3744_v33 = vadd.f32 %v2982_v24, %v1588_v27  ;;  %v1591_v34 = vadd.f32 %v2873_v28, %v3663_v36 }
 0x15a   : > { %v3747_v38 = vadd.f32 %v2985_v31, %v1591_v34  ;;  %v2874_v40 = vpop.f32.mrb[48].mxu0 }
 0x15b   : > { %v2986_v42 = vpop.f32.mrb[48].mxu1  ;;  %v2875_v43 = vpop.f32.mrb[49].mxu0 }
 0x15c   : > { %v2876_v44 = vadd.f32 %v2875_v43, %v2874_v40  ;;  %v2987_v45 = vpop.f32.mrb[49].mxu1  ;;  %v2877_v46 = vpop.f32.mrb[50].mxu0 }
 0x15d   : > { %v2988_v47 = vadd.f32 %v2987_v45, %v2986_v42  ;;  %v2989_v48 = vpop.f32.mrb[50].mxu1  ;;  %v2878_v49 = vpop.f32.mrb[51].mxu0 }
 0x15e   : > { %v1596_v50 = vadd.f32 %v2876_v44, %v3663_v36  ;;  %v2879_v53 = vadd.f32 %v2878_v49, %v2877_v46  ;;  %v2990_v57 = vpop.f32.mrb[51].mxu1 }
 0x15f   : > { %v2991_v59 = vadd.f32 %v2990_v57, %v2989_v48 }
 0x160   : > { %v3750_v60 = vadd.f32 %v2988_v47, %v1596_v50  ;;  %v1599_v61 = vadd.f32 %v2879_v53, %v3663_v36 }
 0x162   : > { %v3753_v62 = vadd.f32 %v2991_v59, %v1599_v61  ;;  %v2880_v0 = vpop.f32.mrb[52].mxu0 }
 0x163   : > { %v2992_v2 = vpop.f32.mrb[52].mxu1  ;;  %v2881_v3 = vpop.f32.mrb[53].mxu0 }
 0x164   : > { %v2882_v4 = vadd.f32 %v2881_v3, %v2880_v0  ;;  %v2993_v5 = vpop.f32.mrb[53].mxu1  ;;  %v2883_v6 = vpop.f32.mrb[54].mxu0 }
 0x165   : > { %v2994_v7 = vadd.f32 %v2993_v5, %v2992_v2  ;;  %v2995_v8 = vpop.f32.mrb[54].mxu1  ;;  %v2884_v11 = vpop.f32.mrb[55].mxu0 }
 0x166   : > { %v1604_v15 = vadd.f32 %v2882_v4, %v3663_v36  ;;  %v2885_v17 = vadd.f32 %v2884_v11, %v2883_v6  ;;  %v2996_v18 = vpop.f32.mrb[55].mxu1 }
 0x167   : > { %v2997_v20 = vadd.f32 %v2996_v18, %v2995_v8 }
 0x168   : > { %v3756_v22 = vadd.f32 %v2994_v7, %v1604_v15  ;;  %v1607_v23 = vadd.f32 %v2885_v17, %v3663_v36 }
 0x16a   : > { %v3759_v24 = vadd.f32 %v2997_v20, %v1607_v23  ;;  %v2886_v25 = vpop.f32.mrb[56].mxu0 }
 0x16b   : > { %v2998_v26 = vpop.f32.mrb[56].mxu1  ;;  %v2887_v27 = vpop.f32.mrb[57].mxu0 }
 0x16c   : > { %v2888_v28 = vadd.f32 %v2887_v27, %v2886_v25  ;;  %v2999_v29 = vpop.f32.mrb[57].mxu1  ;;  %v2889_v31 = vpop.f32.mrb[58].mxu0 }
 0x16d   : > { %v3000_v34 = vadd.f32 %v2999_v29, %v2998_v26  ;;  %v3001_v40 = vpop.f32.mrb[58].mxu1  ;;  %v2890_v42 = vpop.f32.mrb[59].mxu0 }
 0x16e   : > { %v1612_v43 = vadd.f32 %v2888_v28, %v3663_v36  ;;  %v2891_v44 = vadd.f32 %v2890_v42, %v2889_v31  ;;  %v3002_v45 = vpop.f32.mrb[59].mxu1 }
 0x16f   : > { %v3003_v46 = vadd.f32 %v3002_v45, %v3001_v40 }
 0x170   : > { %v3762_v47 = vadd.f32 %v3000_v34, %v1612_v43  ;;  %v1615_v48 = vadd.f32 %v2891_v44, %v3663_v36 }
 0x172   : > { %v3765_v49 = vadd.f32 %v3003_v46, %v1615_v48  ;;  %v2892_v50 = vpop.f32.mrb[60].mxu0 }
 0x173   : > { %v3004_v53 = vpop.f32.mrb[60].mxu1  ;;  %v2893_v57 = vpop.f32.mrb[61].mxu0 }
 0x174   : > { %v2894_v59 = vadd.f32 %v2893_v57, %v2892_v50  ;;  %v3005_v61 = vpop.f32.mrb[61].mxu1  ;;  %v2895_v0 = vpop.f32.mrb[62].mxu0 }
 0x175   : > { %v3006_v2 = vadd.f32 %v3005_v61, %v3004_v53  ;;  %v3007_v3 = vpop.f32.mrb[62].mxu1  ;;  %v2896_v4 = vpop.f32.mrb[63].mxu0 }
 0x176   : > { %v1620_v5 = vadd.f32 %v2894_v59, %v3663_v36  ;;  %v2897_v6 = vadd.f32 %v2896_v4, %v2895_v0  ;;  %v3008_v7 = vpop.f32.mrb[63].mxu1 }
 0x177   : > { %v3009_v8 = vadd.f32 %v3008_v7, %v3007_v3 }
 0x178   : > { %v3768_v11 = vadd.f32 %v3006_v2, %v1620_v5  ;;  %v1623_v15 = vadd.f32 %v2897_v6, %v3663_v36 }
 0x17a   : > { %v3771_v17 = vadd.f32 %v3009_v8, %v1623_v15  ;;  %v3026_v18 = vpop.f32.mrb[64].mxu0 }
 0x17b   : > { %v3138_v20 = vpop.f32.mrb[64].mxu1  ;;  %v3027_v23 = vpop.f32.mrb[65].mxu0 }
 0x17c   : > { %v3028_v25 = vadd.f32 %v3027_v23, %v3026_v18  ;;  %v3139_v26 = vpop.f32.mrb[65].mxu1  ;;  %v3029_v27 = vpop.f32.mrb[66].mxu0 }
 0x17d   : > { %v3140_v28 = vadd.f32 %v3139_v26, %v3138_v20  ;;  %v3141_v29 = vpop.f32.mrb[66].mxu1  ;;  %v3030_v31 = vpop.f32.mrb[67].mxu0 }
 0x17e   : > { %v1822_v34 = vadd.f32 %v3028_v25, %v3666_v52  ;;  %v3031_v40 = vadd.f32 %v3030_v31, %v3029_v27  ;;  %v3142_v42 = vpop.f32.mrb[67].mxu1 }
 0x17f   : > { %v3143_v43 = vadd.f32 %v3142_v42, %v3141_v29 }
 0x180   : > { %v1983_v44 = vadd.f32 %v3140_v28, %v1822_v34  ;;  %v1825_v36 = vadd.f32 %v3031_v40, %v3671_v56 }
 0x182   : > { %v2141_v45 = vmul.f32 0.2, %v1983_v44  ;;  %v1986_v46 = vadd.f32 %v3143_v43, %v1825_v36  ;;  %v3032_v48 = vpop.f32.mrb[68].mxu0  ;;  %vm2109_vm0 = vcmp.ge.f32.partialorder %v1983_v44, 0.0 }
 0x183   : > { %v3144_v50 = vpop.f32.mrb[68].mxu1  ;;  %v3033_v53 = vpop.f32.mrb[69].mxu0 }
 0x184   : > { %vm2110_vm1 = vcmp.ge.f32.partialorder %v1986_v46, 0.0  ;;  %v2142_v57 = vmul.f32 0.2, %v1986_v46  ;;  %v3034_v59 = vadd.f32 %v3033_v53, %v3032_v48  ;;  %v3145_v61 = vpop.f32.mrb[69].mxu1  ;;  %v3035_v0 = vpop.f32.mrb[70].mxu0  ;;  %v2173_v4 = vsel %vm2109_vm0, %v1983_v44, %v2141_v45 }
 0x185   : > { %v3146_v2 = vadd.f32 %v3145_v61, %v3144_v50  ;;  %v3147_v52 = vpop.f32.mrb[70].mxu1  ;;  %v3036_v3 = vpop.f32.mrb[71].mxu0 }
 0x186   : > { %v2174_v56 = vsel %vm2110_vm1, %v1986_v46, %v2142_v57  ;;  %v1830_v5 = vadd.f32 %v3034_v59, %v3676_v12  ;;  %v3037_v6 = vadd.f32 %v3036_v3, %v3035_v0  ;;  %v3148_v7 = vpop.f32.mrb[71].mxu1 }
 0x187   : > { %v2694_v8 = vpack.c.bf16 %v2174_v56, %v2173_v4  ;;  %v3149_v15 = vadd.f32 %v3148_v7, %v3147_v52 }
 0x188   : > { %v1991_v18 = vadd.f32 %v3146_v2, %v1830_v5  ;;  %v1833_v20 = vadd.f32 %v3037_v6, %v3681_v16 }
 0x189   : > { %2695 = vst [vmem:[%s3779_s29] sm:$0xff] %v2694_v8  }
 0x18a   : > { %v2143_v23 = vmul.f32 0.2, %v1991_v18  ;;  %v1994_v25 = vadd.f32 %v3149_v15, %v1833_v20  ;;  %v3038_v26 = vpop.f32.mrb[72].mxu0  ;;  %vm2111_vm2 = vcmp.ge.f32.partialorder %v1991_v18, 0.0 }
 0x18b   : > { %v3150_v27 = vpop.f32.mrb[72].mxu1  ;;  %v3039_v28 = vpop.f32.mrb[73].mxu0 }
 0x18c   : > { %vm2112_vm3 = vcmp.ge.f32.partialorder %v1994_v25, 0.0  ;;  %v2144_v29 = vmul.f32 0.2, %v1994_v25  ;;  %v3040_v31 = vadd.f32 %v3039_v28, %v3038_v26  ;;  %v3151_v34 = vpop.f32.mrb[73].mxu1  ;;  %v3041_v12 = vpop.f32.mrb[74].mxu0  ;;  %v2175_v44 = vsel %vm2111_vm2, %v1991_v18, %v2143_v23 }
 0x18d   : > { %v3152_v40 = vadd.f32 %v3151_v34, %v3150_v27  ;;  %v3153_v42 = vpop.f32.mrb[74].mxu1  ;;  %v3042_v43 = vpop.f32.mrb[75].mxu0 }
 0x18e   : > { %v2176_v36 = vsel %vm2112_vm3, %v1994_v25, %v2144_v29  ;;  %v1838_v16 = vadd.f32 %v3040_v31, %v3686_v37  ;;  %v3043_v45 = vadd.f32 %v3042_v43, %v3041_v12  ;;  %v3154_v46 = vpop.f32.mrb[75].mxu1 }
 0x18f   : > { %v2699_v48 = vpack.c.bf16 %v2176_v36, %v2175_v44  ;;  %v3155_v50 = vadd.f32 %v3154_v46, %v3153_v42 }
 0x190   : > { %v1999_v53 = vadd.f32 %v3152_v40, %v1838_v16  ;;  %v1841_v57 = vadd.f32 %v3043_v45, %v3691_v41 }
 0x191   : > { %2771 = vst [vmem:[%s3779_s29 + $0x8] sm:$0xff] %v2699_v48  }
 0x192   : > { %v2145_v59 = vmul.f32 0.2, %v1999_v53  ;;  %v2002_v61 = vadd.f32 %v3155_v50, %v1841_v57  ;;  %v3044_v0 = vpop.f32.mrb[76].mxu0  ;;  %vm2113_vm4 = vcmp.ge.f32.partialorder %v1999_v53, 0.0 }
 0x193   : > { %v3156_v2 = vpop.f32.mrb[76].mxu1  ;;  %v3045_v52 = vpop.f32.mrb[77].mxu0 }
 0x194   : > { %vm2114_vm5 = vcmp.ge.f32.partialorder %v2002_v61, 0.0  ;;  %v2146_v3 = vmul.f32 0.2, %v2002_v61  ;;  %v3046_v4 = vadd.f32 %v3045_v52, %v3044_v0  ;;  %v3157_v56 = vpop.f32.mrb[77].mxu1  ;;  %v3047_v37 = vpop.f32.mrb[78].mxu0  ;;  %v2177_v8 = vsel %vm2113_vm4, %v1999_v53, %v2145_v59 }
 0x195   : > { %v3158_v5 = vadd.f32 %v3157_v56, %v3156_v2  ;;  %v3159_v6 = vpop.f32.mrb[78].mxu1  ;;  %v3048_v7 = vpop.f32.mrb[79].mxu0 }
 0x196   : > { %v2178_v15 = vsel %vm2114_vm5, %v2002_v61, %v2146_v3  ;;  %v1846_v41 = vadd.f32 %v3046_v4, %v3696_v63  ;;  %v3049_v18 = vadd.f32 %v3048_v7, %v3047_v37  ;;  %v3160_v20 = vpop.f32.mrb[79].mxu1 }
 0x197   : > { %v2704_v23 = vpack.c.bf16 %v2178_v15, %v2177_v8  ;;  %v3161_v25 = vadd.f32 %v3160_v20, %v3159_v6 }
 0x198   : > { %v2007_v26 = vadd.f32 %v3158_v5, %v1846_v41  ;;  %v1849_v27 = vadd.f32 %v3049_v18, %v3699_v1 }
 0x199   : > { %2772 = vst [vmem:[%s3779_s29 + $0x10] sm:$0xff] %v2704_v23  }
 0x19a   : > { %v2147_v28 = vmul.f32 0.2, %v2007_v26  ;;  %v2010_v29 = vadd.f32 %v3161_v25, %v1849_v27  ;;  %v3050_v31 = vpop.f32.mrb[80].mxu0  ;;  %vm2115_vm6 = vcmp.ge.f32.partialorder %v2007_v26, 0.0 }
 0x19b   : > { %v3162_v34 = vpop.f32.mrb[80].mxu1  ;;  %v3051_v12 = vpop.f32.mrb[81].mxu0 }
 0x19c   : > { %vm2116_vm7 = vcmp.ge.f32.partialorder %v2010_v29, 0.0  ;;  %v2148_v40 = vmul.f32 0.2, %v2010_v29  ;;  %v3052_v42 = vadd.f32 %v3051_v12, %v3050_v31  ;;  %v3163_v43 = vpop.f32.mrb[81].mxu1  ;;  %v3053_v63 = vpop.f32.mrb[82].mxu0  ;;  %v2179_v45 = vsel %vm2115_vm6, %v2007_v26, %v2147_v28 }
 0x19d   : > { %v3164_v44 = vadd.f32 %v3163_v43, %v3162_v34  ;;  %v3165_v36 = vpop.f32.mrb[82].mxu1  ;;  %v3054_v16 = vpop.f32.mrb[83].mxu0 }
 0x19e   : > { %v2180_v46 = vsel %vm2116_vm7, %v2010_v29, %v2148_v40  ;;  %v1854_v1 = vadd.f32 %v3052_v42, %v3702_v19  ;;  %v3055_v48 = vadd.f32 %v3054_v16, %v3053_v63  ;;  %v3166_v50 = vpop.f32.mrb[83].mxu1 }
 0x19f   : > { %v2709_v53 = vpack.c.bf16 %v2180_v46, %v2179_v45  ;;  %v3167_v57 = vadd.f32 %v3166_v50, %v3165_v36 }
 0x1a0   : > { %v2015_v59 = vadd.f32 %v3164_v44, %v1854_v1  ;;  %v1857_v61 = vadd.f32 %v3055_v48, %v3705_v21 }
 0x1a1   : > { %2773 = vst [vmem:[%s3779_s29 + $0x18] sm:$0xff] %v2709_v53  }
 0x1a2   : > { %v2149_v0 = vmul.f32 0.2, %v2015_v59  ;;  %v2018_v2 = vadd.f32 %v3167_v57, %v1857_v61  ;;  %v3056_v52 = vpop.f32.mrb[84].mxu0  ;;  %vm2117_vm8 = vcmp.ge.f32.partialorder %v2015_v59, 0.0 }
 0x1a3   : > { %v3168_v3 = vpop.f32.mrb[84].mxu1  ;;  %v3057_v4 = vpop.f32.mrb[85].mxu0 }
 0x1a4   : > { %vm2118_vm9 = vcmp.ge.f32.partialorder %v2018_v2, 0.0  ;;  %v2150_v56 = vmul.f32 0.2, %v2018_v2  ;;  %v3058_v37 = vadd.f32 %v3057_v4, %v3056_v52  ;;  %v3169_v5 = vpop.f32.mrb[85].mxu1  ;;  %v3059_v19 = vpop.f32.mrb[86].mxu0  ;;  %v2181_v15 = vsel %vm2117_vm8, %v2015_v59, %v2149_v0 }
 0x1a5   : > { %v3170_v6 = vadd.f32 %v3169_v5, %v3168_v3  ;;  %v3171_v7 = vpop.f32.mrb[86].mxu1  ;;  %v3060_v8 = vpop.f32.mrb[87].mxu0 }
 0x1a6   : > { %v2182_v41 = vsel %vm2118_vm9, %v2018_v2, %v2150_v56  ;;  %v1862_v21 = vadd.f32 %v3058_v37, %v3708_v35  ;;  %v3061_v18 = vadd.f32 %v3060_v8, %v3059_v19  ;;  %v3172_v20 = vpop.f32.mrb[87].mxu1 }
 0x1a7   : > { %v2714_v23 = vpack.c.bf16 %v2182_v41, %v2181_v15  ;;  %v3173_v25 = vadd.f32 %v3172_v20, %v3171_v7 }
 0x1a8   : > { %v2023_v26 = vadd.f32 %v3170_v6, %v1862_v21  ;;  %v1865_v27 = vadd.f32 %v3061_v18, %v3711_v39 }
 0x1a9   : > { %2774 = vst [vmem:[%s3779_s29 + $0x20] sm:$0xff] %v2714_v23  }
 0x1aa   : > { %v2151_v28 = vmul.f32 0.2, %v2023_v26  ;;  %v2026_v29 = vadd.f32 %v3173_v25, %v1865_v27  ;;  %v3062_v31 = vpop.f32.mrb[88].mxu0  ;;  %vm2119_vm10 = vcmp.ge.f32.partialorder %v2023_v26, 0.0 }
 0x1ab   : > { %v3174_v34 = vpop.f32.mrb[88].mxu1  ;;  %v3063_v12 = vpop.f32.mrb[89].mxu0 }
 0x1ac   : > { %vm2120_vm11 = vcmp.ge.f32.partialorder %v2026_v29, 0.0  ;;  %v2152_v40 = vmul.f32 0.2, %v2026_v29  ;;  %v3064_v42 = vadd.f32 %v3063_v12, %v3062_v31  ;;  %v3175_v43 = vpop.f32.mrb[89].mxu1  ;;  %v3065_v35 = vpop.f32.mrb[90].mxu0  ;;  %v2183_v16 = vsel %vm2119_vm10, %v2023_v26, %v2151_v28 }
 0x1ad   : > { %v3176_v63 = vadd.f32 %v3175_v43, %v3174_v34  ;;  %v3177_v44 = vpop.f32.mrb[90].mxu1  ;;  %v3066_v36 = vpop.f32.mrb[91].mxu0 }
 0x1ae   : > { %v2184_v45 = vsel %vm2120_vm11, %v2026_v29, %v2152_v40  ;;  %v1870_v39 = vadd.f32 %v3064_v42, %v3714_v55  ;;  %v3067_v46 = vadd.f32 %v3066_v36, %v3065_v35  ;;  %v3178_v1 = vpop.f32.mrb[91].mxu1 }
 0x1af   : > { %v2719_v48 = vpack.c.bf16 %v2184_v45, %v2183_v16  ;;  %v3179_v50 = vadd.f32 %v3178_v1, %v3177_v44 }
 0x1b0   : > { %v2031_v53 = vadd.f32 %v3176_v63, %v1870_v39  ;;  %v1873_v57 = vadd.f32 %v3067_v46, %v3717_v58 }
 0x1b1   : > { %2775 = vst [vmem:[%s3779_s29 + $0x28] sm:$0xff] %v2719_v48  }
 0x1b2   : > { %v2153_v59 = vmul.f32 0.2, %v2031_v53  ;;  %v2034_v61 = vadd.f32 %v3179_v50, %v1873_v57  ;;  %v3068_v0 = vpop.f32.mrb[92].mxu0  ;;  %vm2121_vm12 = vcmp.ge.f32.partialorder %v2031_v53, 0.0 }
 0x1b3   : > { %v3180_v2 = vpop.f32.mrb[92].mxu1  ;;  %v3069_v52 = vpop.f32.mrb[93].mxu0 }
 0x1b4   : > { %vm2122_vm13 = vcmp.ge.f32.partialorder %v2034_v61, 0.0  ;;  %v2154_v3 = vmul.f32 0.2, %v2034_v61  ;;  %v3070_v4 = vadd.f32 %v3069_v52, %v3068_v0  ;;  %v3181_v56 = vpop.f32.mrb[93].mxu1  ;;  %v3071_v55 = vpop.f32.mrb[94].mxu0  ;;  %v2185_v6 = vsel %vm2121_vm12, %v2031_v53, %v2153_v59 }
 0x1b5   : > { %v3182_v37 = vadd.f32 %v3181_v56, %v3180_v2  ;;  %v3183_v5 = vpop.f32.mrb[94].mxu1  ;;  %v3072_v19 = vpop.f32.mrb[95].mxu0 }
 0x1b6   : > { %v2186_v7 = vsel %vm2122_vm13, %v2034_v61, %v2154_v3  ;;  %v1878_v58 = vadd.f32 %v3070_v4, %v3720_v10  ;;  %v3073_v8 = vadd.f32 %v3072_v19, %v3071_v55  ;;  %v3184_v15 = vpop.f32.mrb[95].mxu1 }
 0x1b7   : > { %v2724_v41 = vpack.c.bf16 %v2186_v7, %v2185_v6  ;;  %v3185_v21 = vadd.f32 %v3184_v15, %v3183_v5 }
 0x1b8   : > { %v2039_v18 = vadd.f32 %v3182_v37, %v1878_v58  ;;  %v1881_v20 = vadd.f32 %v3073_v8, %v3723_v13 }
 0x1b9   : > { %2776 = vst [vmem:[%s3779_s29 + $0x30] sm:$0xff] %v2724_v41  }
 0x1ba   : > { %v2155_v23 = vmul.f32 0.2, %v2039_v18  ;;  %v2042_v25 = vadd.f32 %v3185_v21, %v1881_v20  ;;  %v3074_v26 = vpop.f32.mrb[96].mxu0  ;;  %vm2123_vm14 = vcmp.ge.f32.partialorder %v2039_v18, 0.0 }
 0x1bb   : > { %v3186_v27 = vpop.f32.mrb[96].mxu1  ;;  %v3075_v28 = vpop.f32.mrb[97].mxu0 }
 0x1bc   : > { %vm2124_vm15 = vcmp.ge.f32.partialorder %v2042_v25, 0.0  ;;  %v2156_v29 = vmul.f32 0.2, %v2042_v25  ;;  %v3076_v31 = vadd.f32 %v3075_v28, %v3074_v26  ;;  %v3187_v34 = vpop.f32.mrb[97].mxu1  ;;  %v3077_v10 = vpop.f32.mrb[98].mxu0  ;;  %v2187_v43 = vsel %vm2123_vm14, %v2039_v18, %v2155_v23 }
 0x1bd   : > { %v3188_v12 = vadd.f32 %v3187_v34, %v3186_v27  ;;  %v3189_v40 = vpop.f32.mrb[98].mxu1  ;;  %v3078_v42 = vpop.f32.mrb[99].mxu0 }
 0x1be   : > { %v2188_v35 = vsel %vm2124_vm15, %v2042_v25, %v2156_v29  ;;  %v1886_v13 = vadd.f32 %v3076_v31, %v3726_v30  ;;  %v3079_v63 = vadd.f32 %v3078_v42, %v3077_v10  ;;  %v3190_v44 = vpop.f32.mrb[99].mxu1 }
 0x1bf   : > { %v2729_v36 = vpack.c.bf16 %v2188_v35, %v2187_v43  ;;  %v3191_v16 = vadd.f32 %v3190_v44, %v3189_v40 }
 0x1c0   : > { %v2047_v45 = vadd.f32 %v3188_v12, %v1886_v13  ;;  %v1889_v39 = vadd.f32 %v3079_v63, %v3729_v32 }
 0x1c1   : > { %2777 = vst [vmem:[%s3779_s29 + $0x38] sm:$0xff] %v2729_v36  }
 0x1c2   : > { %v2157_v46 = vmul.f32 0.2, %v2047_v45  ;;  %v2050_v1 = vadd.f32 %v3191_v16, %v1889_v39  ;;  %v3080_v48 = vpop.f32.mrb[100].mxu0  ;;  %vm2125_vm0 = vcmp.ge.f32.partialorder %v2047_v45, 0.0 }
 0x1c3   : > { %v3192_v50 = vpop.f32.mrb[100].mxu1  ;;  %v3081_v53 = vpop.f32.mrb[101].mxu0 }
 0x1c4   : > { %vm2126_vm1 = vcmp.ge.f32.partialorder %v2050_v1, 0.0  ;;  %v2158_v57 = vmul.f32 0.2, %v2050_v1  ;;  %v3082_v59 = vadd.f32 %v3081_v53, %v3080_v48  ;;  %v3193_v61 = vpop.f32.mrb[101].mxu1  ;;  %v3083_v30 = vpop.f32.mrb[102].mxu0  ;;  %v2189_v3 = vsel %vm2125_vm0, %v2047_v45, %v2157_v46 }
 0x1c5   : > { %v3194_v0 = vadd.f32 %v3193_v61, %v3192_v50  ;;  %v3195_v2 = vpop.f32.mrb[102].mxu1  ;;  %v3084_v52 = vpop.f32.mrb[103].mxu0 }
 0x1c6   : > { %v2190_v4 = vsel %vm2126_vm1, %v2050_v1, %v2158_v57  ;;  %v1894_v32 = vadd.f32 %v3082_v59, %v3732_v51  ;;  %v3085_v56 = vadd.f32 %v3084_v52, %v3083_v30  ;;  %v3196_v55 = vpop.f32.mrb[103].mxu1 }
 0x1c7   : > { %v2734_v37 = vpack.c.bf16 %v2190_v4, %v2189_v3  ;;  %v3197_v5 = vadd.f32 %v3196_v55, %v3195_v2 }
 0x1c8   : > { %v2055_v19 = vadd.f32 %v3194_v0, %v1894_v32  ;;  %v1897_v6 = vadd.f32 %v3085_v56, %v3735_v54 }
 0x1c9   : > { %2778 = vst [vmem:[%s3779_s29 + $0x40] sm:$0xff] %v2734_v37  }
 0x1ca   : > { %v2159_v7 = vmul.f32 0.2, %v2055_v19  ;;  %v2058_v58 = vadd.f32 %v3197_v5, %v1897_v6  ;;  %v3086_v8 = vpop.f32.mrb[104].mxu0  ;;  %vm2127_vm2 = vcmp.ge.f32.partialorder %v2055_v19, 0.0 }
 0x1cb   : > { %v3198_v15 = vpop.f32.mrb[104].mxu1  ;;  %v3087_v41 = vpop.f32.mrb[105].mxu0 }
 0x1cc   : > { %vm2128_vm3 = vcmp.ge.f32.partialorder %v2058_v58, 0.0  ;;  %v2160_v21 = vmul.f32 0.2, %v2058_v58  ;;  %v3088_v18 = vadd.f32 %v3087_v41, %v3086_v8  ;;  %v3199_v20 = vpop.f32.mrb[105].mxu1  ;;  %v3089_v51 = vpop.f32.mrb[106].mxu0  ;;  %v2191_v27 = vsel %vm2127_vm2, %v2055_v19, %v2159_v7 }
 0x1cd   : > { %v3200_v23 = vadd.f32 %v3199_v20, %v3198_v15  ;;  %v3201_v25 = vpop.f32.mrb[106].mxu1  ;;  %v3090_v26 = vpop.f32.mrb[107].mxu0 }
 0x1ce   : > { %v2192_v28 = vsel %vm2128_vm3, %v2058_v58, %v2160_v21  ;;  %v1902_v54 = vadd.f32 %v3088_v18, %v3738_v9  ;;  %v3091_v29 = vadd.f32 %v3090_v26, %v3089_v51  ;;  %v3202_v31 = vpop.f32.mrb[107].mxu1 }
 0x1cf   : > { %v2739_v34 = vpack.c.bf16 %v2192_v28, %v2191_v27  ;;  %v3203_v10 = vadd.f32 %v3202_v31, %v3201_v25 }
 0x1d0   : > { %v2063_v12 = vadd.f32 %v3200_v23, %v1902_v54  ;;  %v1905_v40 = vadd.f32 %v3091_v29, %v3741_v14 }
 0x1d1   : > { %2779 = vst [vmem:[%s3779_s29 + $0x48] sm:$0xff] %v2739_v34  }
 0x1d2   : > { %v2161_v42 = vmul.f32 0.2, %v2063_v12  ;;  %v2066_v43 = vadd.f32 %v3203_v10, %v1905_v40  ;;  %v3092_v35 = vpop.f32.mrb[108].mxu0  ;;  %vm2129_vm4 = vcmp.ge.f32.partialorder %v2063_v12, 0.0 }
 0x1d3   : > { %v3204_v13 = vpop.f32.mrb[108].mxu1  ;;  %v3093_v63 = vpop.f32.mrb[109].mxu0 }
 0x1d4   : > { %vm2130_vm5 = vcmp.ge.f32.partialorder %v2066_v43, 0.0  ;;  %v2162_v44 = vmul.f32 0.2, %v2066_v43  ;;  %v3094_v36 = vadd.f32 %v3093_v63, %v3092_v35  ;;  %v3205_v16 = vpop.f32.mrb[109].mxu1  ;;  %v3095_v9 = vpop.f32.mrb[110].mxu0  ;;  %v2193_v1 = vsel %vm2129_vm4, %v2063_v12, %v2161_v42 }
 0x1d5   : > { %v3206_v45 = vadd.f32 %v3205_v16, %v3204_v13  ;;  %v3207_v39 = vpop.f32.mrb[110].mxu1  ;;  %v3096_v46 = vpop.f32.mrb[111].mxu0 }
 0x1d6   : > { %v2194_v48 = vsel %vm2130_vm5, %v2066_v43, %v2162_v44  ;;  %v1910_v14 = vadd.f32 %v3094_v36, %v3744_v33  ;;  %v3097_v50 = vadd.f32 %v3096_v46, %v3095_v9  ;;  %v3208_v53 = vpop.f32.mrb[111].mxu1 }
 0x1d7   : > { %v2744_v57 = vpack.c.bf16 %v2194_v48, %v2193_v1  ;;  %v3209_v59 = vadd.f32 %v3208_v53, %v3207_v39 }
 0x1d8   : > { %v2071_v61 = vadd.f32 %v3206_v45, %v1910_v14  ;;  %v1913_v30 = vadd.f32 %v3097_v50, %v3747_v38 }
 0x1d9   : > { %2780 = vst [vmem:[%s3779_s29 + $0x50] sm:$0xff] %v2744_v57  }
 0x1da   : > { %v2163_v0 = vmul.f32 0.2, %v2071_v61  ;;  %v2074_v2 = vadd.f32 %v3209_v59, %v1913_v30  ;;  %v3098_v52 = vpop.f32.mrb[112].mxu0  ;;  %vm2131_vm6 = vcmp.ge.f32.partialorder %v2071_v61, 0.0 }
 0x1db   : > { %v3210_v3 = vpop.f32.mrb[112].mxu1  ;;  %v3099_v4 = vpop.f32.mrb[113].mxu0 }
 0x1dc   : > { %vm2132_vm7 = vcmp.ge.f32.partialorder %v2074_v2, 0.0  ;;  %v2164_v32 = vmul.f32 0.2, %v2074_v2  ;;  %v3100_v56 = vadd.f32 %v3099_v4, %v3098_v52  ;;  %v3211_v55 = vpop.f32.mrb[113].mxu1  ;;  %v3101_v33 = vpop.f32.mrb[114].mxu0  ;;  %v2195_v6 = vsel %vm2131_vm6, %v2071_v61, %v2163_v0 }
 0x1dd   : > { %v3212_v37 = vadd.f32 %v3211_v55, %v3210_v3  ;;  %v3213_v5 = vpop.f32.mrb[114].mxu1  ;;  %v3102_v19 = vpop.f32.mrb[115].mxu0 }
 0x1de   : > { %v2196_v7 = vsel %vm2132_vm7, %v2074_v2, %v2164_v32  ;;  %v1918_v38 = vadd.f32 %v3100_v56, %v3750_v60  ;;  %v3103_v58 = vadd.f32 %v3102_v19, %v3101_v33  ;;  %v3214_v8 = vpop.f32.mrb[115].mxu1 }
 0x1df   : > { %v2749_v15 = vpack.c.bf16 %v2196_v7, %v2195_v6  ;;  %v3215_v41 = vadd.f32 %v3214_v8, %v3213_v5 }
 0x1e0   : > { %v2079_v21 = vadd.f32 %v3212_v37, %v1918_v38  ;;  %v1921_v18 = vadd.f32 %v3103_v58, %v3753_v62 }
 0x1e1   : > { %2781 = vst [vmem:[%s3779_s29 + $0x58] sm:$0xff] %v2749_v15  }
 0x1e2   : > { %v2165_v20 = vmul.f32 0.2, %v2079_v21  ;;  %v2082_v51 = vadd.f32 %v3215_v41, %v1921_v18  ;;  %v3104_v23 = vpop.f32.mrb[116].mxu0  ;;  %vm2133_vm8 = vcmp.ge.f32.partialorder %v2079_v21, 0.0 }
 0x1e3   : > { %v3216_v25 = vpop.f32.mrb[116].mxu1  ;;  %v3105_v26 = vpop.f32.mrb[117].mxu0 }
 0x1e4   : > { %vm2134_vm9 = vcmp.ge.f32.partialorder %v2082_v51, 0.0  ;;  %v2166_v27 = vmul.f32 0.2, %v2082_v51  ;;  %v3106_v28 = vadd.f32 %v3105_v26, %v3104_v23  ;;  %v3217_v54 = vpop.f32.mrb[117].mxu1  ;;  %v3107_v60 = vpop.f32.mrb[118].mxu0  ;;  %v2197_v10 = vsel %vm2133_vm8, %v2079_v21, %v2165_v20 }
 0x1e5   : > { %v3218_v29 = vadd.f32 %v3217_v54, %v3216_v25  ;;  %v3219_v31 = vpop.f32.mrb[118].mxu1  ;;  %v3108_v34 = vpop.f32.mrb[119].mxu0 }
 0x1e6   : > { %v2198_v12 = vsel %vm2134_vm9, %v2082_v51, %v2166_v27  ;;  %v1926_v62 = vadd.f32 %v3106_v28, %v3756_v22  ;;  %v3109_v40 = vadd.f32 %v3108_v34, %v3107_v60  ;;  %v3220_v42 = vpop.f32.mrb[119].mxu1 }
 0x1e7   : > { %v2754_v43 = vpack.c.bf16 %v2198_v12, %v2197_v10  ;;  %v3221_v35 = vadd.f32 %v3220_v42, %v3219_v31 }
 0x1e8   : > { %v2087_v13 = vadd.f32 %v3218_v29, %v1926_v62  ;;  %v1929_v63 = vadd.f32 %v3109_v40, %v3759_v24 }
 0x1e9   : > { %2782 = vst [vmem:[%s3779_s29 + $0x60] sm:$0xff] %v2754_v43  }
 0x1ea   : > { %v2167_v44 = vmul.f32 0.2, %v2087_v13  ;;  %v2090_v36 = vadd.f32 %v3221_v35, %v1929_v63  ;;  %v3110_v16 = vpop.f32.mrb[120].mxu0  ;;  %vm2135_vm10 = vcmp.ge.f32.partialorder %v2087_v13, 0.0 }
 0x1eb   : > { %v3222_v9 = vpop.f32.mrb[120].mxu1  ;;  %v3111_v45 = vpop.f32.mrb[121].mxu0 }
 0x1ec   : > { %vm2136_vm11 = vcmp.ge.f32.partialorder %v2090_v36, 0.0  ;;  %v2168_v39 = vmul.f32 0.2, %v2090_v36  ;;  %v3112_v46 = vadd.f32 %v3111_v45, %v3110_v16  ;;  %v3223_v1 = vpop.f32.mrb[121].mxu1  ;;  %v3113_v22 = vpop.f32.mrb[122].mxu0  ;;  %v2199_v53 = vsel %vm2135_vm10, %v2087_v13, %v2167_v44 }
 0x1ed   : > { %v3224_v48 = vadd.f32 %v3223_v1, %v3222_v9  ;;  %v3225_v14 = vpop.f32.mrb[122].mxu1  ;;  %v3114_v50 = vpop.f32.mrb[123].mxu0 }
 0x1ee   : > { %v2200_v57 = vsel %vm2136_vm11, %v2090_v36, %v2168_v39  ;;  %v1934_v24 = vadd.f32 %v3112_v46, %v3762_v47  ;;  %v3115_v59 = vadd.f32 %v3114_v50, %v3113_v22  ;;  %v3226_v61 = vpop.f32.mrb[123].mxu1 }
 0x1ef   : > { %v2759_v30 = vpack.c.bf16 %v2200_v57, %v2199_v53  ;;  %v3227_v0 = vadd.f32 %v3226_v61, %v3225_v14 }
 0x1f0   : > { %v2095_v2 = vadd.f32 %v3224_v48, %v1934_v24  ;;  %v1937_v52 = vadd.f32 %v3115_v59, %v3765_v49 }
 0x1f1   : > { %2783 = vst [vmem:[%s3779_s29 + $0x68] sm:$0xff] %v2759_v30  }
 0x1f2   : > { %v2169_v3 = vmul.f32 0.2, %v2095_v2  ;;  %v2098_v4 = vadd.f32 %v3227_v0, %v1937_v52  ;;  %v3116_v32 = vpop.f32.mrb[124].mxu0  ;;  %vm2137_vm12 = vcmp.ge.f32.partialorder %v2095_v2, 0.0 }
 0x1f3   : > { %v3228_v56 = vpop.f32.mrb[124].mxu1  ;;  %v3117_v55 = vpop.f32.mrb[125].mxu0 }
 0x1f4   : > { %vm2138_vm13 = vcmp.ge.f32.partialorder %v2098_v4, 0.0  ;;  %v2170_v33 = vmul.f32 0.2, %v2098_v4  ;;  %v3118_v37 = vadd.f32 %v3117_v55, %v3116_v32  ;;  %v3229_v5 = vpop.f32.mrb[125].mxu1  ;;  %v3119_v47 = vpop.f32.mrb[126].mxu0  ;;  %v2201_v38 = vsel %vm2137_vm12, %v2095_v2, %v2169_v3 }
 0x1f5   : > { %v3230_v19 = vadd.f32 %v3229_v5, %v3228_v56  ;;  %v3231_v6 = vpop.f32.mrb[126].mxu1  ;;  %v3120_v7 = vpop.f32.mrb[127].mxu0 }
 0x1f6   : > { %v2202_v58 = vsel %vm2138_vm13, %v2098_v4, %v2170_v33  ;;  %v1942_v49 = vadd.f32 %v3118_v37, %v3768_v11  ;;  %v3121_v8 = vadd.f32 %v3120_v7, %v3119_v47  ;;  %v3232_v15 = vpop.f32.mrb[127].mxu1 }
 0x1f7   : > { %v2764_v41 = vpack.c.bf16 %v2202_v58, %v2201_v38  ;;  %v3233_v21 = vadd.f32 %v3232_v15, %v3231_v6 }
 0x1f8   : > { %v2103_v18 = vadd.f32 %v3230_v19, %v1942_v49  ;;  %v1945_v20 = vadd.f32 %v3121_v8, %v3771_v17 }
 0x1f9   : > { %2784 = vst [vmem:[%s3779_s29 + $0x70] sm:$0xff] %v2764_v41  }
 0x1fa   : > { %v2171_v51 = vmul.f32 0.2, %v2103_v18  ;;  %v2106_v23 = vadd.f32 %v3233_v21, %v1945_v20  ;;  %vm2139_vm14 = vcmp.ge.f32.partialorder %v2103_v18, 0.0 }
 0x1fc   : > { %vm2140_vm15 = vcmp.ge.f32.partialorder %v2106_v23, 0.0  ;;  %v2172_v25 = vmul.f32 0.2, %v2106_v23  ;;  %v2203_v26 = vsel %vm2139_vm14, %v2103_v18, %v2171_v51 }
 0x1fe   : > { %v2204_v27 = vsel %vm2140_vm15, %v2106_v23, %v2172_v25 }
 0x1ff   : > { %v2769_v28 = vpack.c.bf16 %v2204_v27, %v2203_v26 }
 0x201   : > { %2785 = vst [vmem:[%s3779_s29 + $0x78] sm:$0xff] %v2769_v28  }
 0x202 PF: > { %s13_s12 = sadd.s32 1, %s3312_s12  }
 0x203   : > { %p10_p4 = scmp.ge.s32.totalorder %s13_s12, 4  }
 0x205   :  { %12 = sbr.rel (!%p10_p4) target bundleno = 1 (0x1), region = 62 }

// kernel: discriminator64_forward.6
= control target key start
LH: loop header
LB: loop body
LE: loop exit
PB: predicated region body
PF: predicated region fallthrough
CT: control target
= control target key end

     0   :  { %s3756_s12 = smov 0   ;;  %s4694_s0 = inlined_call_operand.vmem [shape: bf16[128,2048], index: 0, kind: input, shape index: {}]   ;;  %s4695_s1 = inlined_call_operand.vmem [shape: bf16[2048,256], index: 1, kind: input, shape index: {}]   ;;  %s4696_s2 = inlined_call_operand.vmem [shape: f32[1,256], index: 2, kind: input, shape index: {}]   ;;  %s4697_s3 = inlined_call_operand.vmem [shape: bf16[128,256], index: 3, kind: output, shape index: {}]  }
   0x1 LB: > { %s2857_s13 = sadd.s32 4294967295, %s3734_s12   ;;  %p2861_p0 = scmp.ge.s32.totalorder %s3734_s12, 1  ;;  %s3734_s12 = sphi %s3756_s12, %s13_s12  }
   0x2   : > { %p139_p1 = scmp.lt.s32.totalorder %s3734_s12, 3 }
   0x4   : > { %p140_p2 = pnand %p2861_p0, %p139_p1 }
   0x5   : > { %v3344_v0 = vld [vmem:[%s4695_s1 + $0x4] ss:$8 sps:$4 sm:$0xff] (!%p140_p2)   ;;  %v3348_v2 = vld [vmem:[%s4695_s1] ss:$8 sps:$4 sm:$0xff] (!%p140_p2)   ;;  %v3350_v4 = vld [vmem:[%s4695_s1 + $0x14] ss:$8 sps:$4 sm:$0xff] (!%p140_p2)  }
   0x6   : > { %143 = sbr.rel (%p140_p2) target bundleno = 511 (0x1ff), region = 32  ;;  %v3346_v1 = vld [vmem:[%s4695_s1 + $0x404] ss:$8 sps:$4 sm:$0xff] (!%p140_p2)   ;;  %2111 = vmatprep.subr.bf16.mxu1 (!%p140_p2), %v3344_v0  ;;  %v3349_v3 = vld [vmem:[%s4695_s1 + $0x400] ss:$8 sps:$4 sm:$0xff] (!%p140_p2)   ;;  %s2862_s24 = sshll.u32 (!%p140_p2), %s2857_s13, 3 }
   0x7   : > { %2403 = vmatprep.subr.bf16.mxu0 (!%p140_p2), %v3346_v1  ;;  %2112 = vmatpush1.bf16.msra.mxu1 (!%p140_p2), %v3348_v2  ;;  %v3352_v5 = vld [vmem:[%s4695_s1 + $0x414] ss:$8 sps:$4 sm:$0xff] (!%p140_p2)   ;;  %v3354_v6 = vld [vmem:[%s4695_s1 + $0x10] ss:$8 sps:$4 sm:$0xff] (!%p140_p2)   ;;  %v3356_v8 = vld [vmem:[%s4695_s1 + $0x24] ss:$8 sps:$4 sm:$0xff] (!%p140_p2)  }
   0x8   : > { %2404 = vmatpush1.bf16.msra.mxu0 (!%p140_p2), %v3349_v3  ;;  %2113 = vmatprep.subr.bf16.mxu1 (!%p140_p2), %v3350_v4  ;;  %v3355_v7 = vld [vmem:[%s4695_s1 + $0x410] ss:$8 sps:$4 sm:$0xff] (!%p140_p2)   ;;  %v3358_v9 = vld [vmem:[%s4695_s1 + $0x424] ss:$8 sps:$4 sm:$0xff] (!%p140_p2)   ;;  %v3360_v10 = vld [vmem:[%s4695_s1 + $0x20] ss:$8 sps:$4 sm:$0xff] (!%p140_p2)  }
   0x9   : > { %2405 = vmatprep.subr.bf16.mxu0 (!%p140_p2), %v3352_v5  ;;  %v3361_v11 = vld [vmem:[%s4695_s1 + $0x420] ss:$8 sps:$4 sm:$0xff] (!%p140_p2)   ;;  %v3362_v12 = vld [vmem:[%s4695_s1 + $0x34] ss:$8 sps:$4 sm:$0xff] (!%p140_p2)   ;;  %v3366_v14 = vld [vmem:[%s4695_s1 + $0x30] ss:$8 sps:$4 sm:$0xff] (!%p140_p2)  }
   0xa   : > { %v3364_v13 = vld [vmem:[%s4695_s1 + $0x434] ss:$8 sps:$4 sm:$0xff] (!%p140_p2)   ;;  %v3367_v15 = vld [vmem:[%s4695_s1 + $0x430] ss:$8 sps:$4 sm:$0xff] (!%p140_p2)   ;;  %v3368_v16 = vld [vmem:[%s4695_s1 + $0x44] ss:$8 sps:$4 sm:$0xff] (!%p140_p2)  }
   0xb   : > { %2114 = vmatpush1.bf16.msra.mxu1 (!%p140_p2), %v3354_v6  ;;  %v3370_v17 = vld [vmem:[%s4695_s1 + $0x444] ss:$8 sps:$4 sm:$0xff] (!%p140_p2)   ;;  %v3372_v18 = vld [vmem:[%s4695_s1 + $0x40] ss:$8 sps:$4 sm:$0xff] (!%p140_p2)   ;;  %v3374_v20 = vld [vmem:[%s4695_s1 + $0x54] ss:$8 sps:$4 sm:$0xff] (!%p140_p2)  }
   0xc   : > { %2406 = vmatpush1.bf16.msra.mxu0 (!%p140_p2), %v3355_v7  ;;  %2115 = vmatprep.subr.bf16.mxu1 (!%p140_p2), %v3356_v8  ;;  %v3373_v19 = vld [vmem:[%s4695_s1 + $0x440] ss:$8 sps:$4 sm:$0xff] (!%p140_p2)   ;;  %v3376_v21 = vld [vmem:[%s4695_s1 + $0x454] ss:$8 sps:$4 sm:$0xff] (!%p140_p2)   ;;  %v3378_v22 = vld [vmem:[%s4695_s1 + $0x50] ss:$8 sps:$4 sm:$0xff] (!%p140_p2)  }
   0xd   : > { %2407 = vmatprep.subr.bf16.mxu0 %v3358_v9  ;;  %v3379_v23 = vld [vmem:[%s4695_s1 + $0x450] ss:$8 sps:$4 sm:$0xff]   ;;  %v3380_v24 = vld [vmem:[%s4695_s1 + $0x64] ss:$8 sps:$4 sm:$0xff]   ;;  %v3384_v26 = vld [vmem:[%s4695_s1 + $0x60] ss:$8 sps:$4 sm:$0xff]  }
   0xe   : > { %v3382_v25 = vld [vmem:[%s4695_s1 + $0x464] ss:$8 sps:$4 sm:$0xff]   ;;  %v3385_v27 = vld [vmem:[%s4695_s1 + $0x460] ss:$8 sps:$4 sm:$0xff]   ;;  %v3386_v28 = vld [vmem:[%s4695_s1 + $0x74] ss:$8 sps:$4 sm:$0xff]  }
   0xf   : > { %2116 = vmatpush1.bf16.msra.mxu1 %v3360_v10  ;;  %v3388_v29 = vld [vmem:[%s4695_s1 + $0x474] ss:$8 sps:$4 sm:$0xff]   ;;  %v3390_v30 = vld [vmem:[%s4695_s1 + $0x70] ss:$8 sps:$4 sm:$0xff]   ;;  %v3392_v32 = vld [vmem:[%s4695_s1 + $0x84] ss:$8 sps:$4 sm:$0xff]  }
  0x10   : > { %2408 = vmatpush1.bf16.msra.mxu0 %v3361_v11  ;;  %2117 = vmatprep.subr.bf16.mxu1 %v3362_v12  ;;  %v3391_v31 = vld [vmem:[%s4695_s1 + $0x470] ss:$8 sps:$4 sm:$0xff]   ;;  %p166_p3 = scmp.lt.s32.totalorder %s2862_s24, 15  ;;  %v3394_v33 = vld [vmem:[%s4695_s1 + $0x484] ss:$8 sps:$4 sm:$0xff]  }
  0x11   : > { %2409 = vmatprep.subr.bf16.mxu0 %v3364_v13  ;;  %v3396_v34 = vld [vmem:[%s4695_s1 + $0x80] ss:$8 sps:$4 sm:$0xff]   ;;  %v3398_v36 = vld [vmem:[%s4695_s1 + $0x94] ss:$8 sps:$4 sm:$0xff]   ;;  %v3402_v38 = vld [vmem:[%s4695_s1 + $0x90] ss:$8 sps:$4 sm:$0xff]  }
  0x12   : > { %v3397_v35 = vld [vmem:[%s4695_s1 + $0x480] ss:$8 sps:$4 sm:$0xff]   ;;  %s4699_s24 = smov (!%p166_p3, %s2862_s24), 15  ;;  %v3400_v37 = vld [vmem:[%s4695_s1 + $0x494] ss:$8 sps:$4 sm:$0xff]  }
  0x13   : > { %2118 = vmatpush1.bf16.msra.mxu1 %v3366_v14  ;;  %v3403_v39 = vld [vmem:[%s4695_s1 + $0x490] ss:$8 sps:$4 sm:$0xff]   ;;  %v3404_v40 = vld [vmem:[%s4695_s1 + $0xa4] ss:$8 sps:$4 sm:$0xff]   ;;  %s3198_s21 = sshll.u32 %s4699_s24, 6 }
  0x14   : > { %2410 = vmatpush1.bf16.msra.mxu0 %v3367_v15  ;;  %2119 = vmatprep.subr.bf16.mxu1 %v3368_v16  ;;  %v3406_v41 = vld [vmem:[%s4695_s1 + $0x4a4] ss:$8 sps:$4 sm:$0xff]   ;;  %v3408_v42 = vld [vmem:[%s4695_s1 + $0xa0] ss:$8 sps:$4 sm:$0xff]   ;;  %s3904_s4 = scalar_lea.vmem %s4694_s0, %s3198_s21  ;;  %v3410_v44 = vld [vmem:[%s4695_s1 + $0xb4] ss:$8 sps:$4 sm:$0xff]  }
  0x15   : > { %2411 = vmatprep.subr.bf16.mxu0 %v3370_v17  ;;  %v3409_v43 = vld [vmem:[%s4695_s1 + $0x4a0] ss:$8 sps:$4 sm:$0xff]   ;;  %v3412_v45 = vld [vmem:[%s4695_s1 + $0x4b4] ss:$8 sps:$4 sm:$0xff]   ;;  %v3414_v46 = vld [vmem:[%s4695_s1 + $0xb0] ss:$8 sps:$4 sm:$0xff]  }
  0x16   : > { %v3415_v47 = vld [vmem:[%s4695_s1 + $0x4b0] ss:$8 sps:$4 sm:$0xff]   ;;  %v179_v48 = vld [vmem:[%s3904_s4] sm:$0xff]  ;;  %v3422_v58 = vld [vmem:[%s4695_s1 + $0xd4] ss:$8 sps:$4 sm:$0xff]  }
  0x17   : > { %2120 = vmatpush1.bf16.msra.mxu1 %v3372_v18  ;;  %v187_v49 = vld [vmem:[%s3904_s4 + $0x40] sm:$0xff]  ;;  %v3424_v59 = vld [vmem:[%s4695_s1 + $0x4d4] ss:$8 sps:$4 sm:$0xff]   ;;  %v3426_v60 = vld [vmem:[%s4695_s1 + $0xd0] ss:$8 sps:$4 sm:$0xff]  }
  0x18   : > { %2412 = vmatpush1.bf16.msra.mxu0 %v3373_v19  ;;  %2121 = vmatprep.subr.bf16.mxu1 %v3374_v20  ;;  %v3416_v50 = vld [vmem:[%s4695_s1 + $0xc4] ss:$8 sps:$4 sm:$0xff]   ;;  %v2869_v52 = vcombine.high %v179_v48, %v187_v49  ;;  %v3420_v56 = vld [vmem:[%s4695_s1 + $0xc0] ss:$8 sps:$4 sm:$0xff]   ;;  %v3427_v61 = vld [vmem:[%s4695_s1 + $0x4d0] ss:$8 sps:$4 sm:$0xff]   ;;  %v2868_v8 = vcombine.low %v179_v48, %v187_v49 }
  0x19   : > { %2413 = vmatprep.subr.bf16.mxu0 %v3376_v21  ;;  %v3418_v51 = vld [vmem:[%s4695_s1 + $0x4c4] ss:$8 sps:$4 sm:$0xff]   ;;  %v3421_v57 = vld [vmem:[%s4695_s1 + $0x4c0] ss:$8 sps:$4 sm:$0xff]   ;;  %v3434_v2 = vld [vmem:[%s4695_s1 + $0xf4] ss:$8 sps:$4 sm:$0xff]  }
  0x1a   : > { %v183_v53 = vld [vmem:[%s3904_s4 + $0x20] sm:$0xff]  ;;  %2143 = vmatprep.mubr.bf16.mxu1 %v2869_v52  ;;  %v3436_v3 = vld [vmem:[%s4695_s1 + $0x4f4] ss:$8 sps:$4 sm:$0xff]   ;;  %v3438_v4 = vld [vmem:[%s4695_s1 + $0xf0] ss:$8 sps:$4 sm:$0xff]  }
  0x1b   : > { %2122 = vmatpush1.bf16.msra.mxu1 %v3378_v22  ;;  %v191_v54 = vld [vmem:[%s3904_s4 + $0x60] sm:$0xff]  ;;  %v3439_v5 = vld [vmem:[%s4695_s1 + $0x4f0] ss:$8 sps:$4 sm:$0xff]   ;;  %v3448_v12 = vld [vmem:[%s4695_s1 + $0x114] ss:$8 sps:$4 sm:$0xff]  }
  0x1c   : > { %2414 = vmatpush1.bf16.msra.mxu0 %v3379_v23  ;;  %2123 = vmatprep.subr.bf16.mxu1 %v3380_v24  ;;  %v2877_v55 = vcombine.high %v183_v53, %v191_v54  ;;  %v3428_v62 = vld [vmem:[%s4695_s1 + $0xe4] ss:$8 sps:$4 sm:$0xff]   ;;  %v3432_v0 = vld [vmem:[%s4695_s1 + $0xe0] ss:$8 sps:$4 sm:$0xff]   ;;  %v2876_v10 = vcombine.low %v183_v53, %v191_v54  ;;  %v3451_v13 = vld [vmem:[%s4695_s1 + $0x514] ss:$8 sps:$4 sm:$0xff]  }
  0x1d   : > { %2415 = vmatprep.subr.bf16.mxu0 %v3382_v25  ;;  %v3430_v63 = vld [vmem:[%s4695_s1 + $0x4e4] ss:$8 sps:$4 sm:$0xff]   ;;  %v3433_v1 = vld [vmem:[%s4695_s1 + $0x4e0] ss:$8 sps:$4 sm:$0xff]   ;;  %v3446_v14 = vld [vmem:[%s4695_s1 + $0x110] ss:$8 sps:$4 sm:$0xff]  }
  0x1e   : > { %2435 = vmatprep.mubr.bf16.mxu0 %v2877_v55  ;;  %v3442_v6 = vld [vmem:[%s4695_s1 + $0x104] ss:$8 sps:$4 sm:$0xff]   ;;  %v3440_v9 = vld [vmem:[%s4695_s1 + $0x100] ss:$8 sps:$4 sm:$0xff]   ;;  %v3449_v15 = vld [vmem:[%s4695_s1 + $0x510] ss:$8 sps:$4 sm:$0xff]  }
  0x1f   : > { %2124 = vmatpush1.bf16.msra.mxu1 %v3384_v26  ;;  %v3445_v7 = vld [vmem:[%s4695_s1 + $0x504] ss:$8 sps:$4 sm:$0xff]   ;;  %v3443_v11 = vld [vmem:[%s4695_s1 + $0x500] ss:$8 sps:$4 sm:$0xff]   ;;  %v3460_v22 = vld [vmem:[%s4695_s1 + $0x134] ss:$8 sps:$4 sm:$0xff]  }
  0x20   : > { %2416 = vmatpush1.bf16.msra.mxu0 %v3385_v27  ;;  %2125 = vmatprep.subr.bf16.mxu1 %v3386_v28  ;;  %v3454_v16 = vld [vmem:[%s4695_s1 + $0x124] ss:$8 sps:$4 sm:$0xff]   ;;  %v3452_v18 = vld [vmem:[%s4695_s1 + $0x120] ss:$8 sps:$4 sm:$0xff]   ;;  %v3463_v23 = vld [vmem:[%s4695_s1 + $0x534] ss:$8 sps:$4 sm:$0xff]  }
  0x21   : > { %2417 = vmatprep.subr.bf16.mxu0 %v3388_v29  ;;  %v3457_v17 = vld [vmem:[%s4695_s1 + $0x524] ss:$8 sps:$4 sm:$0xff]   ;;  %v3455_v19 = vld [vmem:[%s4695_s1 + $0x520] ss:$8 sps:$4 sm:$0xff]   ;;  %v3458_v29 = vld [vmem:[%s4695_s1 + $0x130] ss:$8 sps:$4 sm:$0xff]  }
  0x22   : > { %v195_v20 = vld [vmem:[%s3904_s4 + $0x80] sm:$0xff] }
  0x23   : > { %2126 = vmatpush1.bf16.msra.mxu1 %v3390_v30  ;;  %v203_v21 = vld [vmem:[%s3904_s4 + $0xc0] sm:$0xff]  ;;  %v3461_v30 = vld [vmem:[%s4695_s1 + $0x530] ss:$8 sps:$4 sm:$0xff]  }
  0x24   : > { %2418 = vmatpush1.bf16.msra.mxu0 %v3391_v31  ;;  %2127 = vmatprep.subr.bf16.mxu1 %v3392_v32  ;;  %v2885_v24 = vcombine.high %v195_v20, %v203_v21  ;;  %v199_v25 = vld [vmem:[%s3904_s4 + $0xa0] sm:$0xff]  ;;  %v2884_v26 = vcombine.low %v195_v20, %v203_v21  ;;  %v3506_v20 = vld [vmem:[%s4695_s1 + $0x1b0] ss:$8 sps:$4 sm:$0xff]  }
  0x25   : > { %2419 = vmatprep.subr.bf16.mxu0 %v3394_v33  ;;  %v207_v27 = vld [vmem:[%s3904_s4 + $0xe0] sm:$0xff]  ;;  %v3509_v21 = vld [vmem:[%s4695_s1 + $0x5b0] ss:$8 sps:$4 sm:$0xff]  }
  0x26   : > { %v2893_v28 = vcombine.high %v199_v25, %v207_v27  ;;  %v2892_v31 = vcombine.low %v199_v25, %v207_v27  ;;  %v3466_v32 = vld [vmem:[%s4695_s1 + $0x144] ss:$8 sps:$4 sm:$0xff]   ;;  %v3476_v55 = vld [vmem:[%s4695_s1 + $0x160] ss:$8 sps:$4 sm:$0xff]   ;;  %v3523_v27 = vld [vmem:[%s4695_s1 + $0x5d4] ss:$8 sps:$4 sm:$0xff]  }
  0x27   : > { %2128 = vmatpush1.bf16.msra.mxu1 %v3396_v34  ;;  %v3469_v33 = vld [vmem:[%s4695_s1 + $0x544] ss:$8 sps:$4 sm:$0xff]   ;;  %v3515_v25 = vld [vmem:[%s4695_s1 + $0x5c0] ss:$8 sps:$4 sm:$0xff]  }
  0x28   : > { %2420 = vmatpush1.bf16.msra.mxu0 %v3397_v35  ;;  %2129 = vmatprep.subr.bf16.mxu1 %v3398_v36  ;;  %v211_v34 = vld [vmem:[%s3904_s4 + $0x100] sm:$0xff] }
  0x29   : > { %2421 = vmatprep.subr.bf16.mxu0 %v3400_v37  ;;  %v219_v35 = vld [vmem:[%s3904_s4 + $0x140] sm:$0xff] }
  0x2a   : > { %v3464_v36 = vld [vmem:[%s4695_s1 + $0x140] ss:$8 sps:$4 sm:$0xff]   ;;  %v2901_v37 = vcombine.high %v211_v34, %v219_v35 }
  0x2b   : > { %2130 = vmatpush1.bf16.msra.mxu1 %v3402_v38  ;;  %v3467_v38 = vld [vmem:[%s4695_s1 + $0x540] ss:$8 sps:$4 sm:$0xff]  }
  0x2c   : > { %2422 = vmatpush1.bf16.msra.mxu0 %v3403_v39  ;;  %2131 = vmatprep.subr.bf16.mxu1 %v3404_v40  ;;  %v215_v39 = vld [vmem:[%s3904_s4 + $0x120] sm:$0xff] }
  0x2d   : > { %2423 = vmatprep.subr.bf16.mxu0 %v3406_v41  ;;  %v223_v40 = vld [vmem:[%s3904_s4 + $0x160] sm:$0xff]  ;;  %v2900_v41 = vcombine.low %v211_v34, %v219_v35  ;;  %v3532_v34 = vld [vmem:[%s4695_s1 + $0x1f4] ss:$8 sps:$4 sm:$0xff]  }
  0x2e   : > { %v227_v48 = vld [vmem:[%s3904_s4 + $0x180] sm:$0xff]  ;;  %v3535_v35 = vld [vmem:[%s4695_s1 + $0x5f4] ss:$8 sps:$4 sm:$0xff]  }
  0x2f   : > { %2132 = vmatpush1.bf16.msra.mxu1 %v3408_v42  ;;  %v3472_v42 = vld [vmem:[%s4695_s1 + $0x154] ss:$8 sps:$4 sm:$0xff]   ;;  %v235_v49 = vld [vmem:[%s3904_s4 + $0x1c0] sm:$0xff] }
  0x30   : > { %2424 = vmatpush1.bf16.msra.mxu0 %v3409_v43  ;;  %2133 = vmatprep.subr.bf16.mxu1 %v3410_v44  ;;  %v2909_v43 = vcombine.high %v215_v39, %v223_v40  ;;  %v3475_v44 = vld [vmem:[%s4695_s1 + $0x554] ss:$8 sps:$4 sm:$0xff]   ;;  %v2917_v52 = vcombine.high %v227_v48, %v235_v49  ;;  %v231_v53 = vld [vmem:[%s3904_s4 + $0x1a0] sm:$0xff] }
  0x31   : > { %2425 = vmatprep.subr.bf16.mxu0 %v3412_v45  ;;  %v3470_v45 = vld [vmem:[%s4695_s1 + $0x150] ss:$8 sps:$4 sm:$0xff]   ;;  %v239_v54 = vld [vmem:[%s3904_s4 + $0x1e0] sm:$0xff] }
  0x33   : > { %2134 = vmatpush1.bf16.msra.mxu1 %v3414_v46  ;;  %v3473_v46 = vld [vmem:[%s4695_s1 + $0x550] ss:$8 sps:$4 sm:$0xff]  }
  0x34   : > { %2426 = vmatpush1.bf16.msra.mxu0 %v3415_v47  ;;  %2135 = vmatprep.subr.bf16.mxu1 %v3416_v50  ;;  %v2908_v47 = vcombine.low %v215_v39, %v223_v40  ;;  %v3478_v50 = vld [vmem:[%s4695_s1 + $0x164] ss:$8 sps:$4 sm:$0xff]   ;;  %v3536_v40 = vld [vmem:[%s4695_s1 + $0x200] ss:$8 sps:$4 sm:$0xff]  }
  0x35   : > { %2427 = vmatprep.subr.bf16.mxu0 %v3418_v51  ;;  %v3481_v51 = vld [vmem:[%s4695_s1 + $0x564] ss:$8 sps:$4 sm:$0xff]  }
  0x36   : > { %v3541_v39 = vld [vmem:[%s4695_s1 + $0x604] ss:$8 sps:$4 sm:$0xff]  }
  0x37   : > { %2136 = vmatpush1.bf16.msra.mxu1 %v3420_v56  ;;  %v3479_v56 = vld [vmem:[%s4695_s1 + $0x560] ss:$8 sps:$4 sm:$0xff]  }
  0x38   : > { %2428 = vmatpush1.bf16.msra.mxu0 %v3421_v57  ;;  %2137 = vmatprep.subr.bf16.mxu1 %v3422_v58  ;;  %v2925_v57 = vcombine.high %v231_v53, %v239_v54  ;;  %v2916_v58 = vcombine.low %v227_v48, %v235_v49  ;;  %v3544_v48 = vld [vmem:[%s4695_s1 + $0x214] ss:$8 sps:$4 sm:$0xff]  }
  0x39   : > { %2429 = vmatprep.subr.bf16.mxu0 %v3424_v59  ;;  %v3484_v59 = vld [vmem:[%s4695_s1 + $0x174] ss:$8 sps:$4 sm:$0xff]  }
  0x3a   : > { %v3547_v49 = vld [vmem:[%s4695_s1 + $0x614] ss:$8 sps:$4 sm:$0xff]  }
  0x3b   : > { %2138 = vmatpush1.bf16.msra.mxu1 %v3426_v60  ;;  %v3487_v60 = vld [vmem:[%s4695_s1 + $0x574] ss:$8 sps:$4 sm:$0xff]  }
  0x3c   : > { %2430 = vmatpush1.bf16.msra.mxu0 %v3427_v61  ;;  %2139 = vmatprep.subr.bf16.mxu1 %v3428_v62  ;;  %v3482_v61 = vld [vmem:[%s4695_s1 + $0x170] ss:$8 sps:$4 sm:$0xff]  }
  0x3d   : > { %2431 = vmatprep.subr.bf16.mxu0 %v3430_v63  ;;  %v3485_v62 = vld [vmem:[%s4695_s1 + $0x570] ss:$8 sps:$4 sm:$0xff]   ;;  %v4079_v63 = vld [vmem:[%s3904_s4 + $0x8] sm:$0xff] }
  0x3f   : > { %2140 = vmatpush1.bf16.msra.mxu1 %v3432_v0  ;;  %v2924_v0 = vcombine.low %v231_v53, %v239_v54  ;;  %v3545_v53 = vld [vmem:[%s4695_s1 + $0x610] ss:$8 sps:$4 sm:$0xff]   ;;  %v3550_v54 = vld [vmem:[%s4695_s1 + $0x224] ss:$8 sps:$4 sm:$0xff]  }
  0x40   : > { %2432 = vmatpush1.bf16.msra.mxu0 %v3433_v1  ;;  %2141 = vmatprep.subr.bf16.mxu1 %v3434_v2  ;;  %v4082_v1 = vld [vmem:[%s3904_s4 + $0x48] sm:$0xff] }
  0x41   : > { %2433 = vmatprep.subr.bf16.mxu0 %v3436_v3  ;;  %v3490_v2 = vld [vmem:[%s4695_s1 + $0x184] ss:$8 sps:$4 sm:$0xff]  }
  0x42   : > { %v3493_v3 = vld [vmem:[%s4695_s1 + $0x584] ss:$8 sps:$4 sm:$0xff]  }
  0x43   : > { %2142 = vmatpush1.bf16.msra.mxu1 %v3438_v4  ;;  %v2871_v4 = vcombine.high %v4079_v63, %v4082_v1 }
  0x44   : > { %2434 = vmatpush1.bf16.msra.mxu0 %v3439_v5  ;;  %2184 = vmatprep.subr.bf16.mxu1 %v3442_v6  ;;  %v4093_v5 = vld [vmem:[%s3904_s4 + $0x28] sm:$0xff] }
  0x45   : > { %2476 = vmatprep.subr.bf16.mxu0 %v3445_v7  ;;  %v4096_v6 = vld [vmem:[%s3904_s4 + $0x68] sm:$0xff] }
  0x46   : > { %2144 = vmatmul.mubr.bf16.vlgmr.msra.gmra.mrb[0].mxu1 %v2868_v8  ;;  %v2879_v7 = vcombine.high %v4093_v5, %v4096_v6  ;;  %v3488_v8 = vld [vmem:[%s4695_s1 + $0x180] ss:$8 sps:$4 sm:$0xff]  }
  0x47   : > { %2436 = vmatmul.mubr.bf16.vlgmr.msra.gmra.mrb[0].mxu0 %v2876_v10  ;;  %2185 = vmatpush1.bf16.msra.mxu1 %v3440_v9  ;;  %v3491_v9 = vld [vmem:[%s4695_s1 + $0x580] ss:$8 sps:$4 sm:$0xff]   ;;  %v3496_v10 = vld [vmem:[%s4695_s1 + $0x194] ss:$8 sps:$4 sm:$0xff]  }
  0x48   : > { %2477 = vmatpush1.bf16.msra.mxu0 %v3443_v11  ;;  %2186 = vmatprep.subr.bf16.mxu1 %v3448_v12  ;;  %v3499_v11 = vld [vmem:[%s4695_s1 + $0x594] ss:$8 sps:$4 sm:$0xff]   ;;  %v3494_v12 = vld [vmem:[%s4695_s1 + $0x190] ss:$8 sps:$4 sm:$0xff]  }
  0x49   : > { %2478 = vmatprep.subr.bf16.mxu0 %v3451_v13  ;;  %2153 = vmatprep.mubr.bf16.mxu1 %v2885_v24  ;;  %v3497_v13 = vld [vmem:[%s4695_s1 + $0x590] ss:$8 sps:$4 sm:$0xff]   ;;  %v3512_v24 = vld [vmem:[%s4695_s1 + $0x1c0] ss:$8 sps:$4 sm:$0xff]  }
  0x4a   : > { %2445 = vmatprep.mubr.bf16.mxu0 %v2893_v28  ;;  %v3518_v28 = vld [vmem:[%s4695_s1 + $0x1d0] ss:$8 sps:$4 sm:$0xff]  }
  0x4b   : > { %2187 = vmatpush1.bf16.msra.mxu1 %v3446_v14  ;;  %v3502_v14 = vld [vmem:[%s4695_s1 + $0x1a4] ss:$8 sps:$4 sm:$0xff]  }
  0x4c   : > { %2479 = vmatpush1.bf16.msra.mxu0 %v3449_v15  ;;  %2188 = vmatprep.subr.bf16.mxu1 %v3454_v16  ;;  %v3505_v15 = vld [vmem:[%s4695_s1 + $0x5a4] ss:$8 sps:$4 sm:$0xff]   ;;  %v3500_v16 = vld [vmem:[%s4695_s1 + $0x1a0] ss:$8 sps:$4 sm:$0xff]  }
  0x4d   : > { %2480 = vmatprep.subr.bf16.mxu0 %v3457_v17  ;;  %v3503_v17 = vld [vmem:[%s4695_s1 + $0x5a0] ss:$8 sps:$4 sm:$0xff]  }
  0x4e   : > { %2154 = vmatmul.mubr.bf16.gmra.mrb[4].mxu1 %v2884_v26  ;;  %v3520_v26 = vld [vmem:[%s4695_s1 + $0x1d4] ss:$8 sps:$4 sm:$0xff]  }
  0x4f   : > { %2189 = vmatpush1.bf16.msra.mxu1 %v3452_v18  ;;  %2446 = vmatmul.mubr.bf16.gmra.mrb[4].mxu0 %v2892_v31  ;;  %v3508_v18 = vld [vmem:[%s4695_s1 + $0x1b4] ss:$8 sps:$4 sm:$0xff]   ;;  %v3529_v31 = vld [vmem:[%s4695_s1 + $0x5e4] ss:$8 sps:$4 sm:$0xff]  }
  0x50   : > { %2481 = vmatpush1.bf16.msra.mxu0 %v3455_v19  ;;  %2190 = vmatprep.subr.bf16.mxu1 %v3460_v22  ;;  %v3511_v19 = vld [vmem:[%s4695_s1 + $0x5b4] ss:$8 sps:$4 sm:$0xff]   ;;  %v3514_v22 = vld [vmem:[%s4695_s1 + $0x1c4] ss:$8 sps:$4 sm:$0xff]  }
  0x51   : > { %2482 = vmatprep.subr.bf16.mxu0 %v3463_v23  ;;  %2163 = vmatprep.mubr.bf16.mxu1 %v2901_v37  ;;  %v3517_v23 = vld [vmem:[%s4695_s1 + $0x5c4] ss:$8 sps:$4 sm:$0xff]   ;;  %v3533_v37 = vld [vmem:[%s4695_s1 + $0x5f0] ss:$8 sps:$4 sm:$0xff]  }
  0x52   : > { %2455 = vmatprep.mubr.bf16.mxu0 %v2909_v43  ;;  %v2870_v43 = vcombine.low %v4079_v63, %v4082_v1  ;;  %v224_v63 = vld [vmem:[%s3904_s4 + $0x168] sm:$0xff]  ;;  %v3559_v1 = vld [vmem:[%s4695_s1 + $0x634] ss:$8 sps:$4 sm:$0xff]  }
  0x53   : > { %2191 = vmatpush1.bf16.msra.mxu1 %v3458_v29  ;;  %v3521_v29 = vld [vmem:[%s4695_s1 + $0x5d0] ss:$8 sps:$4 sm:$0xff]  }
  0x54   : > { %2483 = vmatpush1.bf16.msra.mxu0 %v3461_v30  ;;  %2192 = vmatprep.subr.bf16.mxu1 %v3466_v32  ;;  %v3526_v30 = vld [vmem:[%s4695_s1 + $0x1e4] ss:$8 sps:$4 sm:$0xff]   ;;  %v3524_v32 = vld [vmem:[%s4695_s1 + $0x1e0] ss:$8 sps:$4 sm:$0xff]  }
  0x55   : > { %2484 = vmatprep.subr.bf16.mxu0 %v3469_v33  ;;  %v3527_v33 = vld [vmem:[%s4695_s1 + $0x5e0] ss:$8 sps:$4 sm:$0xff]  }
  0x56   : > { %2164 = vmatmul.mubr.bf16.gmra.mrb[8].mxu1 %v2900_v41  ;;  %v3539_v41 = vld [vmem:[%s4695_s1 + $0x600] ss:$8 sps:$4 sm:$0xff]  }
  0x57   : > { %2193 = vmatpush1.bf16.msra.mxu1 %v3464_v36  ;;  %2456 = vmatmul.mubr.bf16.gmra.mrb[8].mxu0 %v2908_v47  ;;  %v3530_v36 = vld [vmem:[%s4695_s1 + $0x1f0] ss:$8 sps:$4 sm:$0xff]   ;;  %v208_v47 = vld [vmem:[%s3904_s4 + $0xe8] sm:$0xff] }
  0x58   : > { %2485 = vmatpush1.bf16.msra.mxu0 %v3467_v38  ;;  %2194 = vmatprep.subr.bf16.mxu1 %v3472_v42  ;;  %v3538_v38 = vld [vmem:[%s4695_s1 + $0x204] ss:$8 sps:$4 sm:$0xff]  }
  0x59   : > { %2486 = vmatprep.subr.bf16.mxu0 %v3475_v44  ;;  %2173 = vmatprep.mubr.bf16.mxu1 %v2917_v52  ;;  %v196_v42 = vld [vmem:[%s3904_s4 + $0x88] sm:$0xff]  ;;  %v2878_v44 = vcombine.low %v4093_v5, %v4096_v6  ;;  %v3542_v52 = vld [vmem:[%s4695_s1 + $0x210] ss:$8 sps:$4 sm:$0xff]  }
  0x5a   : > { %2465 = vmatprep.mubr.bf16.mxu0 %v2925_v57  ;;  %v3551_v57 = vld [vmem:[%s4695_s1 + $0x620] ss:$8 sps:$4 sm:$0xff]   ;;  %v3557_v5 = vld [vmem:[%s4695_s1 + $0x630] ss:$8 sps:$4 sm:$0xff]   ;;  %v3562_v6 = vld [vmem:[%s4695_s1 + $0x244] ss:$8 sps:$4 sm:$0xff]  }
  0x5b   : > { %2195 = vmatpush1.bf16.msra.mxu1 %v3470_v45  ;;  %v204_v45 = vld [vmem:[%s3904_s4 + $0xc8] sm:$0xff] }
  0x5c   : > { %2487 = vmatpush1.bf16.msra.mxu0 %v3473_v46  ;;  %2196 = vmatprep.subr.bf16.mxu1 %v3478_v50  ;;  %v200_v46 = vld [vmem:[%s3904_s4 + $0xa8] sm:$0xff]  ;;  %v2887_v50 = vcombine.high %v196_v42, %v204_v45 }
  0x5d   : > { %2488 = vmatprep.subr.bf16.mxu0 %v3481_v51  ;;  %v2895_v51 = vcombine.high %v200_v46, %v208_v47 }
  0x5e   : > { %2174 = vmatmul.mubr.bf16.gmra.mrb[12].mxu1 %v2916_v58  ;;  %v212_v58 = vld [vmem:[%s3904_s4 + $0x108] sm:$0xff] }
  0x5f   : > { %2197 = vmatpush1.bf16.msra.mxu1 %v3476_v55  ;;  %2216 = vmatprep.mubr.bf16.mxu1 %v2871_v4  ;;  %v3553_v55 = vld [vmem:[%s4695_s1 + $0x624] ss:$8 sps:$4 sm:$0xff]   ;;  %v3554_v4 = vld [vmem:[%s4695_s1 + $0x230] ss:$8 sps:$4 sm:$0xff]  }
  0x60   : > { %2489 = vmatpush1.bf16.msra.mxu0 %v3479_v56  ;;  %2198 = vmatprep.subr.bf16.mxu1 %v3484_v59  ;;  %v3548_v56 = vld [vmem:[%s4695_s1 + $0x220] ss:$8 sps:$4 sm:$0xff]  }
  0x61   : > { %2490 = vmatprep.subr.bf16.mxu0 %v3487_v60  ;;  %2466 = vmatmul.mubr.bf16.gmra.mrb[12].mxu0 %v2924_v0  ;;  %v220_v59 = vld [vmem:[%s3904_s4 + $0x148] sm:$0xff]  ;;  %v2886_v60 = vcombine.low %v196_v42, %v204_v45  ;;  %v3556_v0 = vld [vmem:[%s4695_s1 + $0x234] ss:$8 sps:$4 sm:$0xff]   ;;  %v3593_v45 = vld [vmem:[%s4695_s1 + $0x690] ss:$8 sps:$4 sm:$0xff]  }
  0x62   : > { %2508 = vmatprep.mubr.bf16.mxu0 %v2879_v7  ;;  %v3565_v7 = vld [vmem:[%s4695_s1 + $0x644] ss:$8 sps:$4 sm:$0xff]   ;;  %v3592_v42 = vld [vmem:[%s4695_s1 + $0x294] ss:$8 sps:$4 sm:$0xff]  }
  0x63   : > { %2199 = vmatpush1.bf16.msra.mxu1 %v3482_v61  ;;  %v2894_v61 = vcombine.low %v200_v46, %v208_v47  ;;  %v3598_v46 = vld [vmem:[%s4695_s1 + $0x2a4] ss:$8 sps:$4 sm:$0xff]  }
  0x64   : > { %2491 = vmatpush1.bf16.msra.mxu0 %v3485_v62  ;;  %2200 = vmatprep.subr.bf16.mxu1 %v3490_v2  ;;  %v216_v62 = vld [vmem:[%s3904_s4 + $0x128] sm:$0xff]  ;;  %v2903_v2 = vcombine.high %v212_v58, %v220_v59 }
  0x65   : > { %2492 = vmatprep.subr.bf16.mxu0 %v3493_v3  ;;  %v2911_v3 = vcombine.high %v216_v62, %v224_v63  ;;  %v3601_v47 = vld [vmem:[%s4695_s1 + $0x6a4] ss:$8 sps:$4 sm:$0xff]  }
  0x67   : > { %2201 = vmatpush1.bf16.msra.mxu1 %v3488_v8  ;;  %v3560_v8 = vld [vmem:[%s4695_s1 + $0x240] ss:$8 sps:$4 sm:$0xff]  }
  0x68   : > { %2493 = vmatpush1.bf16.msra.mxu0 %v3491_v9  ;;  %2202 = vmatprep.subr.bf16.mxu1 %v3496_v10  ;;  %v3563_v9 = vld [vmem:[%s4695_s1 + $0x640] ss:$8 sps:$4 sm:$0xff]  }
  0x69   : > { %2494 = vmatprep.subr.bf16.mxu0 %v3499_v11  ;;  %v228_v10 = vld [vmem:[%s3904_s4 + $0x188] sm:$0xff] }
  0x6a   : > { %v236_v11 = vld [vmem:[%s3904_s4 + $0x1c8] sm:$0xff] }
  0x6b   : > { %2203 = vmatpush1.bf16.msra.mxu1 %v3494_v12  ;;  %v2902_v12 = vcombine.low %v212_v58, %v220_v59  ;;  %v3616_v58 = vld [vmem:[%s4695_s1 + $0x2d4] ss:$8 sps:$4 sm:$0xff]  }
  0x6c   : > { %2495 = vmatpush1.bf16.msra.mxu0 %v3497_v13  ;;  %2204 = vmatprep.subr.bf16.mxu1 %v3502_v14  ;;  %v2910_v13 = vcombine.low %v216_v62, %v224_v63  ;;  %v232_v14 = vld [vmem:[%s3904_s4 + $0x1a8] sm:$0xff]  ;;  %v3619_v59 = vld [vmem:[%s4695_s1 + $0x6d4] ss:$8 sps:$4 sm:$0xff]  }
  0x6d   : > { %2496 = vmatprep.subr.bf16.mxu0 %v3505_v15  ;;  %v240_v15 = vld [vmem:[%s3904_s4 + $0x1e8] sm:$0xff] }
  0x6e   : > { %v3622_v62 = vld [vmem:[%s4695_s1 + $0x2e4] ss:$8 sps:$4 sm:$0xff]  }
  0x6f   : > { %2205 = vmatpush1.bf16.msra.mxu1 %v3500_v16  ;;  %v3568_v16 = vld [vmem:[%s4695_s1 + $0x254] ss:$8 sps:$4 sm:$0xff]   ;;  %v3625_v63 = vld [vmem:[%s4695_s1 + $0x6e4] ss:$8 sps:$4 sm:$0xff]  }
  0x70   : > { %2497 = vmatpush1.bf16.msra.mxu0 %v3503_v17  ;;  %2206 = vmatprep.subr.bf16.mxu1 %v3508_v18  ;;  %v3571_v17 = vld [vmem:[%s4695_s1 + $0x654] ss:$8 sps:$4 sm:$0xff]   ;;  %v2919_v18 = vcombine.high %v228_v10, %v236_v11 }
  0x71   : > { %2498 = vmatprep.subr.bf16.mxu0 %v3511_v19  ;;  %v2927_v19 = vcombine.high %v232_v14, %v240_v15 }
  0x73   : > { %2207 = vmatpush1.bf16.msra.mxu1 %v3506_v20  ;;  %v3566_v20 = vld [vmem:[%s4695_s1 + $0x250] ss:$8 sps:$4 sm:$0xff]  }
  0x74   : > { %2499 = vmatpush1.bf16.msra.mxu0 %v3509_v21  ;;  %2208 = vmatprep.subr.bf16.mxu1 %v3514_v22  ;;  %v3569_v21 = vld [vmem:[%s4695_s1 + $0x650] ss:$8 sps:$4 sm:$0xff]   ;;  %v3574_v22 = vld [vmem:[%s4695_s1 + $0x264] ss:$8 sps:$4 sm:$0xff]  }
  0x75   : > { %2500 = vmatprep.subr.bf16.mxu0 %v3517_v23  ;;  %v3577_v23 = vld [vmem:[%s4695_s1 + $0x664] ss:$8 sps:$4 sm:$0xff]  }
  0x77   : > { %2209 = vmatpush1.bf16.msra.mxu1 %v3512_v24  ;;  %v3572_v24 = vld [vmem:[%s4695_s1 + $0x260] ss:$8 sps:$4 sm:$0xff]  }
  0x78   : > { %2501 = vmatpush1.bf16.msra.mxu0 %v3515_v25  ;;  %2210 = vmatprep.subr.bf16.mxu1 %v3520_v26  ;;  %v3575_v25 = vld [vmem:[%s4695_s1 + $0x660] ss:$8 sps:$4 sm:$0xff]   ;;  %v4291_v26 = vld [vmem:[%s3904_s4 + $0x10] sm:$0xff] }
  0x79   : > { %2502 = vmatprep.subr.bf16.mxu0 %v3523_v27  ;;  %v4294_v27 = vld [vmem:[%s3904_s4 + $0x50] sm:$0xff] }
  0x7b   : > { %2211 = vmatpush1.bf16.msra.mxu1 %v3518_v28  ;;  %v2918_v28 = vcombine.low %v228_v10, %v236_v11  ;;  %v205_v11 = vld [vmem:[%s3904_s4 + $0xd0] sm:$0xff] }
  0x7c   : > { %2503 = vmatpush1.bf16.msra.mxu0 %v3521_v29  ;;  %2212 = vmatprep.subr.bf16.mxu1 %v3526_v30  ;;  %v2926_v29 = vcombine.low %v232_v14, %v240_v15  ;;  %v4297_v30 = vld [vmem:[%s3904_s4 + $0x30] sm:$0xff]  ;;  %v3632_v14 = vld [vmem:[%s4695_s1 + $0x300] ss:$8 sps:$4 sm:$0xff]  }
  0x7d   : > { %2504 = vmatprep.subr.bf16.mxu0 %v3529_v31  ;;  %v4300_v31 = vld [vmem:[%s3904_s4 + $0x70] sm:$0xff]  ;;  %v3635_v15 = vld [vmem:[%s4695_s1 + $0x700] ss:$8 sps:$4 sm:$0xff]  }
  0x7e   : > { %v2880_v10 = vcombine.low %v4297_v30, %v4300_v31 }
  0x7f   : > { %2213 = vmatpush1.bf16.msra.mxu1 %v3524_v32  ;;  %v3580_v32 = vld [vmem:[%s4695_s1 + $0x274] ss:$8 sps:$4 sm:$0xff]  }
  0x80   : > { %2505 = vmatpush1.bf16.msra.mxu0 %v3527_v33  ;;  %2214 = vmatprep.subr.bf16.mxu1 %v3532_v34  ;;  %v3583_v33 = vld [vmem:[%s4695_s1 + $0x674] ss:$8 sps:$4 sm:$0xff]   ;;  %v2873_v34 = vcombine.high %v4291_v26, %v4294_v27 }
  0x81   : > { %2506 = vmatprep.subr.bf16.mxu0 %v3535_v35  ;;  %v2881_v35 = vcombine.high %v4297_v30, %v4300_v31  ;;  %v3644_v30 = vld [vmem:[%s4695_s1 + $0x320] ss:$8 sps:$4 sm:$0xff]  }
  0x82   : > { %v3647_v31 = vld [vmem:[%s4695_s1 + $0x720] ss:$8 sps:$4 sm:$0xff]  }
  0x83   : > { %2215 = vmatpush1.bf16.msra.mxu1 %v3530_v36  ;;  %v3578_v36 = vld [vmem:[%s4695_s1 + $0x270] ss:$8 sps:$4 sm:$0xff]  }
  0x84   : > { %2507 = vmatpush1.bf16.msra.mxu0 %v3533_v37  ;;  %2257 = vmatprep.subr.bf16.mxu1 %v3538_v38  ;;  %v3581_v37 = vld [vmem:[%s4695_s1 + $0x670] ss:$8 sps:$4 sm:$0xff]   ;;  %v3586_v38 = vld [vmem:[%s4695_s1 + $0x284] ss:$8 sps:$4 sm:$0xff]  }
  0x85   : > { %2549 = vmatprep.subr.bf16.mxu0 %v3541_v39  ;;  %v3589_v39 = vld [vmem:[%s4695_s1 + $0x684] ss:$8 sps:$4 sm:$0xff]  }
  0x86   : > { %2217 = vmatmul.mubr.bf16.vlgmr.msra.gmra.mrb[0].mxu1 %v2870_v43  ;;  %v3595_v43 = vld [vmem:[%s4695_s1 + $0x694] ss:$8 sps:$4 sm:$0xff]  }
  0x87   : > { %2509 = vmatmul.mubr.bf16.vlgmr.msra.gmra.mrb[0].mxu0 %v2878_v44  ;;  %2258 = vmatpush1.bf16.msra.mxu1 %v3536_v40  ;;  %v3584_v40 = vld [vmem:[%s4695_s1 + $0x280] ss:$8 sps:$4 sm:$0xff]   ;;  %v3590_v44 = vld [vmem:[%s4695_s1 + $0x290] ss:$8 sps:$4 sm:$0xff]  }
  0x88   : > { %2550 = vmatpush1.bf16.msra.mxu0 %v3539_v41  ;;  %2259 = vmatprep.subr.bf16.mxu1 %v3544_v48  ;;  %v3587_v41 = vld [vmem:[%s4695_s1 + $0x680] ss:$8 sps:$4 sm:$0xff]  }
  0x89   : > { %2551 = vmatprep.subr.bf16.mxu0 %v3547_v49  ;;  %2226 = vmatprep.mubr.bf16.mxu1 %v2887_v50  ;;  %v3596_v48 = vld [vmem:[%s4695_s1 + $0x2a0] ss:$8 sps:$4 sm:$0xff]   ;;  %v3604_v50 = vld [vmem:[%s4695_s1 + $0x2b4] ss:$8 sps:$4 sm:$0xff]  }
  0x8a   : > { %2518 = vmatprep.mubr.bf16.mxu0 %v2895_v51  ;;  %v3599_v49 = vld [vmem:[%s4695_s1 + $0x6a0] ss:$8 sps:$4 sm:$0xff]   ;;  %v3607_v51 = vld [vmem:[%s4695_s1 + $0x6b4] ss:$8 sps:$4 sm:$0xff]  }
  0x8b   : > { %2260 = vmatpush1.bf16.msra.mxu1 %v3542_v52  ;;  %v3602_v52 = vld [vmem:[%s4695_s1 + $0x2b0] ss:$8 sps:$4 sm:$0xff]  }
  0x8c   : > { %2552 = vmatpush1.bf16.msra.mxu0 %v3545_v53  ;;  %2261 = vmatprep.subr.bf16.mxu1 %v3550_v54  ;;  %v3605_v53 = vld [vmem:[%s4695_s1 + $0x6b0] ss:$8 sps:$4 sm:$0xff]   ;;  %v3610_v54 = vld [vmem:[%s4695_s1 + $0x2c4] ss:$8 sps:$4 sm:$0xff]  }
  0x8d   : > { %2553 = vmatprep.subr.bf16.mxu0 %v3553_v55  ;;  %v3613_v55 = vld [vmem:[%s4695_s1 + $0x6c4] ss:$8 sps:$4 sm:$0xff]  }
  0x8e   : > { %2227 = vmatmul.mubr.bf16.gmra.mrb[4].mxu1 %v2886_v60  ;;  %v3614_v60 = vld [vmem:[%s4695_s1 + $0x2d0] ss:$8 sps:$4 sm:$0xff]  }
  0x8f   : > { %2519 = vmatmul.mubr.bf16.gmra.mrb[4].mxu0 %v2894_v61  ;;  %2262 = vmatpush1.bf16.msra.mxu1 %v3548_v56  ;;  %v3608_v56 = vld [vmem:[%s4695_s1 + $0x2c0] ss:$8 sps:$4 sm:$0xff]   ;;  %v3617_v61 = vld [vmem:[%s4695_s1 + $0x6d0] ss:$8 sps:$4 sm:$0xff]  }
  0x90   : > { %2554 = vmatpush1.bf16.msra.mxu0 %v3551_v57  ;;  %2263 = vmatprep.subr.bf16.mxu1 %v3556_v0  ;;  %v3611_v57 = vld [vmem:[%s4695_s1 + $0x6c0] ss:$8 sps:$4 sm:$0xff]  }
  0x91   : > { %2555 = vmatprep.subr.bf16.mxu0 %v3559_v1  ;;  %2236 = vmatprep.mubr.bf16.mxu1 %v2903_v2  ;;  %v3620_v0 = vld [vmem:[%s4695_s1 + $0x2e0] ss:$8 sps:$4 sm:$0xff]   ;;  %v3628_v2 = vld [vmem:[%s4695_s1 + $0x2f4] ss:$8 sps:$4 sm:$0xff]  }
  0x92   : > { %2528 = vmatprep.mubr.bf16.mxu0 %v2911_v3  ;;  %v3623_v1 = vld [vmem:[%s4695_s1 + $0x6e0] ss:$8 sps:$4 sm:$0xff]   ;;  %v3631_v3 = vld [vmem:[%s4695_s1 + $0x6f4] ss:$8 sps:$4 sm:$0xff]  }
  0x93   : > { %2264 = vmatpush1.bf16.msra.mxu1 %v3554_v4  ;;  %v3626_v4 = vld [vmem:[%s4695_s1 + $0x2f0] ss:$8 sps:$4 sm:$0xff]  }
  0x94   : > { %2556 = vmatpush1.bf16.msra.mxu0 %v3557_v5  ;;  %2265 = vmatprep.subr.bf16.mxu1 %v3562_v6  ;;  %v3629_v5 = vld [vmem:[%s4695_s1 + $0x6f0] ss:$8 sps:$4 sm:$0xff]   ;;  %v3634_v6 = vld [vmem:[%s4695_s1 + $0x304] ss:$8 sps:$4 sm:$0xff]  }
  0x95   : > { %2557 = vmatprep.subr.bf16.mxu0 %v3565_v7  ;;  %v3637_v7 = vld [vmem:[%s4695_s1 + $0x704] ss:$8 sps:$4 sm:$0xff]  }
  0x96   : > { %2237 = vmatmul.mubr.bf16.gmra.mrb[8].mxu1 %v2902_v12  ;;  %v201_v12 = vld [vmem:[%s3904_s4 + $0xb0] sm:$0xff] }
  0x97   : > { %2529 = vmatmul.mubr.bf16.gmra.mrb[8].mxu0 %v2910_v13  ;;  %2266 = vmatpush1.bf16.msra.mxu1 %v3560_v8  ;;  %v197_v8 = vld [vmem:[%s3904_s4 + $0x90] sm:$0xff] }
  0x98   : > { %2558 = vmatpush1.bf16.msra.mxu0 %v3563_v9  ;;  %2267 = vmatprep.subr.bf16.mxu1 %v3568_v16  ;;  %v2872_v9 = vcombine.low %v4291_v26, %v4294_v27  ;;  %v209_v13 = vld [vmem:[%s3904_s4 + $0xf0] sm:$0xff] }
  0x99   : > { %2559 = vmatprep.subr.bf16.mxu0 %v3571_v17  ;;  %2246 = vmatprep.mubr.bf16.mxu1 %v2919_v18  ;;  %v3640_v16 = vld [vmem:[%s4695_s1 + $0x314] ss:$8 sps:$4 sm:$0xff]   ;;  %v2889_v18 = vcombine.high %v197_v8, %v205_v11  ;;  %v2896_v26 = vcombine.low %v201_v12, %v209_v13 }
  0x9a   : > { %2538 = vmatprep.mubr.bf16.mxu0 %v2927_v19  ;;  %v3643_v17 = vld [vmem:[%s4695_s1 + $0x714] ss:$8 sps:$4 sm:$0xff]   ;;  %v2897_v19 = vcombine.high %v201_v12, %v209_v13  ;;  %v3686_v12 = vld [vmem:[%s4695_s1 + $0x390] ss:$8 sps:$4 sm:$0xff]  }
  0x9b   : > { %2268 = vmatpush1.bf16.msra.mxu1 %v3566_v20  ;;  %v3638_v20 = vld [vmem:[%s4695_s1 + $0x310] ss:$8 sps:$4 sm:$0xff]  }
  0x9c   : > { %2560 = vmatpush1.bf16.msra.mxu0 %v3569_v21  ;;  %2269 = vmatprep.subr.bf16.mxu1 %v3574_v22  ;;  %v3641_v21 = vld [vmem:[%s4695_s1 + $0x710] ss:$8 sps:$4 sm:$0xff]   ;;  %v3646_v22 = vld [vmem:[%s4695_s1 + $0x324] ss:$8 sps:$4 sm:$0xff]  }
  0x9d   : > { %2561 = vmatprep.subr.bf16.mxu0 %v3577_v23  ;;  %v3649_v23 = vld [vmem:[%s4695_s1 + $0x724] ss:$8 sps:$4 sm:$0xff]   ;;  %v221_v27 = vld [vmem:[%s3904_s4 + $0x150] sm:$0xff] }
  0x9e   : > { %2247 = vmatmul.mubr.bf16.gmra.mrb[12].mxu1 %v2918_v28  ;;  %v217_v28 = vld [vmem:[%s3904_s4 + $0x130] sm:$0xff] }
  0x9f   : > { %2539 = vmatmul.mubr.bf16.gmra.mrb[12].mxu0 %v2926_v29  ;;  %2270 = vmatpush1.bf16.msra.mxu1 %v3572_v24  ;;  %v213_v24 = vld [vmem:[%s3904_s4 + $0x110] sm:$0xff] }
  0xa0   : > { %2562 = vmatpush1.bf16.msra.mxu0 %v3575_v25  ;;  %2271 = vmatprep.subr.bf16.mxu1 %v3580_v32  ;;  %v2888_v25 = vcombine.low %v197_v8, %v205_v11  ;;  %v225_v29 = vld [vmem:[%s3904_s4 + $0x170] sm:$0xff]  ;;  %v3680_v8 = vld [vmem:[%s4695_s1 + $0x380] ss:$8 sps:$4 sm:$0xff]  }
  0xa1   : > { %2563 = vmatprep.subr.bf16.mxu0 %v3583_v33  ;;  %2289 = vmatprep.mubr.bf16.mxu1 %v2873_v34  ;;  %v3652_v32 = vld [vmem:[%s4695_s1 + $0x334] ss:$8 sps:$4 sm:$0xff]   ;;  %v2905_v34 = vcombine.high %v213_v24, %v221_v27  ;;  %v3689_v13 = vld [vmem:[%s4695_s1 + $0x790] ss:$8 sps:$4 sm:$0xff]  }
  0xa2   : > { %2581 = vmatprep.mubr.bf16.mxu0 %v2881_v35  ;;  %v3655_v33 = vld [vmem:[%s4695_s1 + $0x734] ss:$8 sps:$4 sm:$0xff]   ;;  %v2913_v35 = vcombine.high %v217_v28, %v225_v29 }
  0xa3   : > { %2272 = vmatpush1.bf16.msra.mxu1 %v3578_v36  ;;  %v3650_v36 = vld [vmem:[%s4695_s1 + $0x330] ss:$8 sps:$4 sm:$0xff]   ;;  %v3691_v11 = vld [vmem:[%s4695_s1 + $0x794] ss:$8 sps:$4 sm:$0xff]  }
  0xa4   : > { %2564 = vmatpush1.bf16.msra.mxu0 %v3581_v37  ;;  %2273 = vmatprep.subr.bf16.mxu1 %v3586_v38  ;;  %v3653_v37 = vld [vmem:[%s4695_s1 + $0x730] ss:$8 sps:$4 sm:$0xff]   ;;  %v3658_v38 = vld [vmem:[%s4695_s1 + $0x344] ss:$8 sps:$4 sm:$0xff]  }
  0xa5   : > { %2565 = vmatprep.subr.bf16.mxu0 %v3589_v39  ;;  %v3661_v39 = vld [vmem:[%s4695_s1 + $0x744] ss:$8 sps:$4 sm:$0xff]  }
  0xa7   : > { %2274 = vmatpush1.bf16.msra.mxu1 %v3584_v40  ;;  %v229_v40 = vld [vmem:[%s3904_s4 + $0x190] sm:$0xff] }
  0xa8   : > { %2566 = vmatpush1.bf16.msra.mxu0 %v3587_v41  ;;  %2275 = vmatprep.subr.bf16.mxu1 %v3592_v42  ;;  %v2904_v41 = vcombine.low %v213_v24, %v221_v27  ;;  %v2912_v42 = vcombine.low %v217_v28, %v225_v29  ;;  %v3704_v24 = vld [vmem:[%s4695_s1 + $0x3c0] ss:$8 sps:$4 sm:$0xff]   ;;  %v3715_v27 = vld [vmem:[%s4695_s1 + $0x7d4] ss:$8 sps:$4 sm:$0xff]   ;;  %v3710_v28 = vld [vmem:[%s4695_s1 + $0x3d0] ss:$8 sps:$4 sm:$0xff]  }
  0xa9   : > { %2567 = vmatprep.subr.bf16.mxu0 %v3595_v43  ;;  %v237_v43 = vld [vmem:[%s3904_s4 + $0x1d0] sm:$0xff] }
  0xaa   : > { %v3713_v29 = vld [vmem:[%s4695_s1 + $0x7d0] ss:$8 sps:$4 sm:$0xff]  }
  0xab   : > { %2276 = vmatpush1.bf16.msra.mxu1 %v3590_v44  ;;  %v233_v44 = vld [vmem:[%s3904_s4 + $0x1b0] sm:$0xff] }
  0xac   : > { %2568 = vmatpush1.bf16.msra.mxu0 %v3593_v45  ;;  %2277 = vmatprep.subr.bf16.mxu1 %v3598_v46  ;;  %v241_v45 = vld [vmem:[%s3904_s4 + $0x1f0] sm:$0xff]  ;;  %v3656_v46 = vld [vmem:[%s4695_s1 + $0x340] ss:$8 sps:$4 sm:$0xff]  }
  0xad   : > { %2569 = vmatprep.subr.bf16.mxu0 %v3601_v47  ;;  %v3659_v47 = vld [vmem:[%s4695_s1 + $0x740] ss:$8 sps:$4 sm:$0xff]  }
  0xaf   : > { %2278 = vmatpush1.bf16.msra.mxu1 %v3596_v48  ;;  %v3664_v48 = vld [vmem:[%s4695_s1 + $0x354] ss:$8 sps:$4 sm:$0xff]  }
  0xb0   : > { %2570 = vmatpush1.bf16.msra.mxu0 %v3599_v49  ;;  %2279 = vmatprep.subr.bf16.mxu1 %v3604_v50  ;;  %v3667_v49 = vld [vmem:[%s4695_s1 + $0x754] ss:$8 sps:$4 sm:$0xff]   ;;  %v2921_v50 = vcombine.high %v229_v40, %v237_v43 }
  0xb1   : > { %2571 = vmatprep.subr.bf16.mxu0 %v3607_v51  ;;  %v2929_v51 = vcombine.high %v233_v44, %v241_v45 }
  0xb3   : > { %2280 = vmatpush1.bf16.msra.mxu1 %v3602_v52  ;;  %v3662_v52 = vld [vmem:[%s4695_s1 + $0x350] ss:$8 sps:$4 sm:$0xff]  }
  0xb4   : > { %2572 = vmatpush1.bf16.msra.mxu0 %v3605_v53  ;;  %2281 = vmatprep.subr.bf16.mxu1 %v3610_v54  ;;  %v3665_v53 = vld [vmem:[%s4695_s1 + $0x750] ss:$8 sps:$4 sm:$0xff]   ;;  %v3670_v54 = vld [vmem:[%s4695_s1 + $0x364] ss:$8 sps:$4 sm:$0xff]  }
  0xb5   : > { %2573 = vmatprep.subr.bf16.mxu0 %v3613_v55  ;;  %v3673_v55 = vld [vmem:[%s4695_s1 + $0x764] ss:$8 sps:$4 sm:$0xff]  }
  0xb7   : > { %2282 = vmatpush1.bf16.msra.mxu1 %v3608_v56  ;;  %v4509_v56 = vld [vmem:[%s3904_s4 + $0x18] sm:$0xff] }
  0xb8   : > { %2574 = vmatpush1.bf16.msra.mxu0 %v3611_v57  ;;  %2283 = vmatprep.subr.bf16.mxu1 %v3616_v58  ;;  %v2920_v57 = vcombine.low %v229_v40, %v237_v43  ;;  %v2928_v58 = vcombine.low %v233_v44, %v241_v45  ;;  %v202_v40 = vld [vmem:[%s3904_s4 + $0xb8] sm:$0xff] }
  0xb9   : > { %2575 = vmatprep.subr.bf16.mxu0 %v3619_v59  ;;  %v4512_v59 = vld [vmem:[%s3904_s4 + $0x58] sm:$0xff] }
  0xbb   : > { %2284 = vmatpush1.bf16.msra.mxu1 %v3614_v60  ;;  %v4515_v60 = vld [vmem:[%s3904_s4 + $0x38] sm:$0xff] }
  0xbc   : > { %2576 = vmatpush1.bf16.msra.mxu0 %v3617_v61  ;;  %2285 = vmatprep.subr.bf16.mxu1 %v3622_v62  ;;  %v4518_v61 = vld [vmem:[%s3904_s4 + $0x78] sm:$0xff]  ;;  %v3668_v62 = vld [vmem:[%s4695_s1 + $0x360] ss:$8 sps:$4 sm:$0xff]  }
  0xbd   : > { %2577 = vmatprep.subr.bf16.mxu0 %v3625_v63  ;;  %v3671_v63 = vld [vmem:[%s4695_s1 + $0x760] ss:$8 sps:$4 sm:$0xff]   ;;  %v2882_v43 = vcombine.low %v4515_v60, %v4518_v61 }
  0xbf   : > { %2286 = vmatpush1.bf16.msra.mxu1 %v3620_v0  ;;  %v3676_v0 = vld [vmem:[%s4695_s1 + $0x374] ss:$8 sps:$4 sm:$0xff]  }
  0xc0   : > { %2578 = vmatpush1.bf16.msra.mxu0 %v3623_v1  ;;  %2287 = vmatprep.subr.bf16.mxu1 %v3628_v2  ;;  %v3679_v1 = vld [vmem:[%s4695_s1 + $0x774] ss:$8 sps:$4 sm:$0xff]   ;;  %v2875_v2 = vcombine.high %v4509_v56, %v4512_v59 }
  0xc1   : > { %2579 = vmatprep.subr.bf16.mxu0 %v3631_v3  ;;  %v2883_v3 = vcombine.high %v4515_v60, %v4518_v61 }
  0xc3   : > { %2288 = vmatpush1.bf16.msra.mxu1 %v3626_v4  ;;  %v3674_v4 = vld [vmem:[%s4695_s1 + $0x370] ss:$8 sps:$4 sm:$0xff]  }
  0xc4   : > { %2580 = vmatpush1.bf16.msra.mxu0 %v3629_v5  ;;  %2330 = vmatprep.subr.bf16.mxu1 %v3634_v6  ;;  %v3677_v5 = vld [vmem:[%s4695_s1 + $0x770] ss:$8 sps:$4 sm:$0xff]   ;;  %v3682_v6 = vld [vmem:[%s4695_s1 + $0x384] ss:$8 sps:$4 sm:$0xff]  }
  0xc5   : > { %2622 = vmatprep.subr.bf16.mxu0 %v3637_v7  ;;  %v3685_v7 = vld [vmem:[%s4695_s1 + $0x784] ss:$8 sps:$4 sm:$0xff]  }
  0xc6   : > { %2290 = vmatmul.mubr.bf16.vlgmr.msra.gmra.mrb[0].mxu1 %v2872_v9  ;;  %v3683_v9 = vld [vmem:[%s4695_s1 + $0x780] ss:$8 sps:$4 sm:$0xff]  }
  0xc7   : > { %2582 = vmatmul.mubr.bf16.vlgmr.msra.gmra.mrb[0].mxu0 %v2880_v10  ;;  %2331 = vmatpush1.bf16.msra.mxu1 %v3632_v14  ;;  %v3688_v10 = vld [vmem:[%s4695_s1 + $0x394] ss:$8 sps:$4 sm:$0xff]   ;;  %v3694_v14 = vld [vmem:[%s4695_s1 + $0x3a4] ss:$8 sps:$4 sm:$0xff]  }
  0xc8   : > { %2623 = vmatpush1.bf16.msra.mxu0 %v3635_v15  ;;  %2332 = vmatprep.subr.bf16.mxu1 %v3640_v16  ;;  %v3697_v15 = vld [vmem:[%s4695_s1 + $0x7a4] ss:$8 sps:$4 sm:$0xff]   ;;  %v3692_v16 = vld [vmem:[%s4695_s1 + $0x3a0] ss:$8 sps:$4 sm:$0xff]  }
  0xc9   : > { %2624 = vmatprep.subr.bf16.mxu0 %v3643_v17  ;;  %2299 = vmatprep.mubr.bf16.mxu1 %v2889_v18  ;;  %v3695_v17 = vld [vmem:[%s4695_s1 + $0x7a0] ss:$8 sps:$4 sm:$0xff]   ;;  %v3700_v18 = vld [vmem:[%s4695_s1 + $0x3b4] ss:$8 sps:$4 sm:$0xff]  }
  0xca   : > { %2591 = vmatprep.mubr.bf16.mxu0 %v2897_v19  ;;  %v3703_v19 = vld [vmem:[%s4695_s1 + $0x7b4] ss:$8 sps:$4 sm:$0xff]  }
  0xcb   : > { %2333 = vmatpush1.bf16.msra.mxu1 %v3638_v20  ;;  %v3698_v20 = vld [vmem:[%s4695_s1 + $0x3b0] ss:$8 sps:$4 sm:$0xff]  }
  0xcc   : > { %2625 = vmatpush1.bf16.msra.mxu0 %v3641_v21  ;;  %2334 = vmatprep.subr.bf16.mxu1 %v3646_v22  ;;  %v3701_v21 = vld [vmem:[%s4695_s1 + $0x7b0] ss:$8 sps:$4 sm:$0xff]   ;;  %v3706_v22 = vld [vmem:[%s4695_s1 + $0x3c4] ss:$8 sps:$4 sm:$0xff]  }
  0xcd   : > { %2626 = vmatprep.subr.bf16.mxu0 %v3649_v23  ;;  %v3709_v23 = vld [vmem:[%s4695_s1 + $0x7c4] ss:$8 sps:$4 sm:$0xff]  }
  0xce   : > { %2300 = vmatmul.mubr.bf16.gmra.mrb[4].mxu1 %v2888_v25  ;;  %v3707_v25 = vld [vmem:[%s4695_s1 + $0x7c0] ss:$8 sps:$4 sm:$0xff]  }
  0xcf   : > { %2592 = vmatmul.mubr.bf16.gmra.mrb[4].mxu0 %v2896_v26  ;;  %2335 = vmatpush1.bf16.msra.mxu1 %v3644_v30  ;;  %v3712_v26 = vld [vmem:[%s4695_s1 + $0x3d4] ss:$8 sps:$4 sm:$0xff]   ;;  %v3718_v30 = vld [vmem:[%s4695_s1 + $0x3e4] ss:$8 sps:$4 sm:$0xff]  }
  0xd0   : > { %2627 = vmatpush1.bf16.msra.mxu0 %v3647_v31  ;;  %2336 = vmatprep.subr.bf16.mxu1 %v3652_v32  ;;  %v3721_v31 = vld [vmem:[%s4695_s1 + $0x7e4] ss:$8 sps:$4 sm:$0xff]   ;;  %v3716_v32 = vld [vmem:[%s4695_s1 + $0x3e0] ss:$8 sps:$4 sm:$0xff]  }
  0xd1   : > { %2628 = vmatprep.subr.bf16.mxu0 %v3655_v33  ;;  %2309 = vmatprep.mubr.bf16.mxu1 %v2905_v34  ;;  %v3719_v33 = vld [vmem:[%s4695_s1 + $0x7e0] ss:$8 sps:$4 sm:$0xff]   ;;  %v3724_v34 = vld [vmem:[%s4695_s1 + $0x3f4] ss:$8 sps:$4 sm:$0xff]  }
  0xd2   : > { %2601 = vmatprep.mubr.bf16.mxu0 %v2913_v35  ;;  %v3727_v35 = vld [vmem:[%s4695_s1 + $0x7f4] ss:$8 sps:$4 sm:$0xff]  }
  0xd3   : > { %2337 = vmatpush1.bf16.msra.mxu1 %v3650_v36  ;;  %v3722_v36 = vld [vmem:[%s4695_s1 + $0x3f0] ss:$8 sps:$4 sm:$0xff]  }
  0xd4   : > { %2629 = vmatpush1.bf16.msra.mxu0 %v3653_v37  ;;  %2338 = vmatprep.subr.bf16.mxu1 %v3658_v38  ;;  %v3725_v37 = vld [vmem:[%s4695_s1 + $0x7f0] ss:$8 sps:$4 sm:$0xff]  }
  0xd5   : > { %2630 = vmatprep.subr.bf16.mxu0 %v3661_v39  ;;  %v198_v38 = vld [vmem:[%s3904_s4 + $0x98] sm:$0xff] }
  0xd6   : > { %2310 = vmatmul.mubr.bf16.gmra.mrb[8].mxu1 %v2904_v41  ;;  %v206_v39 = vld [vmem:[%s3904_s4 + $0xd8] sm:$0xff] }
  0xd7   : > { %2602 = vmatmul.mubr.bf16.gmra.mrb[8].mxu0 %v2912_v42  ;;  %2339 = vmatpush1.bf16.msra.mxu1 %v3656_v46  ;;  %v210_v41 = vld [vmem:[%s3904_s4 + $0xf8] sm:$0xff]  ;;  %v2874_v42 = vcombine.low %v4509_v56, %v4512_v59  ;;  %v2891_v44 = vcombine.high %v198_v38, %v206_v39 }
  0xd8   : > { %2631 = vmatpush1.bf16.msra.mxu0 %v3659_v47  ;;  %2340 = vmatprep.subr.bf16.mxu1 %v3664_v48  ;;  %v2899_v45 = vcombine.high %v202_v40, %v210_v41  ;;  %v214_v46 = vld [vmem:[%s3904_s4 + $0x118] sm:$0xff] }
  0xd9   : > { %2632 = vmatprep.subr.bf16.mxu0 %v3667_v49  ;;  %2319 = vmatprep.mubr.bf16.mxu1 %v2921_v50  ;;  %v222_v47 = vld [vmem:[%s3904_s4 + $0x158] sm:$0xff]  ;;  %v2890_v50 = vcombine.low %v198_v38, %v206_v39 }
  0xda   : > { %2611 = vmatprep.mubr.bf16.mxu0 %v2929_v51  ;;  %v218_v48 = vld [vmem:[%s3904_s4 + $0x138] sm:$0xff]  ;;  %v2898_v51 = vcombine.low %v202_v40, %v210_v41 }
  0xdb   : > { %2341 = vmatpush1.bf16.msra.mxu1 %v3662_v52  ;;  %v226_v49 = vld [vmem:[%s3904_s4 + $0x178] sm:$0xff]  ;;  %v2907_v52 = vcombine.high %v214_v46, %v222_v47 }
  0xdc   : > { %2633 = vmatpush1.bf16.msra.mxu0 %v3665_v53  ;;  %2342 = vmatprep.subr.bf16.mxu1 %v3670_v54  ;;  %v2915_v53 = vcombine.high %v218_v48, %v226_v49  ;;  %v230_v54 = vld [vmem:[%s3904_s4 + $0x198] sm:$0xff]  ;;  %v2914_v59 = vcombine.low %v218_v48, %v226_v49 }
  0xdd   : > { %2634 = vmatprep.subr.bf16.mxu0 %v3673_v55  ;;  %v238_v55 = vld [vmem:[%s3904_s4 + $0x1d8] sm:$0xff] }
  0xde   : > { %2320 = vmatmul.mubr.bf16.gmra.mrb[12].mxu1 %v2920_v57  ;;  %v234_v56 = vld [vmem:[%s3904_s4 + $0x1b8] sm:$0xff]  ;;  %v2923_v60 = vcombine.high %v230_v54, %v238_v55 }
  0xdf   : > { %2612 = vmatmul.mubr.bf16.gmra.mrb[12].mxu0 %v2928_v58  ;;  %2343 = vmatpush1.bf16.msra.mxu1 %v3668_v62  ;;  %v242_v57 = vld [vmem:[%s3904_s4 + $0x1f8] sm:$0xff]  ;;  %v2906_v58 = vcombine.low %v214_v46, %v222_v47  ;;  %v2922_v62 = vcombine.low %v230_v54, %v238_v55  ;;  %s3199_s4 = sshll.u32 %s4699_s24, 3 }
  0xe0   : > { %2635 = vmatpush1.bf16.msra.mxu0 %v3671_v63  ;;  %2344 = vmatprep.subr.bf16.mxu1 %v3676_v0  ;;  %v2931_v61 = vcombine.high %v234_v56, %v242_v57  ;;  %v2930_v63 = vcombine.low %v234_v56, %v242_v57  ;;  %v501_v0 = vlaneseq  ;;  %s4669_s27 = scalar_lea.vmem %s4697_s3, %s3199_s4 }
  0xe1   : > { %2636 = vmatprep.subr.bf16.mxu0 %v3679_v1  ;;  %2362 = vmatprep.mubr.bf16.mxu1 %v2875_v2 }
  0xe2   : > { %2654 = vmatprep.mubr.bf16.mxu0 %v2883_v3  ;;  %v502_v1 = vshrl.u32 %v501_v0, 7  ;;  %v499_v3 = vld [vmem:[%s4696_s2] sm:$0x3] }
  0xe3   : > { %2345 = vmatpush1.bf16.msra.mxu1 %v3674_v4 }
  0xe4   : > { %2637 = vmatpush1.bf16.msra.mxu0 %v3677_v5  ;;  %2346 = vmatprep.subr.bf16.mxu1 %v3682_v6  ;;  %v503_v2 = vsub.s32 0, %v502_v1  ;;  %v507_v4 = vsub.s32 1, %v502_v1 }
  0xe5   : > { %2638 = vmatprep.subr.bf16.mxu0 %v3685_v7 }
  0xe6   : > { %v4657_v5 = vrot.slane %v499_v3, %v503_v2  ;;  %v4659_v6 = vrot.slane %v499_v3, %v507_v4 }
  0xe7   : > { %2347 = vmatpush1.bf16.msra.mxu1 %v3680_v8 }
  0xe8   : > { %2639 = vmatpush1.bf16.msra.mxu0 %v3683_v9  ;;  %2348 = vmatprep.subr.bf16.mxu1 %v3688_v10 }
  0xe9   : > { %2640 = vmatprep.subr.bf16.mxu0 %v3691_v11 }
  0xeb   : > { %2349 = vmatpush1.bf16.msra.mxu1 %v3686_v12 }
  0xec   : > { %2641 = vmatpush1.bf16.msra.mxu0 %v3689_v13  ;;  %2350 = vmatprep.subr.bf16.mxu1 %v3694_v14 }
  0xed   : > { %2642 = vmatprep.subr.bf16.mxu0 %v3697_v15 }
  0xef   : > { %2351 = vmatpush1.bf16.msra.mxu1 %v3692_v16 }
  0xf0   : > { %2643 = vmatpush1.bf16.msra.mxu0 %v3695_v17  ;;  %2352 = vmatprep.subr.bf16.mxu1 %v3700_v18 }
  0xf1   : > { %2644 = vmatprep.subr.bf16.mxu0 %v3703_v19 }
  0xf3   : > { %2353 = vmatpush1.bf16.msra.mxu1 %v3698_v20 }
  0xf4   : > { %2645 = vmatpush1.bf16.msra.mxu0 %v3701_v21  ;;  %2354 = vmatprep.subr.bf16.mxu1 %v3706_v22 }
  0xf5   : > { %2646 = vmatprep.subr.bf16.mxu0 %v3709_v23 }
  0xf7   : > { %2355 = vmatpush1.bf16.msra.mxu1 %v3704_v24 }
  0xf8   : > { %2647 = vmatpush1.bf16.msra.mxu0 %v3707_v25  ;;  %2356 = vmatprep.subr.bf16.mxu1 %v3712_v26 }
  0xf9   : > { %2648 = vmatprep.subr.bf16.mxu0 %v3715_v27 }
  0xfb   : > { %2357 = vmatpush1.bf16.msra.mxu1 %v3710_v28 }
  0xfc   : > { %2649 = vmatpush1.bf16.msra.mxu0 %v3713_v29  ;;  %2358 = vmatprep.subr.bf16.mxu1 %v3718_v30 }
  0xfd   : > { %2650 = vmatprep.subr.bf16.mxu0 %v3721_v31 }
  0xff   : > { %2359 = vmatpush1.bf16.msra.mxu1 %v3716_v32 }
 0x100   : > { %2651 = vmatpush1.bf16.msra.mxu0 %v3719_v33  ;;  %2360 = vmatprep.subr.bf16.mxu1 %v3724_v34 }
 0x101   : > { %2652 = vmatprep.subr.bf16.mxu0 %v3727_v35 }
 0x103   : > { %2361 = vmatpush1.bf16.msra.mxu1 %v3722_v36 }
 0x104   : > { %2653 = vmatpush1.bf16.msra.mxu0 %v3725_v37 }
 0x106   : > { %2363 = vmatmul.mubr.bf16.vlgmr.msra.gmra.mrb[0].mxu1 %v2874_v42 }
 0x107   : > { %2655 = vmatmul.mubr.bf16.vlgmr.msra.gmra.mrb[0].mxu0 %v2882_v43  ;;  %2372 = vmatprep.mubr.bf16.mxu1 %v2891_v44 }
 0x108   : > { %2664 = vmatprep.mubr.bf16.mxu0 %v2899_v45 }
 0x10e   : > { %2373 = vmatmul.mubr.bf16.gmra.mrb[4].mxu1 %v2890_v50 }
 0x10f   : > { %2665 = vmatmul.mubr.bf16.gmra.mrb[4].mxu0 %v2898_v51  ;;  %2382 = vmatprep.mubr.bf16.mxu1 %v2907_v52 }
 0x110   : > { %2674 = vmatprep.mubr.bf16.mxu0 %v2915_v53 }
 0x116   : > { %2383 = vmatmul.mubr.bf16.gmra.mrb[8].mxu1 %v2906_v58 }
 0x117   : > { %2675 = vmatmul.mubr.bf16.gmra.mrb[8].mxu0 %v2914_v59  ;;  %2392 = vmatprep.mubr.bf16.mxu1 %v2923_v60 }
 0x118   : > { %2684 = vmatprep.mubr.bf16.mxu0 %v2931_v61 }
 0x11e   : > { %2393 = vmatmul.mubr.bf16.gmra.mrb[12].mxu1 %v2922_v62 }
 0x11f   : > { %2685 = vmatmul.mubr.bf16.gmra.mrb[12].mxu0 %v2930_v63 }
 0x1d9   : > { %v2364_v7 = vpop.f32.mrb[0].mxu1 }
 0x1da   : > { %v2656_v8 = vpop.f32.mrb[0].mxu0  ;;  %v3208_v9 = vadd.f32 %v2364_v7, %v4657_v5  ;;  %v2366_v10 = vpop.f32.mrb[1].mxu1 }
 0x1db   : > { %v2658_v11 = vpop.f32.mrb[1].mxu0  ;;  %v3210_v12 = vadd.f32 %v2366_v10, %v4659_v6  ;;  %v2368_v13 = vpop.f32.mrb[2].mxu1 }
 0x1dc   : > { %v2660_v14 = vpop.f32.mrb[2].mxu0  ;;  %v3209_v15 = vadd.f32 %v3208_v9, %v2656_v8  ;;  %v3212_v16 = vadd.f32 %v2368_v13, %v4657_v5  ;;  %v2370_v17 = vpop.f32.mrb[3].mxu1 }
 0x1dd   : > { %v2662_v18 = vpop.f32.mrb[3].mxu0  ;;  %v3211_v19 = vadd.f32 %v3210_v12, %v2658_v11  ;;  %v3214_v20 = vadd.f32 %v2370_v17, %v4659_v6 }
 0x1de   : > { %vm2695_vm0 = vcmp.ge.f32.partialorder %v3209_v15, 0.0  ;;  %v2711_v21 = vmul.f32 0.2, %v3209_v15  ;;  %v3213_v22 = vadd.f32 %v3212_v16, %v2660_v14 }
 0x1df   : > { %vm2696_vm1 = vcmp.ge.f32.partialorder %v3211_v19, 0.0  ;;  %v2712_v23 = vmul.f32 0.2, %v3211_v19  ;;  %v3215_v24 = vadd.f32 %v3214_v20, %v2662_v18 }
 0x1e0   : > { %v2727_v25 = vsel %vm2695_vm0, %v3209_v15, %v2711_v21  ;;  %vm2697_vm2 = vcmp.ge.f32.partialorder %v3213_v22, 0.0  ;;  %v2713_v26 = vmul.f32 0.2, %v3213_v22 }
 0x1e1   : > { %v2728_v27 = vsel %vm2696_vm1, %v3211_v19, %v2712_v23  ;;  %vm2698_vm3 = vcmp.ge.f32.partialorder %v3215_v24, 0.0  ;;  %v2714_v28 = vmul.f32 0.2, %v3215_v24  ;;  %v2374_v29 = vpop.f32.mrb[4].mxu1 }
 0x1e2   : > { %v2666_v30 = vpop.f32.mrb[4].mxu0  ;;  %v3200_v31 = vpack.c.bf16 %v2728_v27, %v2727_v25  ;;  %v2729_v32 = vsel %vm2697_vm2, %v3213_v22, %v2713_v26  ;;  %v3216_v33 = vadd.f32 %v2374_v29, %v4657_v5  ;;  %v2376_v34 = vpop.f32.mrb[5].mxu1 }
 0x1e3   : > { %v2668_v35 = vpop.f32.mrb[5].mxu0  ;;  %v2730_v36 = vsel %vm2698_vm3, %v3215_v24, %v2714_v28  ;;  %v3218_v37 = vadd.f32 %v2376_v34, %v4659_v6  ;;  %v2378_v38 = vpop.f32.mrb[6].mxu1 }
 0x1e4   : > { %v2670_v39 = vpop.f32.mrb[6].mxu0  ;;  %2791 = vst [vmem:[%s4669_s27] sm:$0xff] %v3200_v31  ;;  %v3201_v40 = vpack.c.bf16 %v2730_v36, %v2729_v32  ;;  %v3217_v41 = vadd.f32 %v3216_v33, %v2666_v30  ;;  %v3220_v42 = vadd.f32 %v2378_v38, %v4657_v5  ;;  %v2380_v43 = vpop.f32.mrb[7].mxu1 }
 0x1e5   : > { %v2672_v44 = vpop.f32.mrb[7].mxu0  ;;  %v3219_v45 = vadd.f32 %v3218_v37, %v2668_v35  ;;  %v3222_v46 = vadd.f32 %v2380_v43, %v4659_v6 }
 0x1e6   : > { %2792 = vst [vmem:[%s4669_s27 + $0x8] sm:$0xff] %v3201_v40  ;;  %vm2699_vm4 = vcmp.ge.f32.partialorder %v3217_v41, 0.0  ;;  %v2715_v47 = vmul.f32 0.2, %v3217_v41  ;;  %v3221_v48 = vadd.f32 %v3220_v42, %v2670_v39 }
 0x1e7   : > { %vm2700_vm5 = vcmp.ge.f32.partialorder %v3219_v45, 0.0  ;;  %v2716_v49 = vmul.f32 0.2, %v3219_v45  ;;  %v3223_v50 = vadd.f32 %v3222_v46, %v2672_v44 }
 0x1e8   : > { %v2731_v51 = vsel %vm2699_vm4, %v3217_v41, %v2715_v47  ;;  %vm2701_vm6 = vcmp.ge.f32.partialorder %v3221_v48, 0.0  ;;  %v2717_v52 = vmul.f32 0.2, %v3221_v48 }
 0x1e9   : > { %v2732_v53 = vsel %vm2700_vm5, %v3219_v45, %v2716_v49  ;;  %vm2702_vm7 = vcmp.ge.f32.partialorder %v3223_v50, 0.0  ;;  %v2718_v54 = vmul.f32 0.2, %v3223_v50  ;;  %v2384_v55 = vpop.f32.mrb[8].mxu1 }
 0x1ea   : > { %v2676_v56 = vpop.f32.mrb[8].mxu0  ;;  %v3202_v57 = vpack.c.bf16 %v2732_v53, %v2731_v51  ;;  %v2733_v58 = vsel %vm2701_vm6, %v3221_v48, %v2717_v52  ;;  %v3224_v59 = vadd.f32 %v2384_v55, %v4657_v5  ;;  %v2386_v60 = vpop.f32.mrb[9].mxu1 }
 0x1eb   : > { %v2678_v61 = vpop.f32.mrb[9].mxu0  ;;  %v2734_v62 = vsel %vm2702_vm7, %v3223_v50, %v2718_v54  ;;  %v3226_v63 = vadd.f32 %v2386_v60, %v4659_v6  ;;  %v2388_v0 = vpop.f32.mrb[10].mxu1 }
 0x1ec   : > { %v2680_v1 = vpop.f32.mrb[10].mxu0  ;;  %2793 = vst [vmem:[%s4669_s27 + $0x10] sm:$0xff] %v3202_v57  ;;  %v3203_v2 = vpack.c.bf16 %v2734_v62, %v2733_v58  ;;  %v3225_v3 = vadd.f32 %v3224_v59, %v2676_v56  ;;  %v3228_v4 = vadd.f32 %v2388_v0, %v4657_v5  ;;  %v2390_v7 = vpop.f32.mrb[11].mxu1 }
 0x1ed   : > { %v2682_v8 = vpop.f32.mrb[11].mxu0  ;;  %v3227_v9 = vadd.f32 %v3226_v63, %v2678_v61  ;;  %v3230_v10 = vadd.f32 %v2390_v7, %v4659_v6 }
 0x1ee   : > { %2794 = vst [vmem:[%s4669_s27 + $0x18] sm:$0xff] %v3203_v2  ;;  %vm2703_vm8 = vcmp.ge.f32.partialorder %v3225_v3, 0.0  ;;  %v2719_v11 = vmul.f32 0.2, %v3225_v3  ;;  %v3229_v12 = vadd.f32 %v3228_v4, %v2680_v1 }
 0x1ef   : > { %vm2704_vm9 = vcmp.ge.f32.partialorder %v3227_v9, 0.0  ;;  %v2720_v13 = vmul.f32 0.2, %v3227_v9  ;;  %v3231_v14 = vadd.f32 %v3230_v10, %v2682_v8 }
 0x1f0   : > { %v2735_v15 = vsel %vm2703_vm8, %v3225_v3, %v2719_v11  ;;  %vm2705_vm10 = vcmp.ge.f32.partialorder %v3229_v12, 0.0  ;;  %v2721_v16 = vmul.f32 0.2, %v3229_v12 }
 0x1f1   : > { %v2736_v17 = vsel %vm2704_vm9, %v3227_v9, %v2720_v13  ;;  %vm2706_vm11 = vcmp.ge.f32.partialorder %v3231_v14, 0.0  ;;  %v2722_v18 = vmul.f32 0.2, %v3231_v14  ;;  %v2394_v19 = vpop.f32.mrb[12].mxu1 }
 0x1f2   : > { %v2686_v20 = vpop.f32.mrb[12].mxu0  ;;  %v3204_v21 = vpack.c.bf16 %v2736_v17, %v2735_v15  ;;  %v2737_v22 = vsel %vm2705_vm10, %v3229_v12, %v2721_v16  ;;  %v3232_v23 = vadd.f32 %v2394_v19, %v4657_v5  ;;  %v2396_v24 = vpop.f32.mrb[13].mxu1 }
 0x1f3   : > { %v2688_v25 = vpop.f32.mrb[13].mxu0  ;;  %v2738_v26 = vsel %vm2706_vm11, %v3231_v14, %v2722_v18  ;;  %v3234_v27 = vadd.f32 %v2396_v24, %v4659_v6  ;;  %v2398_v28 = vpop.f32.mrb[14].mxu1 }
 0x1f4   : > { %v2690_v29 = vpop.f32.mrb[14].mxu0  ;;  %2795 = vst [vmem:[%s4669_s27 + $0x20] sm:$0xff] %v3204_v21  ;;  %v3205_v30 = vpack.c.bf16 %v2738_v26, %v2737_v22  ;;  %v3233_v31 = vadd.f32 %v3232_v23, %v2686_v20  ;;  %v3236_v32 = vadd.f32 %v2398_v28, %v4657_v5  ;;  %v2400_v33 = vpop.f32.mrb[15].mxu1 }
 0x1f5   : > { %v2692_v34 = vpop.f32.mrb[15].mxu0  ;;  %v3235_v35 = vadd.f32 %v3234_v27, %v2688_v25  ;;  %v3238_v36 = vadd.f32 %v2400_v33, %v4659_v6 }
 0x1f6   : > { %2796 = vst [vmem:[%s4669_s27 + $0x28] sm:$0xff] %v3205_v30  ;;  %vm2707_vm12 = vcmp.ge.f32.partialorder %v3233_v31, 0.0  ;;  %v2723_v37 = vmul.f32 0.2, %v3233_v31  ;;  %v3237_v38 = vadd.f32 %v3236_v32, %v2690_v29 }
 0x1f7   : > { %vm2708_vm13 = vcmp.ge.f32.partialorder %v3235_v35, 0.0  ;;  %v2724_v39 = vmul.f32 0.2, %v3235_v35  ;;  %v3239_v40 = vadd.f32 %v3238_v36, %v2692_v34 }
 0x1f8   : > { %v2739_v41 = vsel %vm2707_vm12, %v3233_v31, %v2723_v37  ;;  %vm2709_vm14 = vcmp.ge.f32.partialorder %v3237_v38, 0.0  ;;  %v2725_v42 = vmul.f32 0.2, %v3237_v38 }
 0x1f9   : > { %v2740_v43 = vsel %vm2708_vm13, %v3235_v35, %v2724_v39  ;;  %vm2710_vm15 = vcmp.ge.f32.partialorder %v3239_v40, 0.0  ;;  %v2726_v5 = vmul.f32 0.2, %v3239_v40 }
 0x1fa   : > { %v3206_v44 = vpack.c.bf16 %v2740_v43, %v2739_v41  ;;  %v2741_v45 = vsel %vm2709_vm14, %v3237_v38, %v2725_v42 }
 0x1fb   : > { %v2742_v46 = vsel %vm2710_vm15, %v3239_v40, %v2726_v5 }
 0x1fc   : > { %2797 = vst [vmem:[%s4669_s27 + $0x30] sm:$0xff] %v3206_v44  ;;  %v3207_v6 = vpack.c.bf16 %v2742_v46, %v2741_v45 }
 0x1fe   : > { %2798 = vst [vmem:[%s4669_s27 + $0x38] sm:$0xff] %v3207_v6 }
 0x1ff PF: > { %s13_s12 = sadd.s32 1, %s3734_s12  }
 0x200   : > { %p10_p4 = scmp.ge.s32.totalorder %s13_s12, 4  }
 0x202   :  { %12 = sbr.rel (!%p10_p4) target bundleno = 1 (0x1), region = 62 }

// kernel: discriminator64_forward.7
= control target key start
LH: loop header
LB: loop body
LE: loop exit
PB: predicated region body
PF: predicated region fallthrough
CT: control target
= control target key end

     0   :  { %s10830_s15 = smov 0   ;;  %s14107_s0 = inlined_call_operand.vmem [shape: bf16[32,4096], index: 0, kind: input, shape index: {}]   ;;  %s14108_s1 = inlined_call_operand.vmem [shape: bf16[4096,512], index: 1, kind: input, shape index: {}]   ;;  %s14109_s2 = inlined_call_operand.vmem [shape: f32[1,512], index: 2, kind: input, shape index: {}]   ;;  %s14110_s3 = inlined_call_operand.vmem [shape: f32[16,512], index: 3, kind: input, shape index: {}]   ;;  %s14111_s4 = inlined_call_operand.vmem [shape: f32[2,8,128], index: 4, kind: output, shape index: {}]  }
   0x1 LB: > { %s10836_s16 = sadd.s32 4294967295, %s10803_s15   ;;  %p8056_p0 = scmp.ge.s32.totalorder %s10803_s15, 1  ;;  %s10803_s15 = sphi %s10830_s15, %s14_s15  }
   0x2   : > { %p164_p1 = scmp.lt.s32.totalorder %s10803_s15, 3 }
   0x4   : > { %p165_p2 = pnand %p8056_p0, %p164_p1 }
   0x5   : > { %v9257_v0 = vld [vmem:[%s14108_s1 + $0x4] ss:$16 sps:$4 sm:$0xff] (!%p165_p2)   ;;  %v9259_v1 = vld [vmem:[%s14108_s1 + $0xc] ss:$16 sps:$4 sm:$0xff] (!%p165_p2)   ;;  %v9261_v2 = vld [vmem:[%s14108_s1] ss:$16 sps:$4 sm:$0xff] (!%p165_p2)  }
   0x6   : > { %168 = sbr.rel (%p165_p2) target bundleno = 1445 (0x5a5), region = 36  ;;  %6559 = vmatprep.subr.bf16.mxu0 (!%p165_p2), %v9257_v0  ;;  %v9262_v3 = vld [vmem:[%s14108_s1 + $0x8] ss:$16 sps:$4 sm:$0xff] (!%p165_p2)   ;;  %7247 = vmatprep.subr.bf16.mxu1 (!%p165_p2), %v9259_v1  ;;  %v9263_v4 = vld [vmem:[%s14108_s1 + $0x24] ss:$16 sps:$4 sm:$0xff] (!%p165_p2)   ;;  %s8057_s29 = sshll.u32 (!%p165_p2), %s10836_s16, 1 }
   0x7   : > { %6560 = vmatpush1.bf16.msra.mxu0 (!%p165_p2), %v9261_v2  ;;  %7248 = vmatpush1.bf16.msra.mxu1 (!%p165_p2), %v9262_v3  ;;  %v9265_v5 = vld [vmem:[%s14108_s1 + $0x2c] ss:$16 sps:$4 sm:$0xff] (!%p165_p2)   ;;  %v9267_v6 = vld [vmem:[%s14108_s1 + $0x20] ss:$16 sps:$4 sm:$0xff] (!%p165_p2)   ;;  %v9268_v7 = vld [vmem:[%s14108_s1 + $0x28] ss:$16 sps:$4 sm:$0xff] (!%p165_p2)  }
   0x8   : > { %6561 = vmatprep.subr.bf16.mxu0 (!%p165_p2), %v9263_v4  ;;  %7249 = vmatprep.subr.bf16.mxu1 (!%p165_p2), %v9265_v5  ;;  %v9269_v8 = vld [vmem:[%s14108_s1 + $0x44] ss:$16 sps:$4 sm:$0xff] (!%p165_p2)   ;;  %v9271_v9 = vld [vmem:[%s14108_s1 + $0x4c] ss:$16 sps:$4 sm:$0xff] (!%p165_p2)   ;;  %v9273_v10 = vld [vmem:[%s14108_s1 + $0x40] ss:$16 sps:$4 sm:$0xff] (!%p165_p2)  }
   0x9   : > { %v9274_v11 = vld [vmem:[%s14108_s1 + $0x48] ss:$16 sps:$4 sm:$0xff] (!%p165_p2)   ;;  %v9275_v12 = vld [vmem:[%s14108_s1 + $0x64] ss:$16 sps:$4 sm:$0xff] (!%p165_p2)   ;;  %v9277_v13 = vld [vmem:[%s14108_s1 + $0x6c] ss:$16 sps:$4 sm:$0xff] (!%p165_p2)  }
   0xa   : > { %v9279_v14 = vld [vmem:[%s14108_s1 + $0x60] ss:$16 sps:$4 sm:$0xff] (!%p165_p2)   ;;  %v9280_v15 = vld [vmem:[%s14108_s1 + $0x68] ss:$16 sps:$4 sm:$0xff] (!%p165_p2)   ;;  %v9281_v16 = vld [vmem:[%s14108_s1 + $0x84] ss:$16 sps:$4 sm:$0xff] (!%p165_p2)  }
   0xb   : > { %6562 = vmatpush1.bf16.msra.mxu0 (!%p165_p2), %v9267_v6  ;;  %7250 = vmatpush1.bf16.msra.mxu1 (!%p165_p2), %v9268_v7  ;;  %v9283_v17 = vld [vmem:[%s14108_s1 + $0x8c] ss:$16 sps:$4 sm:$0xff] (!%p165_p2)   ;;  %v9285_v18 = vld [vmem:[%s14108_s1 + $0x80] ss:$16 sps:$4 sm:$0xff] (!%p165_p2)   ;;  %v9286_v19 = vld [vmem:[%s14108_s1 + $0x88] ss:$16 sps:$4 sm:$0xff] (!%p165_p2)  }
   0xc   : > { %6563 = vmatprep.subr.bf16.mxu0 (!%p165_p2), %v9269_v8  ;;  %7251 = vmatprep.subr.bf16.mxu1 (!%p165_p2), %v9271_v9  ;;  %v9287_v20 = vld [vmem:[%s14108_s1 + $0xa4] ss:$16 sps:$4 sm:$0xff] (!%p165_p2)   ;;  %v9289_v21 = vld [vmem:[%s14108_s1 + $0xac] ss:$16 sps:$4 sm:$0xff] (!%p165_p2)   ;;  %v9291_v22 = vld [vmem:[%s14108_s1 + $0xa0] ss:$16 sps:$4 sm:$0xff] (!%p165_p2)  }
   0xd   : > { %v9292_v23 = vld [vmem:[%s14108_s1 + $0xa8] ss:$16 sps:$4 sm:$0xff]   ;;  %v9293_v24 = vld [vmem:[%s14108_s1 + $0xc4] ss:$16 sps:$4 sm:$0xff]   ;;  %v9295_v25 = vld [vmem:[%s14108_s1 + $0xcc] ss:$16 sps:$4 sm:$0xff]  }
   0xe   : > { %v9297_v26 = vld [vmem:[%s14108_s1 + $0xc0] ss:$16 sps:$4 sm:$0xff]   ;;  %v9298_v27 = vld [vmem:[%s14108_s1 + $0xc8] ss:$16 sps:$4 sm:$0xff]   ;;  %v9299_v28 = vld [vmem:[%s14108_s1 + $0xe4] ss:$16 sps:$4 sm:$0xff]  }
   0xf   : > { %6564 = vmatpush1.bf16.msra.mxu0 %v9273_v10  ;;  %7252 = vmatpush1.bf16.msra.mxu1 %v9274_v11  ;;  %v9301_v29 = vld [vmem:[%s14108_s1 + $0xec] ss:$16 sps:$4 sm:$0xff]   ;;  %v9303_v30 = vld [vmem:[%s14108_s1 + $0xe0] ss:$16 sps:$4 sm:$0xff]   ;;  %v9304_v31 = vld [vmem:[%s14108_s1 + $0xe8] ss:$16 sps:$4 sm:$0xff]  }
  0x10   : > { %6565 = vmatprep.subr.bf16.mxu0 %v9275_v12  ;;  %7253 = vmatprep.subr.bf16.mxu1 %v9277_v13  ;;  %v9305_v32 = vld [vmem:[%s14108_s1 + $0x104] ss:$16 sps:$4 sm:$0xff]   ;;  %p191_p3 = scmp.lt.s32.totalorder %s8057_s29, 3  ;;  %v9307_v33 = vld [vmem:[%s14108_s1 + $0x10c] ss:$16 sps:$4 sm:$0xff]   ;;  %p197_p4 = scmp.lt.s32.totalorder %s10836_s16, 1 }
  0x11   : > { %v9309_v34 = vld [vmem:[%s14108_s1 + $0x100] ss:$16 sps:$4 sm:$0xff]   ;;  %v9310_v35 = vld [vmem:[%s14108_s1 + $0x108] ss:$16 sps:$4 sm:$0xff]   ;;  %v9311_v36 = vld [vmem:[%s14108_s1 + $0x124] ss:$16 sps:$4 sm:$0xff]  }
  0x12   : > { %s14113_s29 = smov (!%p191_p3, %s8057_s29), 3  ;;  %v9313_v37 = vld [vmem:[%s14108_s1 + $0x12c] ss:$16 sps:$4 sm:$0xff]   ;;  %v9315_v38 = vld [vmem:[%s14108_s1 + $0x120] ss:$16 sps:$4 sm:$0xff]   ;;  %s14115_s16 = smov (!%p197_p4, %s10836_s16), 1 }
  0x13   : > { %6566 = vmatpush1.bf16.msra.mxu0 %v9279_v14  ;;  %7254 = vmatpush1.bf16.msra.mxu1 %v9280_v15  ;;  %v9316_v39 = vld [vmem:[%s14108_s1 + $0x128] ss:$16 sps:$4 sm:$0xff]   ;;  %v9317_v40 = vld [vmem:[%s14108_s1 + $0x144] ss:$16 sps:$4 sm:$0xff]   ;;  %s9120_s28 = sshll.u32 %s14113_s29, 7  ;;  %s8060_s6 = sshll.u32 %s14115_s16, 3 }
  0x14   : > { %6567 = vmatprep.subr.bf16.mxu0 %v9281_v16  ;;  %7255 = vmatprep.subr.bf16.mxu1 %v9283_v17  ;;  %v9319_v41 = vld [vmem:[%s14108_s1 + $0x14c] ss:$16 sps:$4 sm:$0xff]   ;;  %v9321_v42 = vld [vmem:[%s14108_s1 + $0x140] ss:$16 sps:$4 sm:$0xff]   ;;  %v9322_v43 = vld [vmem:[%s14108_s1 + $0x148] ss:$16 sps:$4 sm:$0xff]   ;;  %s10976_s12 = scalar_lea.vmem %s14107_s0, %s9120_s28  ;;  %s200_s9 = scalar_lea.vmem %s14111_s4, %s8060_s6 }
  0x15   : > { %v9323_v44 = vld [vmem:[%s14108_s1 + $0x164] ss:$16 sps:$4 sm:$0xff]   ;;  %v9325_v45 = vld [vmem:[%s14108_s1 + $0x16c] ss:$16 sps:$4 sm:$0xff]   ;;  %v9327_v48 = vld [vmem:[%s14108_s1 + $0x160] ss:$16 sps:$4 sm:$0xff]  }
  0x16   : > { %v201_v46 = vld [vmem:[%s10976_s12] sm:$0xff]  ;;  %v9328_v49 = vld [vmem:[%s14108_s1 + $0x168] ss:$16 sps:$4 sm:$0xff]   ;;  %v9331_v52 = vld [vmem:[%s14108_s1 + $0x18c] ss:$16 sps:$4 sm:$0xff]  }
  0x17   : > { %6568 = vmatpush1.bf16.msra.mxu0 %v9285_v18  ;;  %7256 = vmatpush1.bf16.msra.mxu1 %v9286_v19  ;;  %v217_v47 = vld [vmem:[%s10976_s12 + $0x80] sm:$0xff]  ;;  %v9334_v54 = vld [vmem:[%s14108_s1 + $0x188] ss:$16 sps:$4 sm:$0xff]   ;;  %v9337_v56 = vld [vmem:[%s14108_s1 + $0x1ac] ss:$16 sps:$4 sm:$0xff]  }
  0x18   : > { %6569 = vmatprep.subr.bf16.mxu0 %v9287_v20  ;;  %7257 = vmatprep.subr.bf16.mxu1 %v9289_v21  ;;  %v8062_v50 = vcombine.high %v201_v46, %v217_v47  ;;  %v9329_v51 = vld [vmem:[%s14108_s1 + $0x184] ss:$16 sps:$4 sm:$0xff]   ;;  %v9333_v53 = vld [vmem:[%s14108_s1 + $0x180] ss:$16 sps:$4 sm:$0xff]   ;;  %v9340_v58 = vld [vmem:[%s14108_s1 + $0x1a8] ss:$16 sps:$4 sm:$0xff]   ;;  %v8061_v5 = vcombine.low %v201_v46, %v217_v47 }
  0x19   : > { %v9335_v55 = vld [vmem:[%s14108_s1 + $0x1a4] ss:$16 sps:$4 sm:$0xff]   ;;  %v9339_v57 = vld [vmem:[%s14108_s1 + $0x1a0] ss:$16 sps:$4 sm:$0xff]   ;;  %v9343_v60 = vld [vmem:[%s14108_s1 + $0x1cc] ss:$16 sps:$4 sm:$0xff]  }
  0x1a   : > { %6591 = vmatprep.mubr.bf16.mxu0 %v8062_v50  ;;  %7279 = vmatprep.mubr.bf16.mxu1 %v8062_v50  ;;  %v9341_v59 = vld [vmem:[%s14108_s1 + $0x1c4] ss:$16 sps:$4 sm:$0xff]   ;;  %v9345_v61 = vld [vmem:[%s14108_s1 + $0x1c0] ss:$16 sps:$4 sm:$0xff]   ;;  %v9346_v62 = vld [vmem:[%s14108_s1 + $0x1c8] ss:$16 sps:$4 sm:$0xff]  }
  0x1b   : > { %6570 = vmatpush1.bf16.msra.mxu0 %v9291_v22  ;;  %7258 = vmatpush1.bf16.msra.mxu1 %v9292_v23  ;;  %v9347_v63 = vld [vmem:[%s14108_s1 + $0x1e4] ss:$16 sps:$4 sm:$0xff]   ;;  %v9349_v0 = vld [vmem:[%s14108_s1 + $0x1ec] ss:$16 sps:$4 sm:$0xff]   ;;  %v9351_v1 = vld [vmem:[%s14108_s1 + $0x1e0] ss:$16 sps:$4 sm:$0xff]  }
  0x1c   : > { %6571 = vmatprep.subr.bf16.mxu0 %v9293_v24  ;;  %7259 = vmatprep.subr.bf16.mxu1 %v9295_v25  ;;  %v9352_v2 = vld [vmem:[%s14108_s1 + $0x1e8] ss:$16 sps:$4 sm:$0xff]   ;;  %v9355_v3 = vld [vmem:[%s14108_s1 + $0x204] ss:$16 sps:$4 sm:$0xff]   ;;  %v9358_v4 = vld [vmem:[%s14108_s1 + $0x20c] ss:$16 sps:$4 sm:$0xff]  }
  0x1d   : > { %v9353_v6 = vld [vmem:[%s14108_s1 + $0x200] ss:$16 sps:$4 sm:$0xff]   ;;  %v9356_v7 = vld [vmem:[%s14108_s1 + $0x208] ss:$16 sps:$4 sm:$0xff]   ;;  %v9361_v8 = vld [vmem:[%s14108_s1 + $0x224] ss:$16 sps:$4 sm:$0xff]  }
  0x1e   : > { %v9364_v9 = vld [vmem:[%s14108_s1 + $0x22c] ss:$16 sps:$4 sm:$0xff]   ;;  %v9359_v10 = vld [vmem:[%s14108_s1 + $0x220] ss:$16 sps:$4 sm:$0xff]   ;;  %v9362_v11 = vld [vmem:[%s14108_s1 + $0x228] ss:$16 sps:$4 sm:$0xff]  }
  0x1f   : > { %6572 = vmatpush1.bf16.msra.mxu0 %v9297_v26  ;;  %7260 = vmatpush1.bf16.msra.mxu1 %v9298_v27  ;;  %v9367_v12 = vld [vmem:[%s14108_s1 + $0x244] ss:$16 sps:$4 sm:$0xff]   ;;  %v9370_v13 = vld [vmem:[%s14108_s1 + $0x24c] ss:$16 sps:$4 sm:$0xff]   ;;  %v9365_v14 = vld [vmem:[%s14108_s1 + $0x240] ss:$16 sps:$4 sm:$0xff]  }
  0x20   : > { %6573 = vmatprep.subr.bf16.mxu0 %v9299_v28  ;;  %7261 = vmatprep.subr.bf16.mxu1 %v9301_v29  ;;  %v9368_v15 = vld [vmem:[%s14108_s1 + $0x248] ss:$16 sps:$4 sm:$0xff]   ;;  %v9373_v16 = vld [vmem:[%s14108_s1 + $0x264] ss:$16 sps:$4 sm:$0xff]   ;;  %v9376_v17 = vld [vmem:[%s14108_s1 + $0x26c] ss:$16 sps:$4 sm:$0xff]  }
  0x21   : > { %v9371_v18 = vld [vmem:[%s14108_s1 + $0x260] ss:$16 sps:$4 sm:$0xff]   ;;  %v9374_v19 = vld [vmem:[%s14108_s1 + $0x268] ss:$16 sps:$4 sm:$0xff]   ;;  %v9379_v20 = vld [vmem:[%s14108_s1 + $0x284] ss:$16 sps:$4 sm:$0xff]  }
  0x22   : > { %v9382_v21 = vld [vmem:[%s14108_s1 + $0x28c] ss:$16 sps:$4 sm:$0xff]   ;;  %v9377_v22 = vld [vmem:[%s14108_s1 + $0x280] ss:$16 sps:$4 sm:$0xff]   ;;  %v9380_v23 = vld [vmem:[%s14108_s1 + $0x288] ss:$16 sps:$4 sm:$0xff]  }
  0x23   : > { %6574 = vmatpush1.bf16.msra.mxu0 %v9303_v30  ;;  %7262 = vmatpush1.bf16.msra.mxu1 %v9304_v31  ;;  %v9385_v24 = vld [vmem:[%s14108_s1 + $0x2a4] ss:$16 sps:$4 sm:$0xff]   ;;  %v9388_v25 = vld [vmem:[%s14108_s1 + $0x2ac] ss:$16 sps:$4 sm:$0xff]   ;;  %v9383_v26 = vld [vmem:[%s14108_s1 + $0x2a0] ss:$16 sps:$4 sm:$0xff]  }
  0x24   : > { %6575 = vmatprep.subr.bf16.mxu0 %v9305_v32  ;;  %7263 = vmatprep.subr.bf16.mxu1 %v9307_v33  ;;  %v9386_v27 = vld [vmem:[%s14108_s1 + $0x2a8] ss:$16 sps:$4 sm:$0xff]   ;;  %v9391_v28 = vld [vmem:[%s14108_s1 + $0x2c4] ss:$16 sps:$4 sm:$0xff]   ;;  %v9394_v29 = vld [vmem:[%s14108_s1 + $0x2cc] ss:$16 sps:$4 sm:$0xff]  }
  0x25   : > { %v11119_v30 = vld [vmem:[%s10976_s12 + $0x8] sm:$0xff]  ;;  %v9389_v32 = vld [vmem:[%s14108_s1 + $0x2c0] ss:$16 sps:$4 sm:$0xff]   ;;  %v9415_v47 = vld [vmem:[%s14108_s1 + $0x344] ss:$16 sps:$4 sm:$0xff]  }
  0x26   : > { %v11122_v31 = vld [vmem:[%s10976_s12 + $0x88] sm:$0xff] }
  0x27   : > { %6576 = vmatpush1.bf16.msra.mxu0 %v9309_v34  ;;  %7264 = vmatpush1.bf16.msra.mxu1 %v9310_v35  ;;  %v9392_v33 = vld [vmem:[%s14108_s1 + $0x2c8] ss:$16 sps:$4 sm:$0xff]   ;;  %v8064_v34 = vcombine.high %v11119_v30, %v11122_v31  ;;  %v9397_v35 = vld [vmem:[%s14108_s1 + $0x2e4] ss:$16 sps:$4 sm:$0xff]  }
  0x28   : > { %6577 = vmatprep.subr.bf16.mxu0 %v9311_v36  ;;  %7265 = vmatprep.subr.bf16.mxu1 %v9313_v37  ;;  %v9400_v36 = vld [vmem:[%s14108_s1 + $0x2ec] ss:$16 sps:$4 sm:$0xff]   ;;  %v9395_v37 = vld [vmem:[%s14108_s1 + $0x2e0] ss:$16 sps:$4 sm:$0xff]   ;;  %v9410_v46 = vld [vmem:[%s14108_s1 + $0x328] ss:$16 sps:$4 sm:$0xff]  }
  0x29   : > { %v9416_v50 = vld [vmem:[%s14108_s1 + $0x348] ss:$16 sps:$4 sm:$0xff]  }
  0x2b   : > { %6578 = vmatpush1.bf16.msra.mxu0 %v9315_v38  ;;  %7266 = vmatpush1.bf16.msra.mxu1 %v9316_v39  ;;  %v9398_v38 = vld [vmem:[%s14108_s1 + $0x2e8] ss:$16 sps:$4 sm:$0xff]   ;;  %v9403_v39 = vld [vmem:[%s14108_s1 + $0x304] ss:$16 sps:$4 sm:$0xff]  }
  0x2c   : > { %6579 = vmatprep.subr.bf16.mxu0 %v9317_v40  ;;  %7267 = vmatprep.subr.bf16.mxu1 %v9319_v41  ;;  %v9406_v40 = vld [vmem:[%s14108_s1 + $0x30c] ss:$16 sps:$4 sm:$0xff]   ;;  %v9401_v41 = vld [vmem:[%s14108_s1 + $0x300] ss:$16 sps:$4 sm:$0xff]  }
  0x2f   : > { %6580 = vmatpush1.bf16.msra.mxu0 %v9321_v42  ;;  %7268 = vmatpush1.bf16.msra.mxu1 %v9322_v43  ;;  %v9404_v42 = vld [vmem:[%s14108_s1 + $0x308] ss:$16 sps:$4 sm:$0xff]   ;;  %v9409_v43 = vld [vmem:[%s14108_s1 + $0x324] ss:$16 sps:$4 sm:$0xff]  }
  0x30   : > { %6581 = vmatprep.subr.bf16.mxu0 %v9323_v44  ;;  %7269 = vmatprep.subr.bf16.mxu1 %v9325_v45  ;;  %v9412_v44 = vld [vmem:[%s14108_s1 + $0x32c] ss:$16 sps:$4 sm:$0xff]   ;;  %v9407_v45 = vld [vmem:[%s14108_s1 + $0x320] ss:$16 sps:$4 sm:$0xff]  }
  0x33   : > { %6582 = vmatpush1.bf16.msra.mxu0 %v9327_v48  ;;  %7270 = vmatpush1.bf16.msra.mxu1 %v9328_v49  ;;  %v9418_v48 = vld [vmem:[%s14108_s1 + $0x34c] ss:$16 sps:$4 sm:$0xff]   ;;  %v9413_v49 = vld [vmem:[%s14108_s1 + $0x340] ss:$16 sps:$4 sm:$0xff]  }
  0x34   : > { %6583 = vmatprep.subr.bf16.mxu0 %v9329_v51  ;;  %7271 = vmatprep.subr.bf16.mxu1 %v9331_v52  ;;  %v9421_v51 = vld [vmem:[%s14108_s1 + $0x364] ss:$16 sps:$4 sm:$0xff]   ;;  %v9424_v52 = vld [vmem:[%s14108_s1 + $0x36c] ss:$16 sps:$4 sm:$0xff]  }
  0x37   : > { %6584 = vmatpush1.bf16.msra.mxu0 %v9333_v53  ;;  %7272 = vmatpush1.bf16.msra.mxu1 %v9334_v54  ;;  %v9419_v53 = vld [vmem:[%s14108_s1 + $0x360] ss:$16 sps:$4 sm:$0xff]   ;;  %v9422_v54 = vld [vmem:[%s14108_s1 + $0x368] ss:$16 sps:$4 sm:$0xff]  }
  0x38   : > { %6585 = vmatprep.subr.bf16.mxu0 %v9335_v55  ;;  %7273 = vmatprep.subr.bf16.mxu1 %v9337_v56  ;;  %v9427_v55 = vld [vmem:[%s14108_s1 + $0x384] ss:$16 sps:$4 sm:$0xff]   ;;  %v9430_v56 = vld [vmem:[%s14108_s1 + $0x38c] ss:$16 sps:$4 sm:$0xff]  }
  0x3b   : > { %6586 = vmatpush1.bf16.msra.mxu0 %v9339_v57  ;;  %7274 = vmatpush1.bf16.msra.mxu1 %v9340_v58  ;;  %v9425_v57 = vld [vmem:[%s14108_s1 + $0x380] ss:$16 sps:$4 sm:$0xff]   ;;  %v9428_v58 = vld [vmem:[%s14108_s1 + $0x388] ss:$16 sps:$4 sm:$0xff]  }
  0x3c   : > { %6587 = vmatprep.subr.bf16.mxu0 %v9341_v59  ;;  %7275 = vmatprep.subr.bf16.mxu1 %v9343_v60  ;;  %v9433_v59 = vld [vmem:[%s14108_s1 + $0x3a4] ss:$16 sps:$4 sm:$0xff]   ;;  %v9436_v60 = vld [vmem:[%s14108_s1 + $0x3ac] ss:$16 sps:$4 sm:$0xff]  }
  0x3f   : > { %6588 = vmatpush1.bf16.msra.mxu0 %v9345_v61  ;;  %7276 = vmatpush1.bf16.msra.mxu1 %v9346_v62  ;;  %v9431_v61 = vld [vmem:[%s14108_s1 + $0x3a0] ss:$16 sps:$4 sm:$0xff]   ;;  %v9434_v62 = vld [vmem:[%s14108_s1 + $0x3a8] ss:$16 sps:$4 sm:$0xff]  }
  0x40   : > { %6589 = vmatprep.subr.bf16.mxu0 %v9347_v63  ;;  %7277 = vmatprep.subr.bf16.mxu1 %v9349_v0  ;;  %v9439_v63 = vld [vmem:[%s14108_s1 + $0x3c4] ss:$16 sps:$4 sm:$0xff]   ;;  %v9442_v0 = vld [vmem:[%s14108_s1 + $0x3cc] ss:$16 sps:$4 sm:$0xff]  }
  0x43   : > { %6590 = vmatpush1.bf16.msra.mxu0 %v9351_v1  ;;  %7278 = vmatpush1.bf16.msra.mxu1 %v9352_v2  ;;  %v9437_v1 = vld [vmem:[%s14108_s1 + $0x3c0] ss:$16 sps:$4 sm:$0xff]   ;;  %v9440_v2 = vld [vmem:[%s14108_s1 + $0x3c8] ss:$16 sps:$4 sm:$0xff]  }
  0x44   : > { %6602 = vmatprep.subr.bf16.mxu0 %v9355_v3  ;;  %7290 = vmatprep.subr.bf16.mxu1 %v9358_v4  ;;  %v9445_v3 = vld [vmem:[%s14108_s1 + $0x3e4] ss:$16 sps:$4 sm:$0xff]   ;;  %v9448_v4 = vld [vmem:[%s14108_s1 + $0x3ec] ss:$16 sps:$4 sm:$0xff]  }
  0x46   : > { %6592 = vmatmul.mubr.bf16.vlgmr.msra.gmra.mrb[0].mxu0 %v8061_v5  ;;  %7280 = vmatmul.mubr.bf16.vlgmr.msra.gmra.mrb[0].mxu1 %v8061_v5  ;;  %v9443_v5 = vld [vmem:[%s14108_s1 + $0x3e0] ss:$16 sps:$4 sm:$0xff]  }
  0x47   : > { %6603 = vmatpush1.bf16.msra.mxu0 %v9353_v6  ;;  %7291 = vmatpush1.bf16.msra.mxu1 %v9356_v7  ;;  %v9446_v6 = vld [vmem:[%s14108_s1 + $0x3e8] ss:$16 sps:$4 sm:$0xff]   ;;  %v9451_v7 = vld [vmem:[%s14108_s1 + $0x404] ss:$16 sps:$4 sm:$0xff]  }
  0x48   : > { %6604 = vmatprep.subr.bf16.mxu0 %v9361_v8  ;;  %7292 = vmatprep.subr.bf16.mxu1 %v9364_v9  ;;  %v9454_v8 = vld [vmem:[%s14108_s1 + $0x40c] ss:$16 sps:$4 sm:$0xff]   ;;  %v8063_v9 = vcombine.low %v11119_v30, %v11122_v31  ;;  %v9476_v30 = vld [vmem:[%s14108_s1 + $0x488] ss:$16 sps:$4 sm:$0xff]   ;;  %v9481_v31 = vld [vmem:[%s14108_s1 + $0x4a4] ss:$16 sps:$4 sm:$0xff]  }
  0x49   : > { %6634 = vmatprep.mubr.bf16.mxu0 %v8064_v34  ;;  %7322 = vmatprep.mubr.bf16.mxu1 %v8064_v34  ;;  %v9482_v34 = vld [vmem:[%s14108_s1 + $0x4a8] ss:$16 sps:$4 sm:$0xff]  }
  0x4b   : > { %6605 = vmatpush1.bf16.msra.mxu0 %v9359_v10  ;;  %7293 = vmatpush1.bf16.msra.mxu1 %v9362_v11  ;;  %v9449_v10 = vld [vmem:[%s14108_s1 + $0x400] ss:$16 sps:$4 sm:$0xff]   ;;  %v9452_v11 = vld [vmem:[%s14108_s1 + $0x408] ss:$16 sps:$4 sm:$0xff]  }
  0x4c   : > { %6606 = vmatprep.subr.bf16.mxu0 %v9367_v12  ;;  %7294 = vmatprep.subr.bf16.mxu1 %v9370_v13  ;;  %v9457_v12 = vld [vmem:[%s14108_s1 + $0x424] ss:$16 sps:$4 sm:$0xff]   ;;  %v9460_v13 = vld [vmem:[%s14108_s1 + $0x42c] ss:$16 sps:$4 sm:$0xff]  }
  0x4f   : > { %6607 = vmatpush1.bf16.msra.mxu0 %v9365_v14  ;;  %7295 = vmatpush1.bf16.msra.mxu1 %v9368_v15  ;;  %v11261_v14 = vld [vmem:[%s10976_s12 + $0x10] sm:$0xff] }
  0x50   : > { %6608 = vmatprep.subr.bf16.mxu0 %v9373_v16  ;;  %7296 = vmatprep.subr.bf16.mxu1 %v9376_v17  ;;  %v11264_v15 = vld [vmem:[%s10976_s12 + $0x90] sm:$0xff] }
  0x51   : > { %v8066_v16 = vcombine.high %v11261_v14, %v11264_v15  ;;  %v9455_v17 = vld [vmem:[%s14108_s1 + $0x420] ss:$16 sps:$4 sm:$0xff]  }
  0x53   : > { %6609 = vmatpush1.bf16.msra.mxu0 %v9371_v18  ;;  %7297 = vmatpush1.bf16.msra.mxu1 %v9374_v19  ;;  %v9458_v18 = vld [vmem:[%s14108_s1 + $0x428] ss:$16 sps:$4 sm:$0xff]   ;;  %v9463_v19 = vld [vmem:[%s14108_s1 + $0x444] ss:$16 sps:$4 sm:$0xff]  }
  0x54   : > { %6610 = vmatprep.subr.bf16.mxu0 %v9379_v20  ;;  %7298 = vmatprep.subr.bf16.mxu1 %v9382_v21  ;;  %v9466_v20 = vld [vmem:[%s14108_s1 + $0x44c] ss:$16 sps:$4 sm:$0xff]   ;;  %v9461_v21 = vld [vmem:[%s14108_s1 + $0x440] ss:$16 sps:$4 sm:$0xff]  }
  0x57   : > { %6611 = vmatpush1.bf16.msra.mxu0 %v9377_v22  ;;  %7299 = vmatpush1.bf16.msra.mxu1 %v9380_v23  ;;  %v9464_v22 = vld [vmem:[%s14108_s1 + $0x448] ss:$16 sps:$4 sm:$0xff]   ;;  %v9469_v23 = vld [vmem:[%s14108_s1 + $0x464] ss:$16 sps:$4 sm:$0xff]  }
  0x58   : > { %6612 = vmatprep.subr.bf16.mxu0 %v9385_v24  ;;  %7300 = vmatprep.subr.bf16.mxu1 %v9388_v25  ;;  %v9472_v24 = vld [vmem:[%s14108_s1 + $0x46c] ss:$16 sps:$4 sm:$0xff]   ;;  %v9467_v25 = vld [vmem:[%s14108_s1 + $0x460] ss:$16 sps:$4 sm:$0xff]  }
  0x5b   : > { %6613 = vmatpush1.bf16.msra.mxu0 %v9383_v26  ;;  %7301 = vmatpush1.bf16.msra.mxu1 %v9386_v27  ;;  %v9470_v26 = vld [vmem:[%s14108_s1 + $0x468] ss:$16 sps:$4 sm:$0xff]   ;;  %v9475_v27 = vld [vmem:[%s14108_s1 + $0x484] ss:$16 sps:$4 sm:$0xff]  }
  0x5c   : > { %6614 = vmatprep.subr.bf16.mxu0 %v9391_v28  ;;  %7302 = vmatprep.subr.bf16.mxu1 %v9394_v29  ;;  %v9478_v28 = vld [vmem:[%s14108_s1 + $0x48c] ss:$16 sps:$4 sm:$0xff]   ;;  %v9473_v29 = vld [vmem:[%s14108_s1 + $0x480] ss:$16 sps:$4 sm:$0xff]  }
  0x5f   : > { %6615 = vmatpush1.bf16.msra.mxu0 %v9389_v32  ;;  %7303 = vmatpush1.bf16.msra.mxu1 %v9392_v33  ;;  %v9484_v32 = vld [vmem:[%s14108_s1 + $0x4ac] ss:$16 sps:$4 sm:$0xff]   ;;  %v9479_v33 = vld [vmem:[%s14108_s1 + $0x4a0] ss:$16 sps:$4 sm:$0xff]  }
  0x60   : > { %6616 = vmatprep.subr.bf16.mxu0 %v9397_v35  ;;  %7304 = vmatprep.subr.bf16.mxu1 %v9400_v36  ;;  %v9487_v35 = vld [vmem:[%s14108_s1 + $0x4c4] ss:$16 sps:$4 sm:$0xff]   ;;  %v9490_v36 = vld [vmem:[%s14108_s1 + $0x4cc] ss:$16 sps:$4 sm:$0xff]  }
  0x63   : > { %6617 = vmatpush1.bf16.msra.mxu0 %v9395_v37  ;;  %7305 = vmatpush1.bf16.msra.mxu1 %v9398_v38  ;;  %v9485_v37 = vld [vmem:[%s14108_s1 + $0x4c0] ss:$16 sps:$4 sm:$0xff]   ;;  %v9488_v38 = vld [vmem:[%s14108_s1 + $0x4c8] ss:$16 sps:$4 sm:$0xff]  }
  0x64   : > { %6618 = vmatprep.subr.bf16.mxu0 %v9403_v39  ;;  %7306 = vmatprep.subr.bf16.mxu1 %v9406_v40  ;;  %v9493_v39 = vld [vmem:[%s14108_s1 + $0x4e4] ss:$16 sps:$4 sm:$0xff]   ;;  %v9496_v40 = vld [vmem:[%s14108_s1 + $0x4ec] ss:$16 sps:$4 sm:$0xff]  }
  0x67   : > { %6619 = vmatpush1.bf16.msra.mxu0 %v9401_v41  ;;  %7307 = vmatpush1.bf16.msra.mxu1 %v9404_v42  ;;  %v9491_v41 = vld [vmem:[%s14108_s1 + $0x4e0] ss:$16 sps:$4 sm:$0xff]   ;;  %v9494_v42 = vld [vmem:[%s14108_s1 + $0x4e8] ss:$16 sps:$4 sm:$0xff]  }
  0x68   : > { %6620 = vmatprep.subr.bf16.mxu0 %v9409_v43  ;;  %7308 = vmatprep.subr.bf16.mxu1 %v9412_v44  ;;  %v9499_v43 = vld [vmem:[%s14108_s1 + $0x504] ss:$16 sps:$4 sm:$0xff]   ;;  %v9502_v44 = vld [vmem:[%s14108_s1 + $0x50c] ss:$16 sps:$4 sm:$0xff]  }
  0x6b   : > { %6621 = vmatpush1.bf16.msra.mxu0 %v9407_v45  ;;  %7309 = vmatpush1.bf16.msra.mxu1 %v9410_v46  ;;  %v9497_v45 = vld [vmem:[%s14108_s1 + $0x500] ss:$16 sps:$4 sm:$0xff]   ;;  %v9500_v46 = vld [vmem:[%s14108_s1 + $0x508] ss:$16 sps:$4 sm:$0xff]  }
  0x6c   : > { %6622 = vmatprep.subr.bf16.mxu0 %v9415_v47  ;;  %7310 = vmatprep.subr.bf16.mxu1 %v9418_v48  ;;  %v9505_v47 = vld [vmem:[%s14108_s1 + $0x524] ss:$16 sps:$4 sm:$0xff]   ;;  %v9508_v48 = vld [vmem:[%s14108_s1 + $0x52c] ss:$16 sps:$4 sm:$0xff]  }
  0x6f   : > { %6623 = vmatpush1.bf16.msra.mxu0 %v9413_v49  ;;  %7311 = vmatpush1.bf16.msra.mxu1 %v9416_v50  ;;  %v9503_v49 = vld [vmem:[%s14108_s1 + $0x520] ss:$16 sps:$4 sm:$0xff]   ;;  %v9506_v50 = vld [vmem:[%s14108_s1 + $0x528] ss:$16 sps:$4 sm:$0xff]  }
  0x70   : > { %6624 = vmatprep.subr.bf16.mxu0 %v9421_v51  ;;  %7312 = vmatprep.subr.bf16.mxu1 %v9424_v52  ;;  %v9511_v51 = vld [vmem:[%s14108_s1 + $0x544] ss:$16 sps:$4 sm:$0xff]   ;;  %v9514_v52 = vld [vmem:[%s14108_s1 + $0x54c] ss:$16 sps:$4 sm:$0xff]  }
  0x73   : > { %6625 = vmatpush1.bf16.msra.mxu0 %v9419_v53  ;;  %7313 = vmatpush1.bf16.msra.mxu1 %v9422_v54  ;;  %v9509_v53 = vld [vmem:[%s14108_s1 + $0x540] ss:$16 sps:$4 sm:$0xff]   ;;  %v9512_v54 = vld [vmem:[%s14108_s1 + $0x548] ss:$16 sps:$4 sm:$0xff]  }
  0x74   : > { %6626 = vmatprep.subr.bf16.mxu0 %v9427_v55  ;;  %7314 = vmatprep.subr.bf16.mxu1 %v9430_v56  ;;  %v9517_v55 = vld [vmem:[%s14108_s1 + $0x564] ss:$16 sps:$4 sm:$0xff]   ;;  %v9520_v56 = vld [vmem:[%s14108_s1 + $0x56c] ss:$16 sps:$4 sm:$0xff]  }
  0x77   : > { %6627 = vmatpush1.bf16.msra.mxu0 %v9425_v57  ;;  %7315 = vmatpush1.bf16.msra.mxu1 %v9428_v58  ;;  %v9515_v57 = vld [vmem:[%s14108_s1 + $0x560] ss:$16 sps:$4 sm:$0xff]   ;;  %v9518_v58 = vld [vmem:[%s14108_s1 + $0x568] ss:$16 sps:$4 sm:$0xff]  }
  0x78   : > { %6628 = vmatprep.subr.bf16.mxu0 %v9433_v59  ;;  %7316 = vmatprep.subr.bf16.mxu1 %v9436_v60  ;;  %v9523_v59 = vld [vmem:[%s14108_s1 + $0x584] ss:$16 sps:$4 sm:$0xff]   ;;  %v9526_v60 = vld [vmem:[%s14108_s1 + $0x58c] ss:$16 sps:$4 sm:$0xff]  }
  0x7b   : > { %6629 = vmatpush1.bf16.msra.mxu0 %v9431_v61  ;;  %7317 = vmatpush1.bf16.msra.mxu1 %v9434_v62  ;;  %v9521_v61 = vld [vmem:[%s14108_s1 + $0x580] ss:$16 sps:$4 sm:$0xff]   ;;  %v9524_v62 = vld [vmem:[%s14108_s1 + $0x588] ss:$16 sps:$4 sm:$0xff]  }
  0x7c   : > { %6630 = vmatprep.subr.bf16.mxu0 %v9439_v63  ;;  %7318 = vmatprep.subr.bf16.mxu1 %v9442_v0  ;;  %v9529_v63 = vld [vmem:[%s14108_s1 + $0x5a4] ss:$16 sps:$4 sm:$0xff]   ;;  %v9532_v0 = vld [vmem:[%s14108_s1 + $0x5ac] ss:$16 sps:$4 sm:$0xff]  }
  0x7f   : > { %6631 = vmatpush1.bf16.msra.mxu0 %v9437_v1  ;;  %7319 = vmatpush1.bf16.msra.mxu1 %v9440_v2  ;;  %v9527_v1 = vld [vmem:[%s14108_s1 + $0x5a0] ss:$16 sps:$4 sm:$0xff]   ;;  %v9530_v2 = vld [vmem:[%s14108_s1 + $0x5a8] ss:$16 sps:$4 sm:$0xff]  }
  0x80   : > { %6632 = vmatprep.subr.bf16.mxu0 %v9445_v3  ;;  %7320 = vmatprep.subr.bf16.mxu1 %v9448_v4  ;;  %v9535_v3 = vld [vmem:[%s14108_s1 + $0x5c4] ss:$16 sps:$4 sm:$0xff]   ;;  %v9538_v4 = vld [vmem:[%s14108_s1 + $0x5cc] ss:$16 sps:$4 sm:$0xff]  }
  0x83   : > { %6633 = vmatpush1.bf16.msra.mxu0 %v9443_v5  ;;  %7321 = vmatpush1.bf16.msra.mxu1 %v9446_v6  ;;  %v9533_v5 = vld [vmem:[%s14108_s1 + $0x5c0] ss:$16 sps:$4 sm:$0xff]   ;;  %v9536_v6 = vld [vmem:[%s14108_s1 + $0x5c8] ss:$16 sps:$4 sm:$0xff]  }
  0x84   : > { %6645 = vmatprep.subr.bf16.mxu0 %v9451_v7  ;;  %7333 = vmatprep.subr.bf16.mxu1 %v9454_v8  ;;  %v9541_v7 = vld [vmem:[%s14108_s1 + $0x5e4] ss:$16 sps:$4 sm:$0xff]   ;;  %v9544_v8 = vld [vmem:[%s14108_s1 + $0x5ec] ss:$16 sps:$4 sm:$0xff]  }
  0x86   : > { %6635 = vmatmul.mubr.bf16.vlgmr.msra.gmra.mrb[0].mxu0 %v8063_v9  ;;  %7323 = vmatmul.mubr.bf16.vlgmr.msra.gmra.mrb[0].mxu1 %v8063_v9  ;;  %v9539_v9 = vld [vmem:[%s14108_s1 + $0x5e0] ss:$16 sps:$4 sm:$0xff]  }
  0x87   : > { %6646 = vmatpush1.bf16.msra.mxu0 %v9449_v10  ;;  %7334 = vmatpush1.bf16.msra.mxu1 %v9452_v11  ;;  %v9542_v10 = vld [vmem:[%s14108_s1 + $0x5e8] ss:$16 sps:$4 sm:$0xff]   ;;  %v9547_v11 = vld [vmem:[%s14108_s1 + $0x604] ss:$16 sps:$4 sm:$0xff]  }
  0x88   : > { %6647 = vmatprep.subr.bf16.mxu0 %v9457_v12  ;;  %7335 = vmatprep.subr.bf16.mxu1 %v9460_v13  ;;  %v9550_v12 = vld [vmem:[%s14108_s1 + $0x60c] ss:$16 sps:$4 sm:$0xff]   ;;  %v9545_v13 = vld [vmem:[%s14108_s1 + $0x600] ss:$16 sps:$4 sm:$0xff]  }
  0x89   : > { %6677 = vmatprep.mubr.bf16.mxu0 %v8066_v16  ;;  %7365 = vmatprep.mubr.bf16.mxu1 %v8066_v16  ;;  %v9548_v16 = vld [vmem:[%s14108_s1 + $0x608] ss:$16 sps:$4 sm:$0xff]  }
  0x8b   : > { %6648 = vmatpush1.bf16.msra.mxu0 %v9455_v17  ;;  %7336 = vmatpush1.bf16.msra.mxu1 %v9458_v18  ;;  %v8065_v17 = vcombine.low %v11261_v14, %v11264_v15  ;;  %v11457_v18 = vld [vmem:[%s10976_s12 + $0x18] sm:$0xff]  ;;  %v9551_v14 = vld [vmem:[%s14108_s1 + $0x620] ss:$16 sps:$4 sm:$0xff]  }
  0x8c   : > { %6649 = vmatprep.subr.bf16.mxu0 %v9463_v19  ;;  %7337 = vmatprep.subr.bf16.mxu1 %v9466_v20  ;;  %v11460_v19 = vld [vmem:[%s10976_s12 + $0x98] sm:$0xff]  ;;  %v9553_v20 = vld [vmem:[%s14108_s1 + $0x624] ss:$16 sps:$4 sm:$0xff]  }
  0x8d   : > { %v9554_v15 = vld [vmem:[%s14108_s1 + $0x628] ss:$16 sps:$4 sm:$0xff]  }
  0x8f   : > { %6650 = vmatpush1.bf16.msra.mxu0 %v9461_v21  ;;  %7338 = vmatpush1.bf16.msra.mxu1 %v9464_v22  ;;  %v9556_v21 = vld [vmem:[%s14108_s1 + $0x62c] ss:$16 sps:$4 sm:$0xff]   ;;  %v8068_v22 = vcombine.high %v11457_v18, %v11460_v19 }
  0x90   : > { %6651 = vmatprep.subr.bf16.mxu0 %v9469_v23  ;;  %7339 = vmatprep.subr.bf16.mxu1 %v9472_v24  ;;  %v9559_v23 = vld [vmem:[%s14108_s1 + $0x644] ss:$16 sps:$4 sm:$0xff]   ;;  %v9562_v24 = vld [vmem:[%s14108_s1 + $0x64c] ss:$16 sps:$4 sm:$0xff]  }
  0x93   : > { %6652 = vmatpush1.bf16.msra.mxu0 %v9467_v25  ;;  %7340 = vmatpush1.bf16.msra.mxu1 %v9470_v26  ;;  %v9557_v25 = vld [vmem:[%s14108_s1 + $0x640] ss:$16 sps:$4 sm:$0xff]   ;;  %v9560_v26 = vld [vmem:[%s14108_s1 + $0x648] ss:$16 sps:$4 sm:$0xff]  }
  0x94   : > { %6653 = vmatprep.subr.bf16.mxu0 %v9475_v27  ;;  %7341 = vmatprep.subr.bf16.mxu1 %v9478_v28  ;;  %v9565_v27 = vld [vmem:[%s14108_s1 + $0x664] ss:$16 sps:$4 sm:$0xff]   ;;  %v9568_v28 = vld [vmem:[%s14108_s1 + $0x66c] ss:$16 sps:$4 sm:$0xff]  }
  0x97   : > { %6654 = vmatpush1.bf16.msra.mxu0 %v9473_v29  ;;  %7342 = vmatpush1.bf16.msra.mxu1 %v9476_v30  ;;  %v9563_v29 = vld [vmem:[%s14108_s1 + $0x660] ss:$16 sps:$4 sm:$0xff]   ;;  %v9566_v30 = vld [vmem:[%s14108_s1 + $0x668] ss:$16 sps:$4 sm:$0xff]  }
  0x98   : > { %6655 = vmatprep.subr.bf16.mxu0 %v9481_v31  ;;  %7343 = vmatprep.subr.bf16.mxu1 %v9484_v32  ;;  %v9571_v31 = vld [vmem:[%s14108_s1 + $0x684] ss:$16 sps:$4 sm:$0xff]   ;;  %v9574_v32 = vld [vmem:[%s14108_s1 + $0x68c] ss:$16 sps:$4 sm:$0xff]  }
  0x9b   : > { %6656 = vmatpush1.bf16.msra.mxu0 %v9479_v33  ;;  %7344 = vmatpush1.bf16.msra.mxu1 %v9482_v34  ;;  %v9569_v33 = vld [vmem:[%s14108_s1 + $0x680] ss:$16 sps:$4 sm:$0xff]   ;;  %v9572_v34 = vld [vmem:[%s14108_s1 + $0x688] ss:$16 sps:$4 sm:$0xff]  }
  0x9c   : > { %6657 = vmatprep.subr.bf16.mxu0 %v9487_v35  ;;  %7345 = vmatprep.subr.bf16.mxu1 %v9490_v36  ;;  %v9577_v35 = vld [vmem:[%s14108_s1 + $0x6a4] ss:$16 sps:$4 sm:$0xff]   ;;  %v9580_v36 = vld [vmem:[%s14108_s1 + $0x6ac] ss:$16 sps:$4 sm:$0xff]  }
  0x9f   : > { %6658 = vmatpush1.bf16.msra.mxu0 %v9485_v37  ;;  %7346 = vmatpush1.bf16.msra.mxu1 %v9488_v38  ;;  %v9575_v37 = vld [vmem:[%s14108_s1 + $0x6a0] ss:$16 sps:$4 sm:$0xff]   ;;  %v9578_v38 = vld [vmem:[%s14108_s1 + $0x6a8] ss:$16 sps:$4 sm:$0xff]  }
  0xa0   : > { %6659 = vmatprep.subr.bf16.mxu0 %v9493_v39  ;;  %7347 = vmatprep.subr.bf16.mxu1 %v9496_v40  ;;  %v9583_v39 = vld [vmem:[%s14108_s1 + $0x6c4] ss:$16 sps:$4 sm:$0xff]   ;;  %v9586_v40 = vld [vmem:[%s14108_s1 + $0x6cc] ss:$16 sps:$4 sm:$0xff]  }
  0xa3   : > { %6660 = vmatpush1.bf16.msra.mxu0 %v9491_v41  ;;  %7348 = vmatpush1.bf16.msra.mxu1 %v9494_v42  ;;  %v9581_v41 = vld [vmem:[%s14108_s1 + $0x6c0] ss:$16 sps:$4 sm:$0xff]   ;;  %v9584_v42 = vld [vmem:[%s14108_s1 + $0x6c8] ss:$16 sps:$4 sm:$0xff]  }
  0xa4   : > { %6661 = vmatprep.subr.bf16.mxu0 %v9499_v43  ;;  %7349 = vmatprep.subr.bf16.mxu1 %v9502_v44  ;;  %v9589_v43 = vld [vmem:[%s14108_s1 + $0x6e4] ss:$16 sps:$4 sm:$0xff]   ;;  %v9592_v44 = vld [vmem:[%s14108_s1 + $0x6ec] ss:$16 sps:$4 sm:$0xff]  }
  0xa7   : > { %6662 = vmatpush1.bf16.msra.mxu0 %v9497_v45  ;;  %7350 = vmatpush1.bf16.msra.mxu1 %v9500_v46  ;;  %v9587_v45 = vld [vmem:[%s14108_s1 + $0x6e0] ss:$16 sps:$4 sm:$0xff]   ;;  %v9590_v46 = vld [vmem:[%s14108_s1 + $0x6e8] ss:$16 sps:$4 sm:$0xff]  }
  0xa8   : > { %6663 = vmatprep.subr.bf16.mxu0 %v9505_v47  ;;  %7351 = vmatprep.subr.bf16.mxu1 %v9508_v48  ;;  %v9595_v47 = vld [vmem:[%s14108_s1 + $0x704] ss:$16 sps:$4 sm:$0xff]   ;;  %v9598_v48 = vld [vmem:[%s14108_s1 + $0x70c] ss:$16 sps:$4 sm:$0xff]  }
  0xab   : > { %6664 = vmatpush1.bf16.msra.mxu0 %v9503_v49  ;;  %7352 = vmatpush1.bf16.msra.mxu1 %v9506_v50  ;;  %v9593_v49 = vld [vmem:[%s14108_s1 + $0x700] ss:$16 sps:$4 sm:$0xff]   ;;  %v9596_v50 = vld [vmem:[%s14108_s1 + $0x708] ss:$16 sps:$4 sm:$0xff]  }
  0xac   : > { %6665 = vmatprep.subr.bf16.mxu0 %v9511_v51  ;;  %7353 = vmatprep.subr.bf16.mxu1 %v9514_v52  ;;  %v9601_v51 = vld [vmem:[%s14108_s1 + $0x724] ss:$16 sps:$4 sm:$0xff]   ;;  %v9604_v52 = vld [vmem:[%s14108_s1 + $0x72c] ss:$16 sps:$4 sm:$0xff]  }
  0xaf   : > { %6666 = vmatpush1.bf16.msra.mxu0 %v9509_v53  ;;  %7354 = vmatpush1.bf16.msra.mxu1 %v9512_v54  ;;  %v9599_v53 = vld [vmem:[%s14108_s1 + $0x720] ss:$16 sps:$4 sm:$0xff]   ;;  %v9602_v54 = vld [vmem:[%s14108_s1 + $0x728] ss:$16 sps:$4 sm:$0xff]  }
  0xb0   : > { %6667 = vmatprep.subr.bf16.mxu0 %v9517_v55  ;;  %7355 = vmatprep.subr.bf16.mxu1 %v9520_v56  ;;  %v9607_v55 = vld [vmem:[%s14108_s1 + $0x744] ss:$16 sps:$4 sm:$0xff]   ;;  %v9610_v56 = vld [vmem:[%s14108_s1 + $0x74c] ss:$16 sps:$4 sm:$0xff]  }
  0xb3   : > { %6668 = vmatpush1.bf16.msra.mxu0 %v9515_v57  ;;  %7356 = vmatpush1.bf16.msra.mxu1 %v9518_v58  ;;  %v9605_v57 = vld [vmem:[%s14108_s1 + $0x740] ss:$16 sps:$4 sm:$0xff]   ;;  %v9608_v58 = vld [vmem:[%s14108_s1 + $0x748] ss:$16 sps:$4 sm:$0xff]  }
  0xb4   : > { %6669 = vmatprep.subr.bf16.mxu0 %v9523_v59  ;;  %7357 = vmatprep.subr.bf16.mxu1 %v9526_v60  ;;  %v9613_v59 = vld [vmem:[%s14108_s1 + $0x764] ss:$16 sps:$4 sm:$0xff]   ;;  %v9616_v60 = vld [vmem:[%s14108_s1 + $0x76c] ss:$16 sps:$4 sm:$0xff]  }
  0xb7   : > { %6670 = vmatpush1.bf16.msra.mxu0 %v9521_v61  ;;  %7358 = vmatpush1.bf16.msra.mxu1 %v9524_v62  ;;  %v9611_v61 = vld [vmem:[%s14108_s1 + $0x760] ss:$16 sps:$4 sm:$0xff]   ;;  %v9614_v62 = vld [vmem:[%s14108_s1 + $0x768] ss:$16 sps:$4 sm:$0xff]  }
  0xb8   : > { %6671 = vmatprep.subr.bf16.mxu0 %v9529_v63  ;;  %7359 = vmatprep.subr.bf16.mxu1 %v9532_v0  ;;  %v9619_v63 = vld [vmem:[%s14108_s1 + $0x784] ss:$16 sps:$4 sm:$0xff]   ;;  %v9622_v0 = vld [vmem:[%s14108_s1 + $0x78c] ss:$16 sps:$4 sm:$0xff]  }
  0xbb   : > { %6672 = vmatpush1.bf16.msra.mxu0 %v9527_v1  ;;  %7360 = vmatpush1.bf16.msra.mxu1 %v9530_v2  ;;  %v9617_v1 = vld [vmem:[%s14108_s1 + $0x780] ss:$16 sps:$4 sm:$0xff]   ;;  %v9620_v2 = vld [vmem:[%s14108_s1 + $0x788] ss:$16 sps:$4 sm:$0xff]  }
  0xbc   : > { %6673 = vmatprep.subr.bf16.mxu0 %v9535_v3  ;;  %7361 = vmatprep.subr.bf16.mxu1 %v9538_v4  ;;  %v9625_v3 = vld [vmem:[%s14108_s1 + $0x7a4] ss:$16 sps:$4 sm:$0xff]   ;;  %v9628_v4 = vld [vmem:[%s14108_s1 + $0x7ac] ss:$16 sps:$4 sm:$0xff]  }
  0xbf   : > { %6674 = vmatpush1.bf16.msra.mxu0 %v9533_v5  ;;  %7362 = vmatpush1.bf16.msra.mxu1 %v9536_v6  ;;  %v9623_v5 = vld [vmem:[%s14108_s1 + $0x7a0] ss:$16 sps:$4 sm:$0xff]   ;;  %v9626_v6 = vld [vmem:[%s14108_s1 + $0x7a8] ss:$16 sps:$4 sm:$0xff]  }
  0xc0   : > { %6675 = vmatprep.subr.bf16.mxu0 %v9541_v7  ;;  %7363 = vmatprep.subr.bf16.mxu1 %v9544_v8  ;;  %v9631_v7 = vld [vmem:[%s14108_s1 + $0x7c4] ss:$16 sps:$4 sm:$0xff]   ;;  %v9634_v8 = vld [vmem:[%s14108_s1 + $0x7cc] ss:$16 sps:$4 sm:$0xff]  }
  0xc3   : > { %6676 = vmatpush1.bf16.msra.mxu0 %v9539_v9  ;;  %7364 = vmatpush1.bf16.msra.mxu1 %v9542_v10  ;;  %v9629_v9 = vld [vmem:[%s14108_s1 + $0x7c0] ss:$16 sps:$4 sm:$0xff]   ;;  %v9632_v10 = vld [vmem:[%s14108_s1 + $0x7c8] ss:$16 sps:$4 sm:$0xff]  }
  0xc4   : > { %6688 = vmatprep.subr.bf16.mxu0 %v9547_v11  ;;  %7376 = vmatprep.subr.bf16.mxu1 %v9550_v12  ;;  %v9637_v11 = vld [vmem:[%s14108_s1 + $0x7e4] ss:$16 sps:$4 sm:$0xff]   ;;  %v9640_v12 = vld [vmem:[%s14108_s1 + $0x7ec] ss:$16 sps:$4 sm:$0xff]  }
  0xc6   : > { %6678 = vmatmul.mubr.bf16.vlgmr.msra.gmra.mrb[0].mxu0 %v8065_v17  ;;  %7366 = vmatmul.mubr.bf16.vlgmr.msra.gmra.mrb[0].mxu1 %v8065_v17  ;;  %v9643_v17 = vld [vmem:[%s14108_s1 + $0x804] ss:$16 sps:$4 sm:$0xff]  }
  0xc7   : > { %6689 = vmatpush1.bf16.msra.mxu0 %v9545_v13  ;;  %7377 = vmatpush1.bf16.msra.mxu1 %v9548_v16  ;;  %v9635_v13 = vld [vmem:[%s14108_s1 + $0x7e0] ss:$16 sps:$4 sm:$0xff]   ;;  %v9638_v16 = vld [vmem:[%s14108_s1 + $0x7e8] ss:$16 sps:$4 sm:$0xff]  }
  0xc8   : > { %6690 = vmatprep.subr.bf16.mxu0 %v9553_v20  ;;  %7378 = vmatprep.subr.bf16.mxu1 %v9556_v21  ;;  %v9646_v20 = vld [vmem:[%s14108_s1 + $0x80c] ss:$16 sps:$4 sm:$0xff]   ;;  %v11651_v21 = vld [vmem:[%s10976_s12 + $0x20] sm:$0xff] }
  0xc9   : > { %6720 = vmatprep.mubr.bf16.mxu0 %v8068_v22  ;;  %7408 = vmatprep.mubr.bf16.mxu1 %v8068_v22  ;;  %v8067_v22 = vcombine.low %v11457_v18, %v11460_v19  ;;  %v9652_v18 = vld [vmem:[%s14108_s1 + $0x82c] ss:$16 sps:$4 sm:$0xff]  }
  0xcb   : > { %6691 = vmatpush1.bf16.msra.mxu0 %v9551_v14  ;;  %7379 = vmatpush1.bf16.msra.mxu1 %v9554_v15  ;;  %v11656_v14 = vld [vmem:[%s10976_s12 + $0xa0] sm:$0xff] }
  0xcc   : > { %6692 = vmatprep.subr.bf16.mxu0 %v9559_v23  ;;  %7380 = vmatprep.subr.bf16.mxu1 %v9562_v24  ;;  %v9641_v15 = vld [vmem:[%s14108_s1 + $0x800] ss:$16 sps:$4 sm:$0xff]   ;;  %v9644_v23 = vld [vmem:[%s14108_s1 + $0x808] ss:$16 sps:$4 sm:$0xff]   ;;  %v9649_v24 = vld [vmem:[%s14108_s1 + $0x824] ss:$16 sps:$4 sm:$0xff]   ;;  %v8070_v19 = vcombine.high %v11651_v21, %v11656_v14 }
  0xcf   : > { %6693 = vmatpush1.bf16.msra.mxu0 %v9557_v25  ;;  %7381 = vmatpush1.bf16.msra.mxu1 %v9560_v26  ;;  %v9647_v25 = vld [vmem:[%s14108_s1 + $0x820] ss:$16 sps:$4 sm:$0xff]   ;;  %v9650_v26 = vld [vmem:[%s14108_s1 + $0x828] ss:$16 sps:$4 sm:$0xff]  }
  0xd0   : > { %6694 = vmatprep.subr.bf16.mxu0 %v9565_v27  ;;  %7382 = vmatprep.subr.bf16.mxu1 %v9568_v28  ;;  %v9655_v27 = vld [vmem:[%s14108_s1 + $0x844] ss:$16 sps:$4 sm:$0xff]   ;;  %v9658_v28 = vld [vmem:[%s14108_s1 + $0x84c] ss:$16 sps:$4 sm:$0xff]  }
  0xd3   : > { %6695 = vmatpush1.bf16.msra.mxu0 %v9563_v29  ;;  %7383 = vmatpush1.bf16.msra.mxu1 %v9566_v30  ;;  %v9653_v29 = vld [vmem:[%s14108_s1 + $0x840] ss:$16 sps:$4 sm:$0xff]   ;;  %v9656_v30 = vld [vmem:[%s14108_s1 + $0x848] ss:$16 sps:$4 sm:$0xff]  }
  0xd4   : > { %6696 = vmatprep.subr.bf16.mxu0 %v9571_v31  ;;  %7384 = vmatprep.subr.bf16.mxu1 %v9574_v32  ;;  %v9661_v31 = vld [vmem:[%s14108_s1 + $0x864] ss:$16 sps:$4 sm:$0xff]   ;;  %v9664_v32 = vld [vmem:[%s14108_s1 + $0x86c] ss:$16 sps:$4 sm:$0xff]  }
  0xd7   : > { %6697 = vmatpush1.bf16.msra.mxu0 %v9569_v33  ;;  %7385 = vmatpush1.bf16.msra.mxu1 %v9572_v34  ;;  %v9659_v33 = vld [vmem:[%s14108_s1 + $0x860] ss:$16 sps:$4 sm:$0xff]   ;;  %v9662_v34 = vld [vmem:[%s14108_s1 + $0x868] ss:$16 sps:$4 sm:$0xff]  }
  0xd8   : > { %6698 = vmatprep.subr.bf16.mxu0 %v9577_v35  ;;  %7386 = vmatprep.subr.bf16.mxu1 %v9580_v36  ;;  %v9667_v35 = vld [vmem:[%s14108_s1 + $0x884] ss:$16 sps:$4 sm:$0xff]   ;;  %v9670_v36 = vld [vmem:[%s14108_s1 + $0x88c] ss:$16 sps:$4 sm:$0xff]  }
  0xdb   : > { %6699 = vmatpush1.bf16.msra.mxu0 %v9575_v37  ;;  %7387 = vmatpush1.bf16.msra.mxu1 %v9578_v38  ;;  %v9665_v37 = vld [vmem:[%s14108_s1 + $0x880] ss:$16 sps:$4 sm:$0xff]   ;;  %v9668_v38 = vld [vmem:[%s14108_s1 + $0x888] ss:$16 sps:$4 sm:$0xff]  }
  0xdc   : > { %6700 = vmatprep.subr.bf16.mxu0 %v9583_v39  ;;  %7388 = vmatprep.subr.bf16.mxu1 %v9586_v40  ;;  %v9673_v39 = vld [vmem:[%s14108_s1 + $0x8a4] ss:$16 sps:$4 sm:$0xff]   ;;  %v9676_v40 = vld [vmem:[%s14108_s1 + $0x8ac] ss:$16 sps:$4 sm:$0xff]  }
  0xdf   : > { %6701 = vmatpush1.bf16.msra.mxu0 %v9581_v41  ;;  %7389 = vmatpush1.bf16.msra.mxu1 %v9584_v42  ;;  %v9671_v41 = vld [vmem:[%s14108_s1 + $0x8a0] ss:$16 sps:$4 sm:$0xff]   ;;  %v9674_v42 = vld [vmem:[%s14108_s1 + $0x8a8] ss:$16 sps:$4 sm:$0xff]  }
  0xe0   : > { %6702 = vmatprep.subr.bf16.mxu0 %v9589_v43  ;;  %7390 = vmatprep.subr.bf16.mxu1 %v9592_v44  ;;  %v9679_v43 = vld [vmem:[%s14108_s1 + $0x8c4] ss:$16 sps:$4 sm:$0xff]   ;;  %v9682_v44 = vld [vmem:[%s14108_s1 + $0x8cc] ss:$16 sps:$4 sm:$0xff]  }
  0xe3   : > { %6703 = vmatpush1.bf16.msra.mxu0 %v9587_v45  ;;  %7391 = vmatpush1.bf16.msra.mxu1 %v9590_v46  ;;  %v9677_v45 = vld [vmem:[%s14108_s1 + $0x8c0] ss:$16 sps:$4 sm:$0xff]   ;;  %v9680_v46 = vld [vmem:[%s14108_s1 + $0x8c8] ss:$16 sps:$4 sm:$0xff]  }
  0xe4   : > { %6704 = vmatprep.subr.bf16.mxu0 %v9595_v47  ;;  %7392 = vmatprep.subr.bf16.mxu1 %v9598_v48  ;;  %v9685_v47 = vld [vmem:[%s14108_s1 + $0x8e4] ss:$16 sps:$4 sm:$0xff]   ;;  %v9688_v48 = vld [vmem:[%s14108_s1 + $0x8ec] ss:$16 sps:$4 sm:$0xff]  }
  0xe7   : > { %6705 = vmatpush1.bf16.msra.mxu0 %v9593_v49  ;;  %7393 = vmatpush1.bf16.msra.mxu1 %v9596_v50  ;;  %v9683_v49 = vld [vmem:[%s14108_s1 + $0x8e0] ss:$16 sps:$4 sm:$0xff]   ;;  %v9686_v50 = vld [vmem:[%s14108_s1 + $0x8e8] ss:$16 sps:$4 sm:$0xff]  }
  0xe8   : > { %6706 = vmatprep.subr.bf16.mxu0 %v9601_v51  ;;  %7394 = vmatprep.subr.bf16.mxu1 %v9604_v52  ;;  %v9691_v51 = vld [vmem:[%s14108_s1 + $0x904] ss:$16 sps:$4 sm:$0xff]   ;;  %v9694_v52 = vld [vmem:[%s14108_s1 + $0x90c] ss:$16 sps:$4 sm:$0xff]  }
  0xeb   : > { %6707 = vmatpush1.bf16.msra.mxu0 %v9599_v53  ;;  %7395 = vmatpush1.bf16.msra.mxu1 %v9602_v54  ;;  %v9689_v53 = vld [vmem:[%s14108_s1 + $0x900] ss:$16 sps:$4 sm:$0xff]   ;;  %v9692_v54 = vld [vmem:[%s14108_s1 + $0x908] ss:$16 sps:$4 sm:$0xff]  }
  0xec   : > { %6708 = vmatprep.subr.bf16.mxu0 %v9607_v55  ;;  %7396 = vmatprep.subr.bf16.mxu1 %v9610_v56  ;;  %v9697_v55 = vld [vmem:[%s14108_s1 + $0x924] ss:$16 sps:$4 sm:$0xff]   ;;  %v9700_v56 = vld [vmem:[%s14108_s1 + $0x92c] ss:$16 sps:$4 sm:$0xff]  }
  0xef   : > { %6709 = vmatpush1.bf16.msra.mxu0 %v9605_v57  ;;  %7397 = vmatpush1.bf16.msra.mxu1 %v9608_v58  ;;  %v9695_v57 = vld [vmem:[%s14108_s1 + $0x920] ss:$16 sps:$4 sm:$0xff]   ;;  %v9698_v58 = vld [vmem:[%s14108_s1 + $0x928] ss:$16 sps:$4 sm:$0xff]  }
  0xf0   : > { %6710 = vmatprep.subr.bf16.mxu0 %v9613_v59  ;;  %7398 = vmatprep.subr.bf16.mxu1 %v9616_v60  ;;  %v9703_v59 = vld [vmem:[%s14108_s1 + $0x944] ss:$16 sps:$4 sm:$0xff]   ;;  %v9706_v60 = vld [vmem:[%s14108_s1 + $0x94c] ss:$16 sps:$4 sm:$0xff]  }
  0xf3   : > { %6711 = vmatpush1.bf16.msra.mxu0 %v9611_v61  ;;  %7399 = vmatpush1.bf16.msra.mxu1 %v9614_v62  ;;  %v9701_v61 = vld [vmem:[%s14108_s1 + $0x940] ss:$16 sps:$4 sm:$0xff]   ;;  %v9704_v62 = vld [vmem:[%s14108_s1 + $0x948] ss:$16 sps:$4 sm:$0xff]  }
  0xf4   : > { %6712 = vmatprep.subr.bf16.mxu0 %v9619_v63  ;;  %7400 = vmatprep.subr.bf16.mxu1 %v9622_v0  ;;  %v9709_v63 = vld [vmem:[%s14108_s1 + $0x964] ss:$16 sps:$4 sm:$0xff]   ;;  %v9712_v0 = vld [vmem:[%s14108_s1 + $0x96c] ss:$16 sps:$4 sm:$0xff]  }
  0xf7   : > { %6713 = vmatpush1.bf16.msra.mxu0 %v9617_v1  ;;  %7401 = vmatpush1.bf16.msra.mxu1 %v9620_v2  ;;  %v9707_v1 = vld [vmem:[%s14108_s1 + $0x960] ss:$16 sps:$4 sm:$0xff]   ;;  %v9710_v2 = vld [vmem:[%s14108_s1 + $0x968] ss:$16 sps:$4 sm:$0xff]  }
  0xf8   : > { %6714 = vmatprep.subr.bf16.mxu0 %v9625_v3  ;;  %7402 = vmatprep.subr.bf16.mxu1 %v9628_v4  ;;  %v9715_v3 = vld [vmem:[%s14108_s1 + $0x984] ss:$16 sps:$4 sm:$0xff]   ;;  %v9718_v4 = vld [vmem:[%s14108_s1 + $0x98c] ss:$16 sps:$4 sm:$0xff]  }
  0xfb   : > { %6715 = vmatpush1.bf16.msra.mxu0 %v9623_v5  ;;  %7403 = vmatpush1.bf16.msra.mxu1 %v9626_v6  ;;  %v9713_v5 = vld [vmem:[%s14108_s1 + $0x980] ss:$16 sps:$4 sm:$0xff]   ;;  %v9716_v6 = vld [vmem:[%s14108_s1 + $0x988] ss:$16 sps:$4 sm:$0xff]  }
  0xfc   : > { %6716 = vmatprep.subr.bf16.mxu0 %v9631_v7  ;;  %7404 = vmatprep.subr.bf16.mxu1 %v9634_v8  ;;  %v9721_v7 = vld [vmem:[%s14108_s1 + $0x9a4] ss:$16 sps:$4 sm:$0xff]   ;;  %v9724_v8 = vld [vmem:[%s14108_s1 + $0x9ac] ss:$16 sps:$4 sm:$0xff]  }
  0xff   : > { %6717 = vmatpush1.bf16.msra.mxu0 %v9629_v9  ;;  %7405 = vmatpush1.bf16.msra.mxu1 %v9632_v10  ;;  %v9719_v9 = vld [vmem:[%s14108_s1 + $0x9a0] ss:$16 sps:$4 sm:$0xff]   ;;  %v9722_v10 = vld [vmem:[%s14108_s1 + $0x9a8] ss:$16 sps:$4 sm:$0xff]  }
 0x100   : > { %6718 = vmatprep.subr.bf16.mxu0 %v9637_v11  ;;  %7406 = vmatprep.subr.bf16.mxu1 %v9640_v12  ;;  %v9727_v11 = vld [vmem:[%s14108_s1 + $0x9c4] ss:$16 sps:$4 sm:$0xff]   ;;  %v9730_v12 = vld [vmem:[%s14108_s1 + $0x9cc] ss:$16 sps:$4 sm:$0xff]  }
 0x103   : > { %6719 = vmatpush1.bf16.msra.mxu0 %v9635_v13  ;;  %7407 = vmatpush1.bf16.msra.mxu1 %v9638_v16  ;;  %v9725_v13 = vld [vmem:[%s14108_s1 + $0x9c0] ss:$16 sps:$4 sm:$0xff]   ;;  %v9728_v16 = vld [vmem:[%s14108_s1 + $0x9c8] ss:$16 sps:$4 sm:$0xff]  }
 0x104   : > { %6731 = vmatprep.subr.bf16.mxu0 %v9643_v17  ;;  %7419 = vmatprep.subr.bf16.mxu1 %v9646_v20  ;;  %v9733_v17 = vld [vmem:[%s14108_s1 + $0x9e4] ss:$16 sps:$4 sm:$0xff]   ;;  %v9736_v20 = vld [vmem:[%s14108_s1 + $0x9ec] ss:$16 sps:$4 sm:$0xff]  }
 0x106   : > { %6721 = vmatmul.mubr.bf16.vlgmr.msra.gmra.mrb[0].mxu0 %v8067_v22  ;;  %7409 = vmatmul.mubr.bf16.vlgmr.msra.gmra.mrb[0].mxu1 %v8067_v22  ;;  %v9731_v22 = vld [vmem:[%s14108_s1 + $0x9e0] ss:$16 sps:$4 sm:$0xff]  }
 0x107   : > { %6732 = vmatpush1.bf16.msra.mxu0 %v9641_v15  ;;  %7420 = vmatpush1.bf16.msra.mxu1 %v9644_v23  ;;  %v9734_v15 = vld [vmem:[%s14108_s1 + $0x9e8] ss:$16 sps:$4 sm:$0xff]   ;;  %v9739_v23 = vld [vmem:[%s14108_s1 + $0xa04] ss:$16 sps:$4 sm:$0xff]  }
 0x108   : > { %6733 = vmatprep.subr.bf16.mxu0 %v9649_v24  ;;  %7421 = vmatprep.subr.bf16.mxu1 %v9652_v18  ;;  %v9742_v24 = vld [vmem:[%s14108_s1 + $0xa0c] ss:$16 sps:$4 sm:$0xff]  }
 0x109   : > { %6763 = vmatprep.mubr.bf16.mxu0 %v8070_v19  ;;  %7451 = vmatprep.mubr.bf16.mxu1 %v8070_v19  ;;  %v11853_v18 = vld [vmem:[%s10976_s12 + $0x28] sm:$0xff] }
 0x10a   : > { %v11856_v19 = vld [vmem:[%s10976_s12 + $0xa8] sm:$0xff] }
 0x10b   : > { %6734 = vmatpush1.bf16.msra.mxu0 %v9647_v25  ;;  %7422 = vmatpush1.bf16.msra.mxu1 %v9650_v26  ;;  %v8069_v25 = vcombine.low %v11651_v21, %v11656_v14  ;;  %v9737_v26 = vld [vmem:[%s14108_s1 + $0xa00] ss:$16 sps:$4 sm:$0xff]   ;;  %v9748_v21 = vld [vmem:[%s14108_s1 + $0xa2c] ss:$16 sps:$4 sm:$0xff]   ;;  %v8072_v14 = vcombine.high %v11853_v18, %v11856_v19 }
 0x10c   : > { %6735 = vmatprep.subr.bf16.mxu0 %v9655_v27  ;;  %7423 = vmatprep.subr.bf16.mxu1 %v9658_v28  ;;  %v9740_v27 = vld [vmem:[%s14108_s1 + $0xa08] ss:$16 sps:$4 sm:$0xff]   ;;  %v9745_v28 = vld [vmem:[%s14108_s1 + $0xa24] ss:$16 sps:$4 sm:$0xff]  }
 0x10f   : > { %6736 = vmatpush1.bf16.msra.mxu0 %v9653_v29  ;;  %7424 = vmatpush1.bf16.msra.mxu1 %v9656_v30  ;;  %v9743_v29 = vld [vmem:[%s14108_s1 + $0xa20] ss:$16 sps:$4 sm:$0xff]   ;;  %v9746_v30 = vld [vmem:[%s14108_s1 + $0xa28] ss:$16 sps:$4 sm:$0xff]  }
 0x110   : > { %6737 = vmatprep.subr.bf16.mxu0 %v9661_v31  ;;  %7425 = vmatprep.subr.bf16.mxu1 %v9664_v32  ;;  %v9751_v31 = vld [vmem:[%s14108_s1 + $0xa44] ss:$16 sps:$4 sm:$0xff]   ;;  %v9754_v32 = vld [vmem:[%s14108_s1 + $0xa4c] ss:$16 sps:$4 sm:$0xff]  }
 0x113   : > { %6738 = vmatpush1.bf16.msra.mxu0 %v9659_v33  ;;  %7426 = vmatpush1.bf16.msra.mxu1 %v9662_v34  ;;  %v9749_v33 = vld [vmem:[%s14108_s1 + $0xa40] ss:$16 sps:$4 sm:$0xff]   ;;  %v9752_v34 = vld [vmem:[%s14108_s1 + $0xa48] ss:$16 sps:$4 sm:$0xff]  }
 0x114   : > { %6739 = vmatprep.subr.bf16.mxu0 %v9667_v35  ;;  %7427 = vmatprep.subr.bf16.mxu1 %v9670_v36  ;;  %v9757_v35 = vld [vmem:[%s14108_s1 + $0xa64] ss:$16 sps:$4 sm:$0xff]   ;;  %v9760_v36 = vld [vmem:[%s14108_s1 + $0xa6c] ss:$16 sps:$4 sm:$0xff]  }
 0x117   : > { %6740 = vmatpush1.bf16.msra.mxu0 %v9665_v37  ;;  %7428 = vmatpush1.bf16.msra.mxu1 %v9668_v38  ;;  %v9755_v37 = vld [vmem:[%s14108_s1 + $0xa60] ss:$16 sps:$4 sm:$0xff]   ;;  %v9758_v38 = vld [vmem:[%s14108_s1 + $0xa68] ss:$16 sps:$4 sm:$0xff]  }
 0x118   : > { %6741 = vmatprep.subr.bf16.mxu0 %v9673_v39  ;;  %7429 = vmatprep.subr.bf16.mxu1 %v9676_v40  ;;  %v9763_v39 = vld [vmem:[%s14108_s1 + $0xa84] ss:$16 sps:$4 sm:$0xff]   ;;  %v9766_v40 = vld [vmem:[%s14108_s1 + $0xa8c] ss:$16 sps:$4 sm:$0xff]  }
 0x11b   : > { %6742 = vmatpush1.bf16.msra.mxu0 %v9671_v41  ;;  %7430 = vmatpush1.bf16.msra.mxu1 %v9674_v42  ;;  %v9761_v41 = vld [vmem:[%s14108_s1 + $0xa80] ss:$16 sps:$4 sm:$0xff]   ;;  %v9764_v42 = vld [vmem:[%s14108_s1 + $0xa88] ss:$16 sps:$4 sm:$0xff]  }
 0x11c   : > { %6743 = vmatprep.subr.bf16.mxu0 %v9679_v43  ;;  %7431 = vmatprep.subr.bf16.mxu1 %v9682_v44  ;;  %v9769_v43 = vld [vmem:[%s14108_s1 + $0xaa4] ss:$16 sps:$4 sm:$0xff]   ;;  %v9772_v44 = vld [vmem:[%s14108_s1 + $0xaac] ss:$16 sps:$4 sm:$0xff]  }
 0x11f   : > { %6744 = vmatpush1.bf16.msra.mxu0 %v9677_v45  ;;  %7432 = vmatpush1.bf16.msra.mxu1 %v9680_v46  ;;  %v9767_v45 = vld [vmem:[%s14108_s1 + $0xaa0] ss:$16 sps:$4 sm:$0xff]   ;;  %v9770_v46 = vld [vmem:[%s14108_s1 + $0xaa8] ss:$16 sps:$4 sm:$0xff]  }
 0x120   : > { %6745 = vmatprep.subr.bf16.mxu0 %v9685_v47  ;;  %7433 = vmatprep.subr.bf16.mxu1 %v9688_v48  ;;  %v9775_v47 = vld [vmem:[%s14108_s1 + $0xac4] ss:$16 sps:$4 sm:$0xff]   ;;  %v9778_v48 = vld [vmem:[%s14108_s1 + $0xacc] ss:$16 sps:$4 sm:$0xff]  }
 0x123   : > { %6746 = vmatpush1.bf16.msra.mxu0 %v9683_v49  ;;  %7434 = vmatpush1.bf16.msra.mxu1 %v9686_v50  ;;  %v9773_v49 = vld [vmem:[%s14108_s1 + $0xac0] ss:$16 sps:$4 sm:$0xff]   ;;  %v9776_v50 = vld [vmem:[%s14108_s1 + $0xac8] ss:$16 sps:$4 sm:$0xff]  }
 0x124   : > { %6747 = vmatprep.subr.bf16.mxu0 %v9691_v51  ;;  %7435 = vmatprep.subr.bf16.mxu1 %v9694_v52  ;;  %v9781_v51 = vld [vmem:[%s14108_s1 + $0xae4] ss:$16 sps:$4 sm:$0xff]   ;;  %v9784_v52 = vld [vmem:[%s14108_s1 + $0xaec] ss:$16 sps:$4 sm:$0xff]  }
 0x127   : > { %6748 = vmatpush1.bf16.msra.mxu0 %v9689_v53  ;;  %7436 = vmatpush1.bf16.msra.mxu1 %v9692_v54  ;;  %v9779_v53 = vld [vmem:[%s14108_s1 + $0xae0] ss:$16 sps:$4 sm:$0xff]   ;;  %v9782_v54 = vld [vmem:[%s14108_s1 + $0xae8] ss:$16 sps:$4 sm:$0xff]  }
 0x128   : > { %6749 = vmatprep.subr.bf16.mxu0 %v9697_v55  ;;  %7437 = vmatprep.subr.bf16.mxu1 %v9700_v56  ;;  %v9787_v55 = vld [vmem:[%s14108_s1 + $0xb04] ss:$16 sps:$4 sm:$0xff]   ;;  %v9790_v56 = vld [vmem:[%s14108_s1 + $0xb0c] ss:$16 sps:$4 sm:$0xff]  }
 0x12b   : > { %6750 = vmatpush1.bf16.msra.mxu0 %v9695_v57  ;;  %7438 = vmatpush1.bf16.msra.mxu1 %v9698_v58  ;;  %v9785_v57 = vld [vmem:[%s14108_s1 + $0xb00] ss:$16 sps:$4 sm:$0xff]   ;;  %v9788_v58 = vld [vmem:[%s14108_s1 + $0xb08] ss:$16 sps:$4 sm:$0xff]  }
 0x12c   : > { %6751 = vmatprep.subr.bf16.mxu0 %v9703_v59  ;;  %7439 = vmatprep.subr.bf16.mxu1 %v9706_v60  ;;  %v9793_v59 = vld [vmem:[%s14108_s1 + $0xb24] ss:$16 sps:$4 sm:$0xff]   ;;  %v9796_v60 = vld [vmem:[%s14108_s1 + $0xb2c] ss:$16 sps:$4 sm:$0xff]  }
 0x12f   : > { %6752 = vmatpush1.bf16.msra.mxu0 %v9701_v61  ;;  %7440 = vmatpush1.bf16.msra.mxu1 %v9704_v62  ;;  %v9791_v61 = vld [vmem:[%s14108_s1 + $0xb20] ss:$16 sps:$4 sm:$0xff]   ;;  %v9794_v62 = vld [vmem:[%s14108_s1 + $0xb28] ss:$16 sps:$4 sm:$0xff]  }
 0x130   : > { %6753 = vmatprep.subr.bf16.mxu0 %v9709_v63  ;;  %7441 = vmatprep.subr.bf16.mxu1 %v9712_v0  ;;  %v9799_v63 = vld [vmem:[%s14108_s1 + $0xb44] ss:$16 sps:$4 sm:$0xff]   ;;  %v9802_v0 = vld [vmem:[%s14108_s1 + $0xb4c] ss:$16 sps:$4 sm:$0xff]  }
 0x133   : > { %6754 = vmatpush1.bf16.msra.mxu0 %v9707_v1  ;;  %7442 = vmatpush1.bf16.msra.mxu1 %v9710_v2  ;;  %v9797_v1 = vld [vmem:[%s14108_s1 + $0xb40] ss:$16 sps:$4 sm:$0xff]   ;;  %v9800_v2 = vld [vmem:[%s14108_s1 + $0xb48] ss:$16 sps:$4 sm:$0xff]  }
 0x134   : > { %6755 = vmatprep.subr.bf16.mxu0 %v9715_v3  ;;  %7443 = vmatprep.subr.bf16.mxu1 %v9718_v4  ;;  %v9805_v3 = vld [vmem:[%s14108_s1 + $0xb64] ss:$16 sps:$4 sm:$0xff]   ;;  %v9808_v4 = vld [vmem:[%s14108_s1 + $0xb6c] ss:$16 sps:$4 sm:$0xff]  }
 0x137   : > { %6756 = vmatpush1.bf16.msra.mxu0 %v9713_v5  ;;  %7444 = vmatpush1.bf16.msra.mxu1 %v9716_v6  ;;  %v9803_v5 = vld [vmem:[%s14108_s1 + $0xb60] ss:$16 sps:$4 sm:$0xff]   ;;  %v9806_v6 = vld [vmem:[%s14108_s1 + $0xb68] ss:$16 sps:$4 sm:$0xff]  }
 0x138   : > { %6757 = vmatprep.subr.bf16.mxu0 %v9721_v7  ;;  %7445 = vmatprep.subr.bf16.mxu1 %v9724_v8  ;;  %v9811_v7 = vld [vmem:[%s14108_s1 + $0xb84] ss:$16 sps:$4 sm:$0xff]   ;;  %v9814_v8 = vld [vmem:[%s14108_s1 + $0xb8c] ss:$16 sps:$4 sm:$0xff]  }
 0x13b   : > { %6758 = vmatpush1.bf16.msra.mxu0 %v9719_v9  ;;  %7446 = vmatpush1.bf16.msra.mxu1 %v9722_v10  ;;  %v9809_v9 = vld [vmem:[%s14108_s1 + $0xb80] ss:$16 sps:$4 sm:$0xff]   ;;  %v9812_v10 = vld [vmem:[%s14108_s1 + $0xb88] ss:$16 sps:$4 sm:$0xff]  }
 0x13c   : > { %6759 = vmatprep.subr.bf16.mxu0 %v9727_v11  ;;  %7447 = vmatprep.subr.bf16.mxu1 %v9730_v12  ;;  %v9817_v11 = vld [vmem:[%s14108_s1 + $0xba4] ss:$16 sps:$4 sm:$0xff]   ;;  %v9820_v12 = vld [vmem:[%s14108_s1 + $0xbac] ss:$16 sps:$4 sm:$0xff]  }
 0x13f   : > { %6760 = vmatpush1.bf16.msra.mxu0 %v9725_v13  ;;  %7448 = vmatpush1.bf16.msra.mxu1 %v9728_v16  ;;  %v9815_v13 = vld [vmem:[%s14108_s1 + $0xba0] ss:$16 sps:$4 sm:$0xff]   ;;  %v9818_v16 = vld [vmem:[%s14108_s1 + $0xba8] ss:$16 sps:$4 sm:$0xff]  }
 0x140   : > { %6761 = vmatprep.subr.bf16.mxu0 %v9733_v17  ;;  %7449 = vmatprep.subr.bf16.mxu1 %v9736_v20  ;;  %v9823_v17 = vld [vmem:[%s14108_s1 + $0xbc4] ss:$16 sps:$4 sm:$0xff]   ;;  %v9826_v20 = vld [vmem:[%s14108_s1 + $0xbcc] ss:$16 sps:$4 sm:$0xff]  }
 0x143   : > { %6762 = vmatpush1.bf16.msra.mxu0 %v9731_v22  ;;  %7450 = vmatpush1.bf16.msra.mxu1 %v9734_v15  ;;  %v9821_v22 = vld [vmem:[%s14108_s1 + $0xbc0] ss:$16 sps:$4 sm:$0xff]   ;;  %v9824_v15 = vld [vmem:[%s14108_s1 + $0xbc8] ss:$16 sps:$4 sm:$0xff]  }
 0x144   : > { %6774 = vmatprep.subr.bf16.mxu0 %v9739_v23  ;;  %7462 = vmatprep.subr.bf16.mxu1 %v9742_v24  ;;  %v9829_v23 = vld [vmem:[%s14108_s1 + $0xbe4] ss:$16 sps:$4 sm:$0xff]   ;;  %v9832_v24 = vld [vmem:[%s14108_s1 + $0xbec] ss:$16 sps:$4 sm:$0xff]  }
 0x146   : > { %6764 = vmatmul.mubr.bf16.vlgmr.msra.gmra.mrb[0].mxu0 %v8069_v25  ;;  %7452 = vmatmul.mubr.bf16.vlgmr.msra.gmra.mrb[0].mxu1 %v8069_v25  ;;  %v9827_v25 = vld [vmem:[%s14108_s1 + $0xbe0] ss:$16 sps:$4 sm:$0xff]  }
 0x147   : > { %6775 = vmatpush1.bf16.msra.mxu0 %v9737_v26  ;;  %7463 = vmatpush1.bf16.msra.mxu1 %v9740_v27  ;;  %v9830_v26 = vld [vmem:[%s14108_s1 + $0xbe8] ss:$16 sps:$4 sm:$0xff]   ;;  %v9835_v27 = vld [vmem:[%s14108_s1 + $0xc04] ss:$16 sps:$4 sm:$0xff]  }
 0x148   : > { %6776 = vmatprep.subr.bf16.mxu0 %v9745_v28  ;;  %7464 = vmatprep.subr.bf16.mxu1 %v9748_v21  ;;  %v9838_v28 = vld [vmem:[%s14108_s1 + $0xc0c] ss:$16 sps:$4 sm:$0xff]   ;;  %v12055_v21 = vld [vmem:[%s10976_s12 + $0x30] sm:$0xff] }
 0x149   : > { %6806 = vmatprep.mubr.bf16.mxu0 %v8072_v14  ;;  %7494 = vmatprep.mubr.bf16.mxu1 %v8072_v14  ;;  %v12058_v14 = vld [vmem:[%s10976_s12 + $0xb0] sm:$0xff] }
 0x14b   : > { %6777 = vmatpush1.bf16.msra.mxu0 %v9743_v29  ;;  %7465 = vmatpush1.bf16.msra.mxu1 %v9746_v30  ;;  %v8071_v29 = vcombine.low %v11853_v18, %v11856_v19  ;;  %v9833_v30 = vld [vmem:[%s14108_s1 + $0xc00] ss:$16 sps:$4 sm:$0xff]   ;;  %v9844_v18 = vld [vmem:[%s14108_s1 + $0xc2c] ss:$16 sps:$4 sm:$0xff]   ;;  %v8074_v19 = vcombine.high %v12055_v21, %v12058_v14 }
 0x14c   : > { %6778 = vmatprep.subr.bf16.mxu0 %v9751_v31  ;;  %7466 = vmatprep.subr.bf16.mxu1 %v9754_v32  ;;  %v9836_v31 = vld [vmem:[%s14108_s1 + $0xc08] ss:$16 sps:$4 sm:$0xff]   ;;  %v9841_v32 = vld [vmem:[%s14108_s1 + $0xc24] ss:$16 sps:$4 sm:$0xff]  }
 0x14f   : > { %6779 = vmatpush1.bf16.msra.mxu0 %v9749_v33  ;;  %7467 = vmatpush1.bf16.msra.mxu1 %v9752_v34  ;;  %v9839_v33 = vld [vmem:[%s14108_s1 + $0xc20] ss:$16 sps:$4 sm:$0xff]   ;;  %v9842_v34 = vld [vmem:[%s14108_s1 + $0xc28] ss:$16 sps:$4 sm:$0xff]  }
 0x150   : > { %6780 = vmatprep.subr.bf16.mxu0 %v9757_v35  ;;  %7468 = vmatprep.subr.bf16.mxu1 %v9760_v36  ;;  %v9847_v35 = vld [vmem:[%s14108_s1 + $0xc44] ss:$16 sps:$4 sm:$0xff]   ;;  %v9850_v36 = vld [vmem:[%s14108_s1 + $0xc4c] ss:$16 sps:$4 sm:$0xff]  }
 0x153   : > { %6781 = vmatpush1.bf16.msra.mxu0 %v9755_v37  ;;  %7469 = vmatpush1.bf16.msra.mxu1 %v9758_v38  ;;  %v9845_v37 = vld [vmem:[%s14108_s1 + $0xc40] ss:$16 sps:$4 sm:$0xff]   ;;  %v9848_v38 = vld [vmem:[%s14108_s1 + $0xc48] ss:$16 sps:$4 sm:$0xff]  }
 0x154   : > { %6782 = vmatprep.subr.bf16.mxu0 %v9763_v39  ;;  %7470 = vmatprep.subr.bf16.mxu1 %v9766_v40  ;;  %v9853_v39 = vld [vmem:[%s14108_s1 + $0xc64] ss:$16 sps:$4 sm:$0xff]   ;;  %v9856_v40 = vld [vmem:[%s14108_s1 + $0xc6c] ss:$16 sps:$4 sm:$0xff]  }
 0x157   : > { %6783 = vmatpush1.bf16.msra.mxu0 %v9761_v41  ;;  %7471 = vmatpush1.bf16.msra.mxu1 %v9764_v42  ;;  %v9851_v41 = vld [vmem:[%s14108_s1 + $0xc60] ss:$16 sps:$4 sm:$0xff]   ;;  %v9854_v42 = vld [vmem:[%s14108_s1 + $0xc68] ss:$16 sps:$4 sm:$0xff]  }
 0x158   : > { %6784 = vmatprep.subr.bf16.mxu0 %v9769_v43  ;;  %7472 = vmatprep.subr.bf16.mxu1 %v9772_v44  ;;  %v9859_v43 = vld [vmem:[%s14108_s1 + $0xc84] ss:$16 sps:$4 sm:$0xff]   ;;  %v9862_v44 = vld [vmem:[%s14108_s1 + $0xc8c] ss:$16 sps:$4 sm:$0xff]  }
 0x15b   : > { %6785 = vmatpush1.bf16.msra.mxu0 %v9767_v45  ;;  %7473 = vmatpush1.bf16.msra.mxu1 %v9770_v46  ;;  %v9857_v45 = vld [vmem:[%s14108_s1 + $0xc80] ss:$16 sps:$4 sm:$0xff]   ;;  %v9860_v46 = vld [vmem:[%s14108_s1 + $0xc88] ss:$16 sps:$4 sm:$0xff]  }
 0x15c   : > { %6786 = vmatprep.subr.bf16.mxu0 %v9775_v47  ;;  %7474 = vmatprep.subr.bf16.mxu1 %v9778_v48  ;;  %v9865_v47 = vld [vmem:[%s14108_s1 + $0xca4] ss:$16 sps:$4 sm:$0xff]   ;;  %v9868_v48 = vld [vmem:[%s14108_s1 + $0xcac] ss:$16 sps:$4 sm:$0xff]  }
 0x15f   : > { %6787 = vmatpush1.bf16.msra.mxu0 %v9773_v49  ;;  %7475 = vmatpush1.bf16.msra.mxu1 %v9776_v50  ;;  %v9863_v49 = vld [vmem:[%s14108_s1 + $0xca0] ss:$16 sps:$4 sm:$0xff]   ;;  %v9866_v50 = vld [vmem:[%s14108_s1 + $0xca8] ss:$16 sps:$4 sm:$0xff]  }
 0x160   : > { %6788 = vmatprep.subr.bf16.mxu0 %v9781_v51  ;;  %7476 = vmatprep.subr.bf16.mxu1 %v9784_v52  ;;  %v9871_v51 = vld [vmem:[%s14108_s1 + $0xcc4] ss:$16 sps:$4 sm:$0xff]   ;;  %v9874_v52 = vld [vmem:[%s14108_s1 + $0xccc] ss:$16 sps:$4 sm:$0xff]  }
 0x163   : > { %6789 = vmatpush1.bf16.msra.mxu0 %v9779_v53  ;;  %7477 = vmatpush1.bf16.msra.mxu1 %v9782_v54  ;;  %v9869_v53 = vld [vmem:[%s14108_s1 + $0xcc0] ss:$16 sps:$4 sm:$0xff]   ;;  %v9872_v54 = vld [vmem:[%s14108_s1 + $0xcc8] ss:$16 sps:$4 sm:$0xff]  }
 0x164   : > { %6790 = vmatprep.subr.bf16.mxu0 %v9787_v55  ;;  %7478 = vmatprep.subr.bf16.mxu1 %v9790_v56  ;;  %v9877_v55 = vld [vmem:[%s14108_s1 + $0xce4] ss:$16 sps:$4 sm:$0xff]   ;;  %v9880_v56 = vld [vmem:[%s14108_s1 + $0xcec] ss:$16 sps:$4 sm:$0xff]  }
 0x167   : > { %6791 = vmatpush1.bf16.msra.mxu0 %v9785_v57  ;;  %7479 = vmatpush1.bf16.msra.mxu1 %v9788_v58  ;;  %v9875_v57 = vld [vmem:[%s14108_s1 + $0xce0] ss:$16 sps:$4 sm:$0xff]   ;;  %v9878_v58 = vld [vmem:[%s14108_s1 + $0xce8] ss:$16 sps:$4 sm:$0xff]  }
 0x168   : > { %6792 = vmatprep.subr.bf16.mxu0 %v9793_v59  ;;  %7480 = vmatprep.subr.bf16.mxu1 %v9796_v60  ;;  %v9883_v59 = vld [vmem:[%s14108_s1 + $0xd04] ss:$16 sps:$4 sm:$0xff]   ;;  %v9886_v60 = vld [vmem:[%s14108_s1 + $0xd0c] ss:$16 sps:$4 sm:$0xff]  }
 0x16b   : > { %6793 = vmatpush1.bf16.msra.mxu0 %v9791_v61  ;;  %7481 = vmatpush1.bf16.msra.mxu1 %v9794_v62  ;;  %v9881_v61 = vld [vmem:[%s14108_s1 + $0xd00] ss:$16 sps:$4 sm:$0xff]   ;;  %v9884_v62 = vld [vmem:[%s14108_s1 + $0xd08] ss:$16 sps:$4 sm:$0xff]  }
 0x16c   : > { %6794 = vmatprep.subr.bf16.mxu0 %v9799_v63  ;;  %7482 = vmatprep.subr.bf16.mxu1 %v9802_v0  ;;  %v9889_v63 = vld [vmem:[%s14108_s1 + $0xd24] ss:$16 sps:$4 sm:$0xff]   ;;  %v9892_v0 = vld [vmem:[%s14108_s1 + $0xd2c] ss:$16 sps:$4 sm:$0xff]  }
 0x16f   : > { %6795 = vmatpush1.bf16.msra.mxu0 %v9797_v1  ;;  %7483 = vmatpush1.bf16.msra.mxu1 %v9800_v2  ;;  %v9887_v1 = vld [vmem:[%s14108_s1 + $0xd20] ss:$16 sps:$4 sm:$0xff]   ;;  %v9890_v2 = vld [vmem:[%s14108_s1 + $0xd28] ss:$16 sps:$4 sm:$0xff]  }
 0x170   : > { %6796 = vmatprep.subr.bf16.mxu0 %v9805_v3  ;;  %7484 = vmatprep.subr.bf16.mxu1 %v9808_v4  ;;  %v9895_v3 = vld [vmem:[%s14108_s1 + $0xd44] ss:$16 sps:$4 sm:$0xff]   ;;  %v9898_v4 = vld [vmem:[%s14108_s1 + $0xd4c] ss:$16 sps:$4 sm:$0xff]  }
 0x173   : > { %6797 = vmatpush1.bf16.msra.mxu0 %v9803_v5  ;;  %7485 = vmatpush1.bf16.msra.mxu1 %v9806_v6  ;;  %v9893_v5 = vld [vmem:[%s14108_s1 + $0xd40] ss:$16 sps:$4 sm:$0xff]   ;;  %v9896_v6 = vld [vmem:[%s14108_s1 + $0xd48] ss:$16 sps:$4 sm:$0xff]  }
 0x174   : > { %6798 = vmatprep.subr.bf16.mxu0 %v9811_v7  ;;  %7486 = vmatprep.subr.bf16.mxu1 %v9814_v8  ;;  %v9901_v7 = vld [vmem:[%s14108_s1 + $0xd64] ss:$16 sps:$4 sm:$0xff]   ;;  %v9904_v8 = vld [vmem:[%s14108_s1 + $0xd6c] ss:$16 sps:$4 sm:$0xff]  }
 0x177   : > { %6799 = vmatpush1.bf16.msra.mxu0 %v9809_v9  ;;  %7487 = vmatpush1.bf16.msra.mxu1 %v9812_v10  ;;  %v9899_v9 = vld [vmem:[%s14108_s1 + $0xd60] ss:$16 sps:$4 sm:$0xff]   ;;  %v9902_v10 = vld [vmem:[%s14108_s1 + $0xd68] ss:$16 sps:$4 sm:$0xff]  }
 0x178   : > { %6800 = vmatprep.subr.bf16.mxu0 %v9817_v11  ;;  %7488 = vmatprep.subr.bf16.mxu1 %v9820_v12  ;;  %v9907_v11 = vld [vmem:[%s14108_s1 + $0xd84] ss:$16 sps:$4 sm:$0xff]   ;;  %v9910_v12 = vld [vmem:[%s14108_s1 + $0xd8c] ss:$16 sps:$4 sm:$0xff]  }
 0x17b   : > { %6801 = vmatpush1.bf16.msra.mxu0 %v9815_v13  ;;  %7489 = vmatpush1.bf16.msra.mxu1 %v9818_v16  ;;  %v9905_v13 = vld [vmem:[%s14108_s1 + $0xd80] ss:$16 sps:$4 sm:$0xff]   ;;  %v9908_v16 = vld [vmem:[%s14108_s1 + $0xd88] ss:$16 sps:$4 sm:$0xff]  }
 0x17c   : > { %6802 = vmatprep.subr.bf16.mxu0 %v9823_v17  ;;  %7490 = vmatprep.subr.bf16.mxu1 %v9826_v20  ;;  %v9913_v17 = vld [vmem:[%s14108_s1 + $0xda4] ss:$16 sps:$4 sm:$0xff]   ;;  %v9916_v20 = vld [vmem:[%s14108_s1 + $0xdac] ss:$16 sps:$4 sm:$0xff]  }
 0x17f   : > { %6803 = vmatpush1.bf16.msra.mxu0 %v9821_v22  ;;  %7491 = vmatpush1.bf16.msra.mxu1 %v9824_v15  ;;  %v9911_v22 = vld [vmem:[%s14108_s1 + $0xda0] ss:$16 sps:$4 sm:$0xff]   ;;  %v9914_v15 = vld [vmem:[%s14108_s1 + $0xda8] ss:$16 sps:$4 sm:$0xff]  }
 0x180   : > { %6804 = vmatprep.subr.bf16.mxu0 %v9829_v23  ;;  %7492 = vmatprep.subr.bf16.mxu1 %v9832_v24  ;;  %v9919_v23 = vld [vmem:[%s14108_s1 + $0xdc4] ss:$16 sps:$4 sm:$0xff]   ;;  %v9922_v24 = vld [vmem:[%s14108_s1 + $0xdcc] ss:$16 sps:$4 sm:$0xff]  }
 0x183   : > { %6805 = vmatpush1.bf16.msra.mxu0 %v9827_v25  ;;  %7493 = vmatpush1.bf16.msra.mxu1 %v9830_v26  ;;  %v9917_v25 = vld [vmem:[%s14108_s1 + $0xdc0] ss:$16 sps:$4 sm:$0xff]   ;;  %v9920_v26 = vld [vmem:[%s14108_s1 + $0xdc8] ss:$16 sps:$4 sm:$0xff]  }
 0x184   : > { %6817 = vmatprep.subr.bf16.mxu0 %v9835_v27  ;;  %7505 = vmatprep.subr.bf16.mxu1 %v9838_v28  ;;  %v9925_v27 = vld [vmem:[%s14108_s1 + $0xde4] ss:$16 sps:$4 sm:$0xff]   ;;  %v9928_v28 = vld [vmem:[%s14108_s1 + $0xdec] ss:$16 sps:$4 sm:$0xff]  }
 0x186   : > { %6807 = vmatmul.mubr.bf16.vlgmr.msra.gmra.mrb[0].mxu0 %v8071_v29  ;;  %7495 = vmatmul.mubr.bf16.vlgmr.msra.gmra.mrb[0].mxu1 %v8071_v29  ;;  %v9923_v29 = vld [vmem:[%s14108_s1 + $0xde0] ss:$16 sps:$4 sm:$0xff]  }
 0x187   : > { %6818 = vmatpush1.bf16.msra.mxu0 %v9833_v30  ;;  %7506 = vmatpush1.bf16.msra.mxu1 %v9836_v31  ;;  %v9926_v30 = vld [vmem:[%s14108_s1 + $0xde8] ss:$16 sps:$4 sm:$0xff]   ;;  %v9931_v31 = vld [vmem:[%s14108_s1 + $0xe04] ss:$16 sps:$4 sm:$0xff]  }
 0x188   : > { %6819 = vmatprep.subr.bf16.mxu0 %v9841_v32  ;;  %7507 = vmatprep.subr.bf16.mxu1 %v9844_v18  ;;  %v9934_v32 = vld [vmem:[%s14108_s1 + $0xe0c] ss:$16 sps:$4 sm:$0xff]  }
 0x189   : > { %6849 = vmatprep.mubr.bf16.mxu0 %v8074_v19  ;;  %7537 = vmatprep.mubr.bf16.mxu1 %v8074_v19  ;;  %v12257_v18 = vld [vmem:[%s10976_s12 + $0x38] sm:$0xff] }
 0x18a   : > { %v12260_v19 = vld [vmem:[%s10976_s12 + $0xb8] sm:$0xff] }
 0x18b   : > { %6820 = vmatpush1.bf16.msra.mxu0 %v9839_v33  ;;  %7508 = vmatpush1.bf16.msra.mxu1 %v9842_v34  ;;  %v8073_v33 = vcombine.low %v12055_v21, %v12058_v14  ;;  %v9929_v34 = vld [vmem:[%s14108_s1 + $0xe00] ss:$16 sps:$4 sm:$0xff]   ;;  %v9940_v21 = vld [vmem:[%s14108_s1 + $0xe2c] ss:$16 sps:$4 sm:$0xff]   ;;  %v8076_v14 = vcombine.high %v12257_v18, %v12260_v19 }
 0x18c   : > { %6821 = vmatprep.subr.bf16.mxu0 %v9847_v35  ;;  %7509 = vmatprep.subr.bf16.mxu1 %v9850_v36  ;;  %v9932_v35 = vld [vmem:[%s14108_s1 + $0xe08] ss:$16 sps:$4 sm:$0xff]   ;;  %v9937_v36 = vld [vmem:[%s14108_s1 + $0xe24] ss:$16 sps:$4 sm:$0xff]  }
 0x18f   : > { %6822 = vmatpush1.bf16.msra.mxu0 %v9845_v37  ;;  %7510 = vmatpush1.bf16.msra.mxu1 %v9848_v38  ;;  %v9935_v37 = vld [vmem:[%s14108_s1 + $0xe20] ss:$16 sps:$4 sm:$0xff]   ;;  %v9938_v38 = vld [vmem:[%s14108_s1 + $0xe28] ss:$16 sps:$4 sm:$0xff]  }
 0x190   : > { %6823 = vmatprep.subr.bf16.mxu0 %v9853_v39  ;;  %7511 = vmatprep.subr.bf16.mxu1 %v9856_v40  ;;  %v9943_v39 = vld [vmem:[%s14108_s1 + $0xe44] ss:$16 sps:$4 sm:$0xff]   ;;  %v9946_v40 = vld [vmem:[%s14108_s1 + $0xe4c] ss:$16 sps:$4 sm:$0xff]  }
 0x193   : > { %6824 = vmatpush1.bf16.msra.mxu0 %v9851_v41  ;;  %7512 = vmatpush1.bf16.msra.mxu1 %v9854_v42  ;;  %v9941_v41 = vld [vmem:[%s14108_s1 + $0xe40] ss:$16 sps:$4 sm:$0xff]   ;;  %v9944_v42 = vld [vmem:[%s14108_s1 + $0xe48] ss:$16 sps:$4 sm:$0xff]  }
 0x194   : > { %6825 = vmatprep.subr.bf16.mxu0 %v9859_v43  ;;  %7513 = vmatprep.subr.bf16.mxu1 %v9862_v44  ;;  %v9949_v43 = vld [vmem:[%s14108_s1 + $0xe64] ss:$16 sps:$4 sm:$0xff]   ;;  %v9952_v44 = vld [vmem:[%s14108_s1 + $0xe6c] ss:$16 sps:$4 sm:$0xff]  }
 0x197   : > { %6826 = vmatpush1.bf16.msra.mxu0 %v9857_v45  ;;  %7514 = vmatpush1.bf16.msra.mxu1 %v9860_v46  ;;  %v9947_v45 = vld [vmem:[%s14108_s1 + $0xe60] ss:$16 sps:$4 sm:$0xff]   ;;  %v9950_v46 = vld [vmem:[%s14108_s1 + $0xe68] ss:$16 sps:$4 sm:$0xff]  }
 0x198   : > { %6827 = vmatprep.subr.bf16.mxu0 %v9865_v47  ;;  %7515 = vmatprep.subr.bf16.mxu1 %v9868_v48  ;;  %v9955_v47 = vld [vmem:[%s14108_s1 + $0xe84] ss:$16 sps:$4 sm:$0xff]   ;;  %v9958_v48 = vld [vmem:[%s14108_s1 + $0xe8c] ss:$16 sps:$4 sm:$0xff]  }
 0x19b   : > { %6828 = vmatpush1.bf16.msra.mxu0 %v9863_v49  ;;  %7516 = vmatpush1.bf16.msra.mxu1 %v9866_v50  ;;  %v9953_v49 = vld [vmem:[%s14108_s1 + $0xe80] ss:$16 sps:$4 sm:$0xff]   ;;  %v9956_v50 = vld [vmem:[%s14108_s1 + $0xe88] ss:$16 sps:$4 sm:$0xff]  }
 0x19c   : > { %6829 = vmatprep.subr.bf16.mxu0 %v9871_v51  ;;  %7517 = vmatprep.subr.bf16.mxu1 %v9874_v52  ;;  %v9961_v51 = vld [vmem:[%s14108_s1 + $0xea4] ss:$16 sps:$4 sm:$0xff]   ;;  %v9964_v52 = vld [vmem:[%s14108_s1 + $0xeac] ss:$16 sps:$4 sm:$0xff]  }
 0x19f   : > { %6830 = vmatpush1.bf16.msra.mxu0 %v9869_v53  ;;  %7518 = vmatpush1.bf16.msra.mxu1 %v9872_v54  ;;  %v9959_v53 = vld [vmem:[%s14108_s1 + $0xea0] ss:$16 sps:$4 sm:$0xff]   ;;  %v9962_v54 = vld [vmem:[%s14108_s1 + $0xea8] ss:$16 sps:$4 sm:$0xff]  }
 0x1a0   : > { %6831 = vmatprep.subr.bf16.mxu0 %v9877_v55  ;;  %7519 = vmatprep.subr.bf16.mxu1 %v9880_v56  ;;  %v9967_v55 = vld [vmem:[%s14108_s1 + $0xec4] ss:$16 sps:$4 sm:$0xff]   ;;  %v9970_v56 = vld [vmem:[%s14108_s1 + $0xecc] ss:$16 sps:$4 sm:$0xff]  }
 0x1a3   : > { %6832 = vmatpush1.bf16.msra.mxu0 %v9875_v57  ;;  %7520 = vmatpush1.bf16.msra.mxu1 %v9878_v58  ;;  %v9965_v57 = vld [vmem:[%s14108_s1 + $0xec0] ss:$16 sps:$4 sm:$0xff]   ;;  %v9968_v58 = vld [vmem:[%s14108_s1 + $0xec8] ss:$16 sps:$4 sm:$0xff]  }
 0x1a4   : > { %6833 = vmatprep.subr.bf16.mxu0 %v9883_v59  ;;  %7521 = vmatprep.subr.bf16.mxu1 %v9886_v60  ;;  %v9973_v59 = vld [vmem:[%s14108_s1 + $0xee4] ss:$16 sps:$4 sm:$0xff]   ;;  %v9976_v60 = vld [vmem:[%s14108_s1 + $0xeec] ss:$16 sps:$4 sm:$0xff]  }
 0x1a7   : > { %6834 = vmatpush1.bf16.msra.mxu0 %v9881_v61  ;;  %7522 = vmatpush1.bf16.msra.mxu1 %v9884_v62  ;;  %v9971_v61 = vld [vmem:[%s14108_s1 + $0xee0] ss:$16 sps:$4 sm:$0xff]   ;;  %v9974_v62 = vld [vmem:[%s14108_s1 + $0xee8] ss:$16 sps:$4 sm:$0xff]  }
 0x1a8   : > { %6835 = vmatprep.subr.bf16.mxu0 %v9889_v63  ;;  %7523 = vmatprep.subr.bf16.mxu1 %v9892_v0  ;;  %v9979_v63 = vld [vmem:[%s14108_s1 + $0xf04] ss:$16 sps:$4 sm:$0xff]   ;;  %v9982_v0 = vld [vmem:[%s14108_s1 + $0xf0c] ss:$16 sps:$4 sm:$0xff]  }
 0x1ab   : > { %6836 = vmatpush1.bf16.msra.mxu0 %v9887_v1  ;;  %7524 = vmatpush1.bf16.msra.mxu1 %v9890_v2  ;;  %v9977_v1 = vld [vmem:[%s14108_s1 + $0xf00] ss:$16 sps:$4 sm:$0xff]   ;;  %v9980_v2 = vld [vmem:[%s14108_s1 + $0xf08] ss:$16 sps:$4 sm:$0xff]  }
 0x1ac   : > { %6837 = vmatprep.subr.bf16.mxu0 %v9895_v3  ;;  %7525 = vmatprep.subr.bf16.mxu1 %v9898_v4  ;;  %v9985_v3 = vld [vmem:[%s14108_s1 + $0xf24] ss:$16 sps:$4 sm:$0xff]   ;;  %v9988_v4 = vld [vmem:[%s14108_s1 + $0xf2c] ss:$16 sps:$4 sm:$0xff]  }
 0x1af   : > { %6838 = vmatpush1.bf16.msra.mxu0 %v9893_v5  ;;  %7526 = vmatpush1.bf16.msra.mxu1 %v9896_v6  ;;  %v9983_v5 = vld [vmem:[%s14108_s1 + $0xf20] ss:$16 sps:$4 sm:$0xff]   ;;  %v9986_v6 = vld [vmem:[%s14108_s1 + $0xf28] ss:$16 sps:$4 sm:$0xff]  }
 0x1b0   : > { %6839 = vmatprep.subr.bf16.mxu0 %v9901_v7  ;;  %7527 = vmatprep.subr.bf16.mxu1 %v9904_v8  ;;  %v9991_v7 = vld [vmem:[%s14108_s1 + $0xf44] ss:$16 sps:$4 sm:$0xff]   ;;  %v9994_v8 = vld [vmem:[%s14108_s1 + $0xf4c] ss:$16 sps:$4 sm:$0xff]  }
 0x1b3   : > { %6840 = vmatpush1.bf16.msra.mxu0 %v9899_v9  ;;  %7528 = vmatpush1.bf16.msra.mxu1 %v9902_v10  ;;  %v9989_v9 = vld [vmem:[%s14108_s1 + $0xf40] ss:$16 sps:$4 sm:$0xff]   ;;  %v9992_v10 = vld [vmem:[%s14108_s1 + $0xf48] ss:$16 sps:$4 sm:$0xff]  }
 0x1b4   : > { %6841 = vmatprep.subr.bf16.mxu0 %v9907_v11  ;;  %7529 = vmatprep.subr.bf16.mxu1 %v9910_v12  ;;  %v9997_v11 = vld [vmem:[%s14108_s1 + $0xf64] ss:$16 sps:$4 sm:$0xff]   ;;  %v10000_v12 = vld [vmem:[%s14108_s1 + $0xf6c] ss:$16 sps:$4 sm:$0xff]  }
 0x1b7   : > { %6842 = vmatpush1.bf16.msra.mxu0 %v9905_v13  ;;  %7530 = vmatpush1.bf16.msra.mxu1 %v9908_v16  ;;  %v9995_v13 = vld [vmem:[%s14108_s1 + $0xf60] ss:$16 sps:$4 sm:$0xff]   ;;  %v9998_v16 = vld [vmem:[%s14108_s1 + $0xf68] ss:$16 sps:$4 sm:$0xff]  }
 0x1b8   : > { %6843 = vmatprep.subr.bf16.mxu0 %v9913_v17  ;;  %7531 = vmatprep.subr.bf16.mxu1 %v9916_v20  ;;  %v10003_v17 = vld [vmem:[%s14108_s1 + $0xf84] ss:$16 sps:$4 sm:$0xff]   ;;  %v10006_v20 = vld [vmem:[%s14108_s1 + $0xf8c] ss:$16 sps:$4 sm:$0xff]  }
 0x1bb   : > { %6844 = vmatpush1.bf16.msra.mxu0 %v9911_v22  ;;  %7532 = vmatpush1.bf16.msra.mxu1 %v9914_v15  ;;  %v10001_v22 = vld [vmem:[%s14108_s1 + $0xf80] ss:$16 sps:$4 sm:$0xff]   ;;  %v10004_v15 = vld [vmem:[%s14108_s1 + $0xf88] ss:$16 sps:$4 sm:$0xff]  }
 0x1bc   : > { %6845 = vmatprep.subr.bf16.mxu0 %v9919_v23  ;;  %7533 = vmatprep.subr.bf16.mxu1 %v9922_v24  ;;  %v10009_v23 = vld [vmem:[%s14108_s1 + $0xfa4] ss:$16 sps:$4 sm:$0xff]   ;;  %v10012_v24 = vld [vmem:[%s14108_s1 + $0xfac] ss:$16 sps:$4 sm:$0xff]  }
 0x1bf   : > { %6846 = vmatpush1.bf16.msra.mxu0 %v9917_v25  ;;  %7534 = vmatpush1.bf16.msra.mxu1 %v9920_v26  ;;  %v10007_v25 = vld [vmem:[%s14108_s1 + $0xfa0] ss:$16 sps:$4 sm:$0xff]   ;;  %v10010_v26 = vld [vmem:[%s14108_s1 + $0xfa8] ss:$16 sps:$4 sm:$0xff]  }
 0x1c0   : > { %6847 = vmatprep.subr.bf16.mxu0 %v9925_v27  ;;  %7535 = vmatprep.subr.bf16.mxu1 %v9928_v28  ;;  %v10015_v27 = vld [vmem:[%s14108_s1 + $0xfc4] ss:$16 sps:$4 sm:$0xff]   ;;  %v10018_v28 = vld [vmem:[%s14108_s1 + $0xfcc] ss:$16 sps:$4 sm:$0xff]  }
 0x1c3   : > { %6848 = vmatpush1.bf16.msra.mxu0 %v9923_v29  ;;  %7536 = vmatpush1.bf16.msra.mxu1 %v9926_v30  ;;  %v10013_v29 = vld [vmem:[%s14108_s1 + $0xfc0] ss:$16 sps:$4 sm:$0xff]   ;;  %v10016_v30 = vld [vmem:[%s14108_s1 + $0xfc8] ss:$16 sps:$4 sm:$0xff]  }
 0x1c4   : > { %6860 = vmatprep.subr.bf16.mxu0 %v9931_v31  ;;  %7548 = vmatprep.subr.bf16.mxu1 %v9934_v32  ;;  %v10021_v31 = vld [vmem:[%s14108_s1 + $0xfe4] ss:$16 sps:$4 sm:$0xff]   ;;  %v10024_v32 = vld [vmem:[%s14108_s1 + $0xfec] ss:$16 sps:$4 sm:$0xff]  }
 0x1c6   : > { %6850 = vmatmul.mubr.bf16.vlgmr.msra.gmra.mrb[0].mxu0 %v8073_v33  ;;  %7538 = vmatmul.mubr.bf16.vlgmr.msra.gmra.mrb[0].mxu1 %v8073_v33  ;;  %v10019_v33 = vld [vmem:[%s14108_s1 + $0xfe0] ss:$16 sps:$4 sm:$0xff]  }
 0x1c7   : > { %6861 = vmatpush1.bf16.msra.mxu0 %v9929_v34  ;;  %7549 = vmatpush1.bf16.msra.mxu1 %v9932_v35  ;;  %v10022_v34 = vld [vmem:[%s14108_s1 + $0xfe8] ss:$16 sps:$4 sm:$0xff]   ;;  %v10027_v35 = vld [vmem:[%s14108_s1 + $0x1004] ss:$16 sps:$4 sm:$0xff]  }
 0x1c8   : > { %6862 = vmatprep.subr.bf16.mxu0 %v9937_v36  ;;  %7550 = vmatprep.subr.bf16.mxu1 %v9940_v21  ;;  %v10030_v36 = vld [vmem:[%s14108_s1 + $0x100c] ss:$16 sps:$4 sm:$0xff]   ;;  %v12459_v21 = vld [vmem:[%s10976_s12 + $0x40] sm:$0xff] }
 0x1c9   : > { %6892 = vmatprep.mubr.bf16.mxu0 %v8076_v14  ;;  %7580 = vmatprep.mubr.bf16.mxu1 %v8076_v14  ;;  %v12462_v14 = vld [vmem:[%s10976_s12 + $0xc0] sm:$0xff] }
 0x1cb   : > { %6863 = vmatpush1.bf16.msra.mxu0 %v9935_v37  ;;  %7551 = vmatpush1.bf16.msra.mxu1 %v9938_v38  ;;  %v8075_v37 = vcombine.low %v12257_v18, %v12260_v19  ;;  %v10025_v38 = vld [vmem:[%s14108_s1 + $0x1000] ss:$16 sps:$4 sm:$0xff]   ;;  %v10036_v18 = vld [vmem:[%s14108_s1 + $0x102c] ss:$16 sps:$4 sm:$0xff]   ;;  %v8078_v19 = vcombine.high %v12459_v21, %v12462_v14 }
 0x1cc   : > { %6864 = vmatprep.subr.bf16.mxu0 %v9943_v39  ;;  %7552 = vmatprep.subr.bf16.mxu1 %v9946_v40  ;;  %v10028_v39 = vld [vmem:[%s14108_s1 + $0x1008] ss:$16 sps:$4 sm:$0xff]   ;;  %v10033_v40 = vld [vmem:[%s14108_s1 + $0x1024] ss:$16 sps:$4 sm:$0xff]  }
 0x1cf   : > { %6865 = vmatpush1.bf16.msra.mxu0 %v9941_v41  ;;  %7553 = vmatpush1.bf16.msra.mxu1 %v9944_v42  ;;  %v10031_v41 = vld [vmem:[%s14108_s1 + $0x1020] ss:$16 sps:$4 sm:$0xff]   ;;  %v10034_v42 = vld [vmem:[%s14108_s1 + $0x1028] ss:$16 sps:$4 sm:$0xff]  }
 0x1d0   : > { %6866 = vmatprep.subr.bf16.mxu0 %v9949_v43  ;;  %7554 = vmatprep.subr.bf16.mxu1 %v9952_v44  ;;  %v10039_v43 = vld [vmem:[%s14108_s1 + $0x1044] ss:$16 sps:$4 sm:$0xff]   ;;  %v10042_v44 = vld [vmem:[%s14108_s1 + $0x104c] ss:$16 sps:$4 sm:$0xff]  }
 0x1d3   : > { %6867 = vmatpush1.bf16.msra.mxu0 %v9947_v45  ;;  %7555 = vmatpush1.bf16.msra.mxu1 %v9950_v46  ;;  %v10037_v45 = vld [vmem:[%s14108_s1 + $0x1040] ss:$16 sps:$4 sm:$0xff]   ;;  %v10040_v46 = vld [vmem:[%s14108_s1 + $0x1048] ss:$16 sps:$4 sm:$0xff]  }
 0x1d4   : > { %6868 = vmatprep.subr.bf16.mxu0 %v9955_v47  ;;  %7556 = vmatprep.subr.bf16.mxu1 %v9958_v48  ;;  %v10045_v47 = vld [vmem:[%s14108_s1 + $0x1064] ss:$16 sps:$4 sm:$0xff]   ;;  %v10048_v48 = vld [vmem:[%s14108_s1 + $0x106c] ss:$16 sps:$4 sm:$0xff]  }
 0x1d7   : > { %6869 = vmatpush1.bf16.msra.mxu0 %v9953_v49  ;;  %7557 = vmatpush1.bf16.msra.mxu1 %v9956_v50  ;;  %v10043_v49 = vld [vmem:[%s14108_s1 + $0x1060] ss:$16 sps:$4 sm:$0xff]   ;;  %v10046_v50 = vld [vmem:[%s14108_s1 + $0x1068] ss:$16 sps:$4 sm:$0xff]  }
 0x1d8   : > { %6870 = vmatprep.subr.bf16.mxu0 %v9961_v51  ;;  %7558 = vmatprep.subr.bf16.mxu1 %v9964_v52  ;;  %v10051_v51 = vld [vmem:[%s14108_s1 + $0x1084] ss:$16 sps:$4 sm:$0xff]   ;;  %v10054_v52 = vld [vmem:[%s14108_s1 + $0x108c] ss:$16 sps:$4 sm:$0xff]  }
 0x1db   : > { %6871 = vmatpush1.bf16.msra.mxu0 %v9959_v53  ;;  %7559 = vmatpush1.bf16.msra.mxu1 %v9962_v54  ;;  %v10049_v53 = vld [vmem:[%s14108_s1 + $0x1080] ss:$16 sps:$4 sm:$0xff]   ;;  %v10052_v54 = vld [vmem:[%s14108_s1 + $0x1088] ss:$16 sps:$4 sm:$0xff]  }
 0x1dc   : > { %6872 = vmatprep.subr.bf16.mxu0 %v9967_v55  ;;  %7560 = vmatprep.subr.bf16.mxu1 %v9970_v56  ;;  %v10057_v55 = vld [vmem:[%s14108_s1 + $0x10a4] ss:$16 sps:$4 sm:$0xff]   ;;  %v10060_v56 = vld [vmem:[%s14108_s1 + $0x10ac] ss:$16 sps:$4 sm:$0xff]  }
 0x1df   : > { %6873 = vmatpush1.bf16.msra.mxu0 %v9965_v57  ;;  %7561 = vmatpush1.bf16.msra.mxu1 %v9968_v58  ;;  %v10055_v57 = vld [vmem:[%s14108_s1 + $0x10a0] ss:$16 sps:$4 sm:$0xff]   ;;  %v10058_v58 = vld [vmem:[%s14108_s1 + $0x10a8] ss:$16 sps:$4 sm:$0xff]  }
 0x1e0   : > { %6874 = vmatprep.subr.bf16.mxu0 %v9973_v59  ;;  %7562 = vmatprep.subr.bf16.mxu1 %v9976_v60  ;;  %v10063_v59 = vld [vmem:[%s14108_s1 + $0x10c4] ss:$16 sps:$4 sm:$0xff]   ;;  %v10066_v60 = vld [vmem:[%s14108_s1 + $0x10cc] ss:$16 sps:$4 sm:$0xff]  }
 0x1e3   : > { %6875 = vmatpush1.bf16.msra.mxu0 %v9971_v61  ;;  %7563 = vmatpush1.bf16.msra.mxu1 %v9974_v62  ;;  %v10061_v61 = vld [vmem:[%s14108_s1 + $0x10c0] ss:$16 sps:$4 sm:$0xff]   ;;  %v10064_v62 = vld [vmem:[%s14108_s1 + $0x10c8] ss:$16 sps:$4 sm:$0xff]  }
 0x1e4   : > { %6876 = vmatprep.subr.bf16.mxu0 %v9979_v63  ;;  %7564 = vmatprep.subr.bf16.mxu1 %v9982_v0  ;;  %v10069_v63 = vld [vmem:[%s14108_s1 + $0x10e4] ss:$16 sps:$4 sm:$0xff]   ;;  %v10072_v0 = vld [vmem:[%s14108_s1 + $0x10ec] ss:$16 sps:$4 sm:$0xff]  }
 0x1e7   : > { %6877 = vmatpush1.bf16.msra.mxu0 %v9977_v1  ;;  %7565 = vmatpush1.bf16.msra.mxu1 %v9980_v2  ;;  %v10067_v1 = vld [vmem:[%s14108_s1 + $0x10e0] ss:$16 sps:$4 sm:$0xff]   ;;  %v10070_v2 = vld [vmem:[%s14108_s1 + $0x10e8] ss:$16 sps:$4 sm:$0xff]  }
 0x1e8   : > { %6878 = vmatprep.subr.bf16.mxu0 %v9985_v3  ;;  %7566 = vmatprep.subr.bf16.mxu1 %v9988_v4  ;;  %v10075_v3 = vld [vmem:[%s14108_s1 + $0x1104] ss:$16 sps:$4 sm:$0xff]   ;;  %v10078_v4 = vld [vmem:[%s14108_s1 + $0x110c] ss:$16 sps:$4 sm:$0xff]  }
 0x1eb   : > { %6879 = vmatpush1.bf16.msra.mxu0 %v9983_v5  ;;  %7567 = vmatpush1.bf16.msra.mxu1 %v9986_v6  ;;  %v10073_v5 = vld [vmem:[%s14108_s1 + $0x1100] ss:$16 sps:$4 sm:$0xff]   ;;  %v10076_v6 = vld [vmem:[%s14108_s1 + $0x1108] ss:$16 sps:$4 sm:$0xff]  }
 0x1ec   : > { %6880 = vmatprep.subr.bf16.mxu0 %v9991_v7  ;;  %7568 = vmatprep.subr.bf16.mxu1 %v9994_v8  ;;  %v10081_v7 = vld [vmem:[%s14108_s1 + $0x1124] ss:$16 sps:$4 sm:$0xff]   ;;  %v10084_v8 = vld [vmem:[%s14108_s1 + $0x112c] ss:$16 sps:$4 sm:$0xff]  }
 0x1ef   : > { %6881 = vmatpush1.bf16.msra.mxu0 %v9989_v9  ;;  %7569 = vmatpush1.bf16.msra.mxu1 %v9992_v10  ;;  %v10079_v9 = vld [vmem:[%s14108_s1 + $0x1120] ss:$16 sps:$4 sm:$0xff]   ;;  %v10082_v10 = vld [vmem:[%s14108_s1 + $0x1128] ss:$16 sps:$4 sm:$0xff]  }
 0x1f0   : > { %6882 = vmatprep.subr.bf16.mxu0 %v9997_v11  ;;  %7570 = vmatprep.subr.bf16.mxu1 %v10000_v12  ;;  %v10087_v11 = vld [vmem:[%s14108_s1 + $0x1144] ss:$16 sps:$4 sm:$0xff]   ;;  %v10090_v12 = vld [vmem:[%s14108_s1 + $0x114c] ss:$16 sps:$4 sm:$0xff]  }
 0x1f3   : > { %6883 = vmatpush1.bf16.msra.mxu0 %v9995_v13  ;;  %7571 = vmatpush1.bf16.msra.mxu1 %v9998_v16  ;;  %v10085_v13 = vld [vmem:[%s14108_s1 + $0x1140] ss:$16 sps:$4 sm:$0xff]   ;;  %v10088_v16 = vld [vmem:[%s14108_s1 + $0x1148] ss:$16 sps:$4 sm:$0xff]  }
 0x1f4   : > { %6884 = vmatprep.subr.bf16.mxu0 %v10003_v17  ;;  %7572 = vmatprep.subr.bf16.mxu1 %v10006_v20  ;;  %v10093_v17 = vld [vmem:[%s14108_s1 + $0x1164] ss:$16 sps:$4 sm:$0xff]   ;;  %v10096_v20 = vld [vmem:[%s14108_s1 + $0x116c] ss:$16 sps:$4 sm:$0xff]  }
 0x1f7   : > { %6885 = vmatpush1.bf16.msra.mxu0 %v10001_v22  ;;  %7573 = vmatpush1.bf16.msra.mxu1 %v10004_v15  ;;  %v10091_v22 = vld [vmem:[%s14108_s1 + $0x1160] ss:$16 sps:$4 sm:$0xff]   ;;  %v10094_v15 = vld [vmem:[%s14108_s1 + $0x1168] ss:$16 sps:$4 sm:$0xff]  }
 0x1f8   : > { %6886 = vmatprep.subr.bf16.mxu0 %v10009_v23  ;;  %7574 = vmatprep.subr.bf16.mxu1 %v10012_v24  ;;  %v10099_v23 = vld [vmem:[%s14108_s1 + $0x1184] ss:$16 sps:$4 sm:$0xff]   ;;  %v10102_v24 = vld [vmem:[%s14108_s1 + $0x118c] ss:$16 sps:$4 sm:$0xff]  }
 0x1fb   : > { %6887 = vmatpush1.bf16.msra.mxu0 %v10007_v25  ;;  %7575 = vmatpush1.bf16.msra.mxu1 %v10010_v26  ;;  %v10097_v25 = vld [vmem:[%s14108_s1 + $0x1180] ss:$16 sps:$4 sm:$0xff]   ;;  %v10100_v26 = vld [vmem:[%s14108_s1 + $0x1188] ss:$16 sps:$4 sm:$0xff]  }
 0x1fc   : > { %6888 = vmatprep.subr.bf16.mxu0 %v10015_v27  ;;  %7576 = vmatprep.subr.bf16.mxu1 %v10018_v28  ;;  %v10105_v27 = vld [vmem:[%s14108_s1 + $0x11a4] ss:$16 sps:$4 sm:$0xff]   ;;  %v10108_v28 = vld [vmem:[%s14108_s1 + $0x11ac] ss:$16 sps:$4 sm:$0xff]  }
 0x1ff   : > { %6889 = vmatpush1.bf16.msra.mxu0 %v10013_v29  ;;  %7577 = vmatpush1.bf16.msra.mxu1 %v10016_v30  ;;  %v10103_v29 = vld [vmem:[%s14108_s1 + $0x11a0] ss:$16 sps:$4 sm:$0xff]   ;;  %v10106_v30 = vld [vmem:[%s14108_s1 + $0x11a8] ss:$16 sps:$4 sm:$0xff]  }
 0x200   : > { %6890 = vmatprep.subr.bf16.mxu0 %v10021_v31  ;;  %7578 = vmatprep.subr.bf16.mxu1 %v10024_v32  ;;  %v10111_v31 = vld [vmem:[%s14108_s1 + $0x11c4] ss:$16 sps:$4 sm:$0xff]   ;;  %v10114_v32 = vld [vmem:[%s14108_s1 + $0x11cc] ss:$16 sps:$4 sm:$0xff]  }
 0x203   : > { %6891 = vmatpush1.bf16.msra.mxu0 %v10019_v33  ;;  %7579 = vmatpush1.bf16.msra.mxu1 %v10022_v34  ;;  %v10109_v33 = vld [vmem:[%s14108_s1 + $0x11c0] ss:$16 sps:$4 sm:$0xff]   ;;  %v10112_v34 = vld [vmem:[%s14108_s1 + $0x11c8] ss:$16 sps:$4 sm:$0xff]  }
 0x204   : > { %6903 = vmatprep.subr.bf16.mxu0 %v10027_v35  ;;  %7591 = vmatprep.subr.bf16.mxu1 %v10030_v36  ;;  %v10117_v35 = vld [vmem:[%s14108_s1 + $0x11e4] ss:$16 sps:$4 sm:$0xff]   ;;  %v10120_v36 = vld [vmem:[%s14108_s1 + $0x11ec] ss:$16 sps:$4 sm:$0xff]  }
 0x206   : > { %6893 = vmatmul.mubr.bf16.vlgmr.msra.gmra.mrb[0].mxu0 %v8075_v37  ;;  %7581 = vmatmul.mubr.bf16.vlgmr.msra.gmra.mrb[0].mxu1 %v8075_v37  ;;  %v10115_v37 = vld [vmem:[%s14108_s1 + $0x11e0] ss:$16 sps:$4 sm:$0xff]  }
 0x207   : > { %6904 = vmatpush1.bf16.msra.mxu0 %v10025_v38  ;;  %7592 = vmatpush1.bf16.msra.mxu1 %v10028_v39  ;;  %v10118_v38 = vld [vmem:[%s14108_s1 + $0x11e8] ss:$16 sps:$4 sm:$0xff]   ;;  %v10123_v39 = vld [vmem:[%s14108_s1 + $0x1204] ss:$16 sps:$4 sm:$0xff]  }
 0x208   : > { %6905 = vmatprep.subr.bf16.mxu0 %v10033_v40  ;;  %7593 = vmatprep.subr.bf16.mxu1 %v10036_v18  ;;  %v10126_v40 = vld [vmem:[%s14108_s1 + $0x120c] ss:$16 sps:$4 sm:$0xff]  }
 0x209   : > { %6935 = vmatprep.mubr.bf16.mxu0 %v8078_v19  ;;  %7623 = vmatprep.mubr.bf16.mxu1 %v8078_v19  ;;  %v12661_v18 = vld [vmem:[%s10976_s12 + $0x48] sm:$0xff] }
 0x20a   : > { %v12664_v19 = vld [vmem:[%s10976_s12 + $0xc8] sm:$0xff] }
 0x20b   : > { %6906 = vmatpush1.bf16.msra.mxu0 %v10031_v41  ;;  %7594 = vmatpush1.bf16.msra.mxu1 %v10034_v42  ;;  %v8077_v41 = vcombine.low %v12459_v21, %v12462_v14  ;;  %v10121_v42 = vld [vmem:[%s14108_s1 + $0x1200] ss:$16 sps:$4 sm:$0xff]   ;;  %v10132_v21 = vld [vmem:[%s14108_s1 + $0x122c] ss:$16 sps:$4 sm:$0xff]   ;;  %v8080_v14 = vcombine.high %v12661_v18, %v12664_v19 }
 0x20c   : > { %6907 = vmatprep.subr.bf16.mxu0 %v10039_v43  ;;  %7595 = vmatprep.subr.bf16.mxu1 %v10042_v44  ;;  %v10124_v43 = vld [vmem:[%s14108_s1 + $0x1208] ss:$16 sps:$4 sm:$0xff]   ;;  %v10129_v44 = vld [vmem:[%s14108_s1 + $0x1224] ss:$16 sps:$4 sm:$0xff]  }
 0x20f   : > { %6908 = vmatpush1.bf16.msra.mxu0 %v10037_v45  ;;  %7596 = vmatpush1.bf16.msra.mxu1 %v10040_v46  ;;  %v10127_v45 = vld [vmem:[%s14108_s1 + $0x1220] ss:$16 sps:$4 sm:$0xff]   ;;  %v10130_v46 = vld [vmem:[%s14108_s1 + $0x1228] ss:$16 sps:$4 sm:$0xff]  }
 0x210   : > { %6909 = vmatprep.subr.bf16.mxu0 %v10045_v47  ;;  %7597 = vmatprep.subr.bf16.mxu1 %v10048_v48  ;;  %v10135_v47 = vld [vmem:[%s14108_s1 + $0x1244] ss:$16 sps:$4 sm:$0xff]   ;;  %v10138_v48 = vld [vmem:[%s14108_s1 + $0x124c] ss:$16 sps:$4 sm:$0xff]  }
 0x213   : > { %6910 = vmatpush1.bf16.msra.mxu0 %v10043_v49  ;;  %7598 = vmatpush1.bf16.msra.mxu1 %v10046_v50  ;;  %v10133_v49 = vld [vmem:[%s14108_s1 + $0x1240] ss:$16 sps:$4 sm:$0xff]   ;;  %v10136_v50 = vld [vmem:[%s14108_s1 + $0x1248] ss:$16 sps:$4 sm:$0xff]  }
 0x214   : > { %6911 = vmatprep.subr.bf16.mxu0 %v10051_v51  ;;  %7599 = vmatprep.subr.bf16.mxu1 %v10054_v52  ;;  %v10141_v51 = vld [vmem:[%s14108_s1 + $0x1264] ss:$16 sps:$4 sm:$0xff]   ;;  %v10144_v52 = vld [vmem:[%s14108_s1 + $0x126c] ss:$16 sps:$4 sm:$0xff]  }
 0x217   : > { %6912 = vmatpush1.bf16.msra.mxu0 %v10049_v53  ;;  %7600 = vmatpush1.bf16.msra.mxu1 %v10052_v54  ;;  %v10139_v53 = vld [vmem:[%s14108_s1 + $0x1260] ss:$16 sps:$4 sm:$0xff]   ;;  %v10142_v54 = vld [vmem:[%s14108_s1 + $0x1268] ss:$16 sps:$4 sm:$0xff]  }
 0x218   : > { %6913 = vmatprep.subr.bf16.mxu0 %v10057_v55  ;;  %7601 = vmatprep.subr.bf16.mxu1 %v10060_v56  ;;  %v10147_v55 = vld [vmem:[%s14108_s1 + $0x1284] ss:$16 sps:$4 sm:$0xff]   ;;  %v10150_v56 = vld [vmem:[%s14108_s1 + $0x128c] ss:$16 sps:$4 sm:$0xff]  }
 0x21b   : > { %6914 = vmatpush1.bf16.msra.mxu0 %v10055_v57  ;;  %7602 = vmatpush1.bf16.msra.mxu1 %v10058_v58  ;;  %v10145_v57 = vld [vmem:[%s14108_s1 + $0x1280] ss:$16 sps:$4 sm:$0xff]   ;;  %v10148_v58 = vld [vmem:[%s14108_s1 + $0x1288] ss:$16 sps:$4 sm:$0xff]  }
 0x21c   : > { %6915 = vmatprep.subr.bf16.mxu0 %v10063_v59  ;;  %7603 = vmatprep.subr.bf16.mxu1 %v10066_v60  ;;  %v10153_v59 = vld [vmem:[%s14108_s1 + $0x12a4] ss:$16 sps:$4 sm:$0xff]   ;;  %v10156_v60 = vld [vmem:[%s14108_s1 + $0x12ac] ss:$16 sps:$4 sm:$0xff]  }
 0x21f   : > { %6916 = vmatpush1.bf16.msra.mxu0 %v10061_v61  ;;  %7604 = vmatpush1.bf16.msra.mxu1 %v10064_v62  ;;  %v10151_v61 = vld [vmem:[%s14108_s1 + $0x12a0] ss:$16 sps:$4 sm:$0xff]   ;;  %v10154_v62 = vld [vmem:[%s14108_s1 + $0x12a8] ss:$16 sps:$4 sm:$0xff]  }
 0x220   : > { %6917 = vmatprep.subr.bf16.mxu0 %v10069_v63  ;;  %7605 = vmatprep.subr.bf16.mxu1 %v10072_v0  ;;  %v10159_v63 = vld [vmem:[%s14108_s1 + $0x12c4] ss:$16 sps:$4 sm:$0xff]   ;;  %v10162_v0 = vld [vmem:[%s14108_s1 + $0x12cc] ss:$16 sps:$4 sm:$0xff]  }
 0x223   : > { %6918 = vmatpush1.bf16.msra.mxu0 %v10067_v1  ;;  %7606 = vmatpush1.bf16.msra.mxu1 %v10070_v2  ;;  %v10157_v1 = vld [vmem:[%s14108_s1 + $0x12c0] ss:$16 sps:$4 sm:$0xff]   ;;  %v10160_v2 = vld [vmem:[%s14108_s1 + $0x12c8] ss:$16 sps:$4 sm:$0xff]  }
 0x224   : > { %6919 = vmatprep.subr.bf16.mxu0 %v10075_v3  ;;  %7607 = vmatprep.subr.bf16.mxu1 %v10078_v4  ;;  %v10165_v3 = vld [vmem:[%s14108_s1 + $0x12e4] ss:$16 sps:$4 sm:$0xff]   ;;  %v10168_v4 = vld [vmem:[%s14108_s1 + $0x12ec] ss:$16 sps:$4 sm:$0xff]  }
 0x227   : > { %6920 = vmatpush1.bf16.msra.mxu0 %v10073_v5  ;;  %7608 = vmatpush1.bf16.msra.mxu1 %v10076_v6  ;;  %v10163_v5 = vld [vmem:[%s14108_s1 + $0x12e0] ss:$16 sps:$4 sm:$0xff]   ;;  %v10166_v6 = vld [vmem:[%s14108_s1 + $0x12e8] ss:$16 sps:$4 sm:$0xff]  }
 0x228   : > { %6921 = vmatprep.subr.bf16.mxu0 %v10081_v7  ;;  %7609 = vmatprep.subr.bf16.mxu1 %v10084_v8  ;;  %v10171_v7 = vld [vmem:[%s14108_s1 + $0x1304] ss:$16 sps:$4 sm:$0xff]   ;;  %v10174_v8 = vld [vmem:[%s14108_s1 + $0x130c] ss:$16 sps:$4 sm:$0xff]  }
 0x22b   : > { %6922 = vmatpush1.bf16.msra.mxu0 %v10079_v9  ;;  %7610 = vmatpush1.bf16.msra.mxu1 %v10082_v10  ;;  %v10169_v9 = vld [vmem:[%s14108_s1 + $0x1300] ss:$16 sps:$4 sm:$0xff]   ;;  %v10172_v10 = vld [vmem:[%s14108_s1 + $0x1308] ss:$16 sps:$4 sm:$0xff]  }
 0x22c   : > { %6923 = vmatprep.subr.bf16.mxu0 %v10087_v11  ;;  %7611 = vmatprep.subr.bf16.mxu1 %v10090_v12  ;;  %v10177_v11 = vld [vmem:[%s14108_s1 + $0x1324] ss:$16 sps:$4 sm:$0xff]   ;;  %v10180_v12 = vld [vmem:[%s14108_s1 + $0x132c] ss:$16 sps:$4 sm:$0xff]  }
 0x22f   : > { %6924 = vmatpush1.bf16.msra.mxu0 %v10085_v13  ;;  %7612 = vmatpush1.bf16.msra.mxu1 %v10088_v16  ;;  %v10175_v13 = vld [vmem:[%s14108_s1 + $0x1320] ss:$16 sps:$4 sm:$0xff]   ;;  %v10178_v16 = vld [vmem:[%s14108_s1 + $0x1328] ss:$16 sps:$4 sm:$0xff]  }
 0x230   : > { %6925 = vmatprep.subr.bf16.mxu0 %v10093_v17  ;;  %7613 = vmatprep.subr.bf16.mxu1 %v10096_v20  ;;  %v10183_v17 = vld [vmem:[%s14108_s1 + $0x1344] ss:$16 sps:$4 sm:$0xff]   ;;  %v10186_v20 = vld [vmem:[%s14108_s1 + $0x134c] ss:$16 sps:$4 sm:$0xff]  }
 0x233   : > { %6926 = vmatpush1.bf16.msra.mxu0 %v10091_v22  ;;  %7614 = vmatpush1.bf16.msra.mxu1 %v10094_v15  ;;  %v10181_v22 = vld [vmem:[%s14108_s1 + $0x1340] ss:$16 sps:$4 sm:$0xff]   ;;  %v10184_v15 = vld [vmem:[%s14108_s1 + $0x1348] ss:$16 sps:$4 sm:$0xff]  }
 0x234   : > { %6927 = vmatprep.subr.bf16.mxu0 %v10099_v23  ;;  %7615 = vmatprep.subr.bf16.mxu1 %v10102_v24  ;;  %v10189_v23 = vld [vmem:[%s14108_s1 + $0x1364] ss:$16 sps:$4 sm:$0xff]   ;;  %v10192_v24 = vld [vmem:[%s14108_s1 + $0x136c] ss:$16 sps:$4 sm:$0xff]  }
 0x237   : > { %6928 = vmatpush1.bf16.msra.mxu0 %v10097_v25  ;;  %7616 = vmatpush1.bf16.msra.mxu1 %v10100_v26  ;;  %v10187_v25 = vld [vmem:[%s14108_s1 + $0x1360] ss:$16 sps:$4 sm:$0xff]   ;;  %v10190_v26 = vld [vmem:[%s14108_s1 + $0x1368] ss:$16 sps:$4 sm:$0xff]  }
 0x238   : > { %6929 = vmatprep.subr.bf16.mxu0 %v10105_v27  ;;  %7617 = vmatprep.subr.bf16.mxu1 %v10108_v28  ;;  %v10195_v27 = vld [vmem:[%s14108_s1 + $0x1384] ss:$16 sps:$4 sm:$0xff]   ;;  %v10198_v28 = vld [vmem:[%s14108_s1 + $0x138c] ss:$16 sps:$4 sm:$0xff]  }
 0x23b   : > { %6930 = vmatpush1.bf16.msra.mxu0 %v10103_v29  ;;  %7618 = vmatpush1.bf16.msra.mxu1 %v10106_v30  ;;  %v10193_v29 = vld [vmem:[%s14108_s1 + $0x1380] ss:$16 sps:$4 sm:$0xff]   ;;  %v10196_v30 = vld [vmem:[%s14108_s1 + $0x1388] ss:$16 sps:$4 sm:$0xff]  }
 0x23c   : > { %6931 = vmatprep.subr.bf16.mxu0 %v10111_v31  ;;  %7619 = vmatprep.subr.bf16.mxu1 %v10114_v32  ;;  %v10201_v31 = vld [vmem:[%s14108_s1 + $0x13a4] ss:$16 sps:$4 sm:$0xff]   ;;  %v10204_v32 = vld [vmem:[%s14108_s1 + $0x13ac] ss:$16 sps:$4 sm:$0xff]  }
 0x23f   : > { %6932 = vmatpush1.bf16.msra.mxu0 %v10109_v33  ;;  %7620 = vmatpush1.bf16.msra.mxu1 %v10112_v34  ;;  %v10199_v33 = vld [vmem:[%s14108_s1 + $0x13a0] ss:$16 sps:$4 sm:$0xff]   ;;  %v10202_v34 = vld [vmem:[%s14108_s1 + $0x13a8] ss:$16 sps:$4 sm:$0xff]  }
 0x240   : > { %6933 = vmatprep.subr.bf16.mxu0 %v10117_v35  ;;  %7621 = vmatprep.subr.bf16.mxu1 %v10120_v36  ;;  %v10207_v35 = vld [vmem:[%s14108_s1 + $0x13c4] ss:$16 sps:$4 sm:$0xff]   ;;  %v10210_v36 = vld [vmem:[%s14108_s1 + $0x13cc] ss:$16 sps:$4 sm:$0xff]  }
 0x243   : > { %6934 = vmatpush1.bf16.msra.mxu0 %v10115_v37  ;;  %7622 = vmatpush1.bf16.msra.mxu1 %v10118_v38  ;;  %v10205_v37 = vld [vmem:[%s14108_s1 + $0x13c0] ss:$16 sps:$4 sm:$0xff]   ;;  %v10208_v38 = vld [vmem:[%s14108_s1 + $0x13c8] ss:$16 sps:$4 sm:$0xff]  }
 0x244   : > { %6946 = vmatprep.subr.bf16.mxu0 %v10123_v39  ;;  %7634 = vmatprep.subr.bf16.mxu1 %v10126_v40  ;;  %v10213_v39 = vld [vmem:[%s14108_s1 + $0x13e4] ss:$16 sps:$4 sm:$0xff]   ;;  %v10216_v40 = vld [vmem:[%s14108_s1 + $0x13ec] ss:$16 sps:$4 sm:$0xff]  }
 0x246   : > { %6936 = vmatmul.mubr.bf16.vlgmr.msra.gmra.mrb[0].mxu0 %v8077_v41  ;;  %7624 = vmatmul.mubr.bf16.vlgmr.msra.gmra.mrb[0].mxu1 %v8077_v41  ;;  %v10211_v41 = vld [vmem:[%s14108_s1 + $0x13e0] ss:$16 sps:$4 sm:$0xff]  }
 0x247   : > { %6947 = vmatpush1.bf16.msra.mxu0 %v10121_v42  ;;  %7635 = vmatpush1.bf16.msra.mxu1 %v10124_v43  ;;  %v10214_v42 = vld [vmem:[%s14108_s1 + $0x13e8] ss:$16 sps:$4 sm:$0xff]   ;;  %v10219_v43 = vld [vmem:[%s14108_s1 + $0x1404] ss:$16 sps:$4 sm:$0xff]  }
 0x248   : > { %6948 = vmatprep.subr.bf16.mxu0 %v10129_v44  ;;  %7636 = vmatprep.subr.bf16.mxu1 %v10132_v21  ;;  %v10222_v44 = vld [vmem:[%s14108_s1 + $0x140c] ss:$16 sps:$4 sm:$0xff]   ;;  %v8079_v21 = vcombine.low %v12661_v18, %v12664_v19  ;;  %v10225_v18 = vld [vmem:[%s14108_s1 + $0x1424] ss:$16 sps:$4 sm:$0xff]  }
 0x249   : > { %6978 = vmatprep.mubr.bf16.mxu0 %v8080_v14  ;;  %7666 = vmatprep.mubr.bf16.mxu1 %v8080_v14  ;;  %v12865_v14 = vld [vmem:[%s10976_s12 + $0x50] sm:$0xff]  ;;  %v10228_v19 = vld [vmem:[%s14108_s1 + $0x142c] ss:$16 sps:$4 sm:$0xff]  }
 0x24b   : > { %6949 = vmatpush1.bf16.msra.mxu0 %v10127_v45  ;;  %7637 = vmatpush1.bf16.msra.mxu1 %v10130_v46  ;;  %v12868_v45 = vld [vmem:[%s10976_s12 + $0xd0] sm:$0xff] }
 0x24c   : > { %6950 = vmatprep.subr.bf16.mxu0 %v10135_v47  ;;  %7638 = vmatprep.subr.bf16.mxu1 %v10138_v48  ;;  %v10217_v46 = vld [vmem:[%s14108_s1 + $0x1400] ss:$16 sps:$4 sm:$0xff]   ;;  %v10220_v47 = vld [vmem:[%s14108_s1 + $0x1408] ss:$16 sps:$4 sm:$0xff]   ;;  %v8082_v48 = vcombine.high %v12865_v14, %v12868_v45 }
 0x24f   : > { %6951 = vmatpush1.bf16.msra.mxu0 %v10133_v49  ;;  %7639 = vmatpush1.bf16.msra.mxu1 %v10136_v50  ;;  %v10223_v49 = vld [vmem:[%s14108_s1 + $0x1420] ss:$16 sps:$4 sm:$0xff]   ;;  %v10226_v50 = vld [vmem:[%s14108_s1 + $0x1428] ss:$16 sps:$4 sm:$0xff]  }
 0x250   : > { %6952 = vmatprep.subr.bf16.mxu0 %v10141_v51  ;;  %7640 = vmatprep.subr.bf16.mxu1 %v10144_v52  ;;  %v10231_v51 = vld [vmem:[%s14108_s1 + $0x1444] ss:$16 sps:$4 sm:$0xff]   ;;  %v10234_v52 = vld [vmem:[%s14108_s1 + $0x144c] ss:$16 sps:$4 sm:$0xff]  }
 0x253   : > { %6953 = vmatpush1.bf16.msra.mxu0 %v10139_v53  ;;  %7641 = vmatpush1.bf16.msra.mxu1 %v10142_v54  ;;  %v10229_v53 = vld [vmem:[%s14108_s1 + $0x1440] ss:$16 sps:$4 sm:$0xff]   ;;  %v10232_v54 = vld [vmem:[%s14108_s1 + $0x1448] ss:$16 sps:$4 sm:$0xff]  }
 0x254   : > { %6954 = vmatprep.subr.bf16.mxu0 %v10147_v55  ;;  %7642 = vmatprep.subr.bf16.mxu1 %v10150_v56  ;;  %v10237_v55 = vld [vmem:[%s14108_s1 + $0x1464] ss:$16 sps:$4 sm:$0xff]   ;;  %v10240_v56 = vld [vmem:[%s14108_s1 + $0x146c] ss:$16 sps:$4 sm:$0xff]  }
 0x257   : > { %6955 = vmatpush1.bf16.msra.mxu0 %v10145_v57  ;;  %7643 = vmatpush1.bf16.msra.mxu1 %v10148_v58  ;;  %v10235_v57 = vld [vmem:[%s14108_s1 + $0x1460] ss:$16 sps:$4 sm:$0xff]   ;;  %v10238_v58 = vld [vmem:[%s14108_s1 + $0x1468] ss:$16 sps:$4 sm:$0xff]  }
 0x258   : > { %6956 = vmatprep.subr.bf16.mxu0 %v10153_v59  ;;  %7644 = vmatprep.subr.bf16.mxu1 %v10156_v60  ;;  %v10243_v59 = vld [vmem:[%s14108_s1 + $0x1484] ss:$16 sps:$4 sm:$0xff]   ;;  %v10246_v60 = vld [vmem:[%s14108_s1 + $0x148c] ss:$16 sps:$4 sm:$0xff]  }
 0x25b   : > { %6957 = vmatpush1.bf16.msra.mxu0 %v10151_v61  ;;  %7645 = vmatpush1.bf16.msra.mxu1 %v10154_v62  ;;  %v10241_v61 = vld [vmem:[%s14108_s1 + $0x1480] ss:$16 sps:$4 sm:$0xff]   ;;  %v10244_v62 = vld [vmem:[%s14108_s1 + $0x1488] ss:$16 sps:$4 sm:$0xff]  }
 0x25c   : > { %6958 = vmatprep.subr.bf16.mxu0 %v10159_v63  ;;  %7646 = vmatprep.subr.bf16.mxu1 %v10162_v0  ;;  %v10249_v63 = vld [vmem:[%s14108_s1 + $0x14a4] ss:$16 sps:$4 sm:$0xff]   ;;  %v10252_v0 = vld [vmem:[%s14108_s1 + $0x14ac] ss:$16 sps:$4 sm:$0xff]  }
 0x25f   : > { %6959 = vmatpush1.bf16.msra.mxu0 %v10157_v1  ;;  %7647 = vmatpush1.bf16.msra.mxu1 %v10160_v2  ;;  %v10247_v1 = vld [vmem:[%s14108_s1 + $0x14a0] ss:$16 sps:$4 sm:$0xff]   ;;  %v10250_v2 = vld [vmem:[%s14108_s1 + $0x14a8] ss:$16 sps:$4 sm:$0xff]  }
 0x260   : > { %6960 = vmatprep.subr.bf16.mxu0 %v10165_v3  ;;  %7648 = vmatprep.subr.bf16.mxu1 %v10168_v4  ;;  %v10255_v3 = vld [vmem:[%s14108_s1 + $0x14c4] ss:$16 sps:$4 sm:$0xff]   ;;  %v10258_v4 = vld [vmem:[%s14108_s1 + $0x14cc] ss:$16 sps:$4 sm:$0xff]  }
 0x263   : > { %6961 = vmatpush1.bf16.msra.mxu0 %v10163_v5  ;;  %7649 = vmatpush1.bf16.msra.mxu1 %v10166_v6  ;;  %v10253_v5 = vld [vmem:[%s14108_s1 + $0x14c0] ss:$16 sps:$4 sm:$0xff]   ;;  %v10256_v6 = vld [vmem:[%s14108_s1 + $0x14c8] ss:$16 sps:$4 sm:$0xff]  }
 0x264   : > { %6962 = vmatprep.subr.bf16.mxu0 %v10171_v7  ;;  %7650 = vmatprep.subr.bf16.mxu1 %v10174_v8  ;;  %v10261_v7 = vld [vmem:[%s14108_s1 + $0x14e4] ss:$16 sps:$4 sm:$0xff]   ;;  %v10264_v8 = vld [vmem:[%s14108_s1 + $0x14ec] ss:$16 sps:$4 sm:$0xff]  }
 0x267   : > { %6963 = vmatpush1.bf16.msra.mxu0 %v10169_v9  ;;  %7651 = vmatpush1.bf16.msra.mxu1 %v10172_v10  ;;  %v10259_v9 = vld [vmem:[%s14108_s1 + $0x14e0] ss:$16 sps:$4 sm:$0xff]   ;;  %v10262_v10 = vld [vmem:[%s14108_s1 + $0x14e8] ss:$16 sps:$4 sm:$0xff]  }
 0x268   : > { %6964 = vmatprep.subr.bf16.mxu0 %v10177_v11  ;;  %7652 = vmatprep.subr.bf16.mxu1 %v10180_v12  ;;  %v10267_v11 = vld [vmem:[%s14108_s1 + $0x1504] ss:$16 sps:$4 sm:$0xff]   ;;  %v10270_v12 = vld [vmem:[%s14108_s1 + $0x150c] ss:$16 sps:$4 sm:$0xff]  }
 0x26b   : > { %6965 = vmatpush1.bf16.msra.mxu0 %v10175_v13  ;;  %7653 = vmatpush1.bf16.msra.mxu1 %v10178_v16  ;;  %v10265_v13 = vld [vmem:[%s14108_s1 + $0x1500] ss:$16 sps:$4 sm:$0xff]   ;;  %v10268_v16 = vld [vmem:[%s14108_s1 + $0x1508] ss:$16 sps:$4 sm:$0xff]  }
 0x26c   : > { %6966 = vmatprep.subr.bf16.mxu0 %v10183_v17  ;;  %7654 = vmatprep.subr.bf16.mxu1 %v10186_v20  ;;  %v10273_v17 = vld [vmem:[%s14108_s1 + $0x1524] ss:$16 sps:$4 sm:$0xff]   ;;  %v10276_v20 = vld [vmem:[%s14108_s1 + $0x152c] ss:$16 sps:$4 sm:$0xff]  }
 0x26f   : > { %6967 = vmatpush1.bf16.msra.mxu0 %v10181_v22  ;;  %7655 = vmatpush1.bf16.msra.mxu1 %v10184_v15  ;;  %v10271_v22 = vld [vmem:[%s14108_s1 + $0x1520] ss:$16 sps:$4 sm:$0xff]   ;;  %v10274_v15 = vld [vmem:[%s14108_s1 + $0x1528] ss:$16 sps:$4 sm:$0xff]  }
 0x270   : > { %6968 = vmatprep.subr.bf16.mxu0 %v10189_v23  ;;  %7656 = vmatprep.subr.bf16.mxu1 %v10192_v24  ;;  %v10279_v23 = vld [vmem:[%s14108_s1 + $0x1544] ss:$16 sps:$4 sm:$0xff]   ;;  %v10282_v24 = vld [vmem:[%s14108_s1 + $0x154c] ss:$16 sps:$4 sm:$0xff]  }
 0x273   : > { %6969 = vmatpush1.bf16.msra.mxu0 %v10187_v25  ;;  %7657 = vmatpush1.bf16.msra.mxu1 %v10190_v26  ;;  %v10277_v25 = vld [vmem:[%s14108_s1 + $0x1540] ss:$16 sps:$4 sm:$0xff]   ;;  %v10280_v26 = vld [vmem:[%s14108_s1 + $0x1548] ss:$16 sps:$4 sm:$0xff]  }
 0x274   : > { %6970 = vmatprep.subr.bf16.mxu0 %v10195_v27  ;;  %7658 = vmatprep.subr.bf16.mxu1 %v10198_v28  ;;  %v10285_v27 = vld [vmem:[%s14108_s1 + $0x1564] ss:$16 sps:$4 sm:$0xff]   ;;  %v10288_v28 = vld [vmem:[%s14108_s1 + $0x156c] ss:$16 sps:$4 sm:$0xff]  }
 0x277   : > { %6971 = vmatpush1.bf16.msra.mxu0 %v10193_v29  ;;  %7659 = vmatpush1.bf16.msra.mxu1 %v10196_v30  ;;  %v10283_v29 = vld [vmem:[%s14108_s1 + $0x1560] ss:$16 sps:$4 sm:$0xff]   ;;  %v10286_v30 = vld [vmem:[%s14108_s1 + $0x1568] ss:$16 sps:$4 sm:$0xff]  }
 0x278   : > { %6972 = vmatprep.subr.bf16.mxu0 %v10201_v31  ;;  %7660 = vmatprep.subr.bf16.mxu1 %v10204_v32  ;;  %v10291_v31 = vld [vmem:[%s14108_s1 + $0x1584] ss:$16 sps:$4 sm:$0xff]   ;;  %v10294_v32 = vld [vmem:[%s14108_s1 + $0x158c] ss:$16 sps:$4 sm:$0xff]  }
 0x27b   : > { %6973 = vmatpush1.bf16.msra.mxu0 %v10199_v33  ;;  %7661 = vmatpush1.bf16.msra.mxu1 %v10202_v34  ;;  %v10289_v33 = vld [vmem:[%s14108_s1 + $0x1580] ss:$16 sps:$4 sm:$0xff]   ;;  %v10292_v34 = vld [vmem:[%s14108_s1 + $0x1588] ss:$16 sps:$4 sm:$0xff]  }
 0x27c   : > { %6974 = vmatprep.subr.bf16.mxu0 %v10207_v35  ;;  %7662 = vmatprep.subr.bf16.mxu1 %v10210_v36  ;;  %v10297_v35 = vld [vmem:[%s14108_s1 + $0x15a4] ss:$16 sps:$4 sm:$0xff]   ;;  %v10300_v36 = vld [vmem:[%s14108_s1 + $0x15ac] ss:$16 sps:$4 sm:$0xff]  }
 0x27f   : > { %6975 = vmatpush1.bf16.msra.mxu0 %v10205_v37  ;;  %7663 = vmatpush1.bf16.msra.mxu1 %v10208_v38  ;;  %v10295_v37 = vld [vmem:[%s14108_s1 + $0x15a0] ss:$16 sps:$4 sm:$0xff]   ;;  %v10298_v38 = vld [vmem:[%s14108_s1 + $0x15a8] ss:$16 sps:$4 sm:$0xff]  }
 0x280   : > { %6976 = vmatprep.subr.bf16.mxu0 %v10213_v39  ;;  %7664 = vmatprep.subr.bf16.mxu1 %v10216_v40  ;;  %v10303_v39 = vld [vmem:[%s14108_s1 + $0x15c4] ss:$16 sps:$4 sm:$0xff]   ;;  %v10306_v40 = vld [vmem:[%s14108_s1 + $0x15cc] ss:$16 sps:$4 sm:$0xff]  }
 0x283   : > { %6977 = vmatpush1.bf16.msra.mxu0 %v10211_v41  ;;  %7665 = vmatpush1.bf16.msra.mxu1 %v10214_v42  ;;  %v10301_v41 = vld [vmem:[%s14108_s1 + $0x15c0] ss:$16 sps:$4 sm:$0xff]   ;;  %v10304_v42 = vld [vmem:[%s14108_s1 + $0x15c8] ss:$16 sps:$4 sm:$0xff]  }
 0x284   : > { %6989 = vmatprep.subr.bf16.mxu0 %v10219_v43  ;;  %7677 = vmatprep.subr.bf16.mxu1 %v10222_v44  ;;  %v10309_v43 = vld [vmem:[%s14108_s1 + $0x15e4] ss:$16 sps:$4 sm:$0xff]   ;;  %v10312_v44 = vld [vmem:[%s14108_s1 + $0x15ec] ss:$16 sps:$4 sm:$0xff]  }
 0x286   : > { %6979 = vmatmul.mubr.bf16.vlgmr.msra.gmra.mrb[0].mxu0 %v8079_v21  ;;  %7667 = vmatmul.mubr.bf16.vlgmr.msra.gmra.mrb[0].mxu1 %v8079_v21  ;;  %v10307_v21 = vld [vmem:[%s14108_s1 + $0x15e0] ss:$16 sps:$4 sm:$0xff]  }
 0x287   : > { %6990 = vmatpush1.bf16.msra.mxu0 %v10217_v46  ;;  %7678 = vmatpush1.bf16.msra.mxu1 %v10220_v47  ;;  %v10310_v46 = vld [vmem:[%s14108_s1 + $0x15e8] ss:$16 sps:$4 sm:$0xff]   ;;  %v10315_v47 = vld [vmem:[%s14108_s1 + $0x1604] ss:$16 sps:$4 sm:$0xff]  }
 0x288   : > { %6991 = vmatprep.subr.bf16.mxu0 %v10225_v18  ;;  %7679 = vmatprep.subr.bf16.mxu1 %v10228_v19  ;;  %v10318_v18 = vld [vmem:[%s14108_s1 + $0x160c] ss:$16 sps:$4 sm:$0xff]   ;;  %v8081_v19 = vcombine.low %v12865_v14, %v12868_v45  ;;  %v10321_v14 = vld [vmem:[%s14108_s1 + $0x1624] ss:$16 sps:$4 sm:$0xff]  }
 0x289   : > { %7021 = vmatprep.mubr.bf16.mxu0 %v8082_v48  ;;  %7709 = vmatprep.mubr.bf16.mxu1 %v8082_v48  ;;  %v13067_v48 = vld [vmem:[%s10976_s12 + $0x58] sm:$0xff] }
 0x28a   : > { %v10324_v45 = vld [vmem:[%s14108_s1 + $0x162c] ss:$16 sps:$4 sm:$0xff]  }
 0x28b   : > { %6992 = vmatpush1.bf16.msra.mxu0 %v10223_v49  ;;  %7680 = vmatpush1.bf16.msra.mxu1 %v10226_v50  ;;  %v13070_v49 = vld [vmem:[%s10976_s12 + $0xd8] sm:$0xff]  ;;  %v10313_v50 = vld [vmem:[%s14108_s1 + $0x1600] ss:$16 sps:$4 sm:$0xff]  }
 0x28c   : > { %6993 = vmatprep.subr.bf16.mxu0 %v10231_v51  ;;  %7681 = vmatprep.subr.bf16.mxu1 %v10234_v52  ;;  %v10316_v51 = vld [vmem:[%s14108_s1 + $0x1608] ss:$16 sps:$4 sm:$0xff]   ;;  %v8084_v52 = vcombine.high %v13067_v48, %v13070_v49 }
 0x28f   : > { %6994 = vmatpush1.bf16.msra.mxu0 %v10229_v53  ;;  %7682 = vmatpush1.bf16.msra.mxu1 %v10232_v54  ;;  %v10319_v53 = vld [vmem:[%s14108_s1 + $0x1620] ss:$16 sps:$4 sm:$0xff]   ;;  %v10322_v54 = vld [vmem:[%s14108_s1 + $0x1628] ss:$16 sps:$4 sm:$0xff]  }
 0x290   : > { %6995 = vmatprep.subr.bf16.mxu0 %v10237_v55  ;;  %7683 = vmatprep.subr.bf16.mxu1 %v10240_v56  ;;  %v10327_v55 = vld [vmem:[%s14108_s1 + $0x1644] ss:$16 sps:$4 sm:$0xff]   ;;  %v10330_v56 = vld [vmem:[%s14108_s1 + $0x164c] ss:$16 sps:$4 sm:$0xff]  }
 0x293   : > { %6996 = vmatpush1.bf16.msra.mxu0 %v10235_v57  ;;  %7684 = vmatpush1.bf16.msra.mxu1 %v10238_v58  ;;  %v10325_v57 = vld [vmem:[%s14108_s1 + $0x1640] ss:$16 sps:$4 sm:$0xff]   ;;  %v10328_v58 = vld [vmem:[%s14108_s1 + $0x1648] ss:$16 sps:$4 sm:$0xff]  }
 0x294   : > { %6997 = vmatprep.subr.bf16.mxu0 %v10243_v59  ;;  %7685 = vmatprep.subr.bf16.mxu1 %v10246_v60  ;;  %v10333_v59 = vld [vmem:[%s14108_s1 + $0x1664] ss:$16 sps:$4 sm:$0xff]   ;;  %v10336_v60 = vld [vmem:[%s14108_s1 + $0x166c] ss:$16 sps:$4 sm:$0xff]  }
 0x297   : > { %6998 = vmatpush1.bf16.msra.mxu0 %v10241_v61  ;;  %7686 = vmatpush1.bf16.msra.mxu1 %v10244_v62  ;;  %v10331_v61 = vld [vmem:[%s14108_s1 + $0x1660] ss:$16 sps:$4 sm:$0xff]   ;;  %v10334_v62 = vld [vmem:[%s14108_s1 + $0x1668] ss:$16 sps:$4 sm:$0xff]  }
 0x298   : > { %6999 = vmatprep.subr.bf16.mxu0 %v10249_v63  ;;  %7687 = vmatprep.subr.bf16.mxu1 %v10252_v0  ;;  %v10339_v63 = vld [vmem:[%s14108_s1 + $0x1684] ss:$16 sps:$4 sm:$0xff]   ;;  %v10342_v0 = vld [vmem:[%s14108_s1 + $0x168c] ss:$16 sps:$4 sm:$0xff]  }
 0x29b   : > { %7000 = vmatpush1.bf16.msra.mxu0 %v10247_v1  ;;  %7688 = vmatpush1.bf16.msra.mxu1 %v10250_v2  ;;  %v10337_v1 = vld [vmem:[%s14108_s1 + $0x1680] ss:$16 sps:$4 sm:$0xff]   ;;  %v10340_v2 = vld [vmem:[%s14108_s1 + $0x1688] ss:$16 sps:$4 sm:$0xff]  }
 0x29c   : > { %7001 = vmatprep.subr.bf16.mxu0 %v10255_v3  ;;  %7689 = vmatprep.subr.bf16.mxu1 %v10258_v4  ;;  %v10345_v3 = vld [vmem:[%s14108_s1 + $0x16a4] ss:$16 sps:$4 sm:$0xff]   ;;  %v10348_v4 = vld [vmem:[%s14108_s1 + $0x16ac] ss:$16 sps:$4 sm:$0xff]  }
 0x29f   : > { %7002 = vmatpush1.bf16.msra.mxu0 %v10253_v5  ;;  %7690 = vmatpush1.bf16.msra.mxu1 %v10256_v6  ;;  %v10343_v5 = vld [vmem:[%s14108_s1 + $0x16a0] ss:$16 sps:$4 sm:$0xff]   ;;  %v10346_v6 = vld [vmem:[%s14108_s1 + $0x16a8] ss:$16 sps:$4 sm:$0xff]  }
 0x2a0   : > { %7003 = vmatprep.subr.bf16.mxu0 %v10261_v7  ;;  %7691 = vmatprep.subr.bf16.mxu1 %v10264_v8  ;;  %v10351_v7 = vld [vmem:[%s14108_s1 + $0x16c4] ss:$16 sps:$4 sm:$0xff]   ;;  %v10354_v8 = vld [vmem:[%s14108_s1 + $0x16cc] ss:$16 sps:$4 sm:$0xff]  }
 0x2a3   : > { %7004 = vmatpush1.bf16.msra.mxu0 %v10259_v9  ;;  %7692 = vmatpush1.bf16.msra.mxu1 %v10262_v10  ;;  %v10349_v9 = vld [vmem:[%s14108_s1 + $0x16c0] ss:$16 sps:$4 sm:$0xff]   ;;  %v10352_v10 = vld [vmem:[%s14108_s1 + $0x16c8] ss:$16 sps:$4 sm:$0xff]  }
 0x2a4   : > { %7005 = vmatprep.subr.bf16.mxu0 %v10267_v11  ;;  %7693 = vmatprep.subr.bf16.mxu1 %v10270_v12  ;;  %v10357_v11 = vld [vmem:[%s14108_s1 + $0x16e4] ss:$16 sps:$4 sm:$0xff]   ;;  %v10360_v12 = vld [vmem:[%s14108_s1 + $0x16ec] ss:$16 sps:$4 sm:$0xff]  }
 0x2a7   : > { %7006 = vmatpush1.bf16.msra.mxu0 %v10265_v13  ;;  %7694 = vmatpush1.bf16.msra.mxu1 %v10268_v16  ;;  %v10355_v13 = vld [vmem:[%s14108_s1 + $0x16e0] ss:$16 sps:$4 sm:$0xff]   ;;  %v10358_v16 = vld [vmem:[%s14108_s1 + $0x16e8] ss:$16 sps:$4 sm:$0xff]  }
 0x2a8   : > { %7007 = vmatprep.subr.bf16.mxu0 %v10273_v17  ;;  %7695 = vmatprep.subr.bf16.mxu1 %v10276_v20  ;;  %v10363_v17 = vld [vmem:[%s14108_s1 + $0x1704] ss:$16 sps:$4 sm:$0xff]   ;;  %v10366_v20 = vld [vmem:[%s14108_s1 + $0x170c] ss:$16 sps:$4 sm:$0xff]  }
 0x2ab   : > { %7008 = vmatpush1.bf16.msra.mxu0 %v10271_v22  ;;  %7696 = vmatpush1.bf16.msra.mxu1 %v10274_v15  ;;  %v10361_v22 = vld [vmem:[%s14108_s1 + $0x1700] ss:$16 sps:$4 sm:$0xff]   ;;  %v10364_v15 = vld [vmem:[%s14108_s1 + $0x1708] ss:$16 sps:$4 sm:$0xff]  }
 0x2ac   : > { %7009 = vmatprep.subr.bf16.mxu0 %v10279_v23  ;;  %7697 = vmatprep.subr.bf16.mxu1 %v10282_v24  ;;  %v10369_v23 = vld [vmem:[%s14108_s1 + $0x1724] ss:$16 sps:$4 sm:$0xff]   ;;  %v10372_v24 = vld [vmem:[%s14108_s1 + $0x172c] ss:$16 sps:$4 sm:$0xff]  }
 0x2af   : > { %7010 = vmatpush1.bf16.msra.mxu0 %v10277_v25  ;;  %7698 = vmatpush1.bf16.msra.mxu1 %v10280_v26  ;;  %v10367_v25 = vld [vmem:[%s14108_s1 + $0x1720] ss:$16 sps:$4 sm:$0xff]   ;;  %v10370_v26 = vld [vmem:[%s14108_s1 + $0x1728] ss:$16 sps:$4 sm:$0xff]  }
 0x2b0   : > { %7011 = vmatprep.subr.bf16.mxu0 %v10285_v27  ;;  %7699 = vmatprep.subr.bf16.mxu1 %v10288_v28  ;;  %v10375_v27 = vld [vmem:[%s14108_s1 + $0x1744] ss:$16 sps:$4 sm:$0xff]   ;;  %v10378_v28 = vld [vmem:[%s14108_s1 + $0x174c] ss:$16 sps:$4 sm:$0xff]  }
 0x2b3   : > { %7012 = vmatpush1.bf16.msra.mxu0 %v10283_v29  ;;  %7700 = vmatpush1.bf16.msra.mxu1 %v10286_v30  ;;  %v10373_v29 = vld [vmem:[%s14108_s1 + $0x1740] ss:$16 sps:$4 sm:$0xff]   ;;  %v10376_v30 = vld [vmem:[%s14108_s1 + $0x1748] ss:$16 sps:$4 sm:$0xff]  }
 0x2b4   : > { %7013 = vmatprep.subr.bf16.mxu0 %v10291_v31  ;;  %7701 = vmatprep.subr.bf16.mxu1 %v10294_v32  ;;  %v10381_v31 = vld [vmem:[%s14108_s1 + $0x1764] ss:$16 sps:$4 sm:$0xff]   ;;  %v10384_v32 = vld [vmem:[%s14108_s1 + $0x176c] ss:$16 sps:$4 sm:$0xff]  }
 0x2b7   : > { %7014 = vmatpush1.bf16.msra.mxu0 %v10289_v33  ;;  %7702 = vmatpush1.bf16.msra.mxu1 %v10292_v34  ;;  %v10379_v33 = vld [vmem:[%s14108_s1 + $0x1760] ss:$16 sps:$4 sm:$0xff]   ;;  %v10382_v34 = vld [vmem:[%s14108_s1 + $0x1768] ss:$16 sps:$4 sm:$0xff]  }
 0x2b8   : > { %7015 = vmatprep.subr.bf16.mxu0 %v10297_v35  ;;  %7703 = vmatprep.subr.bf16.mxu1 %v10300_v36  ;;  %v10387_v35 = vld [vmem:[%s14108_s1 + $0x1784] ss:$16 sps:$4 sm:$0xff]   ;;  %v10390_v36 = vld [vmem:[%s14108_s1 + $0x178c] ss:$16 sps:$4 sm:$0xff]  }
 0x2bb   : > { %7016 = vmatpush1.bf16.msra.mxu0 %v10295_v37  ;;  %7704 = vmatpush1.bf16.msra.mxu1 %v10298_v38  ;;  %v10385_v37 = vld [vmem:[%s14108_s1 + $0x1780] ss:$16 sps:$4 sm:$0xff]   ;;  %v10388_v38 = vld [vmem:[%s14108_s1 + $0x1788] ss:$16 sps:$4 sm:$0xff]  }
 0x2bc   : > { %7017 = vmatprep.subr.bf16.mxu0 %v10303_v39  ;;  %7705 = vmatprep.subr.bf16.mxu1 %v10306_v40  ;;  %v10393_v39 = vld [vmem:[%s14108_s1 + $0x17a4] ss:$16 sps:$4 sm:$0xff]   ;;  %v10396_v40 = vld [vmem:[%s14108_s1 + $0x17ac] ss:$16 sps:$4 sm:$0xff]  }
 0x2bf   : > { %7018 = vmatpush1.bf16.msra.mxu0 %v10301_v41  ;;  %7706 = vmatpush1.bf16.msra.mxu1 %v10304_v42  ;;  %v10391_v41 = vld [vmem:[%s14108_s1 + $0x17a0] ss:$16 sps:$4 sm:$0xff]   ;;  %v10394_v42 = vld [vmem:[%s14108_s1 + $0x17a8] ss:$16 sps:$4 sm:$0xff]  }
 0x2c0   : > { %7019 = vmatprep.subr.bf16.mxu0 %v10309_v43  ;;  %7707 = vmatprep.subr.bf16.mxu1 %v10312_v44  ;;  %v10399_v43 = vld [vmem:[%s14108_s1 + $0x17c4] ss:$16 sps:$4 sm:$0xff]   ;;  %v10402_v44 = vld [vmem:[%s14108_s1 + $0x17cc] ss:$16 sps:$4 sm:$0xff]  }
 0x2c3   : > { %7020 = vmatpush1.bf16.msra.mxu0 %v10307_v21  ;;  %7708 = vmatpush1.bf16.msra.mxu1 %v10310_v46  ;;  %v10397_v21 = vld [vmem:[%s14108_s1 + $0x17c0] ss:$16 sps:$4 sm:$0xff]   ;;  %v10400_v46 = vld [vmem:[%s14108_s1 + $0x17c8] ss:$16 sps:$4 sm:$0xff]  }
 0x2c4   : > { %7032 = vmatprep.subr.bf16.mxu0 %v10315_v47  ;;  %7720 = vmatprep.subr.bf16.mxu1 %v10318_v18  ;;  %v10405_v47 = vld [vmem:[%s14108_s1 + $0x17e4] ss:$16 sps:$4 sm:$0xff]   ;;  %v10408_v18 = vld [vmem:[%s14108_s1 + $0x17ec] ss:$16 sps:$4 sm:$0xff]  }
 0x2c6   : > { %7022 = vmatmul.mubr.bf16.vlgmr.msra.gmra.mrb[0].mxu0 %v8081_v19  ;;  %7710 = vmatmul.mubr.bf16.vlgmr.msra.gmra.mrb[0].mxu1 %v8081_v19  ;;  %v10403_v19 = vld [vmem:[%s14108_s1 + $0x17e0] ss:$16 sps:$4 sm:$0xff]  }
 0x2c7   : > { %7033 = vmatpush1.bf16.msra.mxu0 %v10313_v50  ;;  %7721 = vmatpush1.bf16.msra.mxu1 %v10316_v51  ;;  %v10406_v50 = vld [vmem:[%s14108_s1 + $0x17e8] ss:$16 sps:$4 sm:$0xff]   ;;  %v10411_v51 = vld [vmem:[%s14108_s1 + $0x1804] ss:$16 sps:$4 sm:$0xff]  }
 0x2c8   : > { %7034 = vmatprep.subr.bf16.mxu0 %v10321_v14  ;;  %7722 = vmatprep.subr.bf16.mxu1 %v10324_v45  ;;  %v10414_v14 = vld [vmem:[%s14108_s1 + $0x180c] ss:$16 sps:$4 sm:$0xff]   ;;  %v8083_v45 = vcombine.low %v13067_v48, %v13070_v49  ;;  %v10417_v48 = vld [vmem:[%s14108_s1 + $0x1824] ss:$16 sps:$4 sm:$0xff]  }
 0x2c9   : > { %7064 = vmatprep.mubr.bf16.mxu0 %v8084_v52  ;;  %7752 = vmatprep.mubr.bf16.mxu1 %v8084_v52  ;;  %v13269_v52 = vld [vmem:[%s10976_s12 + $0x60] sm:$0xff]  ;;  %v10420_v49 = vld [vmem:[%s14108_s1 + $0x182c] ss:$16 sps:$4 sm:$0xff]  }
 0x2cb   : > { %7035 = vmatpush1.bf16.msra.mxu0 %v10319_v53  ;;  %7723 = vmatpush1.bf16.msra.mxu1 %v10322_v54  ;;  %v13272_v53 = vld [vmem:[%s10976_s12 + $0xe0] sm:$0xff] }
 0x2cc   : > { %7036 = vmatprep.subr.bf16.mxu0 %v10327_v55  ;;  %7724 = vmatprep.subr.bf16.mxu1 %v10330_v56  ;;  %v10409_v54 = vld [vmem:[%s14108_s1 + $0x1800] ss:$16 sps:$4 sm:$0xff]   ;;  %v10412_v55 = vld [vmem:[%s14108_s1 + $0x1808] ss:$16 sps:$4 sm:$0xff]   ;;  %v8086_v56 = vcombine.high %v13269_v52, %v13272_v53 }
 0x2cf   : > { %7037 = vmatpush1.bf16.msra.mxu0 %v10325_v57  ;;  %7725 = vmatpush1.bf16.msra.mxu1 %v10328_v58  ;;  %v10415_v57 = vld [vmem:[%s14108_s1 + $0x1820] ss:$16 sps:$4 sm:$0xff]   ;;  %v10418_v58 = vld [vmem:[%s14108_s1 + $0x1828] ss:$16 sps:$4 sm:$0xff]  }
 0x2d0   : > { %7038 = vmatprep.subr.bf16.mxu0 %v10333_v59  ;;  %7726 = vmatprep.subr.bf16.mxu1 %v10336_v60  ;;  %v10423_v59 = vld [vmem:[%s14108_s1 + $0x1844] ss:$16 sps:$4 sm:$0xff]   ;;  %v10426_v60 = vld [vmem:[%s14108_s1 + $0x184c] ss:$16 sps:$4 sm:$0xff]  }
 0x2d3   : > { %7039 = vmatpush1.bf16.msra.mxu0 %v10331_v61  ;;  %7727 = vmatpush1.bf16.msra.mxu1 %v10334_v62  ;;  %v10421_v61 = vld [vmem:[%s14108_s1 + $0x1840] ss:$16 sps:$4 sm:$0xff]   ;;  %v10424_v62 = vld [vmem:[%s14108_s1 + $0x1848] ss:$16 sps:$4 sm:$0xff]  }
 0x2d4   : > { %7040 = vmatprep.subr.bf16.mxu0 %v10339_v63  ;;  %7728 = vmatprep.subr.bf16.mxu1 %v10342_v0  ;;  %v10429_v63 = vld [vmem:[%s14108_s1 + $0x1864] ss:$16 sps:$4 sm:$0xff]   ;;  %v10432_v0 = vld [vmem:[%s14108_s1 + $0x186c] ss:$16 sps:$4 sm:$0xff]  }
 0x2d7   : > { %7041 = vmatpush1.bf16.msra.mxu0 %v10337_v1  ;;  %7729 = vmatpush1.bf16.msra.mxu1 %v10340_v2  ;;  %v10427_v1 = vld [vmem:[%s14108_s1 + $0x1860] ss:$16 sps:$4 sm:$0xff]   ;;  %v10430_v2 = vld [vmem:[%s14108_s1 + $0x1868] ss:$16 sps:$4 sm:$0xff]  }
 0x2d8   : > { %7042 = vmatprep.subr.bf16.mxu0 %v10345_v3  ;;  %7730 = vmatprep.subr.bf16.mxu1 %v10348_v4  ;;  %v10435_v3 = vld [vmem:[%s14108_s1 + $0x1884] ss:$16 sps:$4 sm:$0xff]   ;;  %v10438_v4 = vld [vmem:[%s14108_s1 + $0x188c] ss:$16 sps:$4 sm:$0xff]  }
 0x2db   : > { %7043 = vmatpush1.bf16.msra.mxu0 %v10343_v5  ;;  %7731 = vmatpush1.bf16.msra.mxu1 %v10346_v6  ;;  %v10433_v5 = vld [vmem:[%s14108_s1 + $0x1880] ss:$16 sps:$4 sm:$0xff]   ;;  %v10436_v6 = vld [vmem:[%s14108_s1 + $0x1888] ss:$16 sps:$4 sm:$0xff]  }
 0x2dc   : > { %7044 = vmatprep.subr.bf16.mxu0 %v10351_v7  ;;  %7732 = vmatprep.subr.bf16.mxu1 %v10354_v8  ;;  %v10441_v7 = vld [vmem:[%s14108_s1 + $0x18a4] ss:$16 sps:$4 sm:$0xff]   ;;  %v10444_v8 = vld [vmem:[%s14108_s1 + $0x18ac] ss:$16 sps:$4 sm:$0xff]  }
 0x2df   : > { %7045 = vmatpush1.bf16.msra.mxu0 %v10349_v9  ;;  %7733 = vmatpush1.bf16.msra.mxu1 %v10352_v10  ;;  %v10439_v9 = vld [vmem:[%s14108_s1 + $0x18a0] ss:$16 sps:$4 sm:$0xff]   ;;  %v10442_v10 = vld [vmem:[%s14108_s1 + $0x18a8] ss:$16 sps:$4 sm:$0xff]  }
 0x2e0   : > { %7046 = vmatprep.subr.bf16.mxu0 %v10357_v11  ;;  %7734 = vmatprep.subr.bf16.mxu1 %v10360_v12  ;;  %v10447_v11 = vld [vmem:[%s14108_s1 + $0x18c4] ss:$16 sps:$4 sm:$0xff]   ;;  %v10450_v12 = vld [vmem:[%s14108_s1 + $0x18cc] ss:$16 sps:$4 sm:$0xff]  }
 0x2e3   : > { %7047 = vmatpush1.bf16.msra.mxu0 %v10355_v13  ;;  %7735 = vmatpush1.bf16.msra.mxu1 %v10358_v16  ;;  %v10445_v13 = vld [vmem:[%s14108_s1 + $0x18c0] ss:$16 sps:$4 sm:$0xff]   ;;  %v10448_v16 = vld [vmem:[%s14108_s1 + $0x18c8] ss:$16 sps:$4 sm:$0xff]  }
 0x2e4   : > { %7048 = vmatprep.subr.bf16.mxu0 %v10363_v17  ;;  %7736 = vmatprep.subr.bf16.mxu1 %v10366_v20  ;;  %v10453_v17 = vld [vmem:[%s14108_s1 + $0x18e4] ss:$16 sps:$4 sm:$0xff]   ;;  %v10456_v20 = vld [vmem:[%s14108_s1 + $0x18ec] ss:$16 sps:$4 sm:$0xff]  }
 0x2e7   : > { %7049 = vmatpush1.bf16.msra.mxu0 %v10361_v22  ;;  %7737 = vmatpush1.bf16.msra.mxu1 %v10364_v15  ;;  %v10451_v22 = vld [vmem:[%s14108_s1 + $0x18e0] ss:$16 sps:$4 sm:$0xff]   ;;  %v10454_v15 = vld [vmem:[%s14108_s1 + $0x18e8] ss:$16 sps:$4 sm:$0xff]  }
 0x2e8   : > { %7050 = vmatprep.subr.bf16.mxu0 %v10369_v23  ;;  %7738 = vmatprep.subr.bf16.mxu1 %v10372_v24  ;;  %v10459_v23 = vld [vmem:[%s14108_s1 + $0x1904] ss:$16 sps:$4 sm:$0xff]   ;;  %v10462_v24 = vld [vmem:[%s14108_s1 + $0x190c] ss:$16 sps:$4 sm:$0xff]  }
 0x2eb   : > { %7051 = vmatpush1.bf16.msra.mxu0 %v10367_v25  ;;  %7739 = vmatpush1.bf16.msra.mxu1 %v10370_v26  ;;  %v10457_v25 = vld [vmem:[%s14108_s1 + $0x1900] ss:$16 sps:$4 sm:$0xff]   ;;  %v10460_v26 = vld [vmem:[%s14108_s1 + $0x1908] ss:$16 sps:$4 sm:$0xff]  }
 0x2ec   : > { %7052 = vmatprep.subr.bf16.mxu0 %v10375_v27  ;;  %7740 = vmatprep.subr.bf16.mxu1 %v10378_v28  ;;  %v10465_v27 = vld [vmem:[%s14108_s1 + $0x1924] ss:$16 sps:$4 sm:$0xff]   ;;  %v10468_v28 = vld [vmem:[%s14108_s1 + $0x192c] ss:$16 sps:$4 sm:$0xff]  }
 0x2ef   : > { %7053 = vmatpush1.bf16.msra.mxu0 %v10373_v29  ;;  %7741 = vmatpush1.bf16.msra.mxu1 %v10376_v30  ;;  %v10463_v29 = vld [vmem:[%s14108_s1 + $0x1920] ss:$16 sps:$4 sm:$0xff]   ;;  %v10466_v30 = vld [vmem:[%s14108_s1 + $0x1928] ss:$16 sps:$4 sm:$0xff]  }
 0x2f0   : > { %7054 = vmatprep.subr.bf16.mxu0 %v10381_v31  ;;  %7742 = vmatprep.subr.bf16.mxu1 %v10384_v32  ;;  %v10471_v31 = vld [vmem:[%s14108_s1 + $0x1944] ss:$16 sps:$4 sm:$0xff]   ;;  %v10474_v32 = vld [vmem:[%s14108_s1 + $0x194c] ss:$16 sps:$4 sm:$0xff]  }
 0x2f3   : > { %7055 = vmatpush1.bf16.msra.mxu0 %v10379_v33  ;;  %7743 = vmatpush1.bf16.msra.mxu1 %v10382_v34  ;;  %v10469_v33 = vld [vmem:[%s14108_s1 + $0x1940] ss:$16 sps:$4 sm:$0xff]   ;;  %v10472_v34 = vld [vmem:[%s14108_s1 + $0x1948] ss:$16 sps:$4 sm:$0xff]  }
 0x2f4   : > { %7056 = vmatprep.subr.bf16.mxu0 %v10387_v35  ;;  %7744 = vmatprep.subr.bf16.mxu1 %v10390_v36  ;;  %v10477_v35 = vld [vmem:[%s14108_s1 + $0x1964] ss:$16 sps:$4 sm:$0xff]   ;;  %v10480_v36 = vld [vmem:[%s14108_s1 + $0x196c] ss:$16 sps:$4 sm:$0xff]  }
 0x2f7   : > { %7057 = vmatpush1.bf16.msra.mxu0 %v10385_v37  ;;  %7745 = vmatpush1.bf16.msra.mxu1 %v10388_v38  ;;  %v10475_v37 = vld [vmem:[%s14108_s1 + $0x1960] ss:$16 sps:$4 sm:$0xff]   ;;  %v10478_v38 = vld [vmem:[%s14108_s1 + $0x1968] ss:$16 sps:$4 sm:$0xff]  }
 0x2f8   : > { %7058 = vmatprep.subr.bf16.mxu0 %v10393_v39  ;;  %7746 = vmatprep.subr.bf16.mxu1 %v10396_v40  ;;  %v10483_v39 = vld [vmem:[%s14108_s1 + $0x1984] ss:$16 sps:$4 sm:$0xff]   ;;  %v10486_v40 = vld [vmem:[%s14108_s1 + $0x198c] ss:$16 sps:$4 sm:$0xff]  }
 0x2fb   : > { %7059 = vmatpush1.bf16.msra.mxu0 %v10391_v41  ;;  %7747 = vmatpush1.bf16.msra.mxu1 %v10394_v42  ;;  %v10481_v41 = vld [vmem:[%s14108_s1 + $0x1980] ss:$16 sps:$4 sm:$0xff]   ;;  %v10484_v42 = vld [vmem:[%s14108_s1 + $0x1988] ss:$16 sps:$4 sm:$0xff]  }
 0x2fc   : > { %7060 = vmatprep.subr.bf16.mxu0 %v10399_v43  ;;  %7748 = vmatprep.subr.bf16.mxu1 %v10402_v44  ;;  %v10489_v43 = vld [vmem:[%s14108_s1 + $0x19a4] ss:$16 sps:$4 sm:$0xff]   ;;  %v10492_v44 = vld [vmem:[%s14108_s1 + $0x19ac] ss:$16 sps:$4 sm:$0xff]  }
 0x2ff   : > { %7061 = vmatpush1.bf16.msra.mxu0 %v10397_v21  ;;  %7749 = vmatpush1.bf16.msra.mxu1 %v10400_v46  ;;  %v10487_v21 = vld [vmem:[%s14108_s1 + $0x19a0] ss:$16 sps:$4 sm:$0xff]   ;;  %v10490_v46 = vld [vmem:[%s14108_s1 + $0x19a8] ss:$16 sps:$4 sm:$0xff]  }
 0x300   : > { %7062 = vmatprep.subr.bf16.mxu0 %v10405_v47  ;;  %7750 = vmatprep.subr.bf16.mxu1 %v10408_v18  ;;  %v10495_v47 = vld [vmem:[%s14108_s1 + $0x19c4] ss:$16 sps:$4 sm:$0xff]   ;;  %v10498_v18 = vld [vmem:[%s14108_s1 + $0x19cc] ss:$16 sps:$4 sm:$0xff]  }
 0x303   : > { %7063 = vmatpush1.bf16.msra.mxu0 %v10403_v19  ;;  %7751 = vmatpush1.bf16.msra.mxu1 %v10406_v50  ;;  %v10493_v19 = vld [vmem:[%s14108_s1 + $0x19c0] ss:$16 sps:$4 sm:$0xff]   ;;  %v10496_v50 = vld [vmem:[%s14108_s1 + $0x19c8] ss:$16 sps:$4 sm:$0xff]  }
 0x304   : > { %7075 = vmatprep.subr.bf16.mxu0 %v10411_v51  ;;  %7763 = vmatprep.subr.bf16.mxu1 %v10414_v14  ;;  %v10501_v51 = vld [vmem:[%s14108_s1 + $0x19e4] ss:$16 sps:$4 sm:$0xff]   ;;  %v10504_v14 = vld [vmem:[%s14108_s1 + $0x19ec] ss:$16 sps:$4 sm:$0xff]  }
 0x306   : > { %7065 = vmatmul.mubr.bf16.vlgmr.msra.gmra.mrb[0].mxu0 %v8083_v45  ;;  %7753 = vmatmul.mubr.bf16.vlgmr.msra.gmra.mrb[0].mxu1 %v8083_v45  ;;  %v10499_v45 = vld [vmem:[%s14108_s1 + $0x19e0] ss:$16 sps:$4 sm:$0xff]  }
 0x307   : > { %7076 = vmatpush1.bf16.msra.mxu0 %v10409_v54  ;;  %7764 = vmatpush1.bf16.msra.mxu1 %v10412_v55  ;;  %v10502_v54 = vld [vmem:[%s14108_s1 + $0x19e8] ss:$16 sps:$4 sm:$0xff]   ;;  %v10507_v55 = vld [vmem:[%s14108_s1 + $0x1a04] ss:$16 sps:$4 sm:$0xff]  }
 0x308   : > { %7077 = vmatprep.subr.bf16.mxu0 %v10417_v48  ;;  %7765 = vmatprep.subr.bf16.mxu1 %v10420_v49  ;;  %v10510_v48 = vld [vmem:[%s14108_s1 + $0x1a0c] ss:$16 sps:$4 sm:$0xff]   ;;  %v8085_v49 = vcombine.low %v13269_v52, %v13272_v53  ;;  %v10513_v52 = vld [vmem:[%s14108_s1 + $0x1a24] ss:$16 sps:$4 sm:$0xff]  }
 0x309   : > { %7107 = vmatprep.mubr.bf16.mxu0 %v8086_v56  ;;  %7795 = vmatprep.mubr.bf16.mxu1 %v8086_v56  ;;  %v13471_v56 = vld [vmem:[%s10976_s12 + $0x68] sm:$0xff] }
 0x30a   : > { %v10516_v53 = vld [vmem:[%s14108_s1 + $0x1a2c] ss:$16 sps:$4 sm:$0xff]  }
 0x30b   : > { %7078 = vmatpush1.bf16.msra.mxu0 %v10415_v57  ;;  %7766 = vmatpush1.bf16.msra.mxu1 %v10418_v58  ;;  %v13474_v57 = vld [vmem:[%s10976_s12 + $0xe8] sm:$0xff]  ;;  %v10505_v58 = vld [vmem:[%s14108_s1 + $0x1a00] ss:$16 sps:$4 sm:$0xff]  }
 0x30c   : > { %7079 = vmatprep.subr.bf16.mxu0 %v10423_v59  ;;  %7767 = vmatprep.subr.bf16.mxu1 %v10426_v60  ;;  %v10508_v59 = vld [vmem:[%s14108_s1 + $0x1a08] ss:$16 sps:$4 sm:$0xff]   ;;  %v8088_v60 = vcombine.high %v13471_v56, %v13474_v57 }
 0x30f   : > { %7080 = vmatpush1.bf16.msra.mxu0 %v10421_v61  ;;  %7768 = vmatpush1.bf16.msra.mxu1 %v10424_v62  ;;  %v10511_v61 = vld [vmem:[%s14108_s1 + $0x1a20] ss:$16 sps:$4 sm:$0xff]   ;;  %v10514_v62 = vld [vmem:[%s14108_s1 + $0x1a28] ss:$16 sps:$4 sm:$0xff]  }
 0x310   : > { %7081 = vmatprep.subr.bf16.mxu0 %v10429_v63  ;;  %7769 = vmatprep.subr.bf16.mxu1 %v10432_v0  ;;  %v10519_v63 = vld [vmem:[%s14108_s1 + $0x1a44] ss:$16 sps:$4 sm:$0xff]   ;;  %v10522_v0 = vld [vmem:[%s14108_s1 + $0x1a4c] ss:$16 sps:$4 sm:$0xff]  }
 0x313   : > { %7082 = vmatpush1.bf16.msra.mxu0 %v10427_v1  ;;  %7770 = vmatpush1.bf16.msra.mxu1 %v10430_v2  ;;  %v10517_v1 = vld [vmem:[%s14108_s1 + $0x1a40] ss:$16 sps:$4 sm:$0xff]   ;;  %v10520_v2 = vld [vmem:[%s14108_s1 + $0x1a48] ss:$16 sps:$4 sm:$0xff]  }
 0x314   : > { %7083 = vmatprep.subr.bf16.mxu0 %v10435_v3  ;;  %7771 = vmatprep.subr.bf16.mxu1 %v10438_v4  ;;  %v10525_v3 = vld [vmem:[%s14108_s1 + $0x1a64] ss:$16 sps:$4 sm:$0xff]   ;;  %v10528_v4 = vld [vmem:[%s14108_s1 + $0x1a6c] ss:$16 sps:$4 sm:$0xff]  }
 0x317   : > { %7084 = vmatpush1.bf16.msra.mxu0 %v10433_v5  ;;  %7772 = vmatpush1.bf16.msra.mxu1 %v10436_v6  ;;  %v10523_v5 = vld [vmem:[%s14108_s1 + $0x1a60] ss:$16 sps:$4 sm:$0xff]   ;;  %v10526_v6 = vld [vmem:[%s14108_s1 + $0x1a68] ss:$16 sps:$4 sm:$0xff]  }
 0x318   : > { %7085 = vmatprep.subr.bf16.mxu0 %v10441_v7  ;;  %7773 = vmatprep.subr.bf16.mxu1 %v10444_v8  ;;  %v10531_v7 = vld [vmem:[%s14108_s1 + $0x1a84] ss:$16 sps:$4 sm:$0xff]   ;;  %v10534_v8 = vld [vmem:[%s14108_s1 + $0x1a8c] ss:$16 sps:$4 sm:$0xff]  }
 0x31b   : > { %7086 = vmatpush1.bf16.msra.mxu0 %v10439_v9  ;;  %7774 = vmatpush1.bf16.msra.mxu1 %v10442_v10  ;;  %v10529_v9 = vld [vmem:[%s14108_s1 + $0x1a80] ss:$16 sps:$4 sm:$0xff]   ;;  %v10532_v10 = vld [vmem:[%s14108_s1 + $0x1a88] ss:$16 sps:$4 sm:$0xff]  }
 0x31c   : > { %7087 = vmatprep.subr.bf16.mxu0 %v10447_v11  ;;  %7775 = vmatprep.subr.bf16.mxu1 %v10450_v12  ;;  %v10537_v11 = vld [vmem:[%s14108_s1 + $0x1aa4] ss:$16 sps:$4 sm:$0xff]   ;;  %v10540_v12 = vld [vmem:[%s14108_s1 + $0x1aac] ss:$16 sps:$4 sm:$0xff]  }
 0x31f   : > { %7088 = vmatpush1.bf16.msra.mxu0 %v10445_v13  ;;  %7776 = vmatpush1.bf16.msra.mxu1 %v10448_v16  ;;  %v10535_v13 = vld [vmem:[%s14108_s1 + $0x1aa0] ss:$16 sps:$4 sm:$0xff]   ;;  %v10538_v16 = vld [vmem:[%s14108_s1 + $0x1aa8] ss:$16 sps:$4 sm:$0xff]  }
 0x320   : > { %7089 = vmatprep.subr.bf16.mxu0 %v10453_v17  ;;  %7777 = vmatprep.subr.bf16.mxu1 %v10456_v20  ;;  %v10543_v17 = vld [vmem:[%s14108_s1 + $0x1ac4] ss:$16 sps:$4 sm:$0xff]   ;;  %v10546_v20 = vld [vmem:[%s14108_s1 + $0x1acc] ss:$16 sps:$4 sm:$0xff]  }
 0x323   : > { %7090 = vmatpush1.bf16.msra.mxu0 %v10451_v22  ;;  %7778 = vmatpush1.bf16.msra.mxu1 %v10454_v15  ;;  %v10541_v22 = vld [vmem:[%s14108_s1 + $0x1ac0] ss:$16 sps:$4 sm:$0xff]   ;;  %v10544_v15 = vld [vmem:[%s14108_s1 + $0x1ac8] ss:$16 sps:$4 sm:$0xff]  }
 0x324   : > { %7091 = vmatprep.subr.bf16.mxu0 %v10459_v23  ;;  %7779 = vmatprep.subr.bf16.mxu1 %v10462_v24  ;;  %v10549_v23 = vld [vmem:[%s14108_s1 + $0x1ae4] ss:$16 sps:$4 sm:$0xff]   ;;  %v10552_v24 = vld [vmem:[%s14108_s1 + $0x1aec] ss:$16 sps:$4 sm:$0xff]  }
 0x327   : > { %7092 = vmatpush1.bf16.msra.mxu0 %v10457_v25  ;;  %7780 = vmatpush1.bf16.msra.mxu1 %v10460_v26  ;;  %v10547_v25 = vld [vmem:[%s14108_s1 + $0x1ae0] ss:$16 sps:$4 sm:$0xff]   ;;  %v10550_v26 = vld [vmem:[%s14108_s1 + $0x1ae8] ss:$16 sps:$4 sm:$0xff]  }
 0x328   : > { %7093 = vmatprep.subr.bf16.mxu0 %v10465_v27  ;;  %7781 = vmatprep.subr.bf16.mxu1 %v10468_v28  ;;  %v10555_v27 = vld [vmem:[%s14108_s1 + $0x1b04] ss:$16 sps:$4 sm:$0xff]   ;;  %v10558_v28 = vld [vmem:[%s14108_s1 + $0x1b0c] ss:$16 sps:$4 sm:$0xff]  }
 0x32b   : > { %7094 = vmatpush1.bf16.msra.mxu0 %v10463_v29  ;;  %7782 = vmatpush1.bf16.msra.mxu1 %v10466_v30  ;;  %v10553_v29 = vld [vmem:[%s14108_s1 + $0x1b00] ss:$16 sps:$4 sm:$0xff]   ;;  %v10556_v30 = vld [vmem:[%s14108_s1 + $0x1b08] ss:$16 sps:$4 sm:$0xff]  }
 0x32c   : > { %7095 = vmatprep.subr.bf16.mxu0 %v10471_v31  ;;  %7783 = vmatprep.subr.bf16.mxu1 %v10474_v32  ;;  %v10561_v31 = vld [vmem:[%s14108_s1 + $0x1b24] ss:$16 sps:$4 sm:$0xff]   ;;  %v10564_v32 = vld [vmem:[%s14108_s1 + $0x1b2c] ss:$16 sps:$4 sm:$0xff]  }
 0x32f   : > { %7096 = vmatpush1.bf16.msra.mxu0 %v10469_v33  ;;  %7784 = vmatpush1.bf16.msra.mxu1 %v10472_v34  ;;  %v10559_v33 = vld [vmem:[%s14108_s1 + $0x1b20] ss:$16 sps:$4 sm:$0xff]   ;;  %v10562_v34 = vld [vmem:[%s14108_s1 + $0x1b28] ss:$16 sps:$4 sm:$0xff]  }
 0x330   : > { %7097 = vmatprep.subr.bf16.mxu0 %v10477_v35  ;;  %7785 = vmatprep.subr.bf16.mxu1 %v10480_v36  ;;  %v10567_v35 = vld [vmem:[%s14108_s1 + $0x1b44] ss:$16 sps:$4 sm:$0xff]   ;;  %v10570_v36 = vld [vmem:[%s14108_s1 + $0x1b4c] ss:$16 sps:$4 sm:$0xff]  }
 0x333   : > { %7098 = vmatpush1.bf16.msra.mxu0 %v10475_v37  ;;  %7786 = vmatpush1.bf16.msra.mxu1 %v10478_v38  ;;  %v10565_v37 = vld [vmem:[%s14108_s1 + $0x1b40] ss:$16 sps:$4 sm:$0xff]   ;;  %v10568_v38 = vld [vmem:[%s14108_s1 + $0x1b48] ss:$16 sps:$4 sm:$0xff]  }
 0x334   : > { %7099 = vmatprep.subr.bf16.mxu0 %v10483_v39  ;;  %7787 = vmatprep.subr.bf16.mxu1 %v10486_v40  ;;  %v10573_v39 = vld [vmem:[%s14108_s1 + $0x1b64] ss:$16 sps:$4 sm:$0xff]   ;;  %v10576_v40 = vld [vmem:[%s14108_s1 + $0x1b6c] ss:$16 sps:$4 sm:$0xff]  }
 0x337   : > { %7100 = vmatpush1.bf16.msra.mxu0 %v10481_v41  ;;  %7788 = vmatpush1.bf16.msra.mxu1 %v10484_v42  ;;  %v10571_v41 = vld [vmem:[%s14108_s1 + $0x1b60] ss:$16 sps:$4 sm:$0xff]   ;;  %v10574_v42 = vld [vmem:[%s14108_s1 + $0x1b68] ss:$16 sps:$4 sm:$0xff]  }
 0x338   : > { %7101 = vmatprep.subr.bf16.mxu0 %v10489_v43  ;;  %7789 = vmatprep.subr.bf16.mxu1 %v10492_v44  ;;  %v10579_v43 = vld [vmem:[%s14108_s1 + $0x1b84] ss:$16 sps:$4 sm:$0xff]   ;;  %v10582_v44 = vld [vmem:[%s14108_s1 + $0x1b8c] ss:$16 sps:$4 sm:$0xff]  }
 0x33b   : > { %7102 = vmatpush1.bf16.msra.mxu0 %v10487_v21  ;;  %7790 = vmatpush1.bf16.msra.mxu1 %v10490_v46  ;;  %v10577_v21 = vld [vmem:[%s14108_s1 + $0x1b80] ss:$16 sps:$4 sm:$0xff]   ;;  %v10580_v46 = vld [vmem:[%s14108_s1 + $0x1b88] ss:$16 sps:$4 sm:$0xff]  }
 0x33c   : > { %7103 = vmatprep.subr.bf16.mxu0 %v10495_v47  ;;  %7791 = vmatprep.subr.bf16.mxu1 %v10498_v18  ;;  %v10585_v47 = vld [vmem:[%s14108_s1 + $0x1ba4] ss:$16 sps:$4 sm:$0xff]   ;;  %v10588_v18 = vld [vmem:[%s14108_s1 + $0x1bac] ss:$16 sps:$4 sm:$0xff]  }
 0x33f   : > { %7104 = vmatpush1.bf16.msra.mxu0 %v10493_v19  ;;  %7792 = vmatpush1.bf16.msra.mxu1 %v10496_v50  ;;  %v10583_v19 = vld [vmem:[%s14108_s1 + $0x1ba0] ss:$16 sps:$4 sm:$0xff]   ;;  %v10586_v50 = vld [vmem:[%s14108_s1 + $0x1ba8] ss:$16 sps:$4 sm:$0xff]  }
 0x340   : > { %7105 = vmatprep.subr.bf16.mxu0 %v10501_v51  ;;  %7793 = vmatprep.subr.bf16.mxu1 %v10504_v14  ;;  %v10591_v51 = vld [vmem:[%s14108_s1 + $0x1bc4] ss:$16 sps:$4 sm:$0xff]   ;;  %v10594_v14 = vld [vmem:[%s14108_s1 + $0x1bcc] ss:$16 sps:$4 sm:$0xff]  }
 0x343   : > { %7106 = vmatpush1.bf16.msra.mxu0 %v10499_v45  ;;  %7794 = vmatpush1.bf16.msra.mxu1 %v10502_v54  ;;  %v10589_v45 = vld [vmem:[%s14108_s1 + $0x1bc0] ss:$16 sps:$4 sm:$0xff]   ;;  %v10592_v54 = vld [vmem:[%s14108_s1 + $0x1bc8] ss:$16 sps:$4 sm:$0xff]  }
 0x344   : > { %7118 = vmatprep.subr.bf16.mxu0 %v10507_v55  ;;  %7806 = vmatprep.subr.bf16.mxu1 %v10510_v48  ;;  %v10597_v55 = vld [vmem:[%s14108_s1 + $0x1be4] ss:$16 sps:$4 sm:$0xff]   ;;  %v10600_v48 = vld [vmem:[%s14108_s1 + $0x1bec] ss:$16 sps:$4 sm:$0xff]  }
 0x346   : > { %7108 = vmatmul.mubr.bf16.vlgmr.msra.gmra.mrb[0].mxu0 %v8085_v49  ;;  %7796 = vmatmul.mubr.bf16.vlgmr.msra.gmra.mrb[0].mxu1 %v8085_v49  ;;  %v10595_v49 = vld [vmem:[%s14108_s1 + $0x1be0] ss:$16 sps:$4 sm:$0xff]  }
 0x347   : > { %7119 = vmatpush1.bf16.msra.mxu0 %v10505_v58  ;;  %7807 = vmatpush1.bf16.msra.mxu1 %v10508_v59  ;;  %v10598_v58 = vld [vmem:[%s14108_s1 + $0x1be8] ss:$16 sps:$4 sm:$0xff]   ;;  %v10603_v59 = vld [vmem:[%s14108_s1 + $0x1c04] ss:$16 sps:$4 sm:$0xff]  }
 0x348   : > { %7120 = vmatprep.subr.bf16.mxu0 %v10513_v52  ;;  %7808 = vmatprep.subr.bf16.mxu1 %v10516_v53  ;;  %v10606_v52 = vld [vmem:[%s14108_s1 + $0x1c0c] ss:$16 sps:$4 sm:$0xff]   ;;  %v8087_v53 = vcombine.low %v13471_v56, %v13474_v57  ;;  %v10609_v56 = vld [vmem:[%s14108_s1 + $0x1c24] ss:$16 sps:$4 sm:$0xff]  }
 0x349   : > { %7150 = vmatprep.mubr.bf16.mxu0 %v8088_v60  ;;  %7838 = vmatprep.mubr.bf16.mxu1 %v8088_v60  ;;  %v13673_v60 = vld [vmem:[%s10976_s12 + $0x70] sm:$0xff]  ;;  %v10612_v57 = vld [vmem:[%s14108_s1 + $0x1c2c] ss:$16 sps:$4 sm:$0xff]  }
 0x34b   : > { %7121 = vmatpush1.bf16.msra.mxu0 %v10511_v61  ;;  %7809 = vmatpush1.bf16.msra.mxu1 %v10514_v62  ;;  %v13676_v61 = vld [vmem:[%s10976_s12 + $0xf0] sm:$0xff] }
 0x34c   : > { %7122 = vmatprep.subr.bf16.mxu0 %v10519_v63  ;;  %7810 = vmatprep.subr.bf16.mxu1 %v10522_v0  ;;  %v10601_v62 = vld [vmem:[%s14108_s1 + $0x1c00] ss:$16 sps:$4 sm:$0xff]   ;;  %v10604_v63 = vld [vmem:[%s14108_s1 + $0x1c08] ss:$16 sps:$4 sm:$0xff]   ;;  %v8090_v0 = vcombine.high %v13673_v60, %v13676_v61 }
 0x34f   : > { %7123 = vmatpush1.bf16.msra.mxu0 %v10517_v1  ;;  %7811 = vmatpush1.bf16.msra.mxu1 %v10520_v2  ;;  %v10607_v1 = vld [vmem:[%s14108_s1 + $0x1c20] ss:$16 sps:$4 sm:$0xff]   ;;  %v10610_v2 = vld [vmem:[%s14108_s1 + $0x1c28] ss:$16 sps:$4 sm:$0xff]  }
 0x350   : > { %7124 = vmatprep.subr.bf16.mxu0 %v10525_v3  ;;  %7812 = vmatprep.subr.bf16.mxu1 %v10528_v4  ;;  %v10615_v3 = vld [vmem:[%s14108_s1 + $0x1c44] ss:$16 sps:$4 sm:$0xff]   ;;  %v10618_v4 = vld [vmem:[%s14108_s1 + $0x1c4c] ss:$16 sps:$4 sm:$0xff]  }
 0x353   : > { %7125 = vmatpush1.bf16.msra.mxu0 %v10523_v5  ;;  %7813 = vmatpush1.bf16.msra.mxu1 %v10526_v6  ;;  %v10613_v5 = vld [vmem:[%s14108_s1 + $0x1c40] ss:$16 sps:$4 sm:$0xff]   ;;  %v10616_v6 = vld [vmem:[%s14108_s1 + $0x1c48] ss:$16 sps:$4 sm:$0xff]  }
 0x354   : > { %7126 = vmatprep.subr.bf16.mxu0 %v10531_v7  ;;  %7814 = vmatprep.subr.bf16.mxu1 %v10534_v8  ;;  %v10621_v7 = vld [vmem:[%s14108_s1 + $0x1c64] ss:$16 sps:$4 sm:$0xff]   ;;  %v10624_v8 = vld [vmem:[%s14108_s1 + $0x1c6c] ss:$16 sps:$4 sm:$0xff]  }
 0x357   : > { %7127 = vmatpush1.bf16.msra.mxu0 %v10529_v9  ;;  %7815 = vmatpush1.bf16.msra.mxu1 %v10532_v10  ;;  %v10619_v9 = vld [vmem:[%s14108_s1 + $0x1c60] ss:$16 sps:$4 sm:$0xff]   ;;  %v10622_v10 = vld [vmem:[%s14108_s1 + $0x1c68] ss:$16 sps:$4 sm:$0xff]  }
 0x358   : > { %7128 = vmatprep.subr.bf16.mxu0 %v10537_v11  ;;  %7816 = vmatprep.subr.bf16.mxu1 %v10540_v12  ;;  %v10627_v11 = vld [vmem:[%s14108_s1 + $0x1c84] ss:$16 sps:$4 sm:$0xff]   ;;  %v10630_v12 = vld [vmem:[%s14108_s1 + $0x1c8c] ss:$16 sps:$4 sm:$0xff]  }
 0x35b   : > { %7129 = vmatpush1.bf16.msra.mxu0 %v10535_v13  ;;  %7817 = vmatpush1.bf16.msra.mxu1 %v10538_v16  ;;  %v10625_v13 = vld [vmem:[%s14108_s1 + $0x1c80] ss:$16 sps:$4 sm:$0xff]   ;;  %v10628_v16 = vld [vmem:[%s14108_s1 + $0x1c88] ss:$16 sps:$4 sm:$0xff]  }
 0x35c   : > { %7130 = vmatprep.subr.bf16.mxu0 %v10543_v17  ;;  %7818 = vmatprep.subr.bf16.mxu1 %v10546_v20  ;;  %v10633_v17 = vld [vmem:[%s14108_s1 + $0x1ca4] ss:$16 sps:$4 sm:$0xff]   ;;  %v10636_v20 = vld [vmem:[%s14108_s1 + $0x1cac] ss:$16 sps:$4 sm:$0xff]  }
 0x35f   : > { %7131 = vmatpush1.bf16.msra.mxu0 %v10541_v22  ;;  %7819 = vmatpush1.bf16.msra.mxu1 %v10544_v15  ;;  %v10631_v22 = vld [vmem:[%s14108_s1 + $0x1ca0] ss:$16 sps:$4 sm:$0xff]   ;;  %v10634_v15 = vld [vmem:[%s14108_s1 + $0x1ca8] ss:$16 sps:$4 sm:$0xff]  }
 0x360   : > { %7132 = vmatprep.subr.bf16.mxu0 %v10549_v23  ;;  %7820 = vmatprep.subr.bf16.mxu1 %v10552_v24  ;;  %v10639_v23 = vld [vmem:[%s14108_s1 + $0x1cc4] ss:$16 sps:$4 sm:$0xff]   ;;  %v10642_v24 = vld [vmem:[%s14108_s1 + $0x1ccc] ss:$16 sps:$4 sm:$0xff]  }
 0x363   : > { %7133 = vmatpush1.bf16.msra.mxu0 %v10547_v25  ;;  %7821 = vmatpush1.bf16.msra.mxu1 %v10550_v26  ;;  %v10637_v25 = vld [vmem:[%s14108_s1 + $0x1cc0] ss:$16 sps:$4 sm:$0xff]   ;;  %v10640_v26 = vld [vmem:[%s14108_s1 + $0x1cc8] ss:$16 sps:$4 sm:$0xff]  }
 0x364   : > { %7134 = vmatprep.subr.bf16.mxu0 %v10555_v27  ;;  %7822 = vmatprep.subr.bf16.mxu1 %v10558_v28  ;;  %v10645_v27 = vld [vmem:[%s14108_s1 + $0x1ce4] ss:$16 sps:$4 sm:$0xff]   ;;  %v10648_v28 = vld [vmem:[%s14108_s1 + $0x1cec] ss:$16 sps:$4 sm:$0xff]  }
 0x367   : > { %7135 = vmatpush1.bf16.msra.mxu0 %v10553_v29  ;;  %7823 = vmatpush1.bf16.msra.mxu1 %v10556_v30  ;;  %v10643_v29 = vld [vmem:[%s14108_s1 + $0x1ce0] ss:$16 sps:$4 sm:$0xff]   ;;  %v10646_v30 = vld [vmem:[%s14108_s1 + $0x1ce8] ss:$16 sps:$4 sm:$0xff]  }
 0x368   : > { %7136 = vmatprep.subr.bf16.mxu0 %v10561_v31  ;;  %7824 = vmatprep.subr.bf16.mxu1 %v10564_v32  ;;  %v10651_v31 = vld [vmem:[%s14108_s1 + $0x1d04] ss:$16 sps:$4 sm:$0xff]   ;;  %v10654_v32 = vld [vmem:[%s14108_s1 + $0x1d0c] ss:$16 sps:$4 sm:$0xff]  }
 0x36b   : > { %7137 = vmatpush1.bf16.msra.mxu0 %v10559_v33  ;;  %7825 = vmatpush1.bf16.msra.mxu1 %v10562_v34  ;;  %v10649_v33 = vld [vmem:[%s14108_s1 + $0x1d00] ss:$16 sps:$4 sm:$0xff]   ;;  %v10652_v34 = vld [vmem:[%s14108_s1 + $0x1d08] ss:$16 sps:$4 sm:$0xff]  }
 0x36c   : > { %7138 = vmatprep.subr.bf16.mxu0 %v10567_v35  ;;  %7826 = vmatprep.subr.bf16.mxu1 %v10570_v36  ;;  %v10657_v35 = vld [vmem:[%s14108_s1 + $0x1d24] ss:$16 sps:$4 sm:$0xff]   ;;  %v10660_v36 = vld [vmem:[%s14108_s1 + $0x1d2c] ss:$16 sps:$4 sm:$0xff]  }
 0x36f   : > { %7139 = vmatpush1.bf16.msra.mxu0 %v10565_v37  ;;  %7827 = vmatpush1.bf16.msra.mxu1 %v10568_v38  ;;  %v10655_v37 = vld [vmem:[%s14108_s1 + $0x1d20] ss:$16 sps:$4 sm:$0xff]   ;;  %v10658_v38 = vld [vmem:[%s14108_s1 + $0x1d28] ss:$16 sps:$4 sm:$0xff]  }
 0x370   : > { %7140 = vmatprep.subr.bf16.mxu0 %v10573_v39  ;;  %7828 = vmatprep.subr.bf16.mxu1 %v10576_v40  ;;  %v10663_v39 = vld [vmem:[%s14108_s1 + $0x1d44] ss:$16 sps:$4 sm:$0xff]   ;;  %v10666_v40 = vld [vmem:[%s14108_s1 + $0x1d4c] ss:$16 sps:$4 sm:$0xff]  }
 0x373   : > { %7141 = vmatpush1.bf16.msra.mxu0 %v10571_v41  ;;  %7829 = vmatpush1.bf16.msra.mxu1 %v10574_v42  ;;  %v10661_v41 = vld [vmem:[%s14108_s1 + $0x1d40] ss:$16 sps:$4 sm:$0xff]   ;;  %v10664_v42 = vld [vmem:[%s14108_s1 + $0x1d48] ss:$16 sps:$4 sm:$0xff]  }
 0x374   : > { %7142 = vmatprep.subr.bf16.mxu0 %v10579_v43  ;;  %7830 = vmatprep.subr.bf16.mxu1 %v10582_v44  ;;  %v10669_v43 = vld [vmem:[%s14108_s1 + $0x1d64] ss:$16 sps:$4 sm:$0xff]   ;;  %v10672_v44 = vld [vmem:[%s14108_s1 + $0x1d6c] ss:$16 sps:$4 sm:$0xff]  }
 0x377   : > { %7143 = vmatpush1.bf16.msra.mxu0 %v10577_v21  ;;  %7831 = vmatpush1.bf16.msra.mxu1 %v10580_v46  ;;  %v10667_v21 = vld [vmem:[%s14108_s1 + $0x1d60] ss:$16 sps:$4 sm:$0xff]   ;;  %v10670_v46 = vld [vmem:[%s14108_s1 + $0x1d68] ss:$16 sps:$4 sm:$0xff]  }
 0x378   : > { %7144 = vmatprep.subr.bf16.mxu0 %v10585_v47  ;;  %7832 = vmatprep.subr.bf16.mxu1 %v10588_v18  ;;  %v10675_v47 = vld [vmem:[%s14108_s1 + $0x1d84] ss:$16 sps:$4 sm:$0xff]   ;;  %v10678_v18 = vld [vmem:[%s14108_s1 + $0x1d8c] ss:$16 sps:$4 sm:$0xff]  }
 0x37b   : > { %7145 = vmatpush1.bf16.msra.mxu0 %v10583_v19  ;;  %7833 = vmatpush1.bf16.msra.mxu1 %v10586_v50  ;;  %v10673_v19 = vld [vmem:[%s14108_s1 + $0x1d80] ss:$16 sps:$4 sm:$0xff]   ;;  %v10676_v50 = vld [vmem:[%s14108_s1 + $0x1d88] ss:$16 sps:$4 sm:$0xff]  }
 0x37c   : > { %7146 = vmatprep.subr.bf16.mxu0 %v10591_v51  ;;  %7834 = vmatprep.subr.bf16.mxu1 %v10594_v14  ;;  %v10681_v51 = vld [vmem:[%s14108_s1 + $0x1da4] ss:$16 sps:$4 sm:$0xff]   ;;  %v10684_v14 = vld [vmem:[%s14108_s1 + $0x1dac] ss:$16 sps:$4 sm:$0xff]  }
 0x37f   : > { %7147 = vmatpush1.bf16.msra.mxu0 %v10589_v45  ;;  %7835 = vmatpush1.bf16.msra.mxu1 %v10592_v54  ;;  %v10679_v45 = vld [vmem:[%s14108_s1 + $0x1da0] ss:$16 sps:$4 sm:$0xff]   ;;  %v10682_v54 = vld [vmem:[%s14108_s1 + $0x1da8] ss:$16 sps:$4 sm:$0xff]  }
 0x380   : > { %7148 = vmatprep.subr.bf16.mxu0 %v10597_v55  ;;  %7836 = vmatprep.subr.bf16.mxu1 %v10600_v48  ;;  %v10687_v55 = vld [vmem:[%s14108_s1 + $0x1dc4] ss:$16 sps:$4 sm:$0xff]   ;;  %v10690_v48 = vld [vmem:[%s14108_s1 + $0x1dcc] ss:$16 sps:$4 sm:$0xff]  }
 0x383   : > { %7149 = vmatpush1.bf16.msra.mxu0 %v10595_v49  ;;  %7837 = vmatpush1.bf16.msra.mxu1 %v10598_v58  ;;  %v10685_v49 = vld [vmem:[%s14108_s1 + $0x1dc0] ss:$16 sps:$4 sm:$0xff]   ;;  %v10688_v58 = vld [vmem:[%s14108_s1 + $0x1dc8] ss:$16 sps:$4 sm:$0xff]  }
 0x384   : > { %7161 = vmatprep.subr.bf16.mxu0 %v10603_v59  ;;  %7849 = vmatprep.subr.bf16.mxu1 %v10606_v52  ;;  %v10693_v59 = vld [vmem:[%s14108_s1 + $0x1de4] ss:$16 sps:$4 sm:$0xff]   ;;  %v10696_v52 = vld [vmem:[%s14108_s1 + $0x1dec] ss:$16 sps:$4 sm:$0xff]  }
 0x386   : > { %7151 = vmatmul.mubr.bf16.vlgmr.msra.gmra.mrb[0].mxu0 %v8087_v53  ;;  %7839 = vmatmul.mubr.bf16.vlgmr.msra.gmra.mrb[0].mxu1 %v8087_v53  ;;  %v10691_v53 = vld [vmem:[%s14108_s1 + $0x1de0] ss:$16 sps:$4 sm:$0xff]  }
 0x387   : > { %7162 = vmatpush1.bf16.msra.mxu0 %v10601_v62  ;;  %7850 = vmatpush1.bf16.msra.mxu1 %v10604_v63  ;;  %v10694_v62 = vld [vmem:[%s14108_s1 + $0x1de8] ss:$16 sps:$4 sm:$0xff]   ;;  %v10699_v63 = vld [vmem:[%s14108_s1 + $0x1e04] ss:$16 sps:$4 sm:$0xff]  }
 0x388   : > { %7163 = vmatprep.subr.bf16.mxu0 %v10609_v56  ;;  %7851 = vmatprep.subr.bf16.mxu1 %v10612_v57  ;;  %v10702_v56 = vld [vmem:[%s14108_s1 + $0x1e0c] ss:$16 sps:$4 sm:$0xff]   ;;  %v8089_v57 = vcombine.low %v13673_v60, %v13676_v61  ;;  %v10705_v60 = vld [vmem:[%s14108_s1 + $0x1e24] ss:$16 sps:$4 sm:$0xff]  }
 0x389   : > { %7193 = vmatprep.mubr.bf16.mxu0 %v8090_v0  ;;  %7881 = vmatprep.mubr.bf16.mxu1 %v8090_v0  ;;  %v13875_v0 = vld [vmem:[%s10976_s12 + $0x78] sm:$0xff] }
 0x38a   : > { %v10708_v61 = vld [vmem:[%s14108_s1 + $0x1e2c] ss:$16 sps:$4 sm:$0xff]  }
 0x38b   : > { %7164 = vmatpush1.bf16.msra.mxu0 %v10607_v1  ;;  %7852 = vmatpush1.bf16.msra.mxu1 %v10610_v2  ;;  %v13878_v1 = vld [vmem:[%s10976_s12 + $0xf8] sm:$0xff]  ;;  %v10697_v2 = vld [vmem:[%s14108_s1 + $0x1e00] ss:$16 sps:$4 sm:$0xff]  }
 0x38c   : > { %7165 = vmatprep.subr.bf16.mxu0 %v10615_v3  ;;  %7853 = vmatprep.subr.bf16.mxu1 %v10618_v4  ;;  %v10700_v3 = vld [vmem:[%s14108_s1 + $0x1e08] ss:$16 sps:$4 sm:$0xff]   ;;  %v8092_v4 = vcombine.high %v13875_v0, %v13878_v1 }
 0x38f   : > { %7166 = vmatpush1.bf16.msra.mxu0 %v10613_v5  ;;  %7854 = vmatpush1.bf16.msra.mxu1 %v10616_v6  ;;  %v10703_v5 = vld [vmem:[%s14108_s1 + $0x1e20] ss:$16 sps:$4 sm:$0xff]   ;;  %v10706_v6 = vld [vmem:[%s14108_s1 + $0x1e28] ss:$16 sps:$4 sm:$0xff]  }
 0x390   : > { %7167 = vmatprep.subr.bf16.mxu0 %v10621_v7  ;;  %7855 = vmatprep.subr.bf16.mxu1 %v10624_v8  ;;  %v10711_v7 = vld [vmem:[%s14108_s1 + $0x1e44] ss:$16 sps:$4 sm:$0xff]   ;;  %v10714_v8 = vld [vmem:[%s14108_s1 + $0x1e4c] ss:$16 sps:$4 sm:$0xff]  }
 0x393   : > { %7168 = vmatpush1.bf16.msra.mxu0 %v10619_v9  ;;  %7856 = vmatpush1.bf16.msra.mxu1 %v10622_v10  ;;  %v10709_v9 = vld [vmem:[%s14108_s1 + $0x1e40] ss:$16 sps:$4 sm:$0xff]   ;;  %v10712_v10 = vld [vmem:[%s14108_s1 + $0x1e48] ss:$16 sps:$4 sm:$0xff]  }
 0x394   : > { %7169 = vmatprep.subr.bf16.mxu0 %v10627_v11  ;;  %7857 = vmatprep.subr.bf16.mxu1 %v10630_v12  ;;  %v10717_v11 = vld [vmem:[%s14108_s1 + $0x1e64] ss:$16 sps:$4 sm:$0xff]   ;;  %v10720_v12 = vld [vmem:[%s14108_s1 + $0x1e6c] ss:$16 sps:$4 sm:$0xff]  }
 0x397   : > { %7170 = vmatpush1.bf16.msra.mxu0 %v10625_v13  ;;  %7858 = vmatpush1.bf16.msra.mxu1 %v10628_v16  ;;  %v10715_v13 = vld [vmem:[%s14108_s1 + $0x1e60] ss:$16 sps:$4 sm:$0xff]   ;;  %v10718_v16 = vld [vmem:[%s14108_s1 + $0x1e68] ss:$16 sps:$4 sm:$0xff]  }
 0x398   : > { %7171 = vmatprep.subr.bf16.mxu0 %v10633_v17  ;;  %7859 = vmatprep.subr.bf16.mxu1 %v10636_v20  ;;  %v10723_v17 = vld [vmem:[%s14108_s1 + $0x1e84] ss:$16 sps:$4 sm:$0xff]   ;;  %v10726_v20 = vld [vmem:[%s14108_s1 + $0x1e8c] ss:$16 sps:$4 sm:$0xff]  }
 0x39b   : > { %7172 = vmatpush1.bf16.msra.mxu0 %v10631_v22  ;;  %7860 = vmatpush1.bf16.msra.mxu1 %v10634_v15  ;;  %v10721_v22 = vld [vmem:[%s14108_s1 + $0x1e80] ss:$16 sps:$4 sm:$0xff]   ;;  %v10724_v15 = vld [vmem:[%s14108_s1 + $0x1e88] ss:$16 sps:$4 sm:$0xff]  }
 0x39c   : > { %7173 = vmatprep.subr.bf16.mxu0 %v10639_v23  ;;  %7861 = vmatprep.subr.bf16.mxu1 %v10642_v24  ;;  %v10729_v23 = vld [vmem:[%s14108_s1 + $0x1ea4] ss:$16 sps:$4 sm:$0xff]   ;;  %v10732_v24 = vld [vmem:[%s14108_s1 + $0x1eac] ss:$16 sps:$4 sm:$0xff]  }
 0x39f   : > { %7174 = vmatpush1.bf16.msra.mxu0 %v10637_v25  ;;  %7862 = vmatpush1.bf16.msra.mxu1 %v10640_v26  ;;  %v10727_v25 = vld [vmem:[%s14108_s1 + $0x1ea0] ss:$16 sps:$4 sm:$0xff]   ;;  %v10730_v26 = vld [vmem:[%s14108_s1 + $0x1ea8] ss:$16 sps:$4 sm:$0xff]  }
 0x3a0   : > { %7175 = vmatprep.subr.bf16.mxu0 %v10645_v27  ;;  %7863 = vmatprep.subr.bf16.mxu1 %v10648_v28  ;;  %v10735_v27 = vld [vmem:[%s14108_s1 + $0x1ec4] ss:$16 sps:$4 sm:$0xff]   ;;  %v10738_v28 = vld [vmem:[%s14108_s1 + $0x1ecc] ss:$16 sps:$4 sm:$0xff]  }
 0x3a3   : > { %7176 = vmatpush1.bf16.msra.mxu0 %v10643_v29  ;;  %7864 = vmatpush1.bf16.msra.mxu1 %v10646_v30  ;;  %v10733_v29 = vld [vmem:[%s14108_s1 + $0x1ec0] ss:$16 sps:$4 sm:$0xff]   ;;  %v10736_v30 = vld [vmem:[%s14108_s1 + $0x1ec8] ss:$16 sps:$4 sm:$0xff]  }
 0x3a4   : > { %7177 = vmatprep.subr.bf16.mxu0 %v10651_v31  ;;  %7865 = vmatprep.subr.bf16.mxu1 %v10654_v32  ;;  %v10741_v31 = vld [vmem:[%s14108_s1 + $0x1ee4] ss:$16 sps:$4 sm:$0xff]   ;;  %v10744_v32 = vld [vmem:[%s14108_s1 + $0x1eec] ss:$16 sps:$4 sm:$0xff]  }
 0x3a7   : > { %7178 = vmatpush1.bf16.msra.mxu0 %v10649_v33  ;;  %7866 = vmatpush1.bf16.msra.mxu1 %v10652_v34  ;;  %v10739_v33 = vld [vmem:[%s14108_s1 + $0x1ee0] ss:$16 sps:$4 sm:$0xff]   ;;  %v10742_v34 = vld [vmem:[%s14108_s1 + $0x1ee8] ss:$16 sps:$4 sm:$0xff]  }
 0x3a8   : > { %7179 = vmatprep.subr.bf16.mxu0 %v10657_v35  ;;  %7867 = vmatprep.subr.bf16.mxu1 %v10660_v36  ;;  %v10747_v35 = vld [vmem:[%s14108_s1 + $0x1f04] ss:$16 sps:$4 sm:$0xff]   ;;  %v10750_v36 = vld [vmem:[%s14108_s1 + $0x1f0c] ss:$16 sps:$4 sm:$0xff]  }
 0x3ab   : > { %7180 = vmatpush1.bf16.msra.mxu0 %v10655_v37  ;;  %7868 = vmatpush1.bf16.msra.mxu1 %v10658_v38  ;;  %v10745_v37 = vld [vmem:[%s14108_s1 + $0x1f00] ss:$16 sps:$4 sm:$0xff]   ;;  %v10748_v38 = vld [vmem:[%s14108_s1 + $0x1f08] ss:$16 sps:$4 sm:$0xff]  }
 0x3ac   : > { %7181 = vmatprep.subr.bf16.mxu0 %v10663_v39  ;;  %7869 = vmatprep.subr.bf16.mxu1 %v10666_v40  ;;  %v10753_v39 = vld [vmem:[%s14108_s1 + $0x1f24] ss:$16 sps:$4 sm:$0xff]   ;;  %v10756_v40 = vld [vmem:[%s14108_s1 + $0x1f2c] ss:$16 sps:$4 sm:$0xff]  }
 0x3af   : > { %7182 = vmatpush1.bf16.msra.mxu0 %v10661_v41  ;;  %7870 = vmatpush1.bf16.msra.mxu1 %v10664_v42  ;;  %v10751_v41 = vld [vmem:[%s14108_s1 + $0x1f20] ss:$16 sps:$4 sm:$0xff]   ;;  %v10754_v42 = vld [vmem:[%s14108_s1 + $0x1f28] ss:$16 sps:$4 sm:$0xff]  }
 0x3b0   : > { %7183 = vmatprep.subr.bf16.mxu0 %v10669_v43  ;;  %7871 = vmatprep.subr.bf16.mxu1 %v10672_v44  ;;  %v10759_v43 = vld [vmem:[%s14108_s1 + $0x1f44] ss:$16 sps:$4 sm:$0xff]   ;;  %v10762_v44 = vld [vmem:[%s14108_s1 + $0x1f4c] ss:$16 sps:$4 sm:$0xff]  }
 0x3b3   : > { %7184 = vmatpush1.bf16.msra.mxu0 %v10667_v21  ;;  %7872 = vmatpush1.bf16.msra.mxu1 %v10670_v46  ;;  %v10757_v21 = vld [vmem:[%s14108_s1 + $0x1f40] ss:$16 sps:$4 sm:$0xff]   ;;  %v10760_v46 = vld [vmem:[%s14108_s1 + $0x1f48] ss:$16 sps:$4 sm:$0xff]  }
 0x3b4   : > { %7185 = vmatprep.subr.bf16.mxu0 %v10675_v47  ;;  %7873 = vmatprep.subr.bf16.mxu1 %v10678_v18  ;;  %v10765_v47 = vld [vmem:[%s14108_s1 + $0x1f64] ss:$16 sps:$4 sm:$0xff]   ;;  %v10768_v18 = vld [vmem:[%s14108_s1 + $0x1f6c] ss:$16 sps:$4 sm:$0xff]  }
 0x3b7   : > { %7186 = vmatpush1.bf16.msra.mxu0 %v10673_v19  ;;  %7874 = vmatpush1.bf16.msra.mxu1 %v10676_v50  ;;  %v10763_v19 = vld [vmem:[%s14108_s1 + $0x1f60] ss:$16 sps:$4 sm:$0xff]   ;;  %v10766_v50 = vld [vmem:[%s14108_s1 + $0x1f68] ss:$16 sps:$4 sm:$0xff]  }
 0x3b8   : > { %7187 = vmatprep.subr.bf16.mxu0 %v10681_v51  ;;  %7875 = vmatprep.subr.bf16.mxu1 %v10684_v14  ;;  %v10771_v51 = vld [vmem:[%s14108_s1 + $0x1f84] ss:$16 sps:$4 sm:$0xff]   ;;  %v10774_v14 = vld [vmem:[%s14108_s1 + $0x1f8c] ss:$16 sps:$4 sm:$0xff]  }
 0x3bb   : > { %7188 = vmatpush1.bf16.msra.mxu0 %v10679_v45  ;;  %7876 = vmatpush1.bf16.msra.mxu1 %v10682_v54  ;;  %v10769_v45 = vld [vmem:[%s14108_s1 + $0x1f80] ss:$16 sps:$4 sm:$0xff]   ;;  %v10772_v54 = vld [vmem:[%s14108_s1 + $0x1f88] ss:$16 sps:$4 sm:$0xff]  }
 0x3bc   : > { %7189 = vmatprep.subr.bf16.mxu0 %v10687_v55  ;;  %7877 = vmatprep.subr.bf16.mxu1 %v10690_v48  ;;  %v10777_v55 = vld [vmem:[%s14108_s1 + $0x1fa4] ss:$16 sps:$4 sm:$0xff]   ;;  %v10780_v48 = vld [vmem:[%s14108_s1 + $0x1fac] ss:$16 sps:$4 sm:$0xff]  }
 0x3bf   : > { %7190 = vmatpush1.bf16.msra.mxu0 %v10685_v49  ;;  %7878 = vmatpush1.bf16.msra.mxu1 %v10688_v58  ;;  %v10775_v49 = vld [vmem:[%s14108_s1 + $0x1fa0] ss:$16 sps:$4 sm:$0xff]   ;;  %v10778_v58 = vld [vmem:[%s14108_s1 + $0x1fa8] ss:$16 sps:$4 sm:$0xff]  }
 0x3c0   : > { %7191 = vmatprep.subr.bf16.mxu0 %v10693_v59  ;;  %7879 = vmatprep.subr.bf16.mxu1 %v10696_v52  ;;  %v10783_v59 = vld [vmem:[%s14108_s1 + $0x1fc4] ss:$16 sps:$4 sm:$0xff]   ;;  %v10786_v52 = vld [vmem:[%s14108_s1 + $0x1fcc] ss:$16 sps:$4 sm:$0xff]  }
 0x3c3   : > { %7192 = vmatpush1.bf16.msra.mxu0 %v10691_v53  ;;  %7880 = vmatpush1.bf16.msra.mxu1 %v10694_v62  ;;  %v10781_v53 = vld [vmem:[%s14108_s1 + $0x1fc0] ss:$16 sps:$4 sm:$0xff]   ;;  %v10784_v62 = vld [vmem:[%s14108_s1 + $0x1fc8] ss:$16 sps:$4 sm:$0xff]  }
 0x3c4   : > { %7204 = vmatprep.subr.bf16.mxu0 %v10699_v63  ;;  %7892 = vmatprep.subr.bf16.mxu1 %v10702_v56  ;;  %v10789_v63 = vld [vmem:[%s14108_s1 + $0x1fe4] ss:$16 sps:$4 sm:$0xff]   ;;  %v10792_v56 = vld [vmem:[%s14108_s1 + $0x1fec] ss:$16 sps:$4 sm:$0xff]  }
 0x3c6   : > { %7194 = vmatmul.mubr.bf16.vlgmr.msra.gmra.mrb[0].mxu0 %v8089_v57  ;;  %7882 = vmatmul.mubr.bf16.vlgmr.msra.gmra.mrb[0].mxu1 %v8089_v57  ;;  %v10787_v57 = vld [vmem:[%s14108_s1 + $0x1fe0] ss:$16 sps:$4 sm:$0xff]  }
 0x3c7   : > { %7205 = vmatpush1.bf16.msra.mxu0 %v10697_v2  ;;  %7893 = vmatpush1.bf16.msra.mxu1 %v10700_v3  ;;  %v10790_v2 = vld [vmem:[%s14108_s1 + $0x1fe8] ss:$16 sps:$4 sm:$0xff]   ;;  %v8091_v3 = vcombine.low %v13875_v0, %v13878_v1 }
 0x3c8   : > { %7206 = vmatprep.subr.bf16.mxu0 %v10705_v60  ;;  %7894 = vmatprep.subr.bf16.mxu1 %v10708_v61  ;;  %v1259_v60 = vlaneseq }
 0x3c9   : > { %7236 = vmatprep.mubr.bf16.mxu0 %v8092_v4  ;;  %7924 = vmatprep.mubr.bf16.mxu1 %v8092_v4 }
 0x3ca   : > { %v1260_v61 = vshrl.u32 %v1259_v60, 7 }
 0x3cb   : > { %7207 = vmatpush1.bf16.msra.mxu0 %v10703_v5  ;;  %7895 = vmatpush1.bf16.msra.mxu1 %v10706_v6  ;;  %v1257_v6 = vld [vmem:[%s14109_s2] sm:$0xf] }
 0x3cc   : > { %7208 = vmatprep.subr.bf16.mxu0 %v10711_v7  ;;  %7896 = vmatprep.subr.bf16.mxu1 %v10714_v8  ;;  %v1261_v4 = vsub.s32 0, %v1260_v61  ;;  %v1269_v5 = vsub.s32 2, %v1260_v61  ;;  %v1265_v7 = vsub.s32 1, %v1260_v61  ;;  %v1273_v8 = vsub.s32 3, %v1260_v61 }
 0x3cf   : > { %7209 = vmatpush1.bf16.msra.mxu0 %v10709_v9  ;;  %7897 = vmatpush1.bf16.msra.mxu1 %v10712_v10  ;;  %v1262_v9 = vrot.slane %v1257_v6, %v1261_v4  ;;  %v1270_v10 = vrot.slane %v1257_v6, %v1269_v5 }
 0x3d0   : > { %7210 = vmatprep.subr.bf16.mxu0 %v10717_v11  ;;  %7898 = vmatprep.subr.bf16.mxu1 %v10720_v12  ;;  %v1266_v11 = vrot.slane %v1257_v6, %v1265_v7  ;;  %v1274_v12 = vrot.slane %v1257_v6, %v1273_v8 }
 0x3d3   : > { %7211 = vmatpush1.bf16.msra.mxu0 %v10715_v13  ;;  %7899 = vmatpush1.bf16.msra.mxu1 %v10718_v16 }
 0x3d4   : > { %7212 = vmatprep.subr.bf16.mxu0 %v10723_v17  ;;  %7900 = vmatprep.subr.bf16.mxu1 %v10726_v20 }
 0x3d7   : > { %7213 = vmatpush1.bf16.msra.mxu0 %v10721_v22  ;;  %7901 = vmatpush1.bf16.msra.mxu1 %v10724_v15 }
 0x3d8   : > { %7214 = vmatprep.subr.bf16.mxu0 %v10729_v23  ;;  %7902 = vmatprep.subr.bf16.mxu1 %v10732_v24 }
 0x3db   : > { %7215 = vmatpush1.bf16.msra.mxu0 %v10727_v25  ;;  %7903 = vmatpush1.bf16.msra.mxu1 %v10730_v26 }
 0x3dc   : > { %7216 = vmatprep.subr.bf16.mxu0 %v10735_v27  ;;  %7904 = vmatprep.subr.bf16.mxu1 %v10738_v28 }
 0x3df   : > { %7217 = vmatpush1.bf16.msra.mxu0 %v10733_v29  ;;  %7905 = vmatpush1.bf16.msra.mxu1 %v10736_v30 }
 0x3e0   : > { %7218 = vmatprep.subr.bf16.mxu0 %v10741_v31  ;;  %7906 = vmatprep.subr.bf16.mxu1 %v10744_v32 }
 0x3e3   : > { %7219 = vmatpush1.bf16.msra.mxu0 %v10739_v33  ;;  %7907 = vmatpush1.bf16.msra.mxu1 %v10742_v34  ;;  %v7959_v33 = vld [vmem:[%s14110_s3] sm:$0xff] }
 0x3e4   : > { %7220 = vmatprep.subr.bf16.mxu0 %v10747_v35  ;;  %7908 = vmatprep.subr.bf16.mxu1 %v10750_v36  ;;  %v7963_v36 = vld [vmem:[%s14110_s3 + $0x20] sm:$0xff] }
 0x3e7   : > { %7221 = vmatpush1.bf16.msra.mxu0 %v10745_v37  ;;  %7909 = vmatpush1.bf16.msra.mxu1 %v10748_v38 }
 0x3e8   : > { %7222 = vmatprep.subr.bf16.mxu0 %v10753_v39  ;;  %7910 = vmatprep.subr.bf16.mxu1 %v10756_v40  ;;  %v7960_v39 = vld [vmem:[%s14110_s3 + $0x8] sm:$0xff]  ;;  %v7961_v40 = vld [vmem:[%s14110_s3 + $0x10] sm:$0xff] }
 0x3eb   : > { %7223 = vmatpush1.bf16.msra.mxu0 %v10751_v41  ;;  %7911 = vmatpush1.bf16.msra.mxu1 %v10754_v42 }
 0x3ec   : > { %7224 = vmatprep.subr.bf16.mxu0 %v10759_v43  ;;  %7912 = vmatprep.subr.bf16.mxu1 %v10762_v44  ;;  %v7964_v44 = vld [vmem:[%s14110_s3 + $0x28] sm:$0xff] }
 0x3ef   : > { %7225 = vmatpush1.bf16.msra.mxu0 %v10757_v21  ;;  %7913 = vmatpush1.bf16.msra.mxu1 %v10760_v46 }
 0x3f0   : > { %7226 = vmatprep.subr.bf16.mxu0 %v10765_v47  ;;  %7914 = vmatprep.subr.bf16.mxu1 %v10768_v18 }
 0x3f3   : > { %7227 = vmatpush1.bf16.msra.mxu0 %v10763_v19  ;;  %7915 = vmatpush1.bf16.msra.mxu1 %v10766_v50 }
 0x3f4   : > { %7228 = vmatprep.subr.bf16.mxu0 %v10771_v51  ;;  %7916 = vmatprep.subr.bf16.mxu1 %v10774_v14 }
 0x3f7   : > { %7229 = vmatpush1.bf16.msra.mxu0 %v10769_v45  ;;  %7917 = vmatpush1.bf16.msra.mxu1 %v10772_v54  ;;  %v7962_v54 = vld [vmem:[%s14110_s3 + $0x18] sm:$0xff] }
 0x3f8   : > { %7230 = vmatprep.subr.bf16.mxu0 %v10777_v55  ;;  %7918 = vmatprep.subr.bf16.mxu1 %v10780_v48  ;;  %v7965_v55 = vld [vmem:[%s14110_s3 + $0x30] sm:$0xff] }
 0x3fb   : > { %7231 = vmatpush1.bf16.msra.mxu0 %v10775_v49  ;;  %7919 = vmatpush1.bf16.msra.mxu1 %v10778_v58 }
 0x3fc   : > { %7232 = vmatprep.subr.bf16.mxu0 %v10783_v59  ;;  %7920 = vmatprep.subr.bf16.mxu1 %v10786_v52  ;;  %v7966_v52 = vld [vmem:[%s14110_s3 + $0x38] sm:$0xff] }
 0x3ff   : > { %7233 = vmatpush1.bf16.msra.mxu0 %v10781_v53  ;;  %7921 = vmatpush1.bf16.msra.mxu1 %v10784_v62 }
 0x400   : > { %7234 = vmatprep.subr.bf16.mxu0 %v10789_v63  ;;  %7922 = vmatprep.subr.bf16.mxu1 %v10792_v56 }
 0x403   : > { %7235 = vmatpush1.bf16.msra.mxu0 %v10787_v57  ;;  %7923 = vmatpush1.bf16.msra.mxu1 %v10790_v2 }
 0x406   : > { %7237 = vmatmul.mubr.bf16.vlgmr.msra.gmra.mrb[0].mxu0 %v8091_v3  ;;  %7925 = vmatmul.mubr.bf16.vlgmr.msra.gmra.mrb[0].mxu1 %v8091_v3 }
 0x4d9   : > { %v7238_v13 = vpop.f32.mrb[0].mxu0  ;;  %v7926_v0 = vpop.f32.mrb[0].mxu1 }
 0x4da   : > { %v9121_v1 = vadd.f32 %v7238_v13, %v1262_v9  ;;  %v9125_v16 = vadd.f32 %v7926_v0, %v1270_v10  ;;  %v7240_v17 = vpop.f32.mrb[1].mxu0  ;;  %v7928_v20 = vpop.f32.mrb[1].mxu1 }
 0x4db   : > { %v9122_v22 = vadd.f32 %v7240_v17, %v1266_v11  ;;  %v9126_v15 = vadd.f32 %v7928_v20, %v1274_v12  ;;  %v7242_v23 = vpop.f32.mrb[2].mxu0  ;;  %v7930_v24 = vpop.f32.mrb[2].mxu1 }
 0x4dc   : > { %vm7935_vm0 = vcmp.ge.f32.partialorder %v9121_v1, 0.0  ;;  %v7943_v25 = vmul.f32 0.2, %v9121_v1  ;;  %vm7937_vm1 = vcmp.ge.f32.partialorder %v9125_v16, 0.0  ;;  %v7945_v26 = vmul.f32 0.2, %v9125_v16 }
 0x4dd   : > { %vm7936_vm2 = vcmp.ge.f32.partialorder %v9122_v22, 0.0  ;;  %v7944_v27 = vmul.f32 0.2, %v9122_v22  ;;  %vm7938_vm3 = vcmp.ge.f32.partialorder %v9126_v15, 0.0  ;;  %v7946_v28 = vmul.f32 0.2, %v9126_v15 }
 0x4de   : > { %v9123_v29 = vadd.f32 %v7242_v23, %v1262_v9  ;;  %v9127_v30 = vadd.f32 %v7930_v24, %v1270_v10  ;;  %v7244_v31 = vpop.f32.mrb[3].mxu0  ;;  %v7932_v32 = vpop.f32.mrb[3].mxu1  ;;  %v7951_v34 = vsel %vm7935_vm0, %v9121_v1, %v7943_v25  ;;  %v7953_v46 = vsel %vm7937_vm1, %v9125_v16, %v7945_v26 }
 0x4df   : > { %v7952_v35 = vsel %vm7936_vm2, %v9122_v22, %v7944_v27  ;;  %v9124_v37 = vadd.f32 %v7244_v31, %v1266_v11  ;;  %v9128_v38 = vadd.f32 %v7932_v32, %v1274_v12  ;;  %v7967_v18 = vmul.f32 %v7959_v33, %v7951_v34 }
 0x4e0   : > { %vm7939_vm4 = vcmp.ge.f32.partialorder %v9123_v29, 0.0  ;;  %v7947_v41 = vmul.f32 0.2, %v9123_v29  ;;  %vm7941_vm5 = vcmp.ge.f32.partialorder %v9127_v30, 0.0  ;;  %v7949_v42 = vmul.f32 0.2, %v9127_v30 }
 0x4e1   : > { %vm7940_vm6 = vcmp.ge.f32.partialorder %v9124_v37, 0.0  ;;  %v7948_v43 = vmul.f32 0.2, %v9124_v37  ;;  %v7950_v21 = vmul.f32 0.2, %v9128_v38  ;;  %vm7942_vm7 = vcmp.ge.f32.partialorder %v9128_v38, 0.0 }
 0x4e2   : > { %v7955_v47 = vsel %vm7939_vm4, %v9123_v29, %v7947_v41  ;;  %v7968_v19 = vmul.f32 %v7960_v39, %v7952_v35  ;;  %v7957_v51 = vsel %vm7941_vm5, %v9127_v30, %v7949_v42  ;;  %v7954_v45 = vsel %vm7938_vm3, %v9126_v15, %v7946_v28 }
 0x4e3   : > { %v7971_v50 = vmul.f32 %v7963_v36, %v7955_v47  ;;  %v7956_v14 = vsel %vm7940_vm6, %v9124_v37, %v7948_v43  ;;  %v7969_v49 = vmul.f32 %v7961_v40, %v7953_v46  ;;  %v7958_v59 = vsel %vm7942_vm7, %v9128_v38, %v7950_v21 }
 0x4e4   : > { %v7972_v48 = vmul.f32 %v7964_v44, %v7956_v14  ;;  %v7975_v58 = vadd.f32 %v7968_v19, %v7967_v18  ;;  %v7970_v53 = vmul.f32 %v7962_v54, %v7954_v45  ;;  %v7973_v63 = vmul.f32 %v7965_v55, %v7957_v51 }
 0x4e5   : > { %v7974_v2 = vmul.f32 %v7966_v52, %v7958_v59 }
 0x4e6   : > { %v7976_v62 = vadd.f32 %v7975_v58, %v7969_v49  ;;  %v7980_v56 = vadd.f32 %v7972_v48, %v7971_v50 }
 0x4e8   : > { %v7977_v57 = vadd.f32 %v7976_v62, %v7970_v53  ;;  %v7981_v3 = vadd.f32 %v7980_v56, %v7973_v63 }
 0x4ea   : > { %7978 = vadd.xlane.f32.xlu0 %v7977_v57  ;;  %v7982_v60 = vadd.f32 %v7981_v3, %v7974_v2 }
 0x4ee   : > { %7983 = vadd.xlane.f32.xlu0 %v7982_v60 }
 0x577   : > { %v7979_v61 = vpop.xlane.xlu0 %7978 }
 0x57b   : > { %v7984_v4 = vpop.xlane.xlu0 %7983 }
 0x57c   : > { %v7985_v5 = vadd.f32 %v7984_v4, %v7979_v61 }
 0x57e   : > { %v7986_v6 = vrot.slane %v7985_v5, 4 }
 0x580   : > { %v7987_v7 = vadd.f32 %v7986_v6, %v7985_v5 }
 0x582   : > { %v7988_v8 = vrot.slane %v7987_v7, 2 }
 0x584   : > { %v7989_v9 = vadd.f32 %v7988_v8, %v7987_v7 }
 0x586   : > { %v7990_v10 = vrot.slane %v7989_v9, 1 }
 0x588   : > { %v7991_v11 = vadd.f32 %v7990_v10, %v7989_v9 }
 0x58a   : > { %v9117_v12 = vmul.f32 -1.442695, %v7991_v11 }
 0x58c   : > { %10793 = vpow2.f32 %v9117_v12 }
 0x596   : > { %v10794_v13 = vpop.eup %10793 }
 0x597   : > { %v7995_v0 = vadd.f32 1.0, %v10794_v13 }
 0x599   : > { %10795 = vrcp.f32 %v7995_v0 }
 0x5a3   : > { %v10796_v1 = vpop.eup %10795 }
 0x5a4   : > { %7998 = vst [vmem:[%s200_s9] sm:$0xff] %v10796_v1 }
 0x5a5 PF: > { %s14_s15 = sadd.s32 1, %s10803_s15  }
 0x5a6   : > { %p11_p5 = scmp.ge.s32.totalorder %s14_s15, 4  }
 0x5a8   :  { %13 = sbr.rel (!%p11_p5) target bundleno = 1 (0x1), region = 66 }

</bundles_post_ra>
